<compile_context>
chip_gen: v6e
topology: v6e:2x2x1
jax: 0.10.0
libtpu: 0.0.40
codegen_flags: <defaults>
</compile_context>

<pallas_src>
import functools

import jax
import jax.numpy as jnp
from jax.experimental import pallas as pl
from jax.experimental.pallas import tpu as pltpu


def _largest_divisor_leq(n, cap):
    cap = max(1, min(n, cap))
    for d in range(cap, 0, -1):
        if n % d == 0:
            return d
    return 1


# ---------------------------------------------------------------------------
# Kernel 1: fused qkv = dw3x3(dw3x3(conv1x1(x)))  — one pallas_call per image
# ---------------------------------------------------------------------------

def fused_qkv_conv(x, w1, b1, w2, b2, w3, b3):
    """x: (N, C, H, W) f32.  w1: (3C, C, 1, 1), w2/w3: (3C, 3, 3) depthwise, b*: (3C,).
    Returns q, k, v, each (N, C, H, W)."""
    n, c, h, wd = x.shape
    c3 = 3 * c
    hw = h * wd

    x2 = x.reshape(n, c, hw)              # channels-first view; lane dim = H*W (dense)
    w1m = w1.reshape(c3, c)
    b1m = b1.reshape(c3, 1)
    w2m = w2.reshape(c3, 9)
    b2m = b2.reshape(c3, 1)
    w3m = w3.reshape(c3, 9)
    b3m = b3.reshape(c3, 1)

    def kernel(x_ref, w1_ref, b1_ref, w2_ref, b2_ref, w3_ref, b3_ref,
               q_ref, k_ref, v_ref, pad_ref):
        # ---- 1x1 conv on the MXU, lane-dense output: (3C, C) @ (C, H*W) ----
        y0 = jnp.dot(w1_ref[...], x_ref[0],
                     preferred_element_type=jnp.float32) + b1_ref[...]     # (3C, HW)

        # ---- scatter into the zero-padded VMEM scratch (manual HW -> (H, W) split,
        #      avoids an in-kernel lane reshape) ----
        pad_ref[...] = jnp.zeros_like(pad_ref)
        for hh in range(h):
            pad_ref[:, hh + 1:hh + 2, 1:wd + 1] = (
                y0[:, hh * wd:(hh + 1) * wd][:, None, :])

        def dw_pass(w_ref, b_ref):
            # TODO(synk): lane-dense (flattened H*(W+2)) tap accumulation would cut
            # VPU work further; kept in image layout for robust lowering.
            xp = pad_ref[...]                                   # (3C, H+2, W+2)
            acc = jnp.zeros((c3, h, wd), jnp.float32)
            for di in range(3):
                for dj in range(3):
                    tap = xp[:, di:di + h, dj:dj + wd]          # (3C, H, W)
                    wt = w_ref[:, di * 3 + dj:di * 3 + dj + 1][:, :, None]
                    acc = acc + tap * wt
            return acc + b_ref[...][:, :, None]

        y1 = dw_pass(w2_ref, b2_ref)          # first depthwise 3x3 (padding=1)
        pad_ref[:, 1:h + 1, 1:wd + 1] = y1    # borders stay zero for the next pass
        y2 = dw_pass(w3_ref, b3_ref)          # second depthwise 3x3

        q_ref[0] = y2[:c]
        k_ref[0] = y2[c:2 * c]
        v_ref[0] = y2[2 * c:]

    out_sd = jax.ShapeDtypeStruct((n, c, h, wd), jnp.float32)
    q, k, v = pl.pallas_call(
        kernel,
        out_shape=(out_sd, out_sd, out_sd),
        grid=(n,),
        in_specs=[
            pl.BlockSpec((1, c, hw), lambda i: (i, 0, 0)),
            pl.BlockSpec((c3, c), lambda i: (0, 0)),
            pl.BlockSpec((c3, 1), lambda i: (0, 0)),
            pl.BlockSpec((c3, 9), lambda i: (0, 0)),
            pl.BlockSpec((c3, 1), lambda i: (0, 0)),
            pl.BlockSpec((c3, 9), lambda i: (0, 0)),
            pl.BlockSpec((c3, 1), lambda i: (0, 0)),
        ],
        out_specs=(
            pl.BlockSpec((1, c, h, wd), lambda i: (i, 0, 0, 0)),
            pl.BlockSpec((1, c, h, wd), lambda i: (i, 0, 0, 0)),
            pl.BlockSpec((1, c, h, wd), lambda i: (i, 0, 0, 0)),
        ),
        scratch_shapes=[pltpu.VMEM((c3, h + 2, wd + 2), jnp.float32)],
        compiler_params=pltpu.CompilerParams(
            dimension_semantics=("parallel",),
            vmem_limit_bytes=32 * 1024 * 1024,
        ),
    )(x2, w1m, b1m, w2m, b2m, w3m, b3m)
    return q, k, v


# ---------------------------------------------------------------------------
# Kernel 2: batched row attention — many (w, dh) rows per grid step
# ---------------------------------------------------------------------------

def attention(q, k, v, fac, row_tile_cap=64):
    """q, k, v: (R, W, dh) f32.  softmax(normalize(q) @ normalize(k)^T * fac) @ v."""
    r, wd, dh = q.shape
    tb = _largest_divisor_leq(r, min(row_tile_cap, max(1, r // 2)))
    fac_arr = jnp.asarray(fac, jnp.float32).reshape(1)

    def kernel(fac_ref, q_ref, k_ref, v_ref, o_ref):
        f = fac_ref[0]
        qq = q_ref[...]                        # (TB, W, dh)
        kk = k_ref[...]
        vv = v_ref[...]
        eps = 1e-12                            # matches torch.nn.functional.normalize
        qn = qq * jax.lax.rsqrt(
            jnp.maximum(jnp.sum(qq * qq, -1, keepdims=True), eps * eps))
        kn = kk * jax.lax.rsqrt(
            jnp.maximum(jnp.sum(kk * kk, -1, keepdims=True), eps * eps))
        qn = qn * f                            # fold fac into the (W, dh) tile
        s = jnp.einsum('bqd,bkd->bqk', qn, kn, preferred_element_type=jnp.float32)
        s = s - jnp.max(s, axis=-1, keepdims=True)
        e = jnp.exp(s)
        p = e * pl.reciprocal(jnp.sum(e, axis=-1, keepdims=True), approx=True)
        o_ref[...] = jnp.einsum('bqk,bkd->bqd', p, vv,
                                preferred_element_type=jnp.float32)

    return pl.pallas_call(
        kernel,
        out_shape=jax.ShapeDtypeStruct((r, wd, dh), jnp.float32),
        grid=(r // tb,),
        in_specs=[
            pl.BlockSpec(memory_space=pltpu.MemorySpace.SMEM),
            pl.BlockSpec((tb, wd, dh), lambda i: (i, 0, 0)),
            pl.BlockSpec((tb, wd, dh), lambda i: (i, 0, 0)),
            pl.BlockSpec((tb, wd, dh), lambda i: (i, 0, 0)),
        ],
        out_specs=pl.BlockSpec((tb, wd, dh), lambda i: (i, 0, 0)),
        compiler_params=pltpu.CompilerParams(
            dimension_semantics=("parallel",),
            vmem_limit_bytes=32 * 1024 * 1024,
        ),
    )(fac_arr, q, k, v)


# ---------------------------------------------------------------------------
# Kernel 3: channels-first (lane-dense) 1x1 conv, tiled over H*W
# ---------------------------------------------------------------------------

def pointwise_conv(x, w, b, lane_tile_cap=2048):
    """1x1 conv (NCHW).  Computed as (C_out, C_in) @ (C_in, H*W) so the output lane
    dim is H*W.  w: (C_out, C_in, 1, 1), b: (C_out,)."""
    n, cin, h, wd = x.shape
    cout = w.shape[0]
    hw = h * wd
    x2 = x.reshape(n, cin, hw)
    wm = w.reshape(cout, cin)
    bm = b.reshape(cout, 1)

    if hw <= lane_tile_cap:
        thw = hw
    else:
        thw = hw
        for d in range(lane_tile_cap, 127, -1):
            if hw % d == 0 and d % 128 == 0:
                thw = d
                break

    def kernel(x_ref, w_ref, b_ref, o_ref):
        o_ref[0] = jnp.dot(w_ref[...], x_ref[0],
                           preferred_element_type=jnp.float32) + b_ref[...]

    out = pl.pallas_call(
        kernel,
        out_shape=jax.ShapeDtypeStruct((n, cout, hw), jnp.float32),
        grid=(n, hw // thw),
        in_specs=[
            pl.BlockSpec((1, cin, thw), lambda i, j: (i, 0, j)),
            pl.BlockSpec((cout, cin), lambda i, j: (0, 0)),
            pl.BlockSpec((cout, 1), lambda i, j: (0, 0)),
        ],
        out_specs=pl.BlockSpec((1, cout, thw), lambda i, j: (i, 0, j)),
        compiler_params=pltpu.CompilerParams(
            dimension_semantics=("parallel", "parallel"),
            vmem_limit_bytes=32 * 1024 * 1024,
        ),
    )(x2, wm, bm)
    return out.reshape(n, cout, h, wd)


# ---------------------------------------------------------------------------
# Module forward (glue in plain JAX, hot paths in Pallas)
# ---------------------------------------------------------------------------

def next_attention_impl(x, p, num_heads):
    """NextAttentionImplZ.forward."""
    n, c, h, wd = x.shape
    nh = num_heads
    dh = c // nh

    q, k, v = fused_qkv_conv(x, p["q1_w"], p["q1_b"], p["q2_w"], p["q2_b"],
                             p["q3_w"], p["q3_b"])

    # TODO(synk): feed attention straight from the channel-first conv outputs via
    # index_maps (math in (dh, w) orientation) to remove these two HBM permutes.
    def resh(a):  # 'n (nh dh) h w -> (n nh h) w dh'
        a = a.reshape(n, nh, dh, h, wd)
        a = jnp.transpose(a, (0, 1, 3, 4, 2))
        return a.reshape(n * nh * h, wd, dh)

    out = attention(resh(q), resh(k), resh(v), p["fac"])     # (n*nh*h, w, dh)

    # '(n nh h) w dh -> n (nh dh) h w'
    out = out.reshape(n, nh, h, wd, dh)
    out = jnp.transpose(out, (0, 1, 4, 2, 3)).reshape(n, c, h, wd)
    return pointwise_conv(out, p["fin_w"], p["fin_b"])


def next_attention_z(x, row_params, col_params, num_heads=1):
    """NextAttentionZ.forward."""
    n, c, h, wd = x.shape
    x1 = next_attention_impl(x, row_params, num_heads)
    x1 = jnp.swapaxes(x1, -2, -1)
    x1 = next_attention_impl(x1, col_params, num_heads)
    x1 = jnp.swapaxes(x1, -2, -1)
    return x1.reshape(n, -1, h, wd)


# ---------------------------------------------------------------------------
# Deterministic parameter init (same shapes as the PyTorch module's __init__)
# ---------------------------------------------------------------------------

def init_impl_params(key, c):
    ks = jax.random.split(key, 8)
    s = 0.1
    return dict(
        q1_w=jax.random.normal(ks[0], (3 * c, c, 1, 1), jnp.float32) * s,
        q1_b=jax.random.normal(ks[1], (3 * c,), jnp.float32) * s,
        q2_w=jax.random.normal(ks[2], (3 * c, 3, 3), jnp.float32) * s,  # depthwise
        q2_b=jax.random.normal(ks[3], (3 * c,), jnp.float32) * s,
        q3_w=jax.random.normal(ks[4], (3 * c, 3, 3), jnp.float32) * s,
        q3_b=jax.random.normal(ks[5], (3 * c,), jnp.float32) * s,
        fac=jnp.ones((1,), jnp.float32),
        fin_w=jax.random.normal(ks[6], (c, c, 1, 1), jnp.float32) * s,
        fin_b=jax.random.normal(ks[7], (c,), jnp.float32) * s,
    )


if __name__ == "__main__":
    key = jax.random.PRNGKey(0)
    kx, kr, kc = jax.random.split(key, 3)

    n, c, h, w = 2, 4, 16, 16          # num_dims=4, num_heads=1, num_groups=4
    x = jax.random.normal(kx, (n, c, h, w), jnp.float32)

    row_params = init_impl_params(kr, c)
    col_params = init_impl_params(kc, c)

    fwd = jax.jit(functools.partial(next_attention_z, num_heads=1))
    out = jax.block_until_ready(fwd(x, row_params, col_params))

    assert out.shape == (n, c, h, w), out.shape
    assert bool(jnp.all(jnp.isfinite(out)))
    print("KERNEL_OK")
</pallas_src>

<mosaic_0001>
module attributes {stable_mosaic.version = 11 : i64} {
  func.func @kernel(%arg0: i32, %arg1: memref<1x4x256xf32, #tpu.memory_space<vmem>>, %arg2: memref<12x4xf32, #tpu.memory_space<vmem>>, %arg3: memref<12x1xf32, #tpu.memory_space<vmem>>, %arg4: memref<12x9xf32, #tpu.memory_space<vmem>>, %arg5: memref<12x1xf32, #tpu.memory_space<vmem>>, %arg6: memref<12x9xf32, #tpu.memory_space<vmem>>, %arg7: memref<12x1xf32, #tpu.memory_space<vmem>>, %arg8: memref<1x4x16x16xf32, #tpu.memory_space<vmem>>, %arg9: memref<1x4x16x16xf32, #tpu.memory_space<vmem>>, %arg10: memref<1x4x16x16xf32, #tpu.memory_space<vmem>>, %arg11: memref<12x18x18xf32, #tpu.memory_space<vmem>>) attributes {dimension_semantics = [#tpu.dimension_semantics<parallel>], iteration_bounds = array<i64: 2>, scalar_prefetch = 0 : i64, scratch_operands = 1 : i64, tpu.core_type = #tpu.core_type<tc>, window_params = [{transform_indices = @transform_0, window_bounds = array<i64: 1, 4, 256>}, {pipeline_mode = #tpu.pipeline_mode<synchronous>, transform_indices = @transform_1, window_bounds = array<i64: 12, 4>}, {pipeline_mode = #tpu.pipeline_mode<synchronous>, transform_indices = @transform_2, window_bounds = array<i64: 12, 1>}, {pipeline_mode = #tpu.pipeline_mode<synchronous>, transform_indices = @transform_3, window_bounds = array<i64: 12, 9>}, {pipeline_mode = #tpu.pipeline_mode<synchronous>, transform_indices = @transform_4, window_bounds = array<i64: 12, 1>}, {pipeline_mode = #tpu.pipeline_mode<synchronous>, transform_indices = @transform_5, window_bounds = array<i64: 12, 9>}, {pipeline_mode = #tpu.pipeline_mode<synchronous>, transform_indices = @transform_6, window_bounds = array<i64: 12, 1>}, {transform_indices = @transform_7, window_bounds = array<i64: 1, 4, 16, 16>}, {transform_indices = @transform_8, window_bounds = array<i64: 1, 4, 16, 16>}, {transform_indices = @transform_9, window_bounds = array<i64: 1, 4, 16, 16>}]} {
    %c0 = arith.constant 0 : index
    %c0_0 = arith.constant 0 : index
    %0 = vector.load %arg2[%c0, %c0_0] : memref<12x4xf32, #tpu.memory_space<vmem>>, vector<12x4xf32>
    %c0_1 = arith.constant 0 : index
    %c0_2 = arith.constant 0 : index
    %c0_3 = arith.constant 0 : index
    %1 = vector.load %arg1[%c0_1, %c0_2, %c0_3] : memref<1x4x256xf32, #tpu.memory_space<vmem>>, vector<1x4x256xf32>
    %2 = vector.shape_cast %1 : vector<1x4x256xf32> to vector<4x256xf32>
    %cst = arith.constant dense<0.000000e+00> : vector<12x256xf32>
    %3 = tpu.matmul %0, %2, %cst {dimension_numbers = #tpu.dot_dimension_numbers<[1], [0], [0], [1], [0, 0, 1, 1], [], []>} : vector<12x4xf32>, vector<4x256xf32>, vector<12x256xf32> -> vector<12x256xf32>
    %c0_4 = arith.constant 0 : index
    %c0_5 = arith.constant 0 : index
    %4 = vector.load %arg3[%c0_4, %c0_5] : memref<12x1xf32, #tpu.memory_space<vmem>>, vector<12x1xf32>
    %5 = vector.broadcast %4 : vector<12x1xf32> to vector<12x256xf32>
    %6 = arith.addf %3, %5 : vector<12x256xf32>
    %cst_6 = arith.constant 0.000000e+00 : f32
    %7 = vector.broadcast %cst_6 : f32 to vector<12x18x18xf32>
    %c0_7 = arith.constant 0 : index
    %c0_8 = arith.constant 0 : index
    %c0_9 = arith.constant 0 : index
    %8 = vector.load %arg11[%c0_7, %c0_8, %c0_9] : memref<12x18x18xf32, #tpu.memory_space<vmem>>, vector<12x18x18xf32>
    tpu.vector_store %arg11[%c0_7, %c0_8, %c0_9], %7 {strides = array<i32>} : memref<12x18x18xf32, #tpu.memory_space<vmem>>, vector<12x18x18xf32>,
    %9 = vector.extract_strided_slice %6 {offsets = [0, 0], sizes = [12, 16], strides = [1, 1]} : vector<12x256xf32> to vector<12x16xf32>
    %10 = vector.shape_cast %9 : vector<12x16xf32> to vector<12x1x16xf32>
    %c0_10 = arith.constant 0 : index
    %c1 = arith.constant 1 : index
    %c1_11 = arith.constant 1 : index
    %11 = vector.load %arg11[%c0_10, %c1, %c1_11] : memref<12x18x18xf32, #tpu.memory_space<vmem>>, vector<12x1x16xf32>
    tpu.vector_store %arg11[%c0_10, %c1, %c1_11], %10 {strides = array<i32>} : memref<12x18x18xf32, #tpu.memory_space<vmem>>, vector<12x1x16xf32>,
    %12 = vector.extract_strided_slice %6 {offsets = [0, 16], sizes = [12, 16], strides = [1, 1]} : vector<12x256xf32> to vector<12x16xf32>
    %13 = vector.shape_cast %12 : vector<12x16xf32> to vector<12x1x16xf32>
    %c0_12 = arith.constant 0 : index
    %c2 = arith.constant 2 : index
    %c1_13 = arith.constant 1 : index
    %14 = vector.load %arg11[%c0_12, %c2, %c1_13] : memref<12x18x18xf32, #tpu.memory_space<vmem>>, vector<12x1x16xf32>
    tpu.vector_store %arg11[%c0_12, %c2, %c1_13], %13 {strides = array<i32>} : memref<12x18x18xf32, #tpu.memory_space<vmem>>, vector<12x1x16xf32>,
    %15 = vector.extract_strided_slice %6 {offsets = [0, 32], sizes = [12, 16], strides = [1, 1]} : vector<12x256xf32> to vector<12x16xf32>
    %16 = vector.shape_cast %15 : vector<12x16xf32> to vector<12x1x16xf32>
    %c0_14 = arith.constant 0 : index
    %c3 = arith.constant 3 : index
    %c1_15 = arith.constant 1 : index
    %17 = vector.load %arg11[%c0_14, %c3, %c1_15] : memref<12x18x18xf32, #tpu.memory_space<vmem>>, vector<12x1x16xf32>
    tpu.vector_store %arg11[%c0_14, %c3, %c1_15], %16 {strides = array<i32>} : memref<12x18x18xf32, #tpu.memory_space<vmem>>, vector<12x1x16xf32>,
    %18 = vector.extract_strided_slice %6 {offsets = [0, 48], sizes = [12, 16], strides = [1, 1]} : vector<12x256xf32> to vector<12x16xf32>
    %19 = vector.shape_cast %18 : vector<12x16xf32> to vector<12x1x16xf32>
    %c0_16 = arith.constant 0 : index
    %c4 = arith.constant 4 : index
    %c1_17 = arith.constant 1 : index
    %20 = vector.load %arg11[%c0_16, %c4, %c1_17] : memref<12x18x18xf32, #tpu.memory_space<vmem>>, vector<12x1x16xf32>
    tpu.vector_store %arg11[%c0_16, %c4, %c1_17], %19 {strides = array<i32>} : memref<12x18x18xf32, #tpu.memory_space<vmem>>, vector<12x1x16xf32>,
    %21 = vector.extract_strided_slice %6 {offsets = [0, 64], sizes = [12, 16], strides = [1, 1]} : vector<12x256xf32> to vector<12x16xf32>
    %22 = vector.shape_cast %21 : vector<12x16xf32> to vector<12x1x16xf32>
    %c0_18 = arith.constant 0 : index
    %c5 = arith.constant 5 : index
    %c1_19 = arith.constant 1 : index
    %23 = vector.load %arg11[%c0_18, %c5, %c1_19] : memref<12x18x18xf32, #tpu.memory_space<vmem>>, vector<12x1x16xf32>
    tpu.vector_store %arg11[%c0_18, %c5, %c1_19], %22 {strides = array<i32>} : memref<12x18x18xf32, #tpu.memory_space<vmem>>, vector<12x1x16xf32>,
    %24 = vector.extract_strided_slice %6 {offsets = [0, 80], sizes = [12, 16], strides = [1, 1]} : vector<12x256xf32> to vector<12x16xf32>
    %25 = vector.shape_cast %24 : vector<12x16xf32> to vector<12x1x16xf32>
    %c0_20 = arith.constant 0 : index
    %c6 = arith.constant 6 : index
    %c1_21 = arith.constant 1 : index
    %26 = vector.load %arg11[%c0_20, %c6, %c1_21] : memref<12x18x18xf32, #tpu.memory_space<vmem>>, vector<12x1x16xf32>
    tpu.vector_store %arg11[%c0_20, %c6, %c1_21], %25 {strides = array<i32>} : memref<12x18x18xf32, #tpu.memory_space<vmem>>, vector<12x1x16xf32>,
    %27 = vector.extract_strided_slice %6 {offsets = [0, 96], sizes = [12, 16], strides = [1, 1]} : vector<12x256xf32> to vector<12x16xf32>
    %28 = vector.shape_cast %27 : vector<12x16xf32> to vector<12x1x16xf32>
    %c0_22 = arith.constant 0 : index
    %c7 = arith.constant 7 : index
    %c1_23 = arith.constant 1 : index
    %29 = vector.load %arg11[%c0_22, %c7, %c1_23] : memref<12x18x18xf32, #tpu.memory_space<vmem>>, vector<12x1x16xf32>
    tpu.vector_store %arg11[%c0_22, %c7, %c1_23], %28 {strides = array<i32>} : memref<12x18x18xf32, #tpu.memory_space<vmem>>, vector<12x1x16xf32>,
    %30 = vector.extract_strided_slice %6 {offsets = [0, 112], sizes = [12, 16], strides = [1, 1]} : vector<12x256xf32> to vector<12x16xf32>
    %31 = vector.shape_cast %30 : vector<12x16xf32> to vector<12x1x16xf32>
    %c0_24 = arith.constant 0 : index
    %c8 = arith.constant 8 : index
    %c1_25 = arith.constant 1 : index
    %32 = vector.load %arg11[%c0_24, %c8, %c1_25] : memref<12x18x18xf32, #tpu.memory_space<vmem>>, vector<12x1x16xf32>
    tpu.vector_store %arg11[%c0_24, %c8, %c1_25], %31 {strides = array<i32>} : memref<12x18x18xf32, #tpu.memory_space<vmem>>, vector<12x1x16xf32>,
    %33 = vector.extract_strided_slice %6 {offsets = [0, 128], sizes = [12, 16], strides = [1, 1]} : vector<12x256xf32> to vector<12x16xf32>
    %34 = vector.shape_cast %33 : vector<12x16xf32> to vector<12x1x16xf32>
    %c0_26 = arith.constant 0 : index
    %c9 = arith.constant 9 : index
    %c1_27 = arith.constant 1 : index
    %35 = vector.load %arg11[%c0_26, %c9, %c1_27] : memref<12x18x18xf32, #tpu.memory_space<vmem>>, vector<12x1x16xf32>
    tpu.vector_store %arg11[%c0_26, %c9, %c1_27], %34 {strides = array<i32>} : memref<12x18x18xf32, #tpu.memory_space<vmem>>, vector<12x1x16xf32>,
    %36 = vector.extract_strided_slice %6 {offsets = [0, 144], sizes = [12, 16], strides = [1, 1]} : vector<12x256xf32> to vector<12x16xf32>
    %37 = vector.shape_cast %36 : vector<12x16xf32> to vector<12x1x16xf32>
    %c0_28 = arith.constant 0 : index
    %c10 = arith.constant 10 : index
    %c1_29 = arith.constant 1 : index
    %38 = vector.load %arg11[%c0_28, %c10, %c1_29] : memref<12x18x18xf32, #tpu.memory_space<vmem>>, vector<12x1x16xf32>
    tpu.vector_store %arg11[%c0_28, %c10, %c1_29], %37 {strides = array<i32>} : memref<12x18x18xf32, #tpu.memory_space<vmem>>, vector<12x1x16xf32>,
    %39 = vector.extract_strided_slice %6 {offsets = [0, 160], sizes = [12, 16], strides = [1, 1]} : vector<12x256xf32> to vector<12x16xf32>
    %40 = vector.shape_cast %39 : vector<12x16xf32> to vector<12x1x16xf32>
    %c0_30 = arith.constant 0 : index
    %c11 = arith.constant 11 : index
    %c1_31 = arith.constant 1 : index
    %41 = vector.load %arg11[%c0_30, %c11, %c1_31] : memref<12x18x18xf32, #tpu.memory_space<vmem>>, vector<12x1x16xf32>
    tpu.vector_store %arg11[%c0_30, %c11, %c1_31], %40 {strides = array<i32>} : memref<12x18x18xf32, #tpu.memory_space<vmem>>, vector<12x1x16xf32>,
    %42 = vector.extract_strided_slice %6 {offsets = [0, 176], sizes = [12, 16], strides = [1, 1]} : vector<12x256xf32> to vector<12x16xf32>
    %43 = vector.shape_cast %42 : vector<12x16xf32> to vector<12x1x16xf32>
    %c0_32 = arith.constant 0 : index
    %c12 = arith.constant 12 : index
    %c1_33 = arith.constant 1 : index
    %44 = vector.load %arg11[%c0_32, %c12, %c1_33] : memref<12x18x18xf32, #tpu.memory_space<vmem>>, vector<12x1x16xf32>
    tpu.vector_store %arg11[%c0_32, %c12, %c1_33], %43 {strides = array<i32>} : memref<12x18x18xf32, #tpu.memory_space<vmem>>, vector<12x1x16xf32>,
    %45 = vector.extract_strided_slice %6 {offsets = [0, 192], sizes = [12, 16], strides = [1, 1]} : vector<12x256xf32> to vector<12x16xf32>
    %46 = vector.shape_cast %45 : vector<12x16xf32> to vector<12x1x16xf32>
    %c0_34 = arith.constant 0 : index
    %c13 = arith.constant 13 : index
    %c1_35 = arith.constant 1 : index
    %47 = vector.load %arg11[%c0_34, %c13, %c1_35] : memref<12x18x18xf32, #tpu.memory_space<vmem>>, vector<12x1x16xf32>
    tpu.vector_store %arg11[%c0_34, %c13, %c1_35], %46 {strides = array<i32>} : memref<12x18x18xf32, #tpu.memory_space<vmem>>, vector<12x1x16xf32>,
    %48 = vector.extract_strided_slice %6 {offsets = [0, 208], sizes = [12, 16], strides = [1, 1]} : vector<12x256xf32> to vector<12x16xf32>
    %49 = vector.shape_cast %48 : vector<12x16xf32> to vector<12x1x16xf32>
    %c0_36 = arith.constant 0 : index
    %c14 = arith.constant 14 : index
    %c1_37 = arith.constant 1 : index
    %50 = vector.load %arg11[%c0_36, %c14, %c1_37] : memref<12x18x18xf32, #tpu.memory_space<vmem>>, vector<12x1x16xf32>
    tpu.vector_store %arg11[%c0_36, %c14, %c1_37], %49 {strides = array<i32>} : memref<12x18x18xf32, #tpu.memory_space<vmem>>, vector<12x1x16xf32>,
    %51 = vector.extract_strided_slice %6 {offsets = [0, 224], sizes = [12, 16], strides = [1, 1]} : vector<12x256xf32> to vector<12x16xf32>
    %52 = vector.shape_cast %51 : vector<12x16xf32> to vector<12x1x16xf32>
    %c0_38 = arith.constant 0 : index
    %c15 = arith.constant 15 : index
    %c1_39 = arith.constant 1 : index
    %53 = vector.load %arg11[%c0_38, %c15, %c1_39] : memref<12x18x18xf32, #tpu.memory_space<vmem>>, vector<12x1x16xf32>
    tpu.vector_store %arg11[%c0_38, %c15, %c1_39], %52 {strides = array<i32>} : memref<12x18x18xf32, #tpu.memory_space<vmem>>, vector<12x1x16xf32>,
    %54 = vector.extract_strided_slice %6 {offsets = [0, 240], sizes = [12, 16], strides = [1, 1]} : vector<12x256xf32> to vector<12x16xf32>
    %55 = vector.shape_cast %54 : vector<12x16xf32> to vector<12x1x16xf32>
    %c0_40 = arith.constant 0 : index
    %c16 = arith.constant 16 : index
    %c1_41 = arith.constant 1 : index
    %56 = vector.load %arg11[%c0_40, %c16, %c1_41] : memref<12x18x18xf32, #tpu.memory_space<vmem>>, vector<12x1x16xf32>
    tpu.vector_store %arg11[%c0_40, %c16, %c1_41], %55 {strides = array<i32>} : memref<12x18x18xf32, #tpu.memory_space<vmem>>, vector<12x1x16xf32>,
    %c0_42 = arith.constant 0 : index
    %c0_43 = arith.constant 0 : index
    %c0_44 = arith.constant 0 : index
    %57 = vector.load %arg11[%c0_42, %c0_43, %c0_44] : memref<12x18x18xf32, #tpu.memory_space<vmem>>, vector<12x18x18xf32>
    %cst_45 = arith.constant 0.000000e+00 : f32
    %58 = vector.broadcast %cst_45 : f32 to vector<12x16x16xf32>
    %59 = vector.extract_strided_slice %57 {offsets = [0, 0, 0], sizes = [12, 16, 16], strides = [1, 1, 1]} : vector<12x18x18xf32> to vector<12x16x16xf32>
    %c0_46 = arith.constant 0 : index
    %c0_47 = arith.constant 0 : index
    %60 = vector.load %arg4[%c0_46, %c0_47] : memref<12x9xf32, #tpu.memory_space<vmem>>, vector<12x1xf32>
    %61 = vector.shape_cast %60 : vector<12x1xf32> to vector<12x1x1xf32>
    %62 = vector.broadcast %61 : vector<12x1x1xf32> to vector<12x16x16xf32>
    %63 = arith.mulf %59, %62 : vector<12x16x16xf32>
    %64 = arith.addf %58, %63 : vector<12x16x16xf32>
    %65 = vector.extract_strided_slice %57 {offsets = [0, 0, 1], sizes = [12, 16, 16], strides = [1, 1, 1]} : vector<12x18x18xf32> to vector<12x16x16xf32>
    %c0_48 = arith.constant 0 : index
    %c1_49 = arith.constant 1 : index
    %66 = vector.load %arg4[%c0_48, %c1_49] : memref<12x9xf32, #tpu.memory_space<vmem>>, vector<12x1xf32>
    %67 = vector.shape_cast %66 : vector<12x1xf32> to vector<12x1x1xf32>
    %68 = vector.broadcast %67 : vector<12x1x1xf32> to vector<12x16x16xf32>
    %69 = arith.mulf %65, %68 : vector<12x16x16xf32>
    %70 = arith.addf %64, %69 : vector<12x16x16xf32>
    %71 = vector.extract_strided_slice %57 {offsets = [0, 0, 2], sizes = [12, 16, 16], strides = [1, 1, 1]} : vector<12x18x18xf32> to vector<12x16x16xf32>
    %c0_50 = arith.constant 0 : index
    %c2_51 = arith.constant 2 : index
    %72 = vector.load %arg4[%c0_50, %c2_51] : memref<12x9xf32, #tpu.memory_space<vmem>>, vector<12x1xf32>
    %73 = vector.shape_cast %72 : vector<12x1xf32> to vector<12x1x1xf32>
    %74 = vector.broadcast %73 : vector<12x1x1xf32> to vector<12x16x16xf32>
    %75 = arith.mulf %71, %74 : vector<12x16x16xf32>
    %76 = arith.addf %70, %75 : vector<12x16x16xf32>
    %77 = vector.extract_strided_slice %57 {offsets = [0, 1, 0], sizes = [12, 16, 16], strides = [1, 1, 1]} : vector<12x18x18xf32> to vector<12x16x16xf32>
    %c0_52 = arith.constant 0 : index
    %c3_53 = arith.constant 3 : index
    %78 = vector.load %arg4[%c0_52, %c3_53] : memref<12x9xf32, #tpu.memory_space<vmem>>, vector<12x1xf32>
    %79 = vector.shape_cast %78 : vector<12x1xf32> to vector<12x1x1xf32>
    %80 = vector.broadcast %79 : vector<12x1x1xf32> to vector<12x16x16xf32>
    %81 = arith.mulf %77, %80 : vector<12x16x16xf32>
    %82 = arith.addf %76, %81 : vector<12x16x16xf32>
    %83 = vector.extract_strided_slice %57 {offsets = [0, 1, 1], sizes = [12, 16, 16], strides = [1, 1, 1]} : vector<12x18x18xf32> to vector<12x16x16xf32>
    %c0_54 = arith.constant 0 : index
    %c4_55 = arith.constant 4 : index
    %84 = vector.load %arg4[%c0_54, %c4_55] : memref<12x9xf32, #tpu.memory_space<vmem>>, vector<12x1xf32>
    %85 = vector.shape_cast %84 : vector<12x1xf32> to vector<12x1x1xf32>
    %86 = vector.broadcast %85 : vector<12x1x1xf32> to vector<12x16x16xf32>
    %87 = arith.mulf %83, %86 : vector<12x16x16xf32>
    %88 = arith.addf %82, %87 : vector<12x16x16xf32>
    %89 = vector.extract_strided_slice %57 {offsets = [0, 1, 2], sizes = [12, 16, 16], strides = [1, 1, 1]} : vector<12x18x18xf32> to vector<12x16x16xf32>
    %c0_56 = arith.constant 0 : index
    %c5_57 = arith.constant 5 : index
    %90 = vector.load %arg4[%c0_56, %c5_57] : memref<12x9xf32, #tpu.memory_space<vmem>>, vector<12x1xf32>
    %91 = vector.shape_cast %90 : vector<12x1xf32> to vector<12x1x1xf32>
    %92 = vector.broadcast %91 : vector<12x1x1xf32> to vector<12x16x16xf32>
    %93 = arith.mulf %89, %92 : vector<12x16x16xf32>
    %94 = arith.addf %88, %93 : vector<12x16x16xf32>
    %95 = vector.extract_strided_slice %57 {offsets = [0, 2, 0], sizes = [12, 16, 16], strides = [1, 1, 1]} : vector<12x18x18xf32> to vector<12x16x16xf32>
    %c0_58 = arith.constant 0 : index
    %c6_59 = arith.constant 6 : index
    %96 = vector.load %arg4[%c0_58, %c6_59] : memref<12x9xf32, #tpu.memory_space<vmem>>, vector<12x1xf32>
    %97 = vector.shape_cast %96 : vector<12x1xf32> to vector<12x1x1xf32>
    %98 = vector.broadcast %97 : vector<12x1x1xf32> to vector<12x16x16xf32>
    %99 = arith.mulf %95, %98 : vector<12x16x16xf32>
    %100 = arith.addf %94, %99 : vector<12x16x16xf32>
    %101 = vector.extract_strided_slice %57 {offsets = [0, 2, 1], sizes = [12, 16, 16], strides = [1, 1, 1]} : vector<12x18x18xf32> to vector<12x16x16xf32>
    %c0_60 = arith.constant 0 : index
    %c7_61 = arith.constant 7 : index
    %102 = vector.load %arg4[%c0_60, %c7_61] : memref<12x9xf32, #tpu.memory_space<vmem>>, vector<12x1xf32>
    %103 = vector.shape_cast %102 : vector<12x1xf32> to vector<12x1x1xf32>
    %104 = vector.broadcast %103 : vector<12x1x1xf32> to vector<12x16x16xf32>
    %105 = arith.mulf %101, %104 : vector<12x16x16xf32>
    %106 = arith.addf %100, %105 : vector<12x16x16xf32>
    %107 = vector.extract_strided_slice %57 {offsets = [0, 2, 2], sizes = [12, 16, 16], strides = [1, 1, 1]} : vector<12x18x18xf32> to vector<12x16x16xf32>
    %c0_62 = arith.constant 0 : index
    %c8_63 = arith.constant 8 : index
    %108 = vector.load %arg4[%c0_62, %c8_63] : memref<12x9xf32, #tpu.memory_space<vmem>>, vector<12x1xf32>
    %109 = vector.shape_cast %108 : vector<12x1xf32> to vector<12x1x1xf32>
    %110 = vector.broadcast %109 : vector<12x1x1xf32> to vector<12x16x16xf32>
    %111 = arith.mulf %107, %110 : vector<12x16x16xf32>
    %112 = arith.addf %106, %111 : vector<12x16x16xf32>
    %c0_64 = arith.constant 0 : index
    %c0_65 = arith.constant 0 : index
    %113 = vector.load %arg5[%c0_64, %c0_65] : memref<12x1xf32, #tpu.memory_space<vmem>>, vector<12x1xf32>
    %114 = vector.shape_cast %113 : vector<12x1xf32> to vector<12x1x1xf32>
    %115 = vector.broadcast %114 : vector<12x1x1xf32> to vector<12x16x16xf32>
    %116 = arith.addf %112, %115 : vector<12x16x16xf32>
    %c0_66 = arith.constant 0 : index
    %c1_67 = arith.constant 1 : index
    %c1_68 = arith.constant 1 : index
    %117 = vector.load %arg11[%c0_66, %c1_67, %c1_68] : memref<12x18x18xf32, #tpu.memory_space<vmem>>, vector<12x16x16xf32>
    tpu.vector_store %arg11[%c0_66, %c1_67, %c1_68], %116 {strides = array<i32>} : memref<12x18x18xf32, #tpu.memory_space<vmem>>, vector<12x16x16xf32>,
    %c0_69 = arith.constant 0 : index
    %c0_70 = arith.constant 0 : index
    %c0_71 = arith.constant 0 : index
    %118 = vector.load %arg11[%c0_69, %c0_70, %c0_71] : memref<12x18x18xf32, #tpu.memory_space<vmem>>, vector<12x18x18xf32>
    %cst_72 = arith.constant 0.000000e+00 : f32
    %119 = vector.broadcast %cst_72 : f32 to vector<12x16x16xf32>
    %120 = vector.extract_strided_slice %118 {offsets = [0, 0, 0], sizes = [12, 16, 16], strides = [1, 1, 1]} : vector<12x18x18xf32> to vector<12x16x16xf32>
    %c0_73 = arith.constant 0 : index
    %c0_74 = arith.constant 0 : index
    %121 = vector.load %arg6[%c0_73, %c0_74] : memref<12x9xf32, #tpu.memory_space<vmem>>, vector<12x1xf32>
    %122 = vector.shape_cast %121 : vector<12x1xf32> to vector<12x1x1xf32>
    %123 = vector.broadcast %122 : vector<12x1x1xf32> to vector<12x16x16xf32>
    %124 = arith.mulf %120, %123 : vector<12x16x16xf32>
    %125 = arith.addf %119, %124 : vector<12x16x16xf32>
    %126 = vector.extract_strided_slice %118 {offsets = [0, 0, 1], sizes = [12, 16, 16], strides = [1, 1, 1]} : vector<12x18x18xf32> to vector<12x16x16xf32>
    %c0_75 = arith.constant 0 : index
    %c1_76 = arith.constant 1 : index
    %127 = vector.load %arg6[%c0_75, %c1_76] : memref<12x9xf32, #tpu.memory_space<vmem>>, vector<12x1xf32>
    %128 = vector.shape_cast %127 : vector<12x1xf32> to vector<12x1x1xf32>
    %129 = vector.broadcast %128 : vector<12x1x1xf32> to vector<12x16x16xf32>
    %130 = arith.mulf %126, %129 : vector<12x16x16xf32>
    %131 = arith.addf %125, %130 : vector<12x16x16xf32>
    %132 = vector.extract_strided_slice %118 {offsets = [0, 0, 2], sizes = [12, 16, 16], strides = [1, 1, 1]} : vector<12x18x18xf32> to vector<12x16x16xf32>
    %c0_77 = arith.constant 0 : index
    %c2_78 = arith.constant 2 : index
    %133 = vector.load %arg6[%c0_77, %c2_78] : memref<12x9xf32, #tpu.memory_space<vmem>>, vector<12x1xf32>
    %134 = vector.shape_cast %133 : vector<12x1xf32> to vector<12x1x1xf32>
    %135 = vector.broadcast %134 : vector<12x1x1xf32> to vector<12x16x16xf32>
    %136 = arith.mulf %132, %135 : vector<12x16x16xf32>
    %137 = arith.addf %131, %136 : vector<12x16x16xf32>
    %138 = vector.extract_strided_slice %118 {offsets = [0, 1, 0], sizes = [12, 16, 16], strides = [1, 1, 1]} : vector<12x18x18xf32> to vector<12x16x16xf32>
    %c0_79 = arith.constant 0 : index
    %c3_80 = arith.constant 3 : index
    %139 = vector.load %arg6[%c0_79, %c3_80] : memref<12x9xf32, #tpu.memory_space<vmem>>, vector<12x1xf32>
    %140 = vector.shape_cast %139 : vector<12x1xf32> to vector<12x1x1xf32>
    %141 = vector.broadcast %140 : vector<12x1x1xf32> to vector<12x16x16xf32>
    %142 = arith.mulf %138, %141 : vector<12x16x16xf32>
    %143 = arith.addf %137, %142 : vector<12x16x16xf32>
    %144 = vector.extract_strided_slice %118 {offsets = [0, 1, 1], sizes = [12, 16, 16], strides = [1, 1, 1]} : vector<12x18x18xf32> to vector<12x16x16xf32>
    %c0_81 = arith.constant 0 : index
    %c4_82 = arith.constant 4 : index
    %145 = vector.load %arg6[%c0_81, %c4_82] : memref<12x9xf32, #tpu.memory_space<vmem>>, vector<12x1xf32>
    %146 = vector.shape_cast %145 : vector<12x1xf32> to vector<12x1x1xf32>
    %147 = vector.broadcast %146 : vector<12x1x1xf32> to vector<12x16x16xf32>
    %148 = arith.mulf %144, %147 : vector<12x16x16xf32>
    %149 = arith.addf %143, %148 : vector<12x16x16xf32>
    %150 = vector.extract_strided_slice %118 {offsets = [0, 1, 2], sizes = [12, 16, 16], strides = [1, 1, 1]} : vector<12x18x18xf32> to vector<12x16x16xf32>
    %c0_83 = arith.constant 0 : index
    %c5_84 = arith.constant 5 : index
    %151 = vector.load %arg6[%c0_83, %c5_84] : memref<12x9xf32, #tpu.memory_space<vmem>>, vector<12x1xf32>
    %152 = vector.shape_cast %151 : vector<12x1xf32> to vector<12x1x1xf32>
    %153 = vector.broadcast %152 : vector<12x1x1xf32> to vector<12x16x16xf32>
    %154 = arith.mulf %150, %153 : vector<12x16x16xf32>
    %155 = arith.addf %149, %154 : vector<12x16x16xf32>
    %156 = vector.extract_strided_slice %118 {offsets = [0, 2, 0], sizes = [12, 16, 16], strides = [1, 1, 1]} : vector<12x18x18xf32> to vector<12x16x16xf32>
    %c0_85 = arith.constant 0 : index
    %c6_86 = arith.constant 6 : index
    %157 = vector.load %arg6[%c0_85, %c6_86] : memref<12x9xf32, #tpu.memory_space<vmem>>, vector<12x1xf32>
    %158 = vector.shape_cast %157 : vector<12x1xf32> to vector<12x1x1xf32>
    %159 = vector.broadcast %158 : vector<12x1x1xf32> to vector<12x16x16xf32>
    %160 = arith.mulf %156, %159 : vector<12x16x16xf32>
    %161 = arith.addf %155, %160 : vector<12x16x16xf32>
    %162 = vector.extract_strided_slice %118 {offsets = [0, 2, 1], sizes = [12, 16, 16], strides = [1, 1, 1]} : vector<12x18x18xf32> to vector<12x16x16xf32>
    %c0_87 = arith.constant 0 : index
    %c7_88 = arith.constant 7 : index
    %163 = vector.load %arg6[%c0_87, %c7_88] : memref<12x9xf32, #tpu.memory_space<vmem>>, vector<12x1xf32>
    %164 = vector.shape_cast %163 : vector<12x1xf32> to vector<12x1x1xf32>
    %165 = vector.broadcast %164 : vector<12x1x1xf32> to vector<12x16x16xf32>
    %166 = arith.mulf %162, %165 : vector<12x16x16xf32>
    %167 = arith.addf %161, %166 : vector<12x16x16xf32>
    %168 = vector.extract_strided_slice %118 {offsets = [0, 2, 2], sizes = [12, 16, 16], strides = [1, 1, 1]} : vector<12x18x18xf32> to vector<12x16x16xf32>
    %c0_89 = arith.constant 0 : index
    %c8_90 = arith.constant 8 : index
    %169 = vector.load %arg6[%c0_89, %c8_90] : memref<12x9xf32, #tpu.memory_space<vmem>>, vector<12x1xf32>
    %170 = vector.shape_cast %169 : vector<12x1xf32> to vector<12x1x1xf32>
    %171 = vector.broadcast %170 : vector<12x1x1xf32> to vector<12x16x16xf32>
    %172 = arith.mulf %168, %171 : vector<12x16x16xf32>
    %173 = arith.addf %167, %172 : vector<12x16x16xf32>
    %c0_91 = arith.constant 0 : index
    %c0_92 = arith.constant 0 : index
    %174 = vector.load %arg7[%c0_91, %c0_92] : memref<12x1xf32, #tpu.memory_space<vmem>>, vector<12x1xf32>
    %175 = vector.shape_cast %174 : vector<12x1xf32> to vector<12x1x1xf32>
    %176 = vector.broadcast %175 : vector<12x1x1xf32> to vector<12x16x16xf32>
    %177 = arith.addf %173, %176 : vector<12x16x16xf32>
    %178 = vector.extract_strided_slice %177 {offsets = [0, 0, 0], sizes = [4, 16, 16], strides = [1, 1, 1]} : vector<12x16x16xf32> to vector<4x16x16xf32>
    %c0_93 = arith.constant 0 : index
    %c0_94 = arith.constant 0 : index
    %c0_95 = arith.constant 0 : index
    %c0_96 = arith.constant 0 : index
    %179 = vector.load %arg8[%c0_93, %c0_94, %c0_95, %c0_96] : memref<1x4x16x16xf32, #tpu.memory_space<vmem>>, vector<1x4x16x16xf32>
    %180 = vector.shape_cast %179 : vector<1x4x16x16xf32> to vector<4x16x16xf32>
    %181 = vector.shape_cast %178 : vector<4x16x16xf32> to vector<1x4x16x16xf32>
    tpu.vector_store %arg8[%c0_93, %c0_94, %c0_95, %c0_96], %181 {strides = array<i32>} : memref<1x4x16x16xf32, #tpu.memory_space<vmem>>, vector<1x4x16x16xf32>,
    %182 = vector.extract_strided_slice %177 {offsets = [4, 0, 0], sizes = [4, 16, 16], strides = [1, 1, 1]} : vector<12x16x16xf32> to vector<4x16x16xf32>
    %c0_97 = arith.constant 0 : index
    %c0_98 = arith.constant 0 : index
    %c0_99 = arith.constant 0 : index
    %c0_100 = arith.constant 0 : index
    %183 = vector.load %arg9[%c0_97, %c0_98, %c0_99, %c0_100] : memref<1x4x16x16xf32, #tpu.memory_space<vmem>>, vector<1x4x16x16xf32>
    %184 = vector.shape_cast %183 : vector<1x4x16x16xf32> to vector<4x16x16xf32>
    %185 = vector.shape_cast %182 : vector<4x16x16xf32> to vector<1x4x16x16xf32>
    tpu.vector_store %arg9[%c0_97, %c0_98, %c0_99, %c0_100], %185 {strides = array<i32>} : memref<1x4x16x16xf32, #tpu.memory_space<vmem>>, vector<1x4x16x16xf32>,
    %186 = vector.extract_strided_slice %177 {offsets = [8, 0, 0], sizes = [4, 16, 16], strides = [1, 1, 1]} : vector<12x16x16xf32> to vector<4x16x16xf32>
    %c0_101 = arith.constant 0 : index
    %c0_102 = arith.constant 0 : index
    %c0_103 = arith.constant 0 : index
    %c0_104 = arith.constant 0 : index
    %187 = vector.load %arg10[%c0_101, %c0_102, %c0_103, %c0_104] : memref<1x4x16x16xf32, #tpu.memory_space<vmem>>, vector<1x4x16x16xf32>
    %188 = vector.shape_cast %187 : vector<1x4x16x16xf32> to vector<4x16x16xf32>
    %189 = vector.shape_cast %186 : vector<4x16x16xf32> to vector<1x4x16x16xf32>
    tpu.vector_store %arg10[%c0_101, %c0_102, %c0_103, %c0_104], %189 {strides = array<i32>} : memref<1x4x16x16xf32, #tpu.memory_space<vmem>>, vector<1x4x16x16xf32>,
    return
  }
  func.func @transform_0(%arg0: i32) -> (i32, i32, i32) {
    %c0_i32 = arith.constant 0 : i32
    %c0_i32_0 = arith.constant 0 : i32
    %c0_i32_1 = arith.constant 0 : i32
    return %arg0, %c0_i32, %c0_i32_0 : i32, i32, i32
  }
  func.func @transform_1(%arg0: i32) -> (i32, i32) {
    %c0_i32 = arith.constant 0 : i32
    %c0_i32_0 = arith.constant 0 : i32
    %c0_i32_1 = arith.constant 0 : i32
    return %c0_i32, %c0_i32_0 : i32, i32
  }
  func.func @transform_2(%arg0: i32) -> (i32, i32) {
    %c0_i32 = arith.constant 0 : i32
    %c0_i32_0 = arith.constant 0 : i32
    %c0_i32_1 = arith.constant 0 : i32
    return %c0_i32, %c0_i32_0 : i32, i32
  }
  func.func @transform_3(%arg0: i32) -> (i32, i32) {
    %c0_i32 = arith.constant 0 : i32
    %c0_i32_0 = arith.constant 0 : i32
    %c0_i32_1 = arith.constant 0 : i32
    return %c0_i32, %c0_i32_0 : i32, i32
  }
  func.func @transform_4(%arg0: i32) -> (i32, i32) {
    %c0_i32 = arith.constant 0 : i32
    %c0_i32_0 = arith.constant 0 : i32
    %c0_i32_1 = arith.constant 0 : i32
    return %c0_i32, %c0_i32_0 : i32, i32
  }
  func.func @transform_5(%arg0: i32) -> (i32, i32) {
    %c0_i32 = arith.constant 0 : i32
    %c0_i32_0 = arith.constant 0 : i32
    %c0_i32_1 = arith.constant 0 : i32
    return %c0_i32, %c0_i32_0 : i32, i32
  }
  func.func @transform_6(%arg0: i32) -> (i32, i32) {
    %c0_i32 = arith.constant 0 : i32
    %c0_i32_0 = arith.constant 0 : i32
    %c0_i32_1 = arith.constant 0 : i32
    return %c0_i32, %c0_i32_0 : i32, i32
  }
  func.func @transform_7(%arg0: i32) -> (i32, i32, i32, i32) {
    %c0_i32 = arith.constant 0 : i32
    %c0_i32_0 = arith.constant 0 : i32
    %c0_i32_1 = arith.constant 0 : i32
    %c0_i32_2 = arith.constant 0 : i32
    return %arg0, %c0_i32, %c0_i32_0, %c0_i32_1 : i32, i32, i32, i32
  }
  func.func @transform_8(%arg0: i32) -> (i32, i32, i32, i32) {
    %c0_i32 = arith.constant 0 : i32
    %c0_i32_0 = arith.constant 0 : i32
    %c0_i32_1 = arith.constant 0 : i32
    %c0_i32_2 = arith.constant 0 : i32
    return %arg0, %c0_i32, %c0_i32_0, %c0_i32_1 : i32, i32, i32, i32
  }
  func.func @transform_9(%arg0: i32) -> (i32, i32, i32, i32) {
    %c0_i32 = arith.constant 0 : i32
    %c0_i32_0 = arith.constant 0 : i32
    %c0_i32_1 = arith.constant 0 : i32
    %c0_i32_2 = arith.constant 0 : i32
    return %arg0, %c0_i32, %c0_i32_0, %c0_i32_1 : i32, i32, i32, i32
  }
}

module attributes {stable_mosaic.version = 11 : i64} {
  func.func @kernel(%arg0: i32, %arg1: memref<1xf32, #tpu.memory_space<smem>>, %arg2: memref<16x16x4xf32, #tpu.memory_space<vmem>>, %arg3: memref<16x16x4xf32, #tpu.memory_space<vmem>>, %arg4: memref<16x16x4xf32, #tpu.memory_space<vmem>>, %arg5: memref<16x16x4xf32, #tpu.memory_space<vmem>>) attributes {dimension_semantics = [#tpu.dimension_semantics<parallel>], iteration_bounds = array<i64: 2>, scalar_prefetch = 0 : i64, scratch_operands = 0 : i64, tpu.core_type = #tpu.core_type<tc>, window_params = [{transform_indices = @transform_0, window_bounds = array<i64: 1>}, {transform_indices = @transform_1, window_bounds = array<i64: 16, 16, 4>}, {transform_indices = @transform_2, window_bounds = array<i64: 16, 16, 4>}, {transform_indices = @transform_3, window_bounds = array<i64: 16, 16, 4>}, {transform_indices = @transform_4, window_bounds = array<i64: 16, 16, 4>}]} {
    %c0 = arith.constant 0 : index
    %0 = memref.load %arg1[%c0] : memref<1xf32, #tpu.memory_space<smem>>
    %c0_0 = arith.constant 0 : index
    %c0_1 = arith.constant 0 : index
    %c0_2 = arith.constant 0 : index
    %1 = vector.load %arg2[%c0_0, %c0_1, %c0_2] : memref<16x16x4xf32, #tpu.memory_space<vmem>>, vector<16x16x4xf32>
    %c0_3 = arith.constant 0 : index
    %c0_4 = arith.constant 0 : index
    %c0_5 = arith.constant 0 : index
    %2 = vector.load %arg3[%c0_3, %c0_4, %c0_5] : memref<16x16x4xf32, #tpu.memory_space<vmem>>, vector<16x16x4xf32>
    %c0_6 = arith.constant 0 : index
    %c0_7 = arith.constant 0 : index
    %c0_8 = arith.constant 0 : index
    %3 = vector.load %arg4[%c0_6, %c0_7, %c0_8] : memref<16x16x4xf32, #tpu.memory_space<vmem>>, vector<16x16x4xf32>
    %4 = arith.mulf %1, %1 : vector<16x16x4xf32>
    %cst = arith.constant dense<0.000000e+00> : vector<16x16xf32>
    %5 = vector.multi_reduction <add>, %4, %cst [2] : vector<16x16x4xf32> to vector<16x16xf32>
    %6 = vector.shape_cast %5 : vector<16x16xf32> to vector<16x16x1xf32>
    %cst_9 = arith.constant 1.000000e-24 : f32
    %7 = vector.broadcast %cst_9 : f32 to vector<16x16x1xf32>
    %8 = arith.maximumf %6, %7 : vector<16x16x1xf32>
    %9 = math.rsqrt %8 : vector<16x16x1xf32>
    %10 = vector.broadcast %9 : vector<16x16x1xf32> to vector<16x16x4xf32>
    %11 = arith.mulf %1, %10 : vector<16x16x4xf32>
    %12 = arith.mulf %2, %2 : vector<16x16x4xf32>
    %cst_10 = arith.constant dense<0.000000e+00> : vector<16x16xf32>
    %13 = vector.multi_reduction <add>, %12, %cst_10 [2] : vector<16x16x4xf32> to vector<16x16xf32>
    %14 = vector.shape_cast %13 : vector<16x16xf32> to vector<16x16x1xf32>
    %cst_11 = arith.constant 1.000000e-24 : f32
    %15 = vector.broadcast %cst_11 : f32 to vector<16x16x1xf32>
    %16 = arith.maximumf %14, %15 : vector<16x16x1xf32>
    %17 = math.rsqrt %16 : vector<16x16x1xf32>
    %18 = vector.broadcast %17 : vector<16x16x1xf32> to vector<16x16x4xf32>
    %19 = arith.mulf %2, %18 : vector<16x16x4xf32>
    %20 = vector.broadcast %0 : f32 to vector<16x16x4xf32>
    %21 = arith.mulf %11, %20 : vector<16x16x4xf32>
    "tpu.trace_start"() <{level = 10 : i32, message = "bqd,bkd->bqk"}> : () -> ()
    %cst_12 = arith.constant dense<0.000000e+00> : vector<16x16x16xf32>
    %22 = tpu.matmul %21, %19, %cst_12 {dimension_numbers = #tpu.dot_dimension_numbers<[2], [2], [1], [1], [0, 0, 0, 1, 1, 1], [0], [0]>} : vector<16x16x4xf32>, vector<16x16x4xf32>, vector<16x16x16xf32> -> vector<16x16x16xf32>
    "tpu.trace_stop"() : () -> ()
    %cst_13 = arith.constant dense<0xFF800000> : vector<16x16xf32>
    %23 = vector.multi_reduction <maximumf>, %22, %cst_13 [2] : vector<16x16x16xf32> to vector<16x16xf32>
    %24 = vector.shape_cast %23 : vector<16x16xf32> to vector<16x16x1xf32>
    %25 = vector.broadcast %24 : vector<16x16x1xf32> to vector<16x16x16xf32>
    %26 = arith.subf %22, %25 : vector<16x16x16xf32>
    %27 = math.exp %26 : vector<16x16x16xf32>
    %cst_14 = arith.constant dense<0.000000e+00> : vector<16x16xf32>
    %28 = vector.multi_reduction <add>, %27, %cst_14 [2] : vector<16x16x16xf32> to vector<16x16xf32>
    %29 = vector.shape_cast %28 : vector<16x16xf32> to vector<16x16x1xf32>
    %30 = tpu.reciprocal %29 {approx = true} : vector<16x16x1xf32> -> vector<16x16x1xf32>
    %31 = vector.broadcast %30 : vector<16x16x1xf32> to vector<16x16x16xf32>
    %32 = arith.mulf %27, %31 : vector<16x16x16xf32>
    "tpu.trace_start"() <{level = 10 : i32, message = "bqk,bkd->bqd"}> : () -> ()
    %cst_15 = arith.constant dense<0.000000e+00> : vector<16x16x4xf32>
    %33 = tpu.matmul %32, %3, %cst_15 {dimension_numbers = #tpu.dot_dimension_numbers<[2], [1], [1], [2], [0, 0, 0, 1, 1, 2], [0], [0]>} : vector<16x16x16xf32>, vector<16x16x4xf32>, vector<16x16x4xf32> -> vector<16x16x4xf32>
    "tpu.trace_stop"() : () -> ()
    %c0_16 = arith.constant 0 : index
    %c0_17 = arith.constant 0 : index
    %c0_18 = arith.constant 0 : index
    %34 = vector.load %arg5[%c0_16, %c0_17, %c0_18] : memref<16x16x4xf32, #tpu.memory_space<vmem>>, vector<16x16x4xf32>
    tpu.vector_store %arg5[%c0_16, %c0_17, %c0_18], %33 {strides = array<i32>} : memref<16x16x4xf32, #tpu.memory_space<vmem>>, vector<16x16x4xf32>,
    return
  }
  func.func @transform_0(%arg0: i32) -> i32 {
    %c0_i32 = arith.constant 0 : i32
    %c0_i32_0 = arith.constant 0 : i32
    return %c0_i32 : i32
  }
  func.func @transform_1(%arg0: i32) -> (i32, i32, i32) {
    %c0_i32 = arith.constant 0 : i32
    %c0_i32_0 = arith.constant 0 : i32
    %c0_i32_1 = arith.constant 0 : i32
    return %arg0, %c0_i32, %c0_i32_0 : i32, i32, i32
  }
  func.func @transform_2(%arg0: i32) -> (i32, i32, i32) {
    %c0_i32 = arith.constant 0 : i32
    %c0_i32_0 = arith.constant 0 : i32
    %c0_i32_1 = arith.constant 0 : i32
    return %arg0, %c0_i32, %c0_i32_0 : i32, i32, i32
  }
  func.func @transform_3(%arg0: i32) -> (i32, i32, i32) {
    %c0_i32 = arith.constant 0 : i32
    %c0_i32_0 = arith.constant 0 : i32
    %c0_i32_1 = arith.constant 0 : i32
    return %arg0, %c0_i32, %c0_i32_0 : i32, i32, i32
  }
  func.func @transform_4(%arg0: i32) -> (i32, i32, i32) {
    %c0_i32 = arith.constant 0 : i32
    %c0_i32_0 = arith.constant 0 : i32
    %c0_i32_1 = arith.constant 0 : i32
    return %arg0, %c0_i32, %c0_i32_0 : i32, i32, i32
  }
}

module attributes {stable_mosaic.version = 11 : i64} {
  func.func @kernel(%arg0: i32, %arg1: i32, %arg2: memref<1x4x256xf32, #tpu.memory_space<vmem>>, %arg3: memref<4x4xf32, #tpu.memory_space<vmem>>, %arg4: memref<4x1xf32, #tpu.memory_space<vmem>>, %arg5: memref<1x4x256xf32, #tpu.memory_space<vmem>>) attributes {dimension_semantics = [#tpu.dimension_semantics<parallel>, #tpu.dimension_semantics<parallel>], iteration_bounds = array<i64: 2, 1>, scalar_prefetch = 0 : i64, scratch_operands = 0 : i64, tpu.core_type = #tpu.core_type<tc>, window_params = [{transform_indices = @transform_0, window_bounds = array<i64: 1, 4, 256>}, {pipeline_mode = #tpu.pipeline_mode<synchronous>, transform_indices = @transform_1, window_bounds = array<i64: 4, 4>}, {pipeline_mode = #tpu.pipeline_mode<synchronous>, transform_indices = @transform_2, window_bounds = array<i64: 4, 1>}, {transform_indices = @transform_3, window_bounds = array<i64: 1, 4, 256>}]} {
    %c0 = arith.constant 0 : index
    %c0_0 = arith.constant 0 : index
    %0 = vector.load %arg3[%c0, %c0_0] : memref<4x4xf32, #tpu.memory_space<vmem>>, vector<4x4xf32>
    %c0_1 = arith.constant 0 : index
    %c0_2 = arith.constant 0 : index
    %c0_3 = arith.constant 0 : index
    %1 = vector.load %arg2[%c0_1, %c0_2, %c0_3] : memref<1x4x256xf32, #tpu.memory_space<vmem>>, vector<1x4x256xf32>
    %2 = vector.shape_cast %1 : vector<1x4x256xf32> to vector<4x256xf32>
    %cst = arith.constant dense<0.000000e+00> : vector<4x256xf32>
    %3 = tpu.matmul %0, %2, %cst {dimension_numbers = #tpu.dot_dimension_numbers<[1], [0], [0], [1], [0, 0, 1, 1], [], []>} : vector<4x4xf32>, vector<4x256xf32>, vector<4x256xf32> -> vector<4x256xf32>
    %c0_4 = arith.constant 0 : index
    %c0_5 = arith.constant 0 : index
    %4 = vector.load %arg4[%c0_4, %c0_5] : memref<4x1xf32, #tpu.memory_space<vmem>>, vector<4x1xf32>
    %5 = vector.broadcast %4 : vector<4x1xf32> to vector<4x256xf32>
    %6 = arith.addf %3, %5 : vector<4x256xf32>
    %c0_6 = arith.constant 0 : index
    %c0_7 = arith.constant 0 : index
    %c0_8 = arith.constant 0 : index
    %7 = vector.load %arg5[%c0_6, %c0_7, %c0_8] : memref<1x4x256xf32, #tpu.memory_space<vmem>>, vector<1x4x256xf32>
    %8 = vector.shape_cast %7 : vector<1x4x256xf32> to vector<4x256xf32>
    %9 = vector.shape_cast %6 : vector<4x256xf32> to vector<1x4x256xf32>
    tpu.vector_store %arg5[%c0_6, %c0_7, %c0_8], %9 {strides = array<i32>} : memref<1x4x256xf32, #tpu.memory_space<vmem>>, vector<1x4x256xf32>,
    return
  }
  func.func @transform_0(%arg0: i32, %arg1: i32) -> (i32, i32, i32) {
    %c0_i32 = arith.constant 0 : i32
    %c0_i32_0 = arith.constant 0 : i32
    return %arg0, %c0_i32, %arg1 : i32, i32, i32
  }
  func.func @transform_1(%arg0: i32, %arg1: i32) -> (i32, i32) {
    %c0_i32 = arith.constant 0 : i32
    %c0_i32_0 = arith.constant 0 : i32
    %c0_i32_1 = arith.constant 0 : i32
    return %c0_i32, %c0_i32_0 : i32, i32
  }
  func.func @transform_2(%arg0: i32, %arg1: i32) -> (i32, i32) {
    %c0_i32 = arith.constant 0 : i32
    %c0_i32_0 = arith.constant 0 : i32
    %c0_i32_1 = arith.constant 0 : i32
    return %c0_i32, %c0_i32_0 : i32, i32
  }
  func.func @transform_3(%arg0: i32, %arg1: i32) -> (i32, i32, i32) {
    %c0_i32 = arith.constant 0 : i32
    %c0_i32_0 = arith.constant 0 : i32
    return %arg0, %c0_i32, %arg1 : i32, i32, i32
  }
}

</mosaic_0001>

<bundles_post_ra>
// kernel: next_attention_z.8
= control target key start
LH: loop header
LB: loop body
LE: loop exit
PB: predicated region body
PF: predicated region fallthrough
CT: control target
= control target key end

     0   :  { %s482_s12 = smov 0   ;;  %s484_s13 = smov 0   ;;  %s521_s0 = inlined_call_operand.vmem [shape: f32[2,4,256], index: 0, kind: input, shape index: {}]   ;;  %s522_s1 = inlined_call_operand.vmem [shape: f32[4,4], index: 1, kind: input, shape index: {}]   ;;  %s523_s2 = inlined_call_operand.vmem [shape: f32[4,1], index: 2, kind: input, shape index: {}]   ;;  %s524_s3 = inlined_call_operand.vmem [shape: f32[2,4,256], index: 3, kind: output, shape index: {}]  }
   0x1   :  { %s486_s14 = smov 0  }
   0x2 LB: > { %s25_s15 = sadd.s32 1, %s454_s13  ;;  %p396_p0 = scmp.ge.s32.totalorder %s458_s14, 1  ;;  %s458_s14 = sphi %s486_s14, %s13_s14   ;;  %s454_s13 = sphi %s484_s13, %s526_s13   ;;  %s450_s12 = sphi %s482_s12, %s525_s12  }
   0x3   : > { %p27_p1 = scmp.ge.s32.totalorder %s25_s15, 2  ;;  %p158_p2 = scmp.lt.s32.totalorder %s458_s14, 3 }
   0x5   : > { %s528_s15 = smov (%p27_p1, %s25_s15), 0  ;;  %p159_p3 = pnand %p396_p0, %p158_p2 }
   0x6   : > { %p191_p4 = scmp.lt.s32.totalorder (!%p159_p3), %s450_s12, 1 }
   0x7   : > { %162 = sbr.rel (%p159_p3) target bundleno = 220 (0xdc), region = 32 }
   0xc   : > { %v460_v0 = vmov 0.0   ;;  %v212_v1 = vld [vmem:[%s523_s2] sm:$0xf]  ;;  %s530_s12 = smov (!%p191_p4, %s450_s12), 1  ;;  %v461_v2 = vmov 0   ;;  %vm224_vm0 = vcmask 1043456  }
   0xd   : > { %293 = vmatprep.mubr.f32.mxu0 %v460_v0  ;;  %434 = vset.pattern.permute.xlu0 %v461_v2  ;;  %s406_s18 = sshll.u32 %s530_s12, 3  ;;  %v210_v5 = vld [vmem:[%s522_s1] sm:$0xf]  ;;  %vm220_vm1 = vcmask 31744  }
   0xe   : > { %215 = vperm.xlu0 %434, %v212_v1   ;;  %s198_s21 = scalar_lea.vmem %s521_s0, %s406_s18  ;;  %s208_s26 = scalar_lea.vmem %s524_s3, %s406_s18 }
   0xf   : > { %v211_v3 = vld [vmem:[%s198_s21] sm:$0xff] }
  0x10   : > { %v219_v4 = vcombine.high %v211_v3, %v211_v3 }
  0x12   : > { %401 = vmatprep.subr.msk.mxu0 %vm224_vm0, %v219_v4 }
  0x13   : > { %402 = vmatpush1.msk.msra.mxu0 %vm224_vm0, %v211_v3 }
  0x14   : > { %403 = vmatmul.mubr.msk.f32.vlgmr.msra.gmra.mxu0 %vm220_vm1, %v210_v5 }
  0x89   : > { %v216_v6 = vpop.permute.xlu0 %215 }
  0xd4   : > { %v295_v7 = vpop.f32.mrf.mxu0 }
  0xd5   : > { %v296_v9 = vadd.f32 %v295_v7, %v216_v6 }
  0xd6   : > { %v297_v8 = vpop.f32.mrf.mxu0 }
  0xd7   : > { %v298_v10 = vadd.f32 %v297_v8, %v216_v6 }
  0xd9   : > { %v302_v11 = vcombine.low %v296_v9, %v298_v10 }
  0xdb   : > { %304 = vst [vmem:[%s208_s26] sm:$0xff] %v302_v11 }
  0xdc PF: > { %s13_s14 = sadd.s32 1, %s458_s14   ;;  %s525_s12 = smov %s454_s13 }
  0xdd   : > { %p10_p5 = scmp.ge.s32.totalorder %s13_s14, 4   ;;  %s526_s13 = smov %s528_s15 }
  0xdf   :  { %12 = sbr.rel (!%p10_p5) target bundleno = 2 (0x2), region = 62 }

// kernel: next_attention_z.7
= control target key start
LH: loop header
LB: loop body
LE: loop exit
PB: predicated region body
PF: predicated region fallthrough
CT: control target
= control target key end

     0   :  { %s4762_s17 = smov 0   ;;  %s5833_s0 = inlined_call_operand.<no memory space> [shape: f32[1], index: 0, kind: input, shape index: {}]   ;;  %s5834_s1 = inlined_call_operand.vmem [shape: f32[32,16,4], index: 1, kind: input, shape index: {}]   ;;  %s5835_s2 = inlined_call_operand.vmem [shape: f32[32,16,4], index: 2, kind: input, shape index: {}]   ;;  %s5836_s3 = inlined_call_operand.vmem [shape: f32[32,16,4], index: 3, kind: input, shape index: {}]   ;;  %s5837_s4 = inlined_call_operand.vmem [shape: f32[32,16,4], index: 4, kind: output, shape index: {}]  }
   0x1   :  { %9 = sst [smem:[#allocation2]] %s5833_s0 }
   0x2 LB: > { %s3991_s18 = sadd.s32 4294967295, %s4732_s17   ;;  %p3995_p0 = scmp.ge.s32.totalorder %s4732_s17, 1  ;;  %s4732_s17 = sphi %s4762_s17, %s15_s17  }
   0x3   : > { %p189_p1 = scmp.lt.s32.totalorder %s4732_s17, 3 }
   0x5   : > { %p190_p2 = pnand %p3995_p0, %p189_p1 }
   0x7   : > { %193 = sbr.rel (%p190_p2) target bundleno = 1012 (0x3f4), region = 36 }
   0xc   : > { %s3996_s19 = sshll.u32 %s3991_s18, 4  ;;  %vm386_vm0 = vcmask 31744   ;;  %s257_s26 = sld [smem:[#allocation2]]  ;;  %vm2228_vm1 = vcmask 130048  }
   0xd   : > { %p230_p3 = scmp.lt.s32.totalorder %s3996_s19, 31 }
   0xf   : > { %s5887_s19 = smov (!%p230_p3, %s3996_s19), 31 }
  0x10   : > { %s4770_s20 = sshll.u32 %s5887_s19, 4 }
  0x11   : > { %s4776_s22 = scalar_lea.vmem %s5835_s2, %s4770_s20  ;;  %s4782_s25 = scalar_lea.vmem %s5834_s1, %s4770_s20 }
  0x12   : > { %v4785_v0 = vld [vmem:[%s4776_s22 + $0x8] sm:$0xff]  ;;  %v4788_v1 = vld [vmem:[%s4776_s22] sm:$0xff]  ;;  %v4791_v2 = vld [vmem:[%s4776_s22 + $0x18] sm:$0xff]  ;;  %s5538_s29 = scalar_lea.vmem %s5836_s3, %s4770_s20  ;;  %s5764_s6 = scalar_lea.vmem %s5837_s4, %s4770_s20 }
  0x13   : > { %v580_v3 = vmul.f32 %v4785_v0, %v4785_v0  ;;  %v579_v4 = vmul.f32 %v4788_v1, %v4788_v1  ;;  %v582_v5 = vmul.f32 %v4791_v2, %v4791_v2  ;;  %v4800_v6 = vld [vmem:[%s4776_s22 + $0x10] sm:$0xff]  ;;  %v4808_v9 = vld [vmem:[%s4782_s25] sm:$0xff]  ;;  %v4819_v16 = vld [vmem:[%s4782_s25 + $0x18] sm:$0xff] }
  0x14   : > { %v581_v7 = vmul.f32 %v4800_v6, %v4800_v6  ;;  %v4805_v8 = vld [vmem:[%s4782_s25 + $0x10] sm:$0xff]  ;;  %v354_v15 = vmul.f32 %v4808_v9, %v4808_v9  ;;  %v4822_v17 = vld [vmem:[%s4782_s25 + $0x8] sm:$0xff]  ;;  %v357_v20 = vmul.f32 %v4819_v16, %v4819_v16  ;;  %v4831_v22 = vld [vmem:[%s4776_s22 + $0x38] sm:$0xff] }
  0x15   : > { %v614_v10 = vsel %vm386_vm0, %v580_v3, 0.0  ;;  %v611_v11 = vsel %vm386_vm0, %v579_v4, 0.0  ;;  %v620_v12 = vsel %vm386_vm0, %v582_v5, 0.0  ;;  %v356_v14 = vmul.f32 %v4805_v8, %v4805_v8  ;;  %v4834_v23 = vld [vmem:[%s4776_s22 + $0x28] sm:$0xff]  ;;  %v4843_v28 = vld [vmem:[%s4776_s22 + $0x30] sm:$0xff]  ;;  %v4846_v29 = vld [vmem:[%s4776_s22 + $0x20] sm:$0xff] }
  0x16   : > { %615 = vadd.xlane.f32.xlu0 %v614_v10  ;;  %612 = vadd.xlane.f32.xlu1 %v611_v11  ;;  %v617_v13 = vsel %vm386_vm0, %v581_v7, 0.0  ;;  %v387_v19 = vsel %vm386_vm0, %v354_v15, 0.0  ;;  %v355_v21 = vmul.f32 %v4822_v17, %v4822_v17  ;;  %v396_v24 = vsel %vm386_vm0, %v357_v20, 0.0  ;;  %v4855_v34 = vld [vmem:[%s4782_s25 + $0x30] sm:$0xff]  ;;  %v4858_v35 = vld [vmem:[%s4782_s25 + $0x20] sm:$0xff]  ;;  %v4867_v40 = vld [vmem:[%s4782_s25 + $0x38] sm:$0xff] }
  0x17   : > { %v393_v18 = vsel %vm386_vm0, %v356_v14, 0.0  ;;  %v586_v26 = vmul.f32 %v4831_v22, %v4831_v22  ;;  %v584_v27 = vmul.f32 %v4834_v23, %v4834_v23  ;;  %v585_v32 = vmul.f32 %v4843_v28, %v4843_v28  ;;  %v4870_v41 = vld [vmem:[%s4782_s25 + $0x28] sm:$0xff]  ;;  %v4879_v46 = vld [vmem:[%s4776_s22 + $0x58] sm:$0xff]  ;;  %v4891_v52 = vld [vmem:[%s4776_s22 + $0x50] sm:$0xff] }
  0x18   : > { %v390_v25 = vsel %vm386_vm0, %v355_v21, 0.0  ;;  %v583_v33 = vmul.f32 %v4846_v29, %v4846_v29  ;;  %v360_v38 = vmul.f32 %v4855_v34, %v4855_v34  ;;  %v358_v39 = vmul.f32 %v4858_v35, %v4858_v35  ;;  %v4882_v47 = vld [vmem:[%s4776_s22 + $0x48] sm:$0xff]  ;;  %v4894_v53 = vld [vmem:[%s4776_s22 + $0x40] sm:$0xff]  ;;  %v4903_v58 = vld [vmem:[%s4782_s25 + $0x50] sm:$0xff] }
  0x19   : > { %v632_v30 = vsel %vm386_vm0, %v586_v26, 0.0  ;;  %v626_v31 = vsel %vm386_vm0, %v584_v27, 0.0  ;;  %v629_v36 = vsel %vm386_vm0, %v585_v32, 0.0  ;;  %v361_v44 = vmul.f32 %v4867_v40, %v4867_v40  ;;  %v4906_v59 = vld [vmem:[%s4782_s25 + $0x40] sm:$0xff]  ;;  %v4915_v3 = vld [vmem:[%s4782_s25 + $0x58] sm:$0xff]  ;;  %v4918_v4 = vld [vmem:[%s4782_s25 + $0x48] sm:$0xff] }
  0x1a   : > { %621 = vadd.xlane.f32.xlu0 %v620_v12  ;;  %618 = vadd.xlane.f32.xlu1 %v617_v13  ;;  %v623_v37 = vsel %vm386_vm0, %v583_v33, 0.0  ;;  %v405_v42 = vsel %vm386_vm0, %v360_v38, 0.0  ;;  %v399_v43 = vsel %vm386_vm0, %v358_v39, 0.0  ;;  %v359_v45 = vmul.f32 %v4870_v41, %v4870_v41  ;;  %v4927_v12 = vld [vmem:[%s4776_s22 + $0x78] sm:$0xff]  ;;  %v4930_v13 = vld [vmem:[%s4776_s22 + $0x68] sm:$0xff]  ;;  %v4939_v20 = vld [vmem:[%s4776_s22 + $0x70] sm:$0xff] }
  0x1b   : > { %v408_v48 = vsel %vm386_vm0, %v361_v44, 0.0  ;;  %v590_v50 = vmul.f32 %v4879_v46, %v4879_v46  ;;  %v588_v51 = vmul.f32 %v4882_v47, %v4882_v47  ;;  %v589_v56 = vmul.f32 %v4891_v52, %v4891_v52  ;;  %v4942_v21 = vld [vmem:[%s4776_s22 + $0x60] sm:$0xff]  ;;  %v4963_v38 = vld [vmem:[%s4782_s25 + $0x78] sm:$0xff]  ;;  %v4966_v39 = vld [vmem:[%s4782_s25 + $0x68] sm:$0xff] }
  0x1c   : > { %v402_v49 = vsel %vm386_vm0, %v359_v45, 0.0  ;;  %v587_v57 = vmul.f32 %v4894_v53, %v4894_v53  ;;  %v364_v62 = vmul.f32 %v4903_v58, %v4903_v58  ;;  %v362_v63 = vmul.f32 %v4906_v59, %v4906_v59 }
  0x1d   : > { %v644_v54 = vsel %vm386_vm0, %v590_v50, 0.0  ;;  %v638_v55 = vsel %vm386_vm0, %v588_v51, 0.0  ;;  %v641_v60 = vsel %vm386_vm0, %v589_v56, 0.0  ;;  %v365_v10 = vmul.f32 %v4915_v3, %v4915_v3  ;;  %v4987_v56 = vld [vmem:[%s4776_s22 + $0x90] sm:$0xff] }
  0x1e   : > { %394 = vadd.xlane.f32.xlu1 %v393_v18  ;;  %388 = vadd.xlane.f32.xlu0 %v387_v19  ;;  %v635_v61 = vsel %vm386_vm0, %v587_v57, 0.0  ;;  %v417_v5 = vsel %vm386_vm0, %v364_v62, 0.0  ;;  %v411_v7 = vsel %vm386_vm0, %v362_v63, 0.0  ;;  %v363_v11 = vmul.f32 %v4918_v4, %v4918_v4  ;;  %v4990_v57 = vld [vmem:[%s4776_s22 + $0x80] sm:$0xff] }
  0x1f   : > { %v420_v14 = vsel %vm386_vm0, %v365_v10, 0.0  ;;  %v594_v18 = vmul.f32 %v4927_v12, %v4927_v12  ;;  %v592_v19 = vmul.f32 %v4930_v13, %v4930_v13  ;;  %v593_v26 = vmul.f32 %v4939_v20, %v4939_v20 }
  0x20   : > { %v414_v15 = vsel %vm386_vm0, %v363_v11, 0.0  ;;  %v591_v27 = vmul.f32 %v4942_v21, %v4942_v21  ;;  %v369_v44 = vmul.f32 %v4963_v38, %v4963_v38  ;;  %v367_v45 = vmul.f32 %v4966_v39, %v4966_v39 }
  0x21   : > { %v653_v32 = vsel %vm386_vm0, %v593_v26, 0.0  ;;  %v597_v62 = vmul.f32 %v4987_v56, %v4987_v56  ;;  %v595_v63 = vmul.f32 %v4990_v57, %v4990_v57 }
  0x22   : > { %397 = vadd.xlane.f32.xlu1 %v396_v24  ;;  %391 = vadd.xlane.f32.xlu0 %v390_v25  ;;  %v656_v24 = vsel %vm386_vm0, %v594_v18, 0.0  ;;  %v650_v25 = vsel %vm386_vm0, %v592_v19, 0.0  ;;  %v647_v33 = vsel %vm386_vm0, %v591_v27, 0.0  ;;  %v432_v50 = vsel %vm386_vm0, %v369_v44, 0.0  ;;  %v5011_v18 = vld [vmem:[%s4782_s25 + $0x98] sm:$0xff]  ;;  %v5014_v19 = vld [vmem:[%s4782_s25 + $0x88] sm:$0xff] }
  0x23   : > { %v426_v51 = vsel %vm386_vm0, %v367_v45, 0.0  ;;  %v665_v10 = vsel %vm386_vm0, %v597_v62, 0.0  ;;  %v659_v11 = vsel %vm386_vm0, %v595_v63, 0.0  ;;  %v373_v26 = vmul.f32 %v5011_v18, %v5011_v18  ;;  %v5035_v44 = vld [vmem:[%s4776_s22 + $0xb0] sm:$0xff]  ;;  %v5038_v45 = vld [vmem:[%s4776_s22 + $0xa0] sm:$0xff] }
  0x24   : > { %v371_v27 = vmul.f32 %v5014_v19, %v5014_v19 }
  0x26   : > { %633 = vadd.xlane.f32.xlu1 %v632_v30  ;;  %627 = vadd.xlane.f32.xlu0 %v626_v31  ;;  %v4951_v30 = vld [vmem:[%s4782_s25 + $0x70] sm:$0xff]  ;;  %v4954_v31 = vld [vmem:[%s4782_s25 + $0x60] sm:$0xff] }
  0x2a   : > { %630 = vadd.xlane.f32.xlu1 %v629_v36  ;;  %624 = vadd.xlane.f32.xlu0 %v623_v37  ;;  %v368_v36 = vmul.f32 %v4951_v30, %v4951_v30  ;;  %v366_v37 = vmul.f32 %v4954_v31, %v4954_v31 }
  0x2e   : > { %406 = vadd.xlane.f32.xlu1 %v405_v42  ;;  %400 = vadd.xlane.f32.xlu0 %v399_v43  ;;  %v429_v42 = vsel %vm386_vm0, %v368_v36, 0.0  ;;  %v423_v43 = vsel %vm386_vm0, %v366_v37, 0.0  ;;  %v444_v36 = vsel %vm386_vm0, %v373_v26, 0.0  ;;  %v438_v37 = vsel %vm386_vm0, %v371_v27, 0.0 }
  0x32   : > { %409 = vadd.xlane.f32.xlu1 %v408_v48  ;;  %403 = vadd.xlane.f32.xlu0 %v402_v49  ;;  %v4975_v48 = vld [vmem:[%s4776_s22 + $0x98] sm:$0xff]  ;;  %v4978_v49 = vld [vmem:[%s4776_s22 + $0x88] sm:$0xff] }
  0x36   : > { %645 = vadd.xlane.f32.xlu1 %v644_v54  ;;  %639 = vadd.xlane.f32.xlu0 %v638_v55  ;;  %v598_v54 = vmul.f32 %v4975_v48, %v4975_v48  ;;  %v596_v55 = vmul.f32 %v4978_v49, %v4978_v49 }
  0x3a   : > { %642 = vadd.xlane.f32.xlu1 %v641_v60  ;;  %636 = vadd.xlane.f32.xlu0 %v635_v61  ;;  %v668_v60 = vsel %vm386_vm0, %v598_v54, 0.0  ;;  %v662_v61 = vsel %vm386_vm0, %v596_v55, 0.0  ;;  %v601_v54 = vmul.f32 %v5035_v44, %v5035_v44  ;;  %v599_v55 = vmul.f32 %v5038_v45, %v5038_v45 }
  0x3c   : > { %v677_v62 = vsel %vm386_vm0, %v601_v54, 0.0  ;;  %v671_v63 = vsel %vm386_vm0, %v599_v55, 0.0  ;;  %v5083_v54 = vld [vmem:[%s4776_s22 + $0xd0] sm:$0xff]  ;;  %v5086_v55 = vld [vmem:[%s4776_s22 + $0xc0] sm:$0xff] }
  0x3d   : > { %5856 = vst [vmem:[#allocation5_spill] sm:$0xff] %v5083_v54  ;;  %5857 = vst [vmem:[#allocation6_spill] sm:$0xff] %v5086_v55 }
  0x3e   : > { %418 = vadd.xlane.f32.xlu1 %v417_v5  ;;  %412 = vadd.xlane.f32.xlu0 %v411_v7  ;;  %v4999_v5 = vld [vmem:[%s4782_s25 + $0x90] sm:$0xff]  ;;  %v5002_v7 = vld [vmem:[%s4782_s25 + $0x80] sm:$0xff] }
  0x42   : > { %421 = vadd.xlane.f32.xlu1 %v420_v14  ;;  %415 = vadd.xlane.f32.xlu0 %v414_v15  ;;  %v372_v14 = vmul.f32 %v4999_v5, %v4999_v5  ;;  %v370_v15 = vmul.f32 %v5002_v7, %v5002_v7 }
  0x46   : > { %657 = vadd.xlane.f32.xlu1 %v656_v24  ;;  %651 = vadd.xlane.f32.xlu0 %v650_v25  ;;  %v441_v24 = vsel %vm386_vm0, %v372_v14, 0.0  ;;  %v435_v25 = vsel %vm386_vm0, %v370_v15, 0.0  ;;  %v5059_v14 = vld [vmem:[%s4782_s25 + $0xb8] sm:$0xff]  ;;  %v5062_v15 = vld [vmem:[%s4782_s25 + $0xa8] sm:$0xff] }
  0x47   : > { %v377_v26 = vmul.f32 %v5059_v14, %v5059_v14  ;;  %v375_v27 = vmul.f32 %v5062_v15, %v5062_v15 }
  0x4a   : > { %654 = vadd.xlane.f32.xlu1 %v653_v32  ;;  %648 = vadd.xlane.f32.xlu0 %v647_v33  ;;  %v5023_v32 = vld [vmem:[%s4776_s22 + $0xb8] sm:$0xff]  ;;  %v5026_v33 = vld [vmem:[%s4776_s22 + $0xa8] sm:$0xff] }
  0x4e   : > { %430 = vadd.xlane.f32.xlu1 %v429_v42  ;;  %424 = vadd.xlane.f32.xlu0 %v423_v43  ;;  %v602_v42 = vmul.f32 %v5023_v32, %v5023_v32  ;;  %v600_v43 = vmul.f32 %v5026_v33, %v5026_v33 }
  0x52   : > { %433 = vadd.xlane.f32.xlu1 %v432_v50  ;;  %427 = vadd.xlane.f32.xlu0 %v426_v51  ;;  %v680_v50 = vsel %vm386_vm0, %v602_v42, 0.0  ;;  %v674_v51 = vsel %vm386_vm0, %v600_v43, 0.0  ;;  %v456_v42 = vsel %vm386_vm0, %v377_v26, 0.0  ;;  %v450_v43 = vsel %vm386_vm0, %v375_v27, 0.0 }
  0x56   : > { %669 = vadd.xlane.f32.xlu1 %v668_v60  ;;  %663 = vadd.xlane.f32.xlu0 %v662_v61  ;;  %v5047_v60 = vld [vmem:[%s4782_s25 + $0xb0] sm:$0xff]  ;;  %v5050_v61 = vld [vmem:[%s4782_s25 + $0xa0] sm:$0xff] }
  0x5a   : > { %666 = vadd.xlane.f32.xlu1 %v665_v10  ;;  %660 = vadd.xlane.f32.xlu0 %v659_v11  ;;  %v376_v10 = vmul.f32 %v5047_v60, %v5047_v60  ;;  %v374_v11 = vmul.f32 %v5050_v61, %v5050_v61 }
  0x5e   : > { %442 = vadd.xlane.f32.xlu1 %v441_v24  ;;  %436 = vadd.xlane.f32.xlu0 %v435_v25  ;;  %v453_v24 = vsel %vm386_vm0, %v376_v10, 0.0  ;;  %v447_v25 = vsel %vm386_vm0, %v374_v11, 0.0  ;;  %v605_v10 = vmul.f32 %v5083_v54, %v5083_v54  ;;  %v603_v11 = vmul.f32 %v5086_v55, %v5086_v55 }
  0x60   : > { %v689_v26 = vsel %vm386_vm0, %v605_v10, 0.0  ;;  %v683_v27 = vsel %vm386_vm0, %v603_v11, 0.0 }
  0x62   : > { %445 = vadd.xlane.f32.xlu1 %v444_v36  ;;  %439 = vadd.xlane.f32.xlu0 %v438_v37  ;;  %v5071_v36 = vld [vmem:[%s4776_s22 + $0xd8] sm:$0xff]  ;;  %v5074_v37 = vld [vmem:[%s4776_s22 + $0xc8] sm:$0xff] }
  0x63   : > { %5854 = vst [vmem:[#allocation3_spill] sm:$0xff] %v5071_v36  ;;  %5855 = vst [vmem:[#allocation4_spill] sm:$0xff] %v5074_v37 }
  0x66   : > { %681 = vadd.xlane.f32.xlu1 %v680_v50  ;;  %675 = vadd.xlane.f32.xlu0 %v674_v51  ;;  %v606_v50 = vmul.f32 %v5071_v36, %v5071_v36  ;;  %v604_v51 = vmul.f32 %v5074_v37, %v5074_v37 }
  0x6a   : > { %678 = vadd.xlane.f32.xlu1 %v677_v62  ;;  %672 = vadd.xlane.f32.xlu0 %v671_v63  ;;  %v692_v62 = vsel %vm386_vm0, %v606_v50, 0.0  ;;  %v686_v63 = vsel %vm386_vm0, %v604_v51, 0.0  ;;  %v5107_v50 = vld [vmem:[%s4782_s25 + $0xd8] sm:$0xff]  ;;  %v5110_v51 = vld [vmem:[%s4782_s25 + $0xc8] sm:$0xff] }
  0x6b   : > { %5860 = vst [vmem:[#allocation9_spill] sm:$0xff] %v5107_v50  ;;  %5861 = vst [vmem:[#allocation10_spill] sm:$0xff] %v5110_v51  ;;  %v381_v10 = vmul.f32 %v5107_v50, %v5107_v50  ;;  %v379_v11 = vmul.f32 %v5110_v51, %v5110_v51  ;;  %v5131_v50 = vld [vmem:[%s4776_s22 + $0xf0] sm:$0xff]  ;;  %v5134_v51 = vld [vmem:[%s4776_s22 + $0xe0] sm:$0xff] }
  0x6c   : > { %5864 = vst [vmem:[#allocation13_spill] sm:$0xff] %v5131_v50  ;;  %5865 = vst [vmem:[#allocation14_spill] sm:$0xff] %v5134_v51 }
  0x6e   : > { %454 = vadd.xlane.f32.xlu1 %v453_v24  ;;  %448 = vadd.xlane.f32.xlu0 %v447_v25  ;;  %v5095_v24 = vld [vmem:[%s4782_s25 + $0xd0] sm:$0xff]  ;;  %v5098_v25 = vld [vmem:[%s4782_s25 + $0xc0] sm:$0xff] }
  0x6f   : > { %5858 = vst [vmem:[#allocation7_spill] sm:$0xff] %v5095_v24  ;;  %5859 = vst [vmem:[#allocation8_spill] sm:$0xff] %v5098_v25 }
  0x72   : > { %457 = vadd.xlane.f32.xlu1 %v456_v42  ;;  %451 = vadd.xlane.f32.xlu0 %v450_v43  ;;  %v380_v42 = vmul.f32 %v5095_v24, %v5095_v24  ;;  %v378_v43 = vmul.f32 %v5098_v25, %v5098_v25  ;;  %v5119_v24 = vld [vmem:[%s4776_s22 + $0xf8] sm:$0xff]  ;;  %v5122_v25 = vld [vmem:[%s4776_s22 + $0xe8] sm:$0xff] }
  0x73   : > { %5862 = vst [vmem:[#allocation11_spill] sm:$0xff] %v5119_v24  ;;  %5863 = vst [vmem:[#allocation12_spill] sm:$0xff] %v5122_v25 }
  0x76   : > { %693 = vadd.xlane.f32.xlu1 %v692_v62  ;;  %687 = vadd.xlane.f32.xlu0 %v686_v63  ;;  %v465_v62 = vsel %vm386_vm0, %v380_v42, 0.0  ;;  %v459_v63 = vsel %vm386_vm0, %v378_v43, 0.0  ;;  %v610_v42 = vmul.f32 %v5119_v24, %v5119_v24  ;;  %v608_v43 = vmul.f32 %v5122_v25, %v5122_v25  ;;  %v5143_v24 = vld [vmem:[%s4782_s25 + $0xf0] sm:$0xff]  ;;  %v5146_v25 = vld [vmem:[%s4782_s25 + $0xe0] sm:$0xff] }
  0x77   : > { %5866 = vst [vmem:[#allocation15_spill] sm:$0xff] %v5143_v24  ;;  %5867 = vst [vmem:[#allocation16_spill] sm:$0xff] %v5146_v25 }
  0x7a   : > { %690 = vadd.xlane.f32.xlu1 %v689_v26  ;;  %684 = vadd.xlane.f32.xlu0 %v683_v27  ;;  %v468_v26 = vsel %vm386_vm0, %v381_v10, 0.0  ;;  %v462_v27 = vsel %vm386_vm0, %v379_v11, 0.0  ;;  %v609_v10 = vmul.f32 %v5131_v50, %v5131_v50  ;;  %v607_v11 = vmul.f32 %v5134_v51, %v5134_v51  ;;  %v5158_v50 = vld [vmem:[%s4782_s25 + $0xe8] sm:$0xff] }
  0x7b   : > { %5869 = vst [vmem:[#allocation18_spill] sm:$0xff] %v5158_v50 }
  0x7c   : > { %v701_v55 = vsel %vm386_vm0, %v609_v10, 0.0  ;;  %v383_v10 = vmul.f32 %v5158_v50, %v5158_v50 }
  0x7e   : > { %466 = vadd.xlane.f32.xlu1 %v465_v62  ;;  %460 = vadd.xlane.f32.xlu0 %v459_v63  ;;  %v704_v62 = vsel %vm386_vm0, %v610_v42, 0.0  ;;  %v698_v63 = vsel %vm386_vm0, %v608_v43, 0.0  ;;  %v382_v42 = vmul.f32 %v5146_v25, %v5146_v25  ;;  %v5155_v43 = vld [vmem:[%s4782_s25 + $0xf8] sm:$0xff]  ;;  %v474_v25 = vsel %vm386_vm0, %v383_v10, 0.0 }
  0x7f   : > { %5868 = vst [vmem:[#allocation17_spill] sm:$0xff] %v5155_v43 }
  0x82   : > { %469 = vadd.xlane.f32.xlu1 %v468_v26  ;;  %463 = vadd.xlane.f32.xlu0 %v462_v27  ;;  %v695_v26 = vsel %vm386_vm0, %v607_v11, 0.0  ;;  %v384_v27 = vmul.f32 %v5143_v24, %v5143_v24 }
  0x84   : > { %v477_v51 = vsel %vm386_vm0, %v384_v27, 0.0 }
  0x86   : > { %705 = vadd.xlane.f32.xlu1 %v704_v62  ;;  %699 = vadd.xlane.f32.xlu0 %v698_v63  ;;  %v471_v62 = vsel %vm386_vm0, %v382_v42, 0.0  ;;  %v385_v63 = vmul.f32 %v5155_v43, %v5155_v43 }
  0x88   : > { %v480_v11 = vsel %vm386_vm0, %v385_v63, 0.0 }
  0x8a   : > { %702 = vadd.xlane.f32.xlu1 %v701_v55  ;;  %696 = vadd.xlane.f32.xlu0 %v695_v26 }
  0x8e   : > { %478 = vadd.xlane.f32.xlu1 %v477_v51  ;;  %472 = vadd.xlane.f32.xlu0 %v471_v62 }
  0x92   : > { %481 = vadd.xlane.f32.xlu1 %v480_v11  ;;  %475 = vadd.xlane.f32.xlu0 %v474_v25 }
  0x9f   : > { %v616_v55 = vpop.xlane.xlu0 %615  ;;  %v613_v26 = vpop.xlane.xlu1 %612 }
  0xa0   : > { %v708_v24 = vmax.f32 %v616_v55, 1e-24  ;;  %v707_v27 = vmax.f32 %v613_v26, 1e-24 }
  0xa2   : > { %4470 = vrsqrt.f32 %v708_v24 }
  0xa3   : > { %4472 = vrsqrt.f32 %v707_v27  ;;  %v622_v42 = vpop.xlane.xlu0 %621  ;;  %v619_v54 = vpop.xlane.xlu1 %618 }
  0xa4   : > { %v710_v43 = vmax.f32 %v622_v42, 1e-24  ;;  %v709_v37 = vmax.f32 %v619_v54, 1e-24 }
  0xa6   : > { %4474 = vrsqrt.f32 %v710_v43 }
  0xa7   : > { %4476 = vrsqrt.f32 %v709_v37  ;;  %v395_v51 = vpop.xlane.xlu1 %394  ;;  %v389_v62 = vpop.xlane.xlu0 %388 }
  0xa8   : > { %v485_v50 = vmax.f32 %v395_v51, 1e-24  ;;  %v483_v63 = vmax.f32 %v389_v62, 1e-24 }
  0xaa   : > { %4478 = vrsqrt.f32 %v485_v50 }
  0xab   : > { %4480 = vrsqrt.f32 %v483_v63  ;;  %v398_v10 = vpop.xlane.xlu1 %397  ;;  %v392_v25 = vpop.xlane.xlu0 %391 }
  0xac   : > { %v486_v11 = vmax.f32 %v398_v10, 1e-24  ;;  %v484_v36 = vmax.f32 %v392_v25, 1e-24 }
  0xae   : > { %4482 = vrsqrt.f32 %v486_v11 }
  0xaf   : > { %v4471_v55 = vpop.eup %4470  ;;  %4484 = vrsqrt.f32 %v484_v36  ;;  %v634_v24 = vpop.xlane.xlu1 %633 }
  0xb0   : > { %v628_v26 = vpop.xlane.xlu0 %627  ;;  %v4473_v27 = vpop.eup %4472  ;;  %v714_v54 = vmax.f32 %v634_v24, 1e-24  ;;  %v772_v37 = vmul.f32 %v4471_v55, %v4785_v0  ;;  %v5178_v24 = vstv %s257_s26 }
  0xb1   : > { %v712_v43 = vmax.f32 %v628_v26, 1e-24  ;;  %v771_v50 = vmul.f32 %v4473_v27, %v4788_v1 }
  0xb2   : > { %4486 = vrsqrt.f32 %v714_v54  ;;  %4238 = vmatprep.subr.msk.mxu0 %vm386_vm0, %v772_v37 }
  0xb3   : > { %v4475_v42 = vpop.eup %4474  ;;  %4488 = vrsqrt.f32 %v712_v43  ;;  %4239 = vmatpush3.xpose.msk.msra.mxu0 %vm386_vm0, %v772_v37  ;;  %v631_v51 = vpop.xlane.xlu1 %630 }
  0xb4   : > { %v625_v62 = vpop.xlane.xlu0 %624  ;;  %v4477_v36 = vpop.eup %4476  ;;  %v713_v63 = vmax.f32 %v631_v51, 1e-24  ;;  %4240 = vmatprep.subr.msk.mxu0 %vm386_vm0, %v771_v50  ;;  %v774_v25 = vmul.f32 %v4475_v42, %v4791_v2 }
  0xb5   : > { %v711_v10 = vmax.f32 %v625_v62, 1e-24  ;;  %v773_v0 = vmul.f32 %v4477_v36, %v4800_v6 }
  0xb6   : > { %4490 = vrsqrt.f32 %v713_v63  ;;  %4245 = vmatprep.subr.msk.mxu1 %vm386_vm0, %v774_v25 }
  0xb7   : > { %v4479_v11 = vpop.eup %4478  ;;  %4492 = vrsqrt.f32 %v711_v10  ;;  %4241 = vmatpush3.xpose.msk.msra.mxu0 %vm386_vm0, %v771_v50  ;;  %4246 = vmatpush3.xpose.msk.msra.mxu1 %vm386_vm0, %v774_v25  ;;  %v407_v1 = vpop.xlane.xlu1 %406 }
  0xb8   : > { %v401_v55 = vpop.xlane.xlu0 %400  ;;  %v4481_v26 = vpop.eup %4480  ;;  %v489_v27 = vmax.f32 %v407_v1, 1e-24  ;;  %4247 = vmatprep.subr.msk.mxu1 %vm386_vm0, %v773_v0  ;;  %v549_v2 = vmul.f32 %v4479_v11, %v4805_v8 }
  0xb9   : > { %v487_v54 = vmax.f32 %v401_v55, 1e-24  ;;  %v547_v43 = vmul.f32 %v4481_v26, %v4808_v9 }
  0xba   : > { %4494 = vrsqrt.f32 %v489_v27  ;;  %v806_v6 = vmul.f32 %v5178_v24, %v549_v2 }
  0xbb   : > { %v4483_v37 = vpop.eup %4482  ;;  %4496 = vrsqrt.f32 %v487_v54  ;;  %4248 = vmatpush3.xpose.msk.msra.mxu1 %vm386_vm0, %v773_v0  ;;  %v410_v50 = vpop.xlane.xlu1 %409  ;;  %v804_v51 = vmul.f32 %v5178_v24, %v547_v43 }
  0xbc   : > { %v404_v42 = vpop.xlane.xlu0 %403  ;;  %v4485_v62 = vpop.eup %4484  ;;  %v490_v36 = vmax.f32 %v410_v50, 1e-24  ;;  %4249 = vmatprep.mubr.msk.f32.mxu1 %vm386_vm0, %v806_v6  ;;  %v550_v8 = vmul.f32 %v4483_v37, %v4819_v16 }
  0xbd   : > { %v488_v63 = vmax.f32 %v404_v42, 1e-24  ;;  %4242 = vmatprep.mubr.msk.f32.mxu0 %vm386_vm0, %v804_v51  ;;  %v548_v9 = vmul.f32 %v4485_v62, %v4822_v17 }
  0xbe   : > { %4498 = vrsqrt.f32 %v490_v36  ;;  %v807_v10 = vmul.f32 %v5178_v24, %v550_v8 }
  0xbf   : > { %v4487_v25 = vpop.eup %4486  ;;  %4500 = vrsqrt.f32 %v488_v63  ;;  %v646_v0 = vpop.xlane.xlu1 %645  ;;  %v805_v1 = vmul.f32 %v5178_v24, %v548_v9 }
  0xc0   : > { %v640_v11 = vpop.xlane.xlu0 %639  ;;  %v4489_v55 = vpop.eup %4488  ;;  %v718_v26 = vmax.f32 %v646_v0, 1e-24  ;;  %4250 = vmatmul.mubr.msk.f32.vlgmr.msra.gmra.mxu1 %vm386_vm0, %v807_v10  ;;  %v778_v16 = vmul.f32 %v4487_v25, %v4831_v22 }
  0xc1   : > { %v716_v27 = vmax.f32 %v640_v11, 1e-24  ;;  %4243 = vmatmul.mubr.msk.f32.vlgmr.msra.gmra.mxu0 %vm386_vm0, %v805_v1  ;;  %v776_v17 = vmul.f32 %v4489_v55, %v4834_v23 }
  0xc2   : > { %4502 = vrsqrt.f32 %v718_v26  ;;  %4259 = vmatprep.subr.msk.mxu1 %vm386_vm0, %v778_v16 }
  0xc3   : > { %v4491_v54 = vpop.eup %4490  ;;  %4504 = vrsqrt.f32 %v716_v27  ;;  %4252 = vmatprep.subr.msk.mxu0 %vm386_vm0, %v776_v17  ;;  %4260 = vmatpush3.xpose.msk.msra.mxu1 %vm386_vm0, %v778_v16  ;;  %v643_v2 = vpop.xlane.xlu1 %642 }
  0xc4   : > { %v637_v43 = vpop.xlane.xlu0 %636  ;;  %v4493_v6 = vpop.eup %4492  ;;  %v717_v37 = vmax.f32 %v643_v2, 1e-24  ;;  %4253 = vmatpush3.xpose.msk.msra.mxu0 %vm386_vm0, %v776_v17  ;;  %v777_v50 = vmul.f32 %v4491_v54, %v4843_v28 }
  0xc5   : > { %v715_v22 = vmax.f32 %v637_v43, 1e-24  ;;  %v775_v23 = vmul.f32 %v4493_v6, %v4846_v29 }
  0xc6   : > { %4506 = vrsqrt.f32 %v717_v37  ;;  %4261 = vmatprep.subr.msk.mxu1 %vm386_vm0, %v777_v50 }
  0xc7   : > { %v4495_v42 = vpop.eup %4494  ;;  %4508 = vrsqrt.f32 %v715_v22  ;;  %4254 = vmatprep.subr.msk.mxu0 %vm386_vm0, %v775_v23  ;;  %4262 = vmatpush3.xpose.msk.msra.mxu1 %vm386_vm0, %v777_v50  ;;  %v419_v51 = vpop.xlane.xlu1 %418 }
  0xc8   : > { %v413_v62 = vpop.xlane.xlu0 %412  ;;  %v4497_v36 = vpop.eup %4496  ;;  %v493_v63 = vmax.f32 %v419_v51, 1e-24  ;;  %4255 = vmatpush3.xpose.msk.msra.mxu0 %vm386_vm0, %v775_v23  ;;  %v553_v28 = vmul.f32 %v4495_v42, %v4855_v34 }
  0xc9   : > { %v491_v8 = vmax.f32 %v413_v62, 1e-24  ;;  %v551_v29 = vmul.f32 %v4497_v36, %v4858_v35 }
  0xca   : > { %4510 = vrsqrt.f32 %v493_v63  ;;  %v810_v9 = vmul.f32 %v5178_v24, %v553_v28 }
  0xcb   : > { %v4499_v10 = vpop.eup %4498  ;;  %4512 = vrsqrt.f32 %v491_v8  ;;  %v422_v25 = vpop.xlane.xlu1 %421  ;;  %v808_v11 = vmul.f32 %v5178_v24, %v551_v29 }
  0xcc   : > { %v416_v0 = vpop.xlane.xlu0 %415  ;;  %v4501_v1 = vpop.eup %4500  ;;  %v494_v55 = vmax.f32 %v422_v25, 1e-24  ;;  %4263 = vmatprep.mubr.msk.f32.mxu1 %vm386_vm0, %v810_v9  ;;  %v554_v27 = vmul.f32 %v4499_v10, %v4867_v40 }
  0xcd   : > { %v492_v26 = vmax.f32 %v416_v0, 1e-24  ;;  %4256 = vmatprep.mubr.msk.f32.mxu0 %vm386_vm0, %v808_v11  ;;  %v552_v34 = vmul.f32 %v4501_v1, %v4870_v41 }
  0xce   : > { %4514 = vrsqrt.f32 %v494_v55  ;;  %v811_v35 = vmul.f32 %v5178_v24, %v554_v27 }
  0xcf   : > { %v4503_v16 = vpop.eup %4502  ;;  %4516 = vrsqrt.f32 %v492_v26  ;;  %v658_v17 = vpop.xlane.xlu1 %657  ;;  %v809_v2 = vmul.f32 %v5178_v24, %v552_v34 }
  0xd0   : > { %v652_v54 = vpop.xlane.xlu0 %651  ;;  %v4505_v43 = vpop.eup %4504  ;;  %v722_v6 = vmax.f32 %v658_v17, 1e-24  ;;  %4264 = vmatmul.mubr.msk.f32.vlgmr.msra.gmra.mxu1 %vm386_vm0, %v811_v35  ;;  %v782_v40 = vmul.f32 %v4503_v16, %v4879_v46 }
  0xd1   : > { %v720_v37 = vmax.f32 %v652_v54, 1e-24  ;;  %4257 = vmatmul.mubr.msk.f32.vlgmr.msra.gmra.mxu0 %vm386_vm0, %v809_v2  ;;  %v780_v41 = vmul.f32 %v4505_v43, %v4882_v47 }
  0xd2   : > { %4518 = vrsqrt.f32 %v722_v6  ;;  %4273 = vmatprep.subr.msk.mxu1 %vm386_vm0, %v782_v40 }
  0xd3   : > { %v4507_v22 = vpop.eup %4506  ;;  %4520 = vrsqrt.f32 %v720_v37  ;;  %4266 = vmatprep.subr.msk.mxu0 %vm386_vm0, %v780_v41  ;;  %4274 = vmatpush3.xpose.msk.msra.mxu1 %vm386_vm0, %v782_v40  ;;  %v655_v50 = vpop.xlane.xlu1 %654 }
  0xd4   : > { %v649_v23 = vpop.xlane.xlu0 %648  ;;  %v4509_v42 = vpop.eup %4508  ;;  %v721_v51 = vmax.f32 %v655_v50, 1e-24  ;;  %4267 = vmatpush3.xpose.msk.msra.mxu0 %vm386_vm0, %v780_v41  ;;  %v781_v62 = vmul.f32 %v4507_v22, %v4891_v52 }
  0xd5   : > { %v719_v46 = vmax.f32 %v649_v23, 1e-24  ;;  %v779_v47 = vmul.f32 %v4509_v42, %v4894_v53 }
  0xd6   : > { %4522 = vrsqrt.f32 %v721_v51  ;;  %4275 = vmatprep.subr.msk.mxu1 %vm386_vm0, %v781_v62 }
  0xd7   : > { %v4511_v36 = vpop.eup %4510  ;;  %4524 = vrsqrt.f32 %v719_v46  ;;  %4268 = vmatprep.subr.msk.mxu0 %vm386_vm0, %v779_v47  ;;  %4276 = vmatpush3.xpose.msk.msra.mxu1 %vm386_vm0, %v781_v62  ;;  %v431_v63 = vpop.xlane.xlu1 %430 }
  0xd8   : > { %v425_v8 = vpop.xlane.xlu0 %424  ;;  %v4513_v28 = vpop.eup %4512  ;;  %v497_v29 = vmax.f32 %v431_v63, 1e-24  ;;  %4269 = vmatpush3.xpose.msk.msra.mxu0 %vm386_vm0, %v779_v47  ;;  %v557_v52 = vmul.f32 %v4511_v36, %v4903_v58 }
  0xd9   : > { %v495_v9 = vmax.f32 %v425_v8, 1e-24  ;;  %v555_v53 = vmul.f32 %v4513_v28, %v4906_v59 }
  0xda   : > { %4526 = vrsqrt.f32 %v497_v29  ;;  %v814_v10 = vmul.f32 %v5178_v24, %v557_v52 }
  0xdb   : > { %v4515_v25 = vpop.eup %4514  ;;  %4528 = vrsqrt.f32 %v495_v9  ;;  %v434_v0 = vpop.xlane.xlu1 %433  ;;  %v812_v1 = vmul.f32 %v5178_v24, %v555_v53 }
  0xdc   : > { %v428_v11 = vpop.xlane.xlu0 %427  ;;  %v4517_v55 = vpop.eup %4516  ;;  %v498_v26 = vmax.f32 %v434_v0, 1e-24  ;;  %4277 = vmatprep.mubr.msk.f32.mxu1 %vm386_vm0, %v814_v10  ;;  %v558_v34 = vmul.f32 %v4515_v25, %v4915_v3 }
  0xdd   : > { %v496_v27 = vmax.f32 %v428_v11, 1e-24  ;;  %4270 = vmatprep.mubr.msk.f32.mxu0 %vm386_vm0, %v812_v1  ;;  %v556_v58 = vmul.f32 %v4517_v55, %v4918_v4 }
  0xde   : > { %4530 = vrsqrt.f32 %v498_v26  ;;  %v815_v59 = vmul.f32 %v5178_v24, %v558_v34 }
  0xdf   : > { %v4519_v35 = vpop.eup %4518  ;;  %4532 = vrsqrt.f32 %v496_v27  ;;  %v670_v16 = vpop.xlane.xlu1 %669  ;;  %v813_v54 = vmul.f32 %v5178_v24, %v556_v58 }
  0xe0   : > { %v664_v17 = vpop.xlane.xlu0 %663  ;;  %v4521_v2 = vpop.eup %4520  ;;  %v726_v43 = vmax.f32 %v670_v16, 1e-24  ;;  %4278 = vmatmul.mubr.msk.f32.vlgmr.msra.gmra.mxu1 %vm386_vm0, %v815_v59  ;;  %v786_v3 = vmul.f32 %v4519_v35, %v4927_v12 }
  0xe1   : > { %v724_v6 = vmax.f32 %v664_v17, 1e-24  ;;  %4271 = vmatmul.mubr.msk.f32.vlgmr.msra.gmra.mxu0 %vm386_vm0, %v813_v54  ;;  %v784_v4 = vmul.f32 %v4521_v2, %v4930_v13 }
  0xe2   : > { %4534 = vrsqrt.f32 %v726_v43  ;;  %4287 = vmatprep.subr.msk.mxu1 %vm386_vm0, %v786_v3 }
  0xe3   : > { %v4523_v37 = vpop.eup %4522  ;;  %4536 = vrsqrt.f32 %v724_v6  ;;  %4280 = vmatprep.subr.msk.mxu0 %vm386_vm0, %v784_v4  ;;  %4288 = vmatpush3.xpose.msk.msra.mxu1 %vm386_vm0, %v786_v3  ;;  %v667_v40 = vpop.xlane.xlu1 %666 }
  0xe4   : > { %v661_v41 = vpop.xlane.xlu0 %660  ;;  %v4525_v22 = vpop.eup %4524  ;;  %v725_v50 = vmax.f32 %v667_v40, 1e-24  ;;  %4281 = vmatpush3.xpose.msk.msra.mxu0 %vm386_vm0, %v784_v4  ;;  %v785_v23 = vmul.f32 %v4523_v37, %v4939_v20 }
  0xe5   : > { %v723_v12 = vmax.f32 %v661_v41, 1e-24  ;;  %v783_v13 = vmul.f32 %v4525_v22, %v4942_v21 }
  0xe6   : > { %4538 = vrsqrt.f32 %v725_v50  ;;  %4289 = vmatprep.subr.msk.mxu1 %vm386_vm0, %v785_v23 }
  0xe7   : > { %v4527_v42 = vpop.eup %4526  ;;  %4540 = vrsqrt.f32 %v723_v12  ;;  %4282 = vmatprep.subr.msk.mxu0 %vm386_vm0, %v783_v13  ;;  %4290 = vmatpush3.xpose.msk.msra.mxu1 %vm386_vm0, %v785_v23  ;;  %v443_v51 = vpop.xlane.xlu1 %442 }
  0xe8   : > { %v437_v46 = vpop.xlane.xlu0 %436  ;;  %v4529_v62 = vpop.eup %4528  ;;  %v501_v47 = vmax.f32 %v443_v51, 1e-24  ;;  %4283 = vmatpush3.xpose.msk.msra.mxu0 %vm386_vm0, %v783_v13  ;;  %v561_v20 = vmul.f32 %v4527_v42, %v4951_v30 }
  0xe9   : > { %v499_v36 = vmax.f32 %v437_v46, 1e-24  ;;  %v559_v21 = vmul.f32 %v4529_v62, %v4954_v31 }
  0xea   : > { %4542 = vrsqrt.f32 %v501_v47  ;;  %v818_v63 = vmul.f32 %v5178_v24, %v561_v20 }
  0xeb   : > { %v4531_v8 = vpop.eup %4530  ;;  %4544 = vrsqrt.f32 %v499_v36  ;;  %v446_v28 = vpop.xlane.xlu1 %445  ;;  %v816_v9 = vmul.f32 %v5178_v24, %v559_v21 }
  0xec   : > { %v440_v29 = vpop.xlane.xlu0 %439  ;;  %v4533_v52 = vpop.eup %4532  ;;  %v502_v53 = vmax.f32 %v446_v28, 1e-24  ;;  %4291 = vmatprep.mubr.msk.f32.mxu1 %vm386_vm0, %v818_v63  ;;  %v562_v25 = vmul.f32 %v4531_v8, %v4963_v38 }
  0xed   : > { %v500_v10 = vmax.f32 %v440_v29, 1e-24  ;;  %4284 = vmatprep.mubr.msk.f32.mxu0 %vm386_vm0, %v816_v9  ;;  %v560_v30 = vmul.f32 %v4533_v52, %v4966_v39 }
  0xee   : > { %4546 = vrsqrt.f32 %v502_v53  ;;  %v819_v31 = vmul.f32 %v5178_v24, %v562_v25 }
  0xef   : > { %v4535_v0 = vpop.eup %4534  ;;  %4548 = vrsqrt.f32 %v500_v10  ;;  %v682_v11 = vpop.xlane.xlu1 %681  ;;  %v817_v55 = vmul.f32 %v5178_v24, %v560_v30 }
  0xf0   : > { %v676_v1 = vpop.xlane.xlu0 %675  ;;  %v4537_v26 = vpop.eup %4536  ;;  %v730_v27 = vmax.f32 %v682_v11, 1e-24  ;;  %4292 = vmatmul.mubr.msk.f32.vlgmr.msra.gmra.mxu1 %vm386_vm0, %v819_v31  ;;  %v790_v38 = vmul.f32 %v4535_v0, %v4975_v48 }
  0xf1   : > { %v728_v34 = vmax.f32 %v676_v1, 1e-24  ;;  %4285 = vmatmul.mubr.msk.f32.vlgmr.msra.gmra.mxu0 %vm386_vm0, %v817_v55  ;;  %v788_v39 = vmul.f32 %v4537_v26, %v4978_v49 }
  0xf2   : > { %4550 = vrsqrt.f32 %v730_v27  ;;  %4301 = vmatprep.subr.msk.mxu1 %vm386_vm0, %v790_v38 }
  0xf3   : > { %v4539_v58 = vpop.eup %4538  ;;  %4552 = vrsqrt.f32 %v728_v34  ;;  %4294 = vmatprep.subr.msk.mxu0 %vm386_vm0, %v788_v39  ;;  %4302 = vmatpush3.xpose.msk.msra.mxu1 %vm386_vm0, %v790_v38  ;;  %v679_v59 = vpop.xlane.xlu1 %678 }
  0xf4   : > { %v673_v35 = vpop.xlane.xlu0 %672  ;;  %v4541_v16 = vpop.eup %4540  ;;  %v729_v17 = vmax.f32 %v679_v59, 1e-24  ;;  %4295 = vmatpush3.xpose.msk.msra.mxu0 %vm386_vm0, %v788_v39  ;;  %v789_v54 = vmul.f32 %v4539_v58, %v4987_v56 }
  0xf5   : > { %v727_v48 = vmax.f32 %v673_v35, 1e-24  ;;  %v787_v49 = vmul.f32 %v4541_v16, %v4990_v57 }
  0xf6   : > { %4554 = vrsqrt.f32 %v729_v17  ;;  %4303 = vmatprep.subr.msk.mxu1 %vm386_vm0, %v789_v54 }
  0xf7   : > { %v4543_v2 = vpop.eup %4542  ;;  %4556 = vrsqrt.f32 %v727_v48  ;;  %4296 = vmatprep.subr.msk.mxu0 %vm386_vm0, %v787_v49  ;;  %4304 = vmatpush3.xpose.msk.msra.mxu1 %vm386_vm0, %v789_v54  ;;  %v455_v43 = vpop.xlane.xlu1 %454 }
  0xf8   : > { %v449_v6 = vpop.xlane.xlu0 %448  ;;  %v4545_v3 = vpop.eup %4544  ;;  %v505_v4 = vmax.f32 %v455_v43, 1e-24  ;;  %4297 = vmatpush3.xpose.msk.msra.mxu0 %vm386_vm0, %v787_v49  ;;  %v565_v56 = vmul.f32 %v4543_v2, %v4999_v5  ;;  %v5870_v43 = vld [vmem:[#allocation3_spill] sm:$0xff] }
  0xf9   : > { %v503_v37 = vmax.f32 %v449_v6, 1e-24  ;;  %v563_v57 = vmul.f32 %v4545_v3, %v5002_v7  ;;  %v5871_v6 = vld [vmem:[#allocation4_spill] sm:$0xff] }
  0xfa   : > { %4558 = vrsqrt.f32 %v505_v4  ;;  %v822_v40 = vmul.f32 %v5178_v24, %v565_v56 }
  0xfb   : > { %v4547_v41 = vpop.eup %4546  ;;  %4560 = vrsqrt.f32 %v503_v37  ;;  %v458_v22 = vpop.xlane.xlu1 %457  ;;  %v820_v12 = vmul.f32 %v5178_v24, %v563_v57 }
  0xfc   : > { %v452_v50 = vpop.xlane.xlu0 %451  ;;  %v4549_v23 = vpop.eup %4548  ;;  %v506_v13 = vmax.f32 %v458_v22, 1e-24  ;;  %4305 = vmatprep.mubr.msk.f32.mxu1 %vm386_vm0, %v822_v40  ;;  %v566_v51 = vmul.f32 %v4547_v41, %v5011_v18  ;;  %v5872_v41 = vld [vmem:[#allocation5_spill] sm:$0xff] }
  0xfd   : > { %v504_v42 = vmax.f32 %v452_v50, 1e-24  ;;  %4298 = vmatprep.mubr.msk.f32.mxu0 %vm386_vm0, %v820_v12  ;;  %v564_v5 = vmul.f32 %v4549_v23, %v5014_v19  ;;  %v5873_v50 = vld [vmem:[#allocation6_spill] sm:$0xff] }
  0xfe   : > { %4562 = vrsqrt.f32 %v506_v13  ;;  %v823_v7 = vmul.f32 %v5178_v24, %v566_v51 }
  0xff   : > { %v4551_v46 = vpop.eup %4550  ;;  %4564 = vrsqrt.f32 %v504_v42  ;;  %v694_v62 = vpop.xlane.xlu1 %693  ;;  %v821_v36 = vmul.f32 %v5178_v24, %v564_v5 }
 0x100   : > { %v688_v47 = vpop.xlane.xlu0 %687  ;;  %v4553_v20 = vpop.eup %4552  ;;  %v734_v21 = vmax.f32 %v694_v62, 1e-24  ;;  %4306 = vmatmul.mubr.msk.f32.vlgmr.msra.gmra.mxu1 %vm386_vm0, %v823_v7  ;;  %v794_v18 = vmul.f32 %v4551_v46, %v5023_v32  ;;  %v5874_v46 = vld [vmem:[#allocation7_spill] sm:$0xff] }
 0x101   : > { %v732_v63 = vmax.f32 %v688_v47, 1e-24  ;;  %4299 = vmatmul.mubr.msk.f32.vlgmr.msra.gmra.mxu0 %vm386_vm0, %v821_v36  ;;  %v792_v19 = vmul.f32 %v4553_v20, %v5026_v33  ;;  %v5875_v47 = vld [vmem:[#allocation8_spill] sm:$0xff] }
 0x102   : > { %4566 = vrsqrt.f32 %v734_v21  ;;  %4315 = vmatprep.subr.msk.mxu1 %vm386_vm0, %v794_v18 }
 0x103   : > { %v4555_v8 = vpop.eup %4554  ;;  %4568 = vrsqrt.f32 %v732_v63  ;;  %4308 = vmatprep.subr.msk.mxu0 %vm386_vm0, %v792_v19  ;;  %4316 = vmatpush3.xpose.msk.msra.mxu1 %vm386_vm0, %v794_v18  ;;  %v691_v28 = vpop.xlane.xlu1 %690 }
 0x104   : > { %v685_v29 = vpop.xlane.xlu0 %684  ;;  %v4557_v9 = vpop.eup %4556  ;;  %v733_v52 = vmax.f32 %v691_v28, 1e-24  ;;  %4309 = vmatpush3.xpose.msk.msra.mxu0 %vm386_vm0, %v792_v19  ;;  %v793_v53 = vmul.f32 %v4555_v8, %v5035_v44 }
 0x105   : > { %v731_v32 = vmax.f32 %v685_v29, 1e-24  ;;  %v791_v33 = vmul.f32 %v4557_v9, %v5038_v45  ;;  %v5876_v9 = vld [vmem:[#allocation9_spill] sm:$0xff] }
 0x106   : > { %4570 = vrsqrt.f32 %v733_v52  ;;  %4317 = vmatprep.subr.msk.mxu1 %vm386_vm0, %v793_v53 }
 0x107   : > { %v4559_v10 = vpop.eup %4558  ;;  %4572 = vrsqrt.f32 %v731_v32  ;;  %4310 = vmatprep.subr.msk.mxu0 %vm386_vm0, %v791_v33  ;;  %4318 = vmatpush3.xpose.msk.msra.mxu1 %vm386_vm0, %v793_v53  ;;  %v467_v25 = vpop.xlane.xlu1 %466  ;;  %v5877_v32 = vld [vmem:[#allocation10_spill] sm:$0xff] }
 0x108   : > { %v461_v30 = vpop.xlane.xlu0 %460  ;;  %v4561_v31 = vpop.eup %4560  ;;  %v509_v0 = vmax.f32 %v467_v25, 1e-24  ;;  %4311 = vmatpush3.xpose.msk.msra.mxu0 %vm386_vm0, %v791_v33  ;;  %v569_v44 = vmul.f32 %v4559_v10, %v5047_v60 }
 0x109   : > { %v507_v11 = vmax.f32 %v461_v30, 1e-24  ;;  %v567_v45 = vmul.f32 %v4561_v31, %v5050_v61  ;;  %v5878_v31 = vld [vmem:[#allocation11_spill] sm:$0xff] }
 0x10a   : > { %4574 = vrsqrt.f32 %v509_v0  ;;  %v826_v1 = vmul.f32 %v5178_v24, %v569_v44 }
 0x10b   : > { %v4563_v55 = vpop.eup %4562  ;;  %4576 = vrsqrt.f32 %v507_v11  ;;  %v470_v26 = vpop.xlane.xlu1 %469  ;;  %v824_v34 = vmul.f32 %v5178_v24, %v567_v45  ;;  %v5879_v11 = vld [vmem:[#allocation12_spill] sm:$0xff] }
 0x10c   : > { %v464_v27 = vpop.xlane.xlu0 %463  ;;  %v4565_v38 = vpop.eup %4564  ;;  %v510_v39 = vmax.f32 %v470_v26, 1e-24  ;;  %4319 = vmatprep.mubr.msk.f32.mxu1 %vm386_vm0, %v826_v1  ;;  %v570_v59 = vmul.f32 %v4563_v55, %v5059_v14  ;;  %v5880_v55 = vld [vmem:[#allocation13_spill] sm:$0xff] }
 0x10d   : > { %v508_v58 = vmax.f32 %v464_v27, 1e-24  ;;  %4312 = vmatprep.mubr.msk.f32.mxu0 %vm386_vm0, %v824_v34  ;;  %v568_v60 = vmul.f32 %v4565_v38, %v5062_v15  ;;  %v5881_v27 = vld [vmem:[#allocation14_spill] sm:$0xff] }
 0x10e   : > { %4578 = vrsqrt.f32 %v510_v39  ;;  %v827_v61 = vmul.f32 %v5178_v24, %v570_v59 }
 0x10f   : > { %v4567_v35 = vpop.eup %4566  ;;  %4580 = vrsqrt.f32 %v508_v58  ;;  %v706_v16 = vpop.xlane.xlu1 %705  ;;  %v825_v48 = vmul.f32 %v5178_v24, %v568_v60  ;;  %v5882_v58 = vld [vmem:[#allocation15_spill] sm:$0xff]  ;;  %v5883_v60 = vld [vmem:[#allocation16_spill] sm:$0xff] }
 0x110   : > { %v700_v17 = vpop.xlane.xlu0 %699  ;;  %v4569_v54 = vpop.eup %4568  ;;  %v738_v49 = vmax.f32 %v706_v16, 1e-24  ;;  %4320 = vmatmul.mubr.msk.f32.vlgmr.msra.gmra.mxu1 %vm386_vm0, %v827_v61  ;;  %v798_v14 = vmul.f32 %v4567_v35, %v5870_v43 }
 0x111   : > { %v736_v2 = vmax.f32 %v700_v17, 1e-24  ;;  %4313 = vmatmul.mubr.msk.f32.vlgmr.msra.gmra.mxu0 %vm386_vm0, %v825_v48  ;;  %v796_v15 = vmul.f32 %v4569_v54, %v5871_v6  ;;  %v5884_v54 = vld [vmem:[#allocation17_spill] sm:$0xff] }
 0x112   : > { %4582 = vrsqrt.f32 %v738_v49  ;;  %4329 = vmatprep.subr.msk.mxu1 %vm386_vm0, %v798_v14 }
 0x113   : > { %v4571_v3 = vpop.eup %4570  ;;  %4584 = vrsqrt.f32 %v736_v2  ;;  %4322 = vmatprep.subr.msk.mxu0 %vm386_vm0, %v796_v15  ;;  %4330 = vmatpush3.xpose.msk.msra.mxu1 %vm386_vm0, %v798_v14  ;;  %v703_v4 = vpop.xlane.xlu1 %702  ;;  %v5885_v2 = vld [vmem:[#allocation18_spill] sm:$0xff] }
 0x114   : > { %v697_v37 = vpop.xlane.xlu0 %696  ;;  %v4573_v56 = vpop.eup %4572  ;;  %v737_v57 = vmax.f32 %v703_v4, 1e-24  ;;  %4323 = vmatpush3.xpose.msk.msra.mxu0 %vm386_vm0, %v796_v15  ;;  %v797_v22 = vmul.f32 %v4571_v3, %v5872_v41 }
 0x115   : > { %v735_v40 = vmax.f32 %v697_v37, 1e-24  ;;  %v795_v12 = vmul.f32 %v4573_v56, %v5873_v50 }
 0x116   : > { %4586 = vrsqrt.f32 %v737_v57  ;;  %4331 = vmatprep.subr.msk.mxu1 %vm386_vm0, %v797_v22 }
 0x117   : > { %v4575_v23 = vpop.eup %4574  ;;  %4588 = vrsqrt.f32 %v735_v40  ;;  %4324 = vmatprep.subr.msk.mxu0 %vm386_vm0, %v795_v12  ;;  %4332 = vmatpush3.xpose.msk.msra.mxu1 %vm386_vm0, %v797_v22  ;;  %v479_v13 = vpop.xlane.xlu1 %478 }
 0x118   : > { %v473_v42 = vpop.xlane.xlu0 %472  ;;  %v4577_v51 = vpop.eup %4576  ;;  %v513_v5 = vmax.f32 %v479_v13, 1e-24  ;;  %4325 = vmatpush3.xpose.msk.msra.mxu0 %vm386_vm0, %v795_v12  ;;  %v573_v62 = vmul.f32 %v4575_v23, %v5874_v46 }
 0x119   : > { %v511_v7 = vmax.f32 %v473_v42, 1e-24  ;;  %v571_v36 = vmul.f32 %v4577_v51, %v5875_v47 }
 0x11a   : > { %4590 = vrsqrt.f32 %v513_v5  ;;  %v830_v20 = vmul.f32 %v5178_v24, %v573_v62 }
 0x11b   : > { %v4579_v21 = vpop.eup %4578  ;;  %4592 = vrsqrt.f32 %v511_v7  ;;  %v482_v63 = vpop.xlane.xlu1 %481  ;;  %v828_v19 = vmul.f32 %v5178_v24, %v571_v36 }
 0x11c   : > { %v476_v18 = vpop.xlane.xlu0 %475  ;;  %v4581_v8 = vpop.eup %4580  ;;  %v514_v28 = vmax.f32 %v482_v63, 1e-24  ;;  %4333 = vmatprep.mubr.msk.f32.mxu1 %vm386_vm0, %v830_v20  ;;  %v574_v52 = vmul.f32 %v4579_v21, %v5876_v9 }
 0x11d   : > { %v512_v29 = vmax.f32 %v476_v18, 1e-24  ;;  %4326 = vmatprep.mubr.msk.f32.mxu0 %vm386_vm0, %v828_v19  ;;  %v572_v53 = vmul.f32 %v4581_v8, %v5877_v32 }
 0x11e   : > { %4594 = vrsqrt.f32 %v514_v28  ;;  %v831_v33 = vmul.f32 %v5178_v24, %v574_v52 }
 0x11f   : > { %v4583_v10 = vpop.eup %4582  ;;  %4596 = vrsqrt.f32 %v512_v29  ;;  %v829_v25 = vmul.f32 %v5178_v24, %v572_v53 }
 0x120   : > { %v4585_v30 = vpop.eup %4584  ;;  %4334 = vmatmul.mubr.msk.f32.vlgmr.msra.gmra.mxu1 %vm386_vm0, %v831_v33  ;;  %v802_v0 = vmul.f32 %v4583_v10, %v5878_v31 }
 0x121   : > { %4327 = vmatmul.mubr.msk.f32.vlgmr.msra.gmra.mxu0 %vm386_vm0, %v829_v25  ;;  %v800_v44 = vmul.f32 %v4585_v30, %v5879_v11 }
 0x122   : > { %4343 = vmatprep.subr.msk.mxu1 %vm386_vm0, %v802_v0 }
 0x123   : > { %v4587_v45 = vpop.eup %4586  ;;  %4336 = vmatprep.subr.msk.mxu0 %vm386_vm0, %v800_v44  ;;  %4344 = vmatpush3.xpose.msk.msra.mxu1 %vm386_vm0, %v802_v0 }
 0x124   : > { %v4589_v1 = vpop.eup %4588  ;;  %4337 = vmatpush3.xpose.msk.msra.mxu0 %vm386_vm0, %v800_v44  ;;  %v801_v26 = vmul.f32 %v4587_v45, %v5880_v55 }
 0x125   : > { %v799_v34 = vmul.f32 %v4589_v1, %v5881_v27 }
 0x126   : > { %4345 = vmatprep.subr.msk.mxu1 %vm386_vm0, %v801_v26 }
 0x127   : > { %v4591_v38 = vpop.eup %4590  ;;  %4338 = vmatprep.subr.msk.mxu0 %vm386_vm0, %v799_v34  ;;  %4346 = vmatpush3.xpose.msk.msra.mxu1 %vm386_vm0, %v801_v26 }
 0x128   : > { %v4593_v39 = vpop.eup %4592  ;;  %4339 = vmatpush3.xpose.msk.msra.mxu0 %vm386_vm0, %v799_v34  ;;  %v577_v59 = vmul.f32 %v4591_v38, %v5882_v58 }
 0x129   : > { %v575_v61 = vmul.f32 %v4593_v39, %v5883_v60 }
 0x12a   : > { %v834_v35 = vmul.f32 %v5178_v24, %v577_v59 }
 0x12b   : > { %v4595_v16 = vpop.eup %4594  ;;  %v832_v17 = vmul.f32 %v5178_v24, %v575_v61 }
 0x12c   : > { %v4597_v48 = vpop.eup %4596  ;;  %4347 = vmatprep.mubr.msk.f32.mxu1 %vm386_vm0, %v834_v35  ;;  %v578_v49 = vmul.f32 %v4595_v16, %v5884_v54 }
 0x12d   : > { %4340 = vmatprep.mubr.msk.f32.mxu0 %vm386_vm0, %v832_v17  ;;  %v576_v43 = vmul.f32 %v4597_v48, %v5885_v2 }
 0x12e   : > { %v835_v14 = vmul.f32 %v5178_v24, %v578_v49 }
 0x12f   : > { %v833_v6 = vmul.f32 %v5178_v24, %v576_v43 }
 0x130   : > { %4348 = vmatmul.mubr.msk.f32.vlgmr.msra.gmra.mxu1 %vm386_vm0, %v835_v14 }
 0x131   : > { %4341 = vmatmul.mubr.msk.f32.vlgmr.msra.gmra.mxu0 %vm386_vm0, %v833_v6 }
 0x180   : > { %v5362_v15 = vpop.f32.mrf.mxu1 }
 0x181   : > { %v5364_v3 = vpop.f32.mrf.mxu0  ;;  %v2238_v4 = vsel %vm2228_vm1, %v5362_v15, -inf }
 0x182   : > { %2239 = vmax.xlane.f32.xlu1 %v2238_v4  ;;  %v5368_v37 = vpop.f32.mrf.mxu1  ;;  %v2232_v56 = vsel %vm2228_vm1, %v5364_v3, -inf }
 0x183   : > { %2233 = vmax.xlane.f32.xlu0 %v2232_v56  ;;  %v5372_v24 = vpop.f32.mrf.mxu0  ;;  %v2235_v57 = vsel %vm2228_vm1, %v5368_v37, -inf }
 0x184   : > { %v2229_v40 = vsel %vm2228_vm1, %v5372_v24, -inf }
 0x186   : > { %2236 = vmax.xlane.f32.xlu1 %v2235_v57 }
 0x187   : > { %2230 = vmax.xlane.f32.xlu0 %v2229_v40 }
 0x190   : > { %v5378_v41 = vpop.f32.mrf.mxu1 }
 0x191   : > { %v5380_v22 = vpop.f32.mrf.mxu0  ;;  %v2250_v50 = vsel %vm2228_vm1, %v5378_v41, -inf }
 0x192   : > { %2251 = vmax.xlane.f32.xlu1 %v2250_v50  ;;  %v5384_v12 = vpop.f32.mrf.mxu1  ;;  %v2244_v23 = vsel %vm2228_vm1, %v5380_v22, -inf }
 0x193   : > { %2245 = vmax.xlane.f32.xlu0 %v2244_v23  ;;  %v5388_v13 = vpop.f32.mrf.mxu0  ;;  %v2247_v42 = vsel %vm2228_vm1, %v5384_v12, -inf }
 0x194   : > { %v2241_v51 = vsel %vm2228_vm1, %v5388_v13, -inf }
 0x196   : > { %2248 = vmax.xlane.f32.xlu1 %v2247_v42 }
 0x197   : > { %2242 = vmax.xlane.f32.xlu0 %v2241_v51 }
 0x1a0   : > { %v5394_v5 = vpop.f32.mrf.mxu1 }
 0x1a1   : > { %v5396_v7 = vpop.f32.mrf.mxu0  ;;  %v2262_v46 = vsel %vm2228_vm1, %v5394_v5, -inf }
 0x1a2   : > { %2263 = vmax.xlane.f32.xlu1 %v2262_v46  ;;  %v5400_v62 = vpop.f32.mrf.mxu1  ;;  %v2256_v47 = vsel %vm2228_vm1, %v5396_v7, -inf }
 0x1a3   : > { %2257 = vmax.xlane.f32.xlu0 %v2256_v47  ;;  %v5404_v36 = vpop.f32.mrf.mxu0  ;;  %v2259_v20 = vsel %vm2228_vm1, %v5400_v62, -inf }
 0x1a4   : > { %v2253_v21 = vsel %vm2228_vm1, %v5404_v36, -inf }
 0x1a6   : > { %2260 = vmax.xlane.f32.xlu1 %v2259_v20 }
 0x1a7   : > { %2254 = vmax.xlane.f32.xlu0 %v2253_v21 }
 0x1b0   : > { %v5410_v63 = vpop.f32.mrf.mxu1 }
 0x1b1   : > { %v5412_v18 = vpop.f32.mrf.mxu0  ;;  %v2274_v19 = vsel %vm2228_vm1, %v5410_v63, -inf }
 0x1b2   : > { %2275 = vmax.xlane.f32.xlu1 %v2274_v19  ;;  %v5416_v8 = vpop.f32.mrf.mxu1  ;;  %v2268_v28 = vsel %vm2228_vm1, %v5412_v18, -inf }
 0x1b3   : > { %2269 = vmax.xlane.f32.xlu0 %v2268_v28  ;;  %v5420_v29 = vpop.f32.mrf.mxu0  ;;  %v2271_v9 = vsel %vm2228_vm1, %v5416_v8, -inf }
 0x1b4   : > { %v2265_v52 = vsel %vm2228_vm1, %v5420_v29, -inf }
 0x1b6   : > { %2272 = vmax.xlane.f32.xlu1 %v2271_v9 }
 0x1b7   : > { %2266 = vmax.xlane.f32.xlu0 %v2265_v52 }
 0x1c0   : > { %v5426_v32 = vpop.f32.mrf.mxu1 }
 0x1c1   : > { %v5428_v53 = vpop.f32.mrf.mxu0  ;;  %v2286_v33 = vsel %vm2228_vm1, %v5426_v32, -inf }
 0x1c2   : > { %2287 = vmax.xlane.f32.xlu1 %v2286_v33  ;;  %v5432_v10 = vpop.f32.mrf.mxu1  ;;  %v2280_v25 = vsel %vm2228_vm1, %v5428_v53, -inf }
 0x1c3   : > { %2281 = vmax.xlane.f32.xlu0 %v2280_v25  ;;  %v5436_v30 = vpop.f32.mrf.mxu0  ;;  %v2283_v31 = vsel %vm2228_vm1, %v5432_v10, -inf }
 0x1c4   : > { %v2277_v0 = vsel %vm2228_vm1, %v5436_v30, -inf }
 0x1c6   : > { %2284 = vmax.xlane.f32.xlu1 %v2283_v31 }
 0x1c7   : > { %2278 = vmax.xlane.f32.xlu0 %v2277_v0 }
 0x1d0   : > { %v5442_v11 = vpop.f32.mrf.mxu1 }
 0x1d1   : > { %v5444_v44 = vpop.f32.mrf.mxu0  ;;  %v2298_v45 = vsel %vm2228_vm1, %v5442_v11, -inf }
 0x1d2   : > { %2299 = vmax.xlane.f32.xlu1 %v2298_v45  ;;  %v5448_v1 = vpop.f32.mrf.mxu1  ;;  %v2292_v55 = vsel %vm2228_vm1, %v5444_v44, -inf }
 0x1d3   : > { %2293 = vmax.xlane.f32.xlu0 %v2292_v55  ;;  %v5452_v26 = vpop.f32.mrf.mxu0  ;;  %v2295_v27 = vsel %vm2228_vm1, %v5448_v1, -inf }
 0x1d4   : > { %v2289_v34 = vsel %vm2228_vm1, %v5452_v26, -inf }
 0x1d6   : > { %2296 = vmax.xlane.f32.xlu1 %v2295_v27 }
 0x1d7   : > { %2290 = vmax.xlane.f32.xlu0 %v2289_v34 }
 0x1e0   : > { %v5458_v38 = vpop.f32.mrf.mxu1 }
 0x1e1   : > { %v5460_v39 = vpop.f32.mrf.mxu0  ;;  %v2310_v58 = vsel %vm2228_vm1, %v5458_v38, -inf }
 0x1e2   : > { %2311 = vmax.xlane.f32.xlu1 %v2310_v58  ;;  %v5464_v59 = vpop.f32.mrf.mxu1  ;;  %v2304_v60 = vsel %vm2228_vm1, %v5460_v39, -inf }
 0x1e3   : > { %2305 = vmax.xlane.f32.xlu0 %v2304_v60  ;;  %v5468_v61 = vpop.f32.mrf.mxu0  ;;  %v2307_v35 = vsel %vm2228_vm1, %v5464_v59, -inf }
 0x1e4   : > { %v2301_v16 = vsel %vm2228_vm1, %v5468_v61, -inf }
 0x1e6   : > { %2308 = vmax.xlane.f32.xlu1 %v2307_v35 }
 0x1e7   : > { %2302 = vmax.xlane.f32.xlu0 %v2301_v16 }
 0x1f0   : > { %v5474_v17 = vpop.f32.mrf.mxu1 }
 0x1f1   : > { %v5476_v48 = vpop.f32.mrf.mxu0  ;;  %v2322_v14 = vsel %vm2228_vm1, %v5474_v17, -inf }
 0x1f2   : > { %v5478_v54 = vpop.f32.mrf.mxu1  ;;  %v2316_v6 = vsel %vm2228_vm1, %v5476_v48, -inf }
 0x1f3   : > { %v5480_v49 = vpop.f32.mrf.mxu0  ;;  %v2319_v2 = vsel %vm2228_vm1, %v5478_v54, -inf }
 0x1f4   : > { %2320 = vmax.xlane.f32.xlu1 %v2319_v2  ;;  %v2313_v43 = vsel %vm2228_vm1, %v5480_v49, -inf }
 0x1f5   : > { %2314 = vmax.xlane.f32.xlu0 %v2313_v43 }
 0x1f8   : > { %2323 = vmax.xlane.f32.xlu1 %v2322_v14 }
 0x1f9   : > { %2317 = vmax.xlane.f32.xlu0 %v2316_v6 }
 0x20b   : > { %v2240_v4 = vpop.xlane.xlu1 %2239 }
 0x20c   : > { %v2328_v56 = vsub.f32 %v5362_v15, %v2240_v4  ;;  %v2234_v57 = vpop.xlane.xlu0 %2233 }
 0x20d   : > { %v2326_v40 = vsub.f32 %v5364_v3, %v2234_v57 }
 0x20e   : > { %v2363_v50 = vmul.f32 1.442695, %v2328_v56 }
 0x20f   : > { %v2359_v23 = vmul.f32 1.442695, %v2326_v40  ;;  %v2237_v42 = vpop.xlane.xlu1 %2236 }
 0x210   : > { %4598 = vpow2.f32 %v2363_v50  ;;  %v2327_v51 = vsub.f32 %v5368_v37, %v2237_v42  ;;  %v2231_v46 = vpop.xlane.xlu0 %2230 }
 0x211   : > { %4600 = vpow2.f32 %v2359_v23  ;;  %v2325_v47 = vsub.f32 %v5372_v24, %v2231_v46 }
 0x212   : > { %v2361_v20 = vmul.f32 1.442695, %v2327_v51 }
 0x213   : > { %v2357_v21 = vmul.f32 1.442695, %v2325_v47 }
 0x214   : > { %4602 = vpow2.f32 %v2361_v20  ;;  %v324_v20 = vld [vmem:[%s5538_s29 + $0x10] sm:$0xff] }
 0x215   : > { %4604 = vpow2.f32 %v2357_v21 }
 0x21b   : > { %v2252_v19 = vpop.xlane.xlu1 %2251 }
 0x21c   : > { %v2332_v15 = vsub.f32 %v5378_v41, %v2252_v19  ;;  %v2246_v28 = vpop.xlane.xlu0 %2245 }
 0x21d   : > { %v5495_v9 = vpop.eup %4598  ;;  %v2330_v3 = vsub.f32 %v5380_v22, %v2246_v28  ;;  %v322_v28 = vld [vmem:[%s5538_s29] sm:$0xff] }
 0x21e   : > { %v5498_v52 = vpop.eup %4600  ;;  %v2371_v33 = vmul.f32 1.442695, %v2332_v15  ;;  %v2430_v37 = vsel %vm2228_vm1, %v5495_v9, 0.0 }
 0x21f   : > { %v2367_v25 = vmul.f32 1.442695, %v2330_v3  ;;  %2431 = vadd.xlane.f32.xlu1 %v2430_v37  ;;  %v2249_v24 = vpop.xlane.xlu1 %2248  ;;  %v2424_v31 = vsel %vm2228_vm1, %v5498_v52, 0.0 }
 0x220   : > { %4606 = vpow2.f32 %v2371_v33  ;;  %v2331_v41 = vsub.f32 %v5384_v12, %v2249_v24  ;;  %2425 = vadd.xlane.f32.xlu0 %v2424_v31  ;;  %v2243_v0 = vpop.xlane.xlu0 %2242 }
 0x221   : > { %v5505_v45 = vpop.eup %4602  ;;  %4608 = vpow2.f32 %v2367_v25  ;;  %v2329_v22 = vsub.f32 %v5388_v13, %v2243_v0 }
 0x222   : > { %v5508_v55 = vpop.eup %4604  ;;  %v2369_v27 = vmul.f32 1.442695, %v2331_v41  ;;  %v2427_v34 = vsel %vm2228_vm1, %v5505_v45, 0.0 }
 0x223   : > { %v2365_v58 = vmul.f32 1.442695, %v2329_v22  ;;  %2428 = vadd.xlane.f32.xlu1 %v2427_v34  ;;  %v2421_v60 = vsel %vm2228_vm1, %v5508_v55, 0.0 }
 0x224   : > { %4610 = vpow2.f32 %v2369_v27  ;;  %2422 = vadd.xlane.f32.xlu0 %v2421_v60 }
 0x225   : > { %4612 = vpow2.f32 %v2365_v58 }
 0x22b   : > { %v2264_v12 = vpop.xlane.xlu1 %2263 }
 0x22c   : > { %v2336_v35 = vsub.f32 %v5394_v5, %v2264_v12  ;;  %v2258_v16 = vpop.xlane.xlu0 %2257 }
 0x22d   : > { %v5515_v2 = vpop.eup %4606  ;;  %v2334_v13 = vsub.f32 %v5396_v7, %v2258_v16  ;;  %v5568_v16 = vld [vmem:[%s5538_s29 + $0x38] sm:$0xff] }
 0x22e   : > { %v5518_v43 = vpop.eup %4608  ;;  %v2379_v14 = vmul.f32 1.442695, %v2336_v35  ;;  %v2442_v6 = vsel %vm2228_vm1, %v5515_v2, 0.0 }
 0x22f   : > { %v2375_v4 = vmul.f32 1.442695, %v2334_v13  ;;  %2443 = vadd.xlane.f32.xlu1 %v2442_v6  ;;  %v2261_v56 = vpop.xlane.xlu1 %2260  ;;  %v2436_v57 = vsel %vm2228_vm1, %v5518_v43, 0.0 }
 0x230   : > { %4614 = vpow2.f32 %v2379_v14  ;;  %v2335_v5 = vsub.f32 %v5400_v62, %v2261_v56  ;;  %2437 = vadd.xlane.f32.xlu0 %v2436_v57  ;;  %v2255_v40 = vpop.xlane.xlu0 %2254  ;;  %v323_v62 = vld [vmem:[%s5538_s29 + $0x8] sm:$0xff] }
 0x231   : > { %v5525_v50 = vpop.eup %4610  ;;  %4616 = vpow2.f32 %v2375_v4  ;;  %v2333_v7 = vsub.f32 %v5404_v36, %v2255_v40  ;;  %v325_v36 = vld [vmem:[%s5538_s29 + $0x18] sm:$0xff]  ;;  %4350 = vmatprep.subr.mxu0 %v323_v62 }
 0x232   : > { %v5528_v23 = vpop.eup %4612  ;;  %v2377_v42 = vmul.f32 1.442695, %v2335_v5  ;;  %v2439_v51 = vsel %vm2228_vm1, %v5525_v50, 0.0  ;;  %4357 = vmatprep.subr.mxu1 %v325_v36  ;;  %4351 = vmatpush3.msra.mxu0 %v323_v62 }
 0x233   : > { %v2373_v46 = vmul.f32 1.442695, %v2333_v7  ;;  %2440 = vadd.xlane.f32.xlu1 %v2439_v51  ;;  %v2433_v47 = vsel %vm2228_vm1, %v5528_v23, 0.0  ;;  %4358 = vmatpush3.msra.mxu1 %v325_v36 }
 0x234   : > { %4618 = vpow2.f32 %v2377_v42  ;;  %2434 = vadd.xlane.f32.xlu0 %v2433_v47  ;;  %4359 = vmatprep.subr.mxu1 %v324_v20 }
 0x235   : > { %4620 = vpow2.f32 %v2373_v46  ;;  %4352 = vmatprep.subr.mxu0 %v322_v28  ;;  %4360 = vmatpush3.msra.mxu1 %v324_v20 }
 0x236   : > { %4353 = vmatpush3.msra.mxu0 %v322_v28  ;;  %4371 = vmatprep.subr.mxu1 %v5568_v16 }
 0x23b   : > { %v2276_v21 = vpop.xlane.xlu1 %2275 }
 0x23c   : > { %v2340_v19 = vsub.f32 %v5410_v63, %v2276_v21  ;;  %v2270_v15 = vpop.xlane.xlu0 %2269 }
 0x23d   : > { %v5545_v3 = vpop.eup %4614  ;;  %v2338_v33 = vsub.f32 %v5412_v18, %v2270_v15 }
 0x23e   : > { %v5548_v37 = vpop.eup %4616  ;;  %v2387_v25 = vmul.f32 1.442695, %v2340_v19  ;;  %v2454_v24 = vsel %vm2228_vm1, %v5545_v3, 0.0 }
 0x23f   : > { %v2383_v31 = vmul.f32 1.442695, %v2338_v33  ;;  %2455 = vadd.xlane.f32.xlu1 %v2454_v24  ;;  %v2273_v63 = vpop.xlane.xlu1 %2272  ;;  %v2448_v41 = vsel %vm2228_vm1, %v5548_v37, 0.0 }
 0x240   : > { %4622 = vpow2.f32 %v2387_v25  ;;  %v2339_v18 = vsub.f32 %v5416_v8, %v2273_v63  ;;  %2449 = vadd.xlane.f32.xlu0 %v2448_v41  ;;  %v2267_v0 = vpop.xlane.xlu0 %2266  ;;  %v5565_v8 = vld [vmem:[%s5538_s29 + $0x28] sm:$0xff] }
 0x241   : > { %v5555_v22 = vpop.eup %4618  ;;  %4624 = vpow2.f32 %v2383_v31  ;;  %v2337_v27 = vsub.f32 %v5420_v29, %v2267_v0  ;;  %4364 = vmatprep.subr.mxu0 %v5565_v8 }
 0x242   : > { %v5558_v34 = vpop.eup %4620  ;;  %v2385_v58 = vmul.f32 1.442695, %v2339_v18  ;;  %v2451_v60 = vsel %vm2228_vm1, %v5555_v22, 0.0 }
 0x243   : > { %v2381_v12 = vmul.f32 1.442695, %v2337_v27  ;;  %2452 = vadd.xlane.f32.xlu1 %v2451_v60  ;;  %v2445_v35 = vsel %vm2228_vm1, %v5558_v34, 0.0 }
 0x244   : > { %4626 = vpow2.f32 %v2385_v58  ;;  %2446 = vadd.xlane.f32.xlu0 %v2445_v35 }
 0x245   : > { %4628 = vpow2.f32 %v2381_v12 }
 0x24b   : > { %v2288_v13 = vpop.xlane.xlu1 %2287 }
 0x24c   : > { %v2344_v29 = vsub.f32 %v5426_v32, %v2288_v13  ;;  %v2282_v14 = vpop.xlane.xlu0 %2281 }
 0x24d   : > { %v5573_v6 = vpop.eup %4622  ;;  %v2342_v4 = vsub.f32 %v5428_v53, %v2282_v14 }
 0x24e   : > { %v5576_v56 = vpop.eup %4624  ;;  %v2395_v57 = vmul.f32 1.442695, %v2344_v29  ;;  %v2466_v5 = vsel %vm2228_vm1, %v5573_v6, 0.0 }
 0x24f   : > { %v2391_v40 = vmul.f32 1.442695, %v2342_v4  ;;  %2467 = vadd.xlane.f32.xlu1 %v2466_v5  ;;  %v2285_v7 = vpop.xlane.xlu1 %2284  ;;  %v2460_v42 = vsel %vm2228_vm1, %v5576_v56, 0.0 }
 0x250   : > { %4630 = vpow2.f32 %v2395_v57  ;;  %v2343_v32 = vsub.f32 %v5432_v10, %v2285_v7  ;;  %2461 = vadd.xlane.f32.xlu0 %v2460_v42  ;;  %v2279_v51 = vpop.xlane.xlu0 %2278 }
 0x251   : > { %v5583_v46 = vpop.eup %4626  ;;  %4632 = vpow2.f32 %v2391_v40  ;;  %v2341_v53 = vsub.f32 %v5436_v30, %v2279_v51 }
 0x252   : > { %v5586_v47 = vpop.eup %4628  ;;  %v2393_v62 = vmul.f32 1.442695, %v2343_v32  ;;  %v2463_v36 = vsel %vm2228_vm1, %v5583_v46, 0.0 }
 0x253   : > { %v2389_v20 = vmul.f32 1.442695, %v2341_v53  ;;  %2464 = vadd.xlane.f32.xlu1 %v2463_v36  ;;  %v2457_v21 = vsel %vm2228_vm1, %v5586_v47, 0.0 }
 0x254   : > { %4634 = vpow2.f32 %v2393_v62  ;;  %2458 = vadd.xlane.f32.xlu0 %v2457_v21 }
 0x255   : > { %4636 = vpow2.f32 %v2389_v20 }
 0x25b   : > { %v2300_v10 = vpop.xlane.xlu1 %2299 }
 0x25c   : > { %v2348_v19 = vsub.f32 %v5442_v11, %v2300_v10  ;;  %v2294_v15 = vpop.xlane.xlu0 %2293 }
 0x25d   : > { %v5593_v28 = vpop.eup %4630  ;;  %v2346_v30 = vsub.f32 %v5444_v44, %v2294_v15 }
 0x25e   : > { %v5596_v33 = vpop.eup %4632  ;;  %v2403_v25 = vmul.f32 1.442695, %v2348_v19  ;;  %v2478_v24 = vsel %vm2228_vm1, %v5593_v28, 0.0 }
 0x25f   : > { %v2399_v31 = vmul.f32 1.442695, %v2346_v30  ;;  %2479 = vadd.xlane.f32.xlu1 %v2478_v24  ;;  %v2297_v63 = vpop.xlane.xlu1 %2296  ;;  %v2472_v41 = vsel %vm2228_vm1, %v5596_v33, 0.0 }
 0x260   : > { %4638 = vpow2.f32 %v2403_v25  ;;  %v2347_v11 = vsub.f32 %v5448_v1, %v2297_v63  ;;  %2473 = vadd.xlane.f32.xlu0 %v2472_v41  ;;  %v2291_v18 = vpop.xlane.xlu0 %2290 }
 0x261   : > { %v5603_v0 = vpop.eup %4634  ;;  %4640 = vpow2.f32 %v2399_v31  ;;  %v2345_v44 = vsub.f32 %v5452_v26, %v2291_v18 }
 0x262   : > { %v5606_v27 = vpop.eup %4636  ;;  %v2401_v58 = vmul.f32 1.442695, %v2347_v11  ;;  %v2475_v60 = vsel %vm2228_vm1, %v5603_v0, 0.0 }
 0x263   : > { %v2397_v12 = vmul.f32 1.442695, %v2345_v44  ;;  %2476 = vadd.xlane.f32.xlu1 %v2475_v60  ;;  %v2469_v35 = vsel %vm2228_vm1, %v5606_v27, 0.0 }
 0x264   : > { %4642 = vpow2.f32 %v2401_v58  ;;  %2470 = vadd.xlane.f32.xlu0 %v2469_v35 }
 0x265   : > { %4644 = vpow2.f32 %v2397_v12 }
 0x26b   : > { %v2312_v1 = vpop.xlane.xlu1 %2311 }
 0x26c   : > { %v2352_v13 = vsub.f32 %v5458_v38, %v2312_v1  ;;  %v2306_v29 = vpop.xlane.xlu0 %2305 }
 0x26d   : > { %v5613_v14 = vpop.eup %4638  ;;  %v2350_v26 = vsub.f32 %v5460_v39, %v2306_v29 }
 0x26e   : > { %v5616_v4 = vpop.eup %4640  ;;  %v2411_v57 = vmul.f32 1.442695, %v2352_v13  ;;  %v2490_v5 = vsel %vm2228_vm1, %v5613_v14, 0.0 }
 0x26f   : > { %v2407_v40 = vmul.f32 1.442695, %v2350_v26  ;;  %2491 = vadd.xlane.f32.xlu1 %v2490_v5  ;;  %v2309_v7 = vpop.xlane.xlu1 %2308  ;;  %v2484_v42 = vsel %vm2228_vm1, %v5616_v4, 0.0 }
 0x270   : > { %4646 = vpow2.f32 %v2411_v57  ;;  %v2351_v38 = vsub.f32 %v5464_v59, %v2309_v7  ;;  %2485 = vadd.xlane.f32.xlu0 %v2484_v42  ;;  %v2303_v32 = vpop.xlane.xlu0 %2302 }
 0x271   : > { %v5623_v51 = vpop.eup %4642  ;;  %4648 = vpow2.f32 %v2407_v40  ;;  %v2349_v39 = vsub.f32 %v5468_v61, %v2303_v32 }
 0x272   : > { %v5626_v53 = vpop.eup %4644  ;;  %v2409_v62 = vmul.f32 1.442695, %v2351_v38  ;;  %v2487_v36 = vsel %vm2228_vm1, %v5623_v51, 0.0 }
 0x273   : > { %v2405_v20 = vmul.f32 1.442695, %v2349_v39  ;;  %2488 = vadd.xlane.f32.xlu1 %v2487_v36  ;;  %v2481_v21 = vsel %vm2228_vm1, %v5626_v53, 0.0 }
 0x274   : > { %4650 = vpow2.f32 %v2409_v62  ;;  %2482 = vadd.xlane.f32.xlu0 %v2481_v21 }
 0x275   : > { %4652 = vpow2.f32 %v2405_v20 }
 0x27d   : > { %v5632_v59 = vpop.eup %4646  ;;  %v2321_v10 = vpop.xlane.xlu1 %2320 }
 0x27e   : > { %v5634_v19 = vpop.eup %4648  ;;  %v2355_v61 = vsub.f32 %v5478_v54, %v2321_v10  ;;  %v2315_v15 = vpop.xlane.xlu0 %2314  ;;  %v2502_v30 = vsel %vm2228_vm1, %v5632_v59, 0.0 }
 0x27f   : > { %v2353_v25 = vsub.f32 %v5480_v49, %v2315_v15  ;;  %2503 = vadd.xlane.f32.xlu1 %v2502_v30  ;;  %v2496_v24 = vsel %vm2228_vm1, %v5634_v19, 0.0 }
 0x280   : > { %v2417_v31 = vmul.f32 1.442695, %v2355_v61  ;;  %2497 = vadd.xlane.f32.xlu0 %v2496_v24 }
 0x281   : > { %v5642_v63 = vpop.eup %4650  ;;  %v2413_v41 = vmul.f32 1.442695, %v2353_v25  ;;  %v2324_v11 = vpop.xlane.xlu1 %2323 }
 0x282   : > { %v5644_v18 = vpop.eup %4652  ;;  %4654 = vpow2.f32 %v2417_v31  ;;  %v2356_v54 = vsub.f32 %v5474_v17, %v2324_v11  ;;  %v2318_v44 = vpop.xlane.xlu0 %2317  ;;  %v2499_v58 = vsel %vm2228_vm1, %v5642_v63, 0.0  ;;  %v328_v31 = vld [vmem:[%s5538_s29 + $0x30] sm:$0xff] }
 0x283   : > { %4656 = vpow2.f32 %v2413_v41  ;;  %v2354_v49 = vsub.f32 %v5476_v48, %v2318_v44  ;;  %2500 = vadd.xlane.f32.xlu1 %v2499_v58  ;;  %v2493_v60 = vsel %vm2228_vm1, %v5644_v18, 0.0 }
 0x284   : > { %v2419_v12 = vmul.f32 1.442695, %v2356_v54  ;;  %2494 = vadd.xlane.f32.xlu0 %v2493_v60 }
 0x285   : > { %v2415_v35 = vmul.f32 1.442695, %v2354_v49 }
 0x286   : > { %4658 = vpow2.f32 %v2419_v12 }
 0x287   : > { %4660 = vpow2.f32 %v2415_v35 }
 0x28f   : > { %v5652_v1 = vpop.eup %4654 }
 0x290   : > { %v5654_v13 = vpop.eup %4656  ;;  %v2511_v17 = vsel %vm2228_vm1, %v5652_v1, 0.0 }
 0x291   : > { %2512 = vadd.xlane.f32.xlu1 %v2511_v17  ;;  %v2505_v48 = vsel %vm2228_vm1, %v5654_v13, 0.0  ;;  %v332_v17 = vld [vmem:[%s5538_s29 + $0x50] sm:$0xff] }
 0x292   : > { %2506 = vadd.xlane.f32.xlu0 %v2505_v48 }
 0x293   : > { %v5660_v29 = vpop.eup %4658 }
 0x294   : > { %v5662_v26 = vpop.eup %4660  ;;  %v2514_v57 = vsel %vm2228_vm1, %v5660_v29, 0.0 }
 0x295   : > { %2515 = vadd.xlane.f32.xlu1 %v2514_v57  ;;  %v2508_v5 = vsel %vm2228_vm1, %v5662_v26, 0.0 }
 0x296   : > { %2509 = vadd.xlane.f32.xlu0 %v2508_v5 }
 0x2a8   : > { %v2432_v40 = vpop.xlane.xlu1 %2431 }
 0x2a9   : > { %v2426_v7 = vpop.xlane.xlu0 %2425  ;;  %4662 = vrcp.f32 %v2432_v40 }
 0x2aa   : > { %4664 = vrcp.f32 %v2426_v7 }
 0x2ac   : > { %v2429_v42 = vpop.xlane.xlu1 %2428 }
 0x2ad   : > { %4666 = vrcp.f32 %v2429_v42  ;;  %v2423_v38 = vpop.xlane.xlu0 %2422 }
 0x2ae   : > { %4668 = vrcp.f32 %v2423_v38 }
 0x2b6   : > { %v4663_v32 = vpop.eup %4662 }
 0x2b7   : > { %v4665_v62 = vpop.eup %4664  ;;  %v2552_v30 = vmul.f32 %v4663_v32, %v5495_v9  ;;  %v331_v9 = vld [vmem:[%s5538_s29 + $0x48] sm:$0xff] }
 0x2b8   : > { %v2444_v39 = vpop.xlane.xlu1 %2443  ;;  %v2550_v24 = vmul.f32 %v4665_v62, %v5498_v52 }
 0x2b9   : > { %v2438_v36 = vpop.xlane.xlu0 %2437  ;;  %4670 = vrcp.f32 %v2444_v39 }
 0x2ba   : > { %v4667_v20 = vpop.eup %4666  ;;  %4672 = vrcp.f32 %v2438_v36 }
 0x2bb   : > { %v4669_v21 = vpop.eup %4668  ;;  %v2551_v10 = vmul.f32 %v4667_v20, %v5505_v45  ;;  %v326_v45 = vld [vmem:[%s5538_s29 + $0x20] sm:$0xff]  ;;  %v336_v20 = vld [vmem:[%s5538_s29 + $0x70] sm:$0xff] }
 0x2bc   : > { %v2441_v61 = vpop.xlane.xlu1 %2440  ;;  %v2549_v15 = vmul.f32 %v4669_v21, %v5508_v55  ;;  %v333_v55 = vld [vmem:[%s5538_s29 + $0x58] sm:$0xff] }
 0x2bd   : > { %4674 = vrcp.f32 %v2441_v61  ;;  %v2435_v25 = vpop.xlane.xlu0 %2434  ;;  %4361 = vmatprep.mubr.msk.f32.mxu1 %vm2228_vm1, %v2551_v10 }
 0x2be   : > { %4676 = vrcp.f32 %v2435_v25  ;;  %4354 = vmatprep.mubr.msk.f32.mxu0 %vm2228_vm1, %v2549_v15  ;;  %4362 = vmatmul.mubr.msk.f32.vlgmr.msra.gmra.mxu1 %vm2228_vm1, %v2552_v30 }
 0x2bf   : > { %4355 = vmatmul.mubr.msk.f32.vlgmr.msra.gmra.mxu0 %vm2228_vm1, %v2550_v24  ;;  %4372 = vmatpush3.msra.mxu1 %v5568_v16 }
 0x2c0   : > { %4365 = vmatpush3.msra.mxu0 %v5565_v8  ;;  %4373 = vmatprep.subr.mxu1 %v328_v31 }
 0x2c1   : > { %4366 = vmatprep.subr.mxu0 %v326_v45  ;;  %4374 = vmatpush3.msra.mxu1 %v328_v31 }
 0x2c2   : > { %4367 = vmatpush3.msra.mxu0 %v326_v45  ;;  %4385 = vmatprep.subr.mxu1 %v333_v55 }
 0x2c3   : > { %4378 = vmatprep.subr.mxu0 %v331_v9 }
 0x2c6   : > { %v4671_v52 = vpop.eup %4670 }
 0x2c7   : > { %v4673_v11 = vpop.eup %4672  ;;  %v2556_v60 = vmul.f32 %v4671_v52, %v5515_v2  ;;  %v335_v2 = vld [vmem:[%s5538_s29 + $0x68] sm:$0xff]  ;;  %v340_v52 = vld [vmem:[%s5538_s29 + $0x90] sm:$0xff] }
 0x2c8   : > { %v2456_v41 = vpop.xlane.xlu1 %2455  ;;  %v2554_v35 = vmul.f32 %v4673_v11, %v5518_v43 }
 0x2c9   : > { %v2450_v54 = vpop.xlane.xlu0 %2449  ;;  %4678 = vrcp.f32 %v2456_v41 }
 0x2ca   : > { %v4675_v44 = vpop.eup %4674  ;;  %4680 = vrcp.f32 %v2450_v54 }
 0x2cb   : > { %v4677_v58 = vpop.eup %4676  ;;  %v2555_v16 = vmul.f32 %v4675_v44, %v5525_v50  ;;  %v330_v50 = vld [vmem:[%s5538_s29 + $0x40] sm:$0xff] }
 0x2cc   : > { %v2453_v8 = vpop.xlane.xlu1 %2452  ;;  %v2553_v49 = vmul.f32 %v4677_v58, %v5528_v23  ;;  %v337_v23 = vld [vmem:[%s5538_s29 + $0x78] sm:$0xff] }
 0x2cd   : > { %4682 = vrcp.f32 %v2453_v8  ;;  %v2447_v12 = vpop.xlane.xlu0 %2446  ;;  %4375 = vmatprep.mubr.msk.f32.mxu1 %vm2228_vm1, %v2555_v16 }
 0x2ce   : > { %4684 = vrcp.f32 %v2447_v12  ;;  %4368 = vmatprep.mubr.msk.f32.mxu0 %vm2228_vm1, %v2553_v49  ;;  %4376 = vmatmul.mubr.msk.f32.vlgmr.msra.gmra.mxu1 %vm2228_vm1, %v2556_v60 }
 0x2cf   : > { %4369 = vmatmul.mubr.msk.f32.vlgmr.msra.gmra.mxu0 %vm2228_vm1, %v2554_v35  ;;  %4386 = vmatpush3.msra.mxu1 %v333_v55 }
 0x2d0   : > { %4379 = vmatpush3.msra.mxu0 %v331_v9  ;;  %4387 = vmatprep.subr.mxu1 %v332_v17 }
 0x2d1   : > { %4380 = vmatprep.subr.mxu0 %v330_v50  ;;  %4388 = vmatpush3.msra.mxu1 %v332_v17  ;;  %v344_v17 = vld [vmem:[%s5538_s29 + $0xb0] sm:$0xff] }
 0x2d2   : > { %4381 = vmatpush3.msra.mxu0 %v330_v50  ;;  %4399 = vmatprep.subr.mxu1 %v337_v23 }
 0x2d3   : > { %4392 = vmatprep.subr.mxu0 %v335_v2 }
 0x2d6   : > { %v4679_v43 = vpop.eup %4678 }
 0x2d7   : > { %v4681_v57 = vpop.eup %4680  ;;  %v2560_v39 = vmul.f32 %v4679_v43, %v5545_v3  ;;  %v339_v3 = vld [vmem:[%s5538_s29 + $0x88] sm:$0xff] }
 0x2d8   : > { %v2468_v48 = vpop.xlane.xlu1 %2467  ;;  %v2558_v36 = vmul.f32 %v4681_v57, %v5548_v37 }
 0x2d9   : > { %v2462_v5 = vpop.xlane.xlu0 %2461  ;;  %4686 = vrcp.f32 %v2468_v48 }
 0x2da   : > { %v4683_v40 = vpop.eup %4682  ;;  %4688 = vrcp.f32 %v2462_v5 }
 0x2db   : > { %v4685_v7 = vpop.eup %4684  ;;  %v2559_v42 = vmul.f32 %v4683_v40, %v5555_v22  ;;  %v334_v22 = vld [vmem:[%s5538_s29 + $0x60] sm:$0xff] }
 0x2dc   : > { %v2465_v38 = vpop.xlane.xlu1 %2464  ;;  %v2557_v32 = vmul.f32 %v4685_v7, %v5558_v34  ;;  %v341_v34 = vld [vmem:[%s5538_s29 + $0x98] sm:$0xff] }
 0x2dd   : > { %4690 = vrcp.f32 %v2465_v38  ;;  %v2459_v62 = vpop.xlane.xlu0 %2458  ;;  %4389 = vmatprep.mubr.msk.f32.mxu1 %vm2228_vm1, %v2559_v42 }
 0x2de   : > { %4692 = vrcp.f32 %v2459_v62  ;;  %4382 = vmatprep.mubr.msk.f32.mxu0 %vm2228_vm1, %v2557_v32  ;;  %4390 = vmatmul.mubr.msk.f32.vlgmr.msra.gmra.mxu1 %vm2228_vm1, %v2560_v39  ;;  %v348_v32 = vld [vmem:[%s5538_s29 + $0xd0] sm:$0xff] }
 0x2df   : > { %4383 = vmatmul.mubr.msk.f32.vlgmr.msra.gmra.mxu0 %vm2228_vm1, %v2558_v36  ;;  %4400 = vmatpush3.msra.mxu1 %v337_v23 }
 0x2e0   : > { %4393 = vmatpush3.msra.mxu0 %v335_v2  ;;  %4401 = vmatprep.subr.mxu1 %v336_v20 }
 0x2e1   : > { %4394 = vmatprep.subr.mxu0 %v334_v22  ;;  %4402 = vmatpush3.msra.mxu1 %v336_v20 }
 0x2e2   : > { %4395 = vmatpush3.msra.mxu0 %v334_v22  ;;  %4413 = vmatprep.subr.mxu1 %v341_v34 }
 0x2e3   : > { %4406 = vmatprep.subr.mxu0 %v339_v3 }
 0x2e6   : > { %v4687_v37 = vpop.eup %4686 }
 0x2e7   : > { %v4689_v10 = vpop.eup %4688  ;;  %v2564_v45 = vmul.f32 %v4687_v37, %v5573_v6  ;;  %v343_v6 = vld [vmem:[%s5538_s29 + $0xa8] sm:$0xff] }
 0x2e8   : > { %v2480_v21 = vpop.xlane.xlu1 %2479  ;;  %v2562_v9 = vmul.f32 %v4689_v10, %v5576_v56  ;;  %v352_v10 = vld [vmem:[%s5538_s29 + $0xf0] sm:$0xff] }
 0x2e9   : > { %v2474_v61 = vpop.xlane.xlu0 %2473  ;;  %4694 = vrcp.f32 %v2480_v21 }
 0x2ea   : > { %v4691_v15 = vpop.eup %4690  ;;  %4696 = vrcp.f32 %v2474_v61 }
 0x2eb   : > { %v4693_v30 = vpop.eup %4692  ;;  %v2563_v25 = vmul.f32 %v4691_v15, %v5583_v46  ;;  %v338_v46 = vld [vmem:[%s5538_s29 + $0x80] sm:$0xff] }
 0x2ec   : > { %v2477_v24 = vpop.xlane.xlu1 %2476  ;;  %v2561_v31 = vmul.f32 %v4693_v30, %v5586_v47  ;;  %v345_v47 = vld [vmem:[%s5538_s29 + $0xb8] sm:$0xff]  ;;  %v350_v15 = vld [vmem:[%s5538_s29 + $0xe0] sm:$0xff] }
 0x2ed   : > { %4698 = vrcp.f32 %v2477_v24  ;;  %v2471_v55 = vpop.xlane.xlu0 %2470  ;;  %4403 = vmatprep.mubr.msk.f32.mxu1 %vm2228_vm1, %v2563_v25 }
 0x2ee   : > { %4700 = vrcp.f32 %v2471_v55  ;;  %4396 = vmatprep.mubr.msk.f32.mxu0 %vm2228_vm1, %v2561_v31  ;;  %4404 = vmatmul.mubr.msk.f32.vlgmr.msra.gmra.mxu1 %vm2228_vm1, %v2564_v45 }
 0x2ef   : > { %4397 = vmatmul.mubr.msk.f32.vlgmr.msra.gmra.mxu0 %vm2228_vm1, %v2562_v9  ;;  %4414 = vmatpush3.msra.mxu1 %v341_v34 }
 0x2f0   : > { %4407 = vmatpush3.msra.mxu0 %v339_v3  ;;  %4415 = vmatprep.subr.mxu1 %v340_v52 }
 0x2f1   : > { %4408 = vmatprep.subr.mxu0 %v338_v46  ;;  %4416 = vmatpush3.msra.mxu1 %v340_v52 }
 0x2f2   : > { %4409 = vmatpush3.msra.mxu0 %v338_v46  ;;  %4427 = vmatprep.subr.mxu1 %v345_v47 }
 0x2f3   : > { %4420 = vmatprep.subr.mxu0 %v343_v6 }
 0x2f6   : > { %v4695_v56 = vpop.eup %4694 }
 0x2f7   : > { %v4697_v11 = vpop.eup %4696  ;;  %v2568_v60 = vmul.f32 %v4695_v56, %v5593_v28  ;;  %v347_v28 = vld [vmem:[%s5538_s29 + $0xc8] sm:$0xff] }
 0x2f8   : > { %v2492_v41 = vpop.xlane.xlu1 %2491  ;;  %v2566_v35 = vmul.f32 %v4697_v11, %v5596_v33 }
 0x2f9   : > { %v2486_v54 = vpop.xlane.xlu0 %2485  ;;  %4702 = vrcp.f32 %v2492_v41 }
 0x2fa   : > { %v4699_v44 = vpop.eup %4698  ;;  %4704 = vrcp.f32 %v2486_v54 }
 0x2fb   : > { %v4701_v58 = vpop.eup %4700  ;;  %v2567_v16 = vmul.f32 %v4699_v44, %v5603_v0  ;;  %v342_v0 = vld [vmem:[%s5538_s29 + $0xa0] sm:$0xff] }
 0x2fc   : > { %v2489_v8 = vpop.xlane.xlu1 %2488  ;;  %v2565_v49 = vmul.f32 %v4701_v58, %v5606_v27  ;;  %v349_v27 = vld [vmem:[%s5538_s29 + $0xd8] sm:$0xff] }
 0x2fd   : > { %4706 = vrcp.f32 %v2489_v8  ;;  %v2483_v12 = vpop.xlane.xlu0 %2482  ;;  %4417 = vmatprep.mubr.msk.f32.mxu1 %vm2228_vm1, %v2567_v16 }
 0x2fe   : > { %4708 = vrcp.f32 %v2483_v12  ;;  %4410 = vmatprep.mubr.msk.f32.mxu0 %vm2228_vm1, %v2565_v49  ;;  %4418 = vmatmul.mubr.msk.f32.vlgmr.msra.gmra.mxu1 %vm2228_vm1, %v2568_v60 }
 0x2ff   : > { %4411 = vmatmul.mubr.msk.f32.vlgmr.msra.gmra.mxu0 %vm2228_vm1, %v2566_v35  ;;  %4428 = vmatpush3.msra.mxu1 %v345_v47 }
 0x300   : > { %4421 = vmatpush3.msra.mxu0 %v343_v6  ;;  %4429 = vmatprep.subr.mxu1 %v344_v17 }
 0x301   : > { %4422 = vmatprep.subr.mxu0 %v342_v0  ;;  %4430 = vmatpush3.msra.mxu1 %v344_v17 }
 0x302   : > { %4423 = vmatpush3.msra.mxu0 %v342_v0  ;;  %4441 = vmatprep.subr.mxu1 %v349_v27 }
 0x303   : > { %4434 = vmatprep.subr.mxu0 %v347_v28 }
 0x306   : > { %v4703_v33 = vpop.eup %4702 }
 0x307   : > { %v4705_v23 = vpop.eup %4704  ;;  %v2572_v7 = vmul.f32 %v4703_v33, %v5613_v14  ;;  %v351_v14 = vld [vmem:[%s5538_s29 + $0xe8] sm:$0xff] }
 0x308   : > { %v2504_v50 = vpop.xlane.xlu1 %2503  ;;  %v2570_v38 = vmul.f32 %v4705_v23, %v5616_v4 }
 0x309   : > { %v2498_v2 = vpop.xlane.xlu0 %2497  ;;  %4710 = vrcp.f32 %v2504_v50 }
 0x30a   : > { %v4707_v43 = vpop.eup %4706  ;;  %4712 = vrcp.f32 %v2498_v2 }
 0x30b   : > { %v4709_v48 = vpop.eup %4708  ;;  %v2571_v57 = vmul.f32 %v4707_v43, %v5623_v51  ;;  %v346_v51 = vld [vmem:[%s5538_s29 + $0xc0] sm:$0xff] }
 0x30c   : > { %v2501_v5 = vpop.xlane.xlu1 %2500  ;;  %v2569_v40 = vmul.f32 %v4709_v48, %v5626_v53  ;;  %v353_v53 = vld [vmem:[%s5538_s29 + $0xf8] sm:$0xff] }
 0x30d   : > { %4714 = vrcp.f32 %v2501_v5  ;;  %v2495_v42 = vpop.xlane.xlu0 %2494  ;;  %4431 = vmatprep.mubr.msk.f32.mxu1 %vm2228_vm1, %v2571_v57 }
 0x30e   : > { %4716 = vrcp.f32 %v2495_v42  ;;  %4424 = vmatprep.mubr.msk.f32.mxu0 %vm2228_vm1, %v2569_v40  ;;  %4432 = vmatmul.mubr.msk.f32.vlgmr.msra.gmra.mxu1 %vm2228_vm1, %v2572_v7 }
 0x30f   : > { %4425 = vmatmul.mubr.msk.f32.vlgmr.msra.gmra.mxu0 %vm2228_vm1, %v2570_v38  ;;  %4442 = vmatpush3.msra.mxu1 %v349_v27 }
 0x310   : > { %4435 = vmatpush3.msra.mxu0 %v347_v28  ;;  %4443 = vmatprep.subr.mxu1 %v348_v32 }
 0x311   : > { %4436 = vmatprep.subr.mxu0 %v346_v51  ;;  %4444 = vmatpush3.msra.mxu1 %v348_v32 }
 0x312   : > { %4437 = vmatpush3.msra.mxu0 %v346_v51  ;;  %4455 = vmatprep.subr.mxu1 %v353_v53 }
 0x313   : > { %4448 = vmatprep.subr.mxu0 %v351_v14 }
 0x316   : > { %v4711_v4 = vpop.eup %4710 }
 0x317   : > { %v4713_v39 = vpop.eup %4712  ;;  %v2576_v37 = vmul.f32 %v4711_v4, %v5632_v59 }
 0x318   : > { %v2574_v21 = vmul.f32 %v4713_v39, %v5634_v19 }
 0x31a   : > { %v4715_v62 = vpop.eup %4714  ;;  %v2513_v36 = vpop.xlane.xlu1 %2512 }
 0x31b   : > { %v4717_v20 = vpop.eup %4716  ;;  %4718 = vrcp.f32 %v2513_v36  ;;  %v2507_v22 = vpop.xlane.xlu0 %2506  ;;  %v2575_v34 = vmul.f32 %v4715_v62, %v5642_v63 }
 0x31c   : > { %4720 = vrcp.f32 %v2507_v22  ;;  %v2573_v3 = vmul.f32 %v4717_v20, %v5644_v18 }
 0x31d   : > { %4445 = vmatprep.mubr.msk.f32.mxu1 %vm2228_vm1, %v2575_v34 }
 0x31e   : > { %4438 = vmatprep.mubr.msk.f32.mxu0 %vm2228_vm1, %v2573_v3  ;;  %4446 = vmatmul.mubr.msk.f32.vlgmr.msra.gmra.mxu1 %vm2228_vm1, %v2576_v37  ;;  %v2516_v61 = vpop.xlane.xlu1 %2515 }
 0x31f   : > { %4722 = vrcp.f32 %v2516_v61  ;;  %4439 = vmatmul.mubr.msk.f32.vlgmr.msra.gmra.mxu0 %vm2228_vm1, %v2574_v21  ;;  %v2510_v63 = vpop.xlane.xlu0 %2509  ;;  %4456 = vmatpush3.msra.mxu1 %v353_v53 }
 0x320   : > { %4724 = vrcp.f32 %v2510_v63  ;;  %4449 = vmatpush3.msra.mxu0 %v351_v14  ;;  %4457 = vmatprep.subr.mxu1 %v352_v10 }
 0x321   : > { %4450 = vmatprep.subr.mxu0 %v350_v15  ;;  %4458 = vmatpush3.msra.mxu1 %v352_v10 }
 0x322   : > { %4451 = vmatpush3.msra.mxu0 %v350_v15 }
 0x328   : > { %v4719_v59 = vpop.eup %4718 }
 0x329   : > { %v4721_v19 = vpop.eup %4720  ;;  %v2579_v18 = vmul.f32 %v4719_v59, %v5652_v1 }
 0x32a   : > { %v2577_v30 = vmul.f32 %v4721_v19, %v5654_v13 }
 0x32b   : > { %4459 = vmatprep.mubr.msk.f32.mxu1 %vm2228_vm1, %v2579_v18 }
 0x32c   : > { %v4723_v25 = vpop.eup %4722  ;;  %4452 = vmatprep.mubr.msk.f32.mxu0 %vm2228_vm1, %v2577_v30 }
 0x32d   : > { %v4725_v24 = vpop.eup %4724  ;;  %v2580_v31 = vmul.f32 %v4723_v25, %v5660_v29 }
 0x32e   : > { %v2578_v45 = vmul.f32 %v4725_v24, %v5662_v26 }
 0x32f   : > { %4460 = vmatmul.mubr.msk.f32.vlgmr.msra.gmra.mxu1 %vm2228_vm1, %v2580_v31 }
 0x330   : > { %4453 = vmatmul.mubr.msk.f32.vlgmr.msra.gmra.mxu0 %vm2228_vm1, %v2578_v45 }
 0x37e   : > { %v4363_v1 = vpop.f32.mrf.mxu1 }
 0x37f   : > { %v4356_v13 = vpop.f32.mrf.mxu0  ;;  %3880 = vst.msk [vmem:[%s5764_s6 + $0x18] sm:$0xff] %vm386_vm0, %v4363_v1 }
 0x380   : > { %3878 = vst.msk [vmem:[%s5764_s6 + $0x8] sm:$0xff] %vm386_vm0, %v4356_v13  ;;  %v2734_v29 = vpop.f32.mrf.mxu1 }
 0x381   : > { %v2653_v26 = vpop.f32.mrf.mxu0  ;;  %3879 = vst.msk [vmem:[%s5764_s6 + $0x10] sm:$0xff] %vm386_vm0, %v2734_v29 }
 0x382   : > { %3877 = vst.msk [vmem:[%s5764_s6] sm:$0xff] %vm386_vm0, %v2653_v26 }
 0x38e   : > { %v4377_v55 = vpop.f32.mrf.mxu1 }
 0x38f   : > { %v4370_v9 = vpop.f32.mrf.mxu0  ;;  %3884 = vst.msk [vmem:[%s5764_s6 + $0x38] sm:$0xff] %vm386_vm0, %v4377_v55 }
 0x390   : > { %3882 = vst.msk [vmem:[%s5764_s6 + $0x28] sm:$0xff] %vm386_vm0, %v4370_v9  ;;  %v2896_v52 = vpop.f32.mrf.mxu1 }
 0x391   : > { %v2815_v46 = vpop.f32.mrf.mxu0  ;;  %3883 = vst.msk [vmem:[%s5764_s6 + $0x30] sm:$0xff] %vm386_vm0, %v2896_v52 }
 0x392   : > { %3881 = vst.msk [vmem:[%s5764_s6 + $0x20] sm:$0xff] %vm386_vm0, %v2815_v46 }
 0x39e   : > { %v4391_v47 = vpop.f32.mrf.mxu1 }
 0x39f   : > { %v4384_v6 = vpop.f32.mrf.mxu0  ;;  %3888 = vst.msk [vmem:[%s5764_s6 + $0x58] sm:$0xff] %vm386_vm0, %v4391_v47 }
 0x3a0   : > { %3886 = vst.msk [vmem:[%s5764_s6 + $0x48] sm:$0xff] %vm386_vm0, %v4384_v6  ;;  %v3058_v56 = vpop.f32.mrf.mxu1 }
 0x3a1   : > { %v2977_v41 = vpop.f32.mrf.mxu0  ;;  %3887 = vst.msk [vmem:[%s5764_s6 + $0x50] sm:$0xff] %vm386_vm0, %v3058_v56 }
 0x3a2   : > { %3885 = vst.msk [vmem:[%s5764_s6 + $0x40] sm:$0xff] %vm386_vm0, %v2977_v41 }
 0x3ae   : > { %v4405_v11 = vpop.f32.mrf.mxu1 }
 0x3af   : > { %v4398_v54 = vpop.f32.mrf.mxu0  ;;  %3892 = vst.msk [vmem:[%s5764_s6 + $0x78] sm:$0xff] %vm386_vm0, %v4405_v11 }
 0x3b0   : > { %3890 = vst.msk [vmem:[%s5764_s6 + $0x68] sm:$0xff] %vm386_vm0, %v4398_v54  ;;  %v3220_v44 = vpop.f32.mrf.mxu1 }
 0x3b1   : > { %v3139_v58 = vpop.f32.mrf.mxu0  ;;  %3891 = vst.msk [vmem:[%s5764_s6 + $0x70] sm:$0xff] %vm386_vm0, %v3220_v44 }
 0x3b2   : > { %3889 = vst.msk [vmem:[%s5764_s6 + $0x60] sm:$0xff] %vm386_vm0, %v3139_v58 }
 0x3be   : > { %v4419_v16 = vpop.f32.mrf.mxu1 }
 0x3bf   : > { %v4412_v8 = vpop.f32.mrf.mxu0  ;;  %3896 = vst.msk [vmem:[%s5764_s6 + $0x98] sm:$0xff] %vm386_vm0, %v4419_v16 }
 0x3c0   : > { %3894 = vst.msk [vmem:[%s5764_s6 + $0x88] sm:$0xff] %vm386_vm0, %v4412_v8  ;;  %v3382_v49 = vpop.f32.mrf.mxu1 }
 0x3c1   : > { %v3301_v60 = vpop.f32.mrf.mxu0  ;;  %3895 = vst.msk [vmem:[%s5764_s6 + $0x90] sm:$0xff] %vm386_vm0, %v3382_v49 }
 0x3c2   : > { %3893 = vst.msk [vmem:[%s5764_s6 + $0x80] sm:$0xff] %vm386_vm0, %v3301_v60 }
 0x3ce   : > { %v4433_v12 = vpop.f32.mrf.mxu1 }
 0x3cf   : > { %v4426_v35 = vpop.f32.mrf.mxu0  ;;  %3900 = vst.msk [vmem:[%s5764_s6 + $0xb8] sm:$0xff] %vm386_vm0, %v4433_v12 }
 0x3d0   : > { %3898 = vst.msk [vmem:[%s5764_s6 + $0xa8] sm:$0xff] %vm386_vm0, %v4426_v35  ;;  %v3544_v17 = vpop.f32.mrf.mxu1 }
 0x3d1   : > { %v3463_v0 = vpop.f32.mrf.mxu0  ;;  %3899 = vst.msk [vmem:[%s5764_s6 + $0xb0] sm:$0xff] %vm386_vm0, %v3544_v17 }
 0x3d2   : > { %3897 = vst.msk [vmem:[%s5764_s6 + $0xa0] sm:$0xff] %vm386_vm0, %v3463_v0 }
 0x3de   : > { %v4447_v27 = vpop.f32.mrf.mxu1 }
 0x3df   : > { %v4440_v28 = vpop.f32.mrf.mxu0  ;;  %3904 = vst.msk [vmem:[%s5764_s6 + $0xd8] sm:$0xff] %vm386_vm0, %v4447_v27 }
 0x3e0   : > { %3902 = vst.msk [vmem:[%s5764_s6 + $0xc8] sm:$0xff] %vm386_vm0, %v4440_v28  ;;  %v3706_v33 = vpop.f32.mrf.mxu1 }
 0x3e1   : > { %v3625_v50 = vpop.f32.mrf.mxu0  ;;  %3903 = vst.msk [vmem:[%s5764_s6 + $0xd0] sm:$0xff] %vm386_vm0, %v3706_v33 }
 0x3e2   : > { %3901 = vst.msk [vmem:[%s5764_s6 + $0xc0] sm:$0xff] %vm386_vm0, %v3625_v50 }
 0x3ef   : > { %v4461_v23 = vpop.f32.mrf.mxu1 }
 0x3f0   : > { %v4454_v2 = vpop.f32.mrf.mxu0  ;;  %3908 = vst.msk [vmem:[%s5764_s6 + $0xf8] sm:$0xff] %vm386_vm0, %v4461_v23 }
 0x3f1   : > { %3906 = vst.msk [vmem:[%s5764_s6 + $0xe8] sm:$0xff] %vm386_vm0, %v4454_v2  ;;  %v3868_v43 = vpop.f32.mrf.mxu1 }
 0x3f2   : > { %v3787_v48 = vpop.f32.mrf.mxu0  ;;  %3907 = vst.msk [vmem:[%s5764_s6 + $0xf0] sm:$0xff] %vm386_vm0, %v3868_v43 }
 0x3f3   : > { %3905 = vst.msk [vmem:[%s5764_s6 + $0xe0] sm:$0xff] %vm386_vm0, %v3787_v48 }
 0x3f4 PF: > { %s15_s17 = sadd.s32 1, %s4732_s17  }
 0x3f5   : > { %p12_p4 = scmp.ge.s32.totalorder %s15_s17, 4  }
 0x3f7   :  { %14 = sbr.rel (!%p12_p4) target bundleno = 2 (0x2), region = 72 }

// kernel: next_attention_z.6
= control target key start
LH: loop header
LB: loop body
LE: loop exit
PB: predicated region body
PF: predicated region fallthrough
CT: control target
= control target key end

     0   :  { %s8892_s30 = smov 0   ;;  %s13237_s0 = inlined_call_operand.vmem [shape: f32[2,4,256], index: 0, kind: input, shape index: {}]   ;;  %s13238_s1 = inlined_call_operand.vmem [shape: f32[12,4], index: 1, kind: input, shape index: {}]   ;;  %s13239_s2 = inlined_call_operand.vmem [shape: f32[12,1], index: 2, kind: input, shape index: {}]   ;;  %s13240_s3 = inlined_call_operand.vmem [shape: f32[12,9], index: 3, kind: input, shape index: {}]   ;;  %s13241_s4 = inlined_call_operand.vmem [shape: f32[12,1], index: 4, kind: input, shape index: {}]   ;;  %s13242_s5 = inlined_call_operand.vmem [shape: f32[12,9], index: 5, kind: input, shape index: {}]   ;;  %s13243_s6 = inlined_call_operand.vmem [shape: f32[12,1], index: 6, kind: input, shape index: {}]   ;;  %s13244_s7 = inlined_call_operand.vmem [shape: f32[2,4,16,16], index: 7, kind: output, shape index: {0}]   ;;  %s13245_s8 = inlined_call_operand.vmem [shape: f32[2,4,16,16], index: 8, kind: output, shape index: {1}]   ;;  %s13246_s9 = inlined_call_operand.vmem [shape: f32[2,4,16,16], index: 9, kind: output, shape index: {2}]  }
   0x1 LB: > { %s8582_s10 = sadd.s32 4294967295, %s8819_s30   ;;  %p8586_p0 = scmp.ge.s32.totalorder %s8819_s30, 1  ;;  %s8819_s30 = sphi %s8892_s30, %s20_s30  }
   0x2   : > { %p292_p1 = scmp.lt.s32.totalorder %s8819_s30, 3 }
   0x4   : > { %p293_p2 = pnand %p8586_p0, %p292_p1 }
   0x6   : > { %296 = sbr.rel (%p293_p2) target bundleno = 3201 (0xc81), region = 48 }
   0xb   : > { %p338_p3 = scmp.lt.s32.totalorder %s8582_s10, 1  ;;  %v8821_v0 = vmov 0.0   ;;  %v361_v1 = vld [vmem:[%s13239_s2] sm:$0xff]  ;;  %v13253_v2 = vmov 0   ;;  %v362_v3 = vld [vmem:[%s13239_s2 + $0x8] sm:$0xf]  ;;  %v508_v10 = vlaneseq }
   0xc   : > { %451 = vmatprep.mubr.f32.mxu0 %v8821_v0  ;;  %457 = vmatprep.mubr.f32.mxu1 %v8821_v0  ;;  %vm382_vm0 = vcmask 1043456   ;;  %v358_v6 = vld [vmem:[%s13238_s1] sm:$0xff]  ;;  %vm375_vm1 = vcmask 31744   ;;  %v359_v7 = vld [vmem:[%s13238_s1 + $0x8] sm:$0xf]  ;;  %vm464_vm2 = vcmask 146432  }
   0xd   : > { %s14100_s10 = smov (!%p338_p3, %s8582_s10), 1  ;;  %8656 = vset.pattern.permute.xlu0 %v13253_v2  ;;  %8657 = vset.pattern.permute.xlu1 %v13253_v2  ;;  %v8823_v8 = vmov 1966171168   ;;  %v509_v13 = vshrl.u32 %v508_v10, 7  ;;  %490 = vst.msk [vmem:[#allocation2 + $0xc0] sm:$0xff] %vm464_vm2, %v8821_v0  ;;  %465 = vst.msk [vmem:[#allocation2] sm:$0xff] %vm464_vm2, %v8821_v0 }
   0xe   : > { %365 = vperm.xlu0 %8656, %v361_v1   ;;  %s8621_s13 = sshll.u32 %s14100_s10, 3  ;;  %v506_v9 = vunpack.c.l.s4 %v8823_v8  ;;  %466 = vst.msk [vmem:[#allocation2 + $0x8] sm:$0xff] %vm464_vm2, %v8821_v0  ;;  %469 = vst.msk [vmem:[#allocation2 + $0x18] sm:$0xff] %vm464_vm2, %v8821_v0  ;;  %s8824_s23 = smov 1   ;;  %vm661_vm3 = vcmask 131080   ;;  %vm467_vm4 = vcmask 140288  }
   0xf   : > { %s342_s18 = scalar_lea.vmem %s13237_s0, %s8621_s13  ;;  %470 = vst.msk [vmem:[#allocation2 + $0x20] sm:$0xff] %vm464_vm2, %v8821_v0  ;;  %472 = vst.msk [vmem:[#allocation2 + $0x30] sm:$0xff] %vm464_vm2, %v8821_v0  ;;  %v8980_v22 = vsub.s32 0, %v509_v13  ;;  %s8825_s24 = smov 113   ;;  %vm2653_vm5 = vcmask 1046528   ;;  %vm3809_vm6 = vcmask 1045504  }
  0x10   : > { %v360_v4 = vld [vmem:[%s342_s18] sm:$0xff]  ;;  %v507_v12 = vunpack.c.0.s8 %v506_v9  ;;  %473 = vst.msk [vmem:[#allocation2 + $0x38] sm:$0xff] %vm464_vm2, %v8821_v0  ;;  %475 = vst.msk [vmem:[#allocation2 + $0x48] sm:$0xff] %vm464_vm2, %v8821_v0  ;;  %s8826_s25 = smov 97   ;;  %s8827_s26 = smov 81   ;;  %vm5013_vm7 = vcmask 138248  }
  0x11   : > { %v374_v5 = vcombine.high %v360_v4, %v360_v4  ;;  %476 = vst.msk [vmem:[#allocation2 + $0x50] sm:$0xff] %vm464_vm2, %v8821_v0  ;;  %478 = vst.msk [vmem:[#allocation2 + $0x60] sm:$0xff] %vm464_vm2, %v8821_v0  ;;  %s8828_s27 = smov 65   ;;  %s8829_s28 = smov 49   ;;  %vm8436_vm8 = vcmask 130048  }
  0x12   : > { %370 = vperm.xlu0 %8656, %v362_v3   ;;  %479 = vst.msk [vmem:[#allocation2 + $0x68] sm:$0xff] %vm464_vm2, %v8821_v0  ;;  %481 = vst.msk [vmem:[#allocation2 + $0x78] sm:$0xff] %vm464_vm2, %v8821_v0  ;;  %v8974_v15 = vsub.s32 %v507_v12, %v509_v13  ;;  %s8830_s29 = smov 33   ;;  %s8831_s11 = smov 17  }
  0x13   : > { %8595 = vmatprep.subr.msk.mxu0 %vm382_vm0, %v374_v5  ;;  %8625 = vmatprep.subr.msk.mxu1 %vm382_vm0, %v374_v5  ;;  %482 = vst.msk [vmem:[#allocation2 + $0x80] sm:$0xff] %vm464_vm2, %v8821_v0  ;;  %484 = vst.msk [vmem:[#allocation2 + $0x90] sm:$0xff] %vm464_vm2, %v8821_v0  ;;  %s8834_s16 = smov 127   ;;  %s8836_s17 = smov 126  }
  0x14   : > { %8596 = vmatpush1.msk.msra.mxu0 %vm382_vm0, %v360_v4  ;;  %8626 = vmatpush1.msk.msra.mxu1 %vm382_vm0, %v360_v4  ;;  %485 = vst.msk [vmem:[#allocation2 + $0x98] sm:$0xff] %vm464_vm2, %v8821_v0  ;;  %487 = vst.msk [vmem:[#allocation2 + $0xa8] sm:$0xff] %vm464_vm2, %v8821_v0 }
  0x15   : > { %8597 = vmatmul.mubr.msk.f32.vlgmr.msra.gmra.mxu0 %vm375_vm1, %v358_v6  ;;  %8598 = vmatmul.mubr.msk.f32.vlgmr.msra.gmra.mxu1 %vm375_vm1, %v359_v7  ;;  %488 = vst.msk [vmem:[#allocation2 + $0xb0] sm:$0xff] %vm464_vm2, %v8821_v0  ;;  %491 = vst.msk [vmem:[#allocation2 + $0xc8] sm:$0xff] %vm464_vm2, %v8821_v0 }
  0x16   : > { %493 = vst.msk [vmem:[#allocation2 + $0xd8] sm:$0xff] %vm464_vm2, %v8821_v0  ;;  %494 = vst.msk [vmem:[#allocation2 + $0xe0] sm:$0xff] %vm464_vm2, %v8821_v0 }
  0x17   : > { %496 = vst.msk [vmem:[#allocation2 + $0xf0] sm:$0xff] %vm464_vm2, %v8821_v0  ;;  %497 = vst.msk [vmem:[#allocation2 + $0xf8] sm:$0xff] %vm464_vm2, %v8821_v0 }
  0x18   : > { %499 = vst.msk [vmem:[#allocation2 + $0x108] sm:$0xff] %vm464_vm2, %v8821_v0  ;;  %500 = vst.msk [vmem:[#allocation2 + $0x110] sm:$0xff] %vm464_vm2, %v8821_v0 }
  0x19   : > { %13367 = vst [vmem:[#allocation3_spill] sm:$0xff] %v8974_v15  ;;  %13368 = vst [vmem:[#allocation4_spill] sm:$0xff] %v8980_v22 }
  0x1a   : > { %468 = vst.msk [vmem:[#allocation2 + $0x10] sm:$0x3] %vm467_vm4, %v8821_v0  ;;  %471 = vst.msk [vmem:[#allocation2 + $0x28] sm:$0x3] %vm467_vm4, %v8821_v0 }
  0x1b   : > { %474 = vst.msk [vmem:[#allocation2 + $0x40] sm:$0x3] %vm467_vm4, %v8821_v0  ;;  %477 = vst.msk [vmem:[#allocation2 + $0x58] sm:$0x3] %vm467_vm4, %v8821_v0 }
  0x1c   : > { %480 = vst.msk [vmem:[#allocation2 + $0x70] sm:$0x3] %vm467_vm4, %v8821_v0  ;;  %483 = vst.msk [vmem:[#allocation2 + $0x88] sm:$0x3] %vm467_vm4, %v8821_v0 }
  0x1d   : > { %486 = vst.msk [vmem:[#allocation2 + $0xa0] sm:$0x3] %vm467_vm4, %v8821_v0  ;;  %489 = vst.msk [vmem:[#allocation2 + $0xb8] sm:$0x3] %vm467_vm4, %v8821_v0 }
  0x1e   : > { %492 = vst.msk [vmem:[#allocation2 + $0xd0] sm:$0x3] %vm467_vm4, %v8821_v0  ;;  %495 = vst.msk [vmem:[#allocation2 + $0xe8] sm:$0x3] %vm467_vm4, %v8821_v0 }
  0x1f   : > { %498 = vst.msk [vmem:[#allocation2 + $0x100] sm:$0x3] %vm467_vm4, %v8821_v0  ;;  %501 = vst.msk [vmem:[#allocation2 + $0x118] sm:$0x3] %vm467_vm4, %v8821_v0 }
  0x89   : > { %v8922_v11 = vpop.permute.xlu0 %365 }
  0x8d   : > { %v8972_v14 = vpop.permute.xlu0 %370 }
  0xd5   : > { %v453_v16 = vpop.f32.mrf.mxu0  ;;  %v459_v17 = vpop.f32.mrf.mxu1 }
  0xd6   : > { %v454_v18 = vadd.f32 %v453_v16, %v8922_v11  ;;  %v460_v19 = vadd.f32 %v459_v17, %v8972_v14 }
  0xd7   : > { %v455_v61 = vpop.f32.mrf.mxu0  ;;  %v461_v3 = vpop.f32.mrf.mxu1 }
  0xd8   : > { %v511_v20 = vrot.slane %v454_v18, %v8974_v15  ;;  %v559_v21 = vrot.slane %v460_v19, %v8974_v15  ;;  %v504_v33 = vcombine.high %v454_v18, %v454_v18  ;;  %v9144_v63 = vadd.f32 %v455_v61, %v8922_v11 }
  0xd9   : > { %v462_v6 = vadd.f32 %v461_v3, %v8972_v14 }
  0xda   : > { %v519_v23 = vcombine.high %v511_v20, %v511_v20  ;;  %v527_v24 = vrot.slane %v511_v20, %v8974_v15  ;;  %v567_v25 = vrot.slane %v559_v21, %v8974_v15  ;;  %v560_v29 = vcombine.high %v559_v21, %v559_v21 }
  0xdb   : > { %v518_v34 = vrot.slane %v504_v33, %v8974_v15  ;;  %v1019_v5 = vrot.slane %v9144_v63, %v8974_v15  ;;  %v1067_v10 = vrot.slane %v462_v6, %v8974_v15 }
  0xdc   : > { %v580_v26 = vrot.slane %v527_v24, %v8980_v22  ;;  %v612_v27 = vrot.slane %v567_v25, %v8980_v22  ;;  %v541_v28 = vrot.slane %v519_v23, %v8974_v15  ;;  %v574_v31 = vrot.slane %v560_v29, %v8974_v15 }
  0xdd   : > { %v549_v35 = vcombine.high %v527_v24, %v527_v24  ;;  %v9022_v36 = vrot.slane %v518_v34, %v8974_v15  ;;  %v575_v39 = vcombine.high %v567_v25, %v567_v25  ;;  %v520_v40 = vcombine.high %v518_v34, %v518_v34 }
  0xde   : > { %641 = vrot.lane.b32.xlu0 %v612_v27, %s8824_s23  ;;  %625 = vrot.lane.b32.xlu1 %v580_v26, %s8824_s23  ;;  %v584_v30 = vrot.slane %v541_v28, %v8980_v22  ;;  %v616_v32 = vrot.slane %v574_v31, %v8980_v22  ;;  %v551_v41 = vcombine.high %v541_v28, %v541_v28 }
  0xdf   : > { %v9025_v37 = vrot.slane %v549_v35, %v8980_v22  ;;  %v9032_v38 = vrot.slane %v9022_v36, %v8980_v22  ;;  %v9038_v42 = vrot.slane %v575_v39, %v8980_v22  ;;  %v9041_v43 = vrot.slane %v520_v40, %v8974_v15 }
  0xe0   : > { %v9044_v44 = vrot.slane %v551_v41, %v8980_v22  ;;  %v576_v46 = vcombine.high %v574_v31, %v574_v31  ;;  %v9162_v9 = vrot.slane %v1019_v5, %v8974_v15  ;;  %v9176_v14 = vrot.slane %v1067_v10, %v8974_v15 }
  0xe1   : > { %v9052_v45 = vrot.slane %v9041_v43, %v8980_v22  ;;  %v1027_v17 = vcombine.high %v1019_v5, %v1019_v5  ;;  %v550_v19 = vcombine.high %v9022_v36, %v9022_v36  ;;  %v1068_v24 = vcombine.high %v1067_v10, %v1067_v10 }
  0xe2   : > { %674 = vrot.lane.b32.xlu0 %v580_v26, %s8825_s24  ;;  %627 = vrot.lane.b32.xlu1 %v584_v30, %s8824_s23  ;;  %v9059_v47 = vrot.slane %v576_v46, %v8980_v22  ;;  %v9173_v13 = vrot.slane %v9162_v9, %v8980_v22  ;;  %v9188_v20 = vrot.slane %v9176_v14, %v8980_v22 }
  0xe3   : > { %v9191_v23 = vrot.slane %v1027_v17, %v8974_v15  ;;  %v9205_v29 = vrot.slane %v1068_v24, %v8974_v15 }
  0xe5   : > { %v9202_v28 = vrot.slane %v9191_v23, %v8980_v22  ;;  %v9216_v33 = vrot.slane %v9205_v29, %v8980_v22  ;;  %v1084_v10 = vcombine.high %v9205_v29, %v9205_v29 }
  0xe6   : > { %690 = vrot.lane.b32.xlu0 %v612_v27, %s8825_s24  ;;  %643 = vrot.lane.b32.xlu1 %v616_v32, %s8824_s23 }
  0xea   : > { %722 = vrot.lane.b32.xlu0 %v580_v26, %s8826_s25  ;;  %676 = vrot.lane.b32.xlu1 %v584_v30, %s8825_s24 }
  0xee   : > { %738 = vrot.lane.b32.xlu0 %v612_v27, %s8826_s25  ;;  %692 = vrot.lane.b32.xlu1 %v616_v32, %s8825_s24 }
  0xf2   : > { %770 = vrot.lane.b32.xlu0 %v580_v26, %s8827_s26  ;;  %724 = vrot.lane.b32.xlu1 %v584_v30, %s8826_s25 }
  0xf6   : > { %786 = vrot.lane.b32.xlu0 %v612_v27, %s8827_s26  ;;  %740 = vrot.lane.b32.xlu1 %v616_v32, %s8826_s25 }
  0xfa   : > { %818 = vrot.lane.b32.xlu0 %v580_v26, %s8828_s27  ;;  %772 = vrot.lane.b32.xlu1 %v584_v30, %s8827_s26 }
  0xfe   : > { %834 = vrot.lane.b32.xlu0 %v612_v27, %s8828_s27  ;;  %788 = vrot.lane.b32.xlu1 %v616_v32, %s8827_s26 }
 0x102   : > { %866 = vrot.lane.b32.xlu0 %v580_v26, %s8829_s28  ;;  %820 = vrot.lane.b32.xlu1 %v584_v30, %s8828_s27 }
 0x106   : > { %882 = vrot.lane.b32.xlu0 %v612_v27, %s8829_s28  ;;  %836 = vrot.lane.b32.xlu1 %v616_v32, %s8828_s27 }
 0x10a   : > { %914 = vrot.lane.b32.xlu0 %v580_v26, %s8830_s29  ;;  %868 = vrot.lane.b32.xlu1 %v584_v30, %s8829_s28 }
 0x10e   : > { %930 = vrot.lane.b32.xlu0 %v612_v27, %s8830_s29  ;;  %884 = vrot.lane.b32.xlu1 %v616_v32, %s8829_s28 }
 0x112   : > { %962 = vrot.lane.b32.xlu0 %v580_v26, %s8831_s11  ;;  %916 = vrot.lane.b32.xlu1 %v584_v30, %s8830_s29  ;;  %v604_v26 = vrot.slane %v550_v19, %v8980_v22 }
 0x116   : > { %978 = vrot.lane.b32.xlu0 %v612_v27, %s8831_s11  ;;  %932 = vrot.lane.b32.xlu1 %v616_v32, %s8830_s29 }
 0x11a   : > { %629 = vrot.lane.b32.xlu0 %v9025_v37, %s8824_s23  ;;  %964 = vrot.lane.b32.xlu1 %v584_v30, %s8831_s11 }
 0x11e   : > { %633 = vrot.lane.b32.xlu0 %v9032_v38, %s8824_s23  ;;  %980 = vrot.lane.b32.xlu1 %v616_v32, %s8831_s11  ;;  %v552_v32 = vcombine.high %v9041_v43, %v9041_v43 }
 0x120   : > { %v608_v36 = vrot.slane %v552_v32, %v8980_v22 }
 0x122   : > { %645 = vrot.lane.b32.xlu0 %v9038_v42, %s8824_s23  ;;  %631 = vrot.lane.b32.xlu1 %v9044_v44, %s8824_s23 }
 0x126   : > { %678 = vrot.lane.b32.xlu0 %v9025_v37, %s8825_s24  ;;  %635 = vrot.lane.b32.xlu1 %v9052_v45, %s8824_s23 }
 0x12a   : > { %682 = vrot.lane.b32.xlu0 %v9032_v38, %s8825_s24  ;;  %647 = vrot.lane.b32.xlu1 %v9059_v47, %s8824_s23 }
 0x12e   : > { %694 = vrot.lane.b32.xlu0 %v9038_v42, %s8825_s24  ;;  %680 = vrot.lane.b32.xlu1 %v9044_v44, %s8825_s24 }
 0x132   : > { %726 = vrot.lane.b32.xlu0 %v9025_v37, %s8826_s25  ;;  %684 = vrot.lane.b32.xlu1 %v9052_v45, %s8825_s24 }
 0x136   : > { %730 = vrot.lane.b32.xlu0 %v9032_v38, %s8826_s25  ;;  %696 = vrot.lane.b32.xlu1 %v9059_v47, %s8825_s24 }
 0x13a   : > { %742 = vrot.lane.b32.xlu0 %v9038_v42, %s8826_s25  ;;  %728 = vrot.lane.b32.xlu1 %v9044_v44, %s8826_s25 }
 0x13e   : > { %774 = vrot.lane.b32.xlu0 %v9025_v37, %s8827_s26  ;;  %732 = vrot.lane.b32.xlu1 %v9052_v45, %s8826_s25 }
 0x142   : > { %778 = vrot.lane.b32.xlu0 %v9032_v38, %s8827_s26  ;;  %744 = vrot.lane.b32.xlu1 %v9059_v47, %s8826_s25 }
 0x146   : > { %790 = vrot.lane.b32.xlu0 %v9038_v42, %s8827_s26  ;;  %776 = vrot.lane.b32.xlu1 %v9044_v44, %s8827_s26 }
 0x14a   : > { %822 = vrot.lane.b32.xlu0 %v9025_v37, %s8828_s27  ;;  %780 = vrot.lane.b32.xlu1 %v9052_v45, %s8827_s26 }
 0x14e   : > { %826 = vrot.lane.b32.xlu0 %v9032_v38, %s8828_s27  ;;  %792 = vrot.lane.b32.xlu1 %v9059_v47, %s8827_s26 }
 0x150   : > { %v642_v48 = vpop.permute.xlu0 %641  ;;  %v626_v49 = vpop.permute.xlu1 %625 }
 0x151   : > { %670 = vst.msk [vmem:[#allocation2 + $0xc1] sm:$0x1] %vm661_vm3, %v642_v48  ;;  %662 = vst.msk [vmem:[#allocation2 + $0x1] sm:$0x1] %vm661_vm3, %v626_v49  ;;  %v1057_v48 = vcombine.high %v9162_v9, %v9162_v9 }
 0x152   : > { %838 = vrot.lane.b32.xlu0 %v9038_v42, %s8828_s27  ;;  %824 = vrot.lane.b32.xlu1 %v9044_v44, %s8828_s27 }
 0x154   : > { %v675_v50 = vpop.permute.xlu0 %674  ;;  %v628_v51 = vpop.permute.xlu1 %627 }
 0x155   : > { %710 = vst.msk [vmem:[#allocation2 + $0x2] sm:$0x1] %vm661_vm3, %v675_v50  ;;  %663 = vst.msk [vmem:[#allocation2 + $0x19] sm:$0x1] %vm661_vm3, %v628_v51 }
 0x156   : > { %870 = vrot.lane.b32.xlu0 %v9025_v37, %s8829_s28  ;;  %828 = vrot.lane.b32.xlu1 %v9052_v45, %s8828_s27 }
 0x158   : > { %v691_v52 = vpop.permute.xlu0 %690  ;;  %v644_v53 = vpop.permute.xlu1 %643 }
 0x159   : > { %718 = vst.msk [vmem:[#allocation2 + $0xc2] sm:$0x1] %vm661_vm3, %v691_v52  ;;  %671 = vst.msk [vmem:[#allocation2 + $0xd9] sm:$0x1] %vm661_vm3, %v644_v53  ;;  %v9255_v52 = vrot.slane %v1057_v48, %v8980_v22 }
 0x15a   : > { %874 = vrot.lane.b32.xlu0 %v9032_v38, %s8829_s28  ;;  %840 = vrot.lane.b32.xlu1 %v9059_v47, %s8828_s27 }
 0x15c   : > { %v723_v54 = vpop.permute.xlu0 %722  ;;  %v677_v55 = vpop.permute.xlu1 %676 }
 0x15d   : > { %758 = vst.msk [vmem:[#allocation2 + $0x3] sm:$0x1] %vm661_vm3, %v723_v54  ;;  %711 = vst.msk [vmem:[#allocation2 + $0x1a] sm:$0x1] %vm661_vm3, %v677_v55 }
 0x15e   : > { %886 = vrot.lane.b32.xlu0 %v9038_v42, %s8829_s28  ;;  %872 = vrot.lane.b32.xlu1 %v9044_v44, %s8829_s28 }
 0x160   : > { %v739_v56 = vpop.permute.xlu0 %738  ;;  %v693_v57 = vpop.permute.xlu1 %692 }
 0x161   : > { %766 = vst.msk [vmem:[#allocation2 + $0xc3] sm:$0x1] %vm661_vm3, %v739_v56  ;;  %719 = vst.msk [vmem:[#allocation2 + $0xda] sm:$0x1] %vm661_vm3, %v693_v57  ;;  %v1083_v56 = vcombine.high %v9176_v14, %v9176_v14 }
 0x162   : > { %918 = vrot.lane.b32.xlu0 %v9025_v37, %s8830_s29  ;;  %876 = vrot.lane.b32.xlu1 %v9052_v45, %s8829_s28 }
 0x164   : > { %v771_v58 = vpop.permute.xlu0 %770  ;;  %v725_v59 = vpop.permute.xlu1 %724 }
 0x165   : > { %806 = vst.msk [vmem:[#allocation2 + $0x4] sm:$0x1] %vm661_vm3, %v771_v58  ;;  %759 = vst.msk [vmem:[#allocation2 + $0x1b] sm:$0x1] %vm661_vm3, %v725_v59  ;;  %v1059_v59 = vcombine.high %v9191_v23, %v9191_v23 }
 0x166   : > { %922 = vrot.lane.b32.xlu0 %v9032_v38, %s8830_s29  ;;  %888 = vrot.lane.b32.xlu1 %v9059_v47, %s8829_s28 }
 0x167   : > { %v9279_v3 = vrot.slane %v1059_v59, %v8980_v22 }
 0x168   : > { %v787_v60 = vpop.permute.xlu0 %786  ;;  %v741_v62 = vpop.permute.xlu1 %740 }
 0x169   : > { %814 = vst.msk [vmem:[#allocation2 + $0xc4] sm:$0x1] %vm661_vm3, %v787_v60  ;;  %767 = vst.msk [vmem:[#allocation2 + $0xdb] sm:$0x1] %vm661_vm3, %v741_v62  ;;  %v9275_v62 = vrot.slane %v1083_v56, %v8980_v22 }
 0x16a   : > { %934 = vrot.lane.b32.xlu0 %v9038_v42, %s8830_s29  ;;  %920 = vrot.lane.b32.xlu1 %v9044_v44, %s8830_s29 }
 0x16c   : > { %v819_v1 = vpop.permute.xlu0 %818  ;;  %v773_v4 = vpop.permute.xlu1 %772 }
 0x16d   : > { %854 = vst.msk [vmem:[#allocation2 + $0x5] sm:$0x1] %vm661_vm3, %v819_v1  ;;  %807 = vst.msk [vmem:[#allocation2 + $0x1c] sm:$0x1] %vm661_vm3, %v773_v4 }
 0x16e   : > { %966 = vrot.lane.b32.xlu0 %v9025_v37, %s8831_s11  ;;  %924 = vrot.lane.b32.xlu1 %v9052_v45, %s8830_s29 }
 0x170   : > { %v835_v7 = vpop.permute.xlu0 %834  ;;  %v789_v8 = vpop.permute.xlu1 %788 }
 0x171   : > { %862 = vst.msk [vmem:[#allocation2 + $0xc5] sm:$0x1] %vm661_vm3, %v835_v7  ;;  %815 = vst.msk [vmem:[#allocation2 + $0xdc] sm:$0x1] %vm661_vm3, %v789_v8 }
 0x172   : > { %970 = vrot.lane.b32.xlu0 %v9032_v38, %s8831_s11  ;;  %936 = vrot.lane.b32.xlu1 %v9059_v47, %s8830_s29 }
 0x174   : > { %v867_v11 = vpop.permute.xlu0 %866  ;;  %v821_v12 = vpop.permute.xlu1 %820 }
 0x175   : > { %902 = vst.msk [vmem:[#allocation2 + $0x6] sm:$0x1] %vm661_vm3, %v867_v11  ;;  %855 = vst.msk [vmem:[#allocation2 + $0x1d] sm:$0x1] %vm661_vm3, %v821_v12 }
 0x176   : > { %982 = vrot.lane.b32.xlu0 %v9038_v42, %s8831_s11  ;;  %968 = vrot.lane.b32.xlu1 %v9044_v44, %s8831_s11  ;;  %v1012_v44 = vcombine.high %v9144_v63, %v9144_v63 }
 0x178   : > { %v883_v16 = vpop.permute.xlu0 %882  ;;  %v837_v18 = vpop.permute.xlu1 %836 }
 0x179   : > { %910 = vst.msk [vmem:[#allocation2 + $0xc6] sm:$0x1] %vm661_vm3, %v883_v16  ;;  %863 = vst.msk [vmem:[#allocation2 + $0xdd] sm:$0x1] %vm661_vm3, %v837_v18  ;;  %v9308_v16 = vrot.slane %v1084_v10, %v8980_v22 }
 0x17a   : > { %1133 = vrot.lane.b32.xlu0 %v9173_v13, %s8824_s23  ;;  %972 = vrot.lane.b32.xlu1 %v9052_v45, %s8831_s11 }
 0x17c   : > { %v915_v21 = vpop.permute.xlu0 %914  ;;  %v869_v25 = vpop.permute.xlu1 %868 }
 0x17d   : > { %950 = vst.msk [vmem:[#allocation2 + $0x7] sm:$0x1] %vm661_vm3, %v915_v21  ;;  %903 = vst.msk [vmem:[#allocation2 + $0x1e] sm:$0x1] %vm661_vm3, %v869_v25 }
 0x17e   : > { %1149 = vrot.lane.b32.xlu0 %v9188_v20, %s8824_s23  ;;  %984 = vrot.lane.b32.xlu1 %v9059_v47, %s8831_s11  ;;  %v1026_v47 = vrot.slane %v1012_v44, %v8974_v15 }
 0x180   : > { %v931_v27 = vpop.permute.xlu0 %930  ;;  %v885_v30 = vpop.permute.xlu1 %884  ;;  %v1042_v51 = vrot.slane %v1026_v47, %v8974_v15  ;;  %v1028_v58 = vcombine.high %v1026_v47, %v1026_v47 }
 0x181   : > { %958 = vst.msk [vmem:[#allocation2 + $0xc7] sm:$0x1] %vm661_vm3, %v931_v27  ;;  %911 = vst.msk [vmem:[#allocation2 + $0xde] sm:$0x1] %vm661_vm3, %v885_v30 }
 0x182   : > { %637 = vrot.lane.b32.xlu0 %v604_v26, %s8824_s23  ;;  %1135 = vrot.lane.b32.xlu1 %v9202_v28, %s8824_s23  ;;  %v9263_v55 = vrot.slane %v1042_v51, %v8980_v22  ;;  %v1058_v61 = vcombine.high %v1042_v51, %v1042_v51  ;;  %v1056_v1 = vrot.slane %v1028_v58, %v8974_v15 }
 0x184   : > { %v963_v31 = vpop.permute.xlu0 %962  ;;  %v917_v34 = vpop.permute.xlu1 %916  ;;  %v9288_v5 = vrot.slane %v1058_v61, %v8980_v22  ;;  %v9291_v7 = vrot.slane %v1056_v1, %v8980_v22  ;;  %v1060_v14 = vcombine.high %v1056_v1, %v1056_v1 }
 0x185   : > { %998 = vst.msk [vmem:[#allocation2 + $0x8] sm:$0x1] %vm661_vm3, %v963_v31  ;;  %951 = vst.msk [vmem:[#allocation2 + $0x1f] sm:$0x1] %vm661_vm3, %v917_v34 }
 0x186   : > { %686 = vrot.lane.b32.xlu0 %v604_v26, %s8825_s24  ;;  %1151 = vrot.lane.b32.xlu1 %v9216_v33, %s8824_s23  ;;  %v9317_v19 = vrot.slane %v1060_v14, %v8980_v22 }
 0x188   : > { %v979_v35 = vpop.permute.xlu0 %978  ;;  %v933_v37 = vpop.permute.xlu1 %932 }
 0x189   : > { %1006 = vst.msk [vmem:[#allocation2 + $0xc8] sm:$0x1] %vm661_vm3, %v979_v35  ;;  %959 = vst.msk [vmem:[#allocation2 + $0xdf] sm:$0x1] %vm661_vm3, %v933_v37 }
 0x18a   : > { %734 = vrot.lane.b32.xlu0 %v604_v26, %s8826_s25  ;;  %639 = vrot.lane.b32.xlu1 %v608_v36, %s8824_s23 }
 0x18c   : > { %v630_v38 = vpop.permute.xlu0 %629  ;;  %v965_v39 = vpop.permute.xlu1 %964 }
 0x18d   : > { %664 = vst.msk [vmem:[#allocation2 + $0x31] sm:$0x1] %vm661_vm3, %v630_v38  ;;  %999 = vst.msk [vmem:[#allocation2 + $0x20] sm:$0x1] %vm661_vm3, %v965_v39 }
 0x18e   : > { %782 = vrot.lane.b32.xlu0 %v604_v26, %s8827_s26  ;;  %688 = vrot.lane.b32.xlu1 %v608_v36, %s8825_s24 }
 0x190   : > { %v634_v40 = vpop.permute.xlu0 %633  ;;  %v981_v41 = vpop.permute.xlu1 %980 }
 0x191   : > { %666 = vst.msk [vmem:[#allocation2 + $0x61] sm:$0x1] %vm661_vm3, %v634_v40  ;;  %1007 = vst.msk [vmem:[#allocation2 + $0xe0] sm:$0x1] %vm661_vm3, %v981_v41  ;;  %v13251_v41 = vmov 1  }
 0x192   : > { %830 = vrot.lane.b32.xlu0 %v604_v26, %s8828_s27  ;;  %736 = vrot.lane.b32.xlu1 %v608_v36, %s8826_s25 }
 0x193   : > { %8658 = vset.pattern.permute.xlu0 %v13251_v41 }
 0x194   : > { %v646_v42 = vpop.permute.xlu0 %645  ;;  %v632_v43 = vpop.permute.xlu1 %631 }
 0x195   : > { %672 = vst.msk [vmem:[#allocation2 + $0xf1] sm:$0x1] %vm661_vm3, %v646_v42  ;;  %665 = vst.msk [vmem:[#allocation2 + $0x49] sm:$0x1] %vm661_vm3, %v632_v43 }
 0x196   : > { %878 = vrot.lane.b32.xlu0 %v604_v26, %s8829_s28  ;;  %784 = vrot.lane.b32.xlu1 %v608_v36, %s8827_s26 }
 0x198   : > { %v679_v45 = vpop.permute.xlu0 %678  ;;  %v636_v46 = vpop.permute.xlu1 %635 }
 0x199   : > { %712 = vst.msk [vmem:[#allocation2 + $0x32] sm:$0x1] %vm661_vm3, %v679_v45  ;;  %667 = vst.msk [vmem:[#allocation2 + $0x79] sm:$0x1] %vm661_vm3, %v636_v46 }
 0x19a   : > { %926 = vrot.lane.b32.xlu0 %v604_v26, %s8830_s29  ;;  %832 = vrot.lane.b32.xlu1 %v608_v36, %s8828_s27 }
 0x19c   : > { %v683_v49 = vpop.permute.xlu0 %682  ;;  %v648_v50 = vpop.permute.xlu1 %647 }
 0x19d   : > { %714 = vst.msk [vmem:[#allocation2 + $0x62] sm:$0x1] %vm661_vm3, %v683_v49  ;;  %673 = vst.msk [vmem:[#allocation2 + $0x109] sm:$0x1] %vm661_vm3, %v648_v50 }
 0x19e   : > { %974 = vrot.lane.b32.xlu0 %v604_v26, %s8831_s11  ;;  %880 = vrot.lane.b32.xlu1 %v608_v36, %s8829_s28 }
 0x1a0   : > { %v695_v53 = vpop.permute.xlu0 %694  ;;  %v681_v54 = vpop.permute.xlu1 %680 }
 0x1a1   : > { %720 = vst.msk [vmem:[#allocation2 + $0xf2] sm:$0x1] %vm661_vm3, %v695_v53  ;;  %713 = vst.msk [vmem:[#allocation2 + $0x4a] sm:$0x1] %vm661_vm3, %v681_v54 }
 0x1a2   : > { %1137 = vrot.lane.b32.xlu0 %v9255_v52, %s8824_s23  ;;  %928 = vrot.lane.b32.xlu1 %v608_v36, %s8830_s29 }
 0x1a4   : > { %v727_v57 = vpop.permute.xlu0 %726  ;;  %v685_v60 = vpop.permute.xlu1 %684 }
 0x1a5   : > { %760 = vst.msk [vmem:[#allocation2 + $0x33] sm:$0x1] %vm661_vm3, %v727_v57  ;;  %715 = vst.msk [vmem:[#allocation2 + $0x7a] sm:$0x1] %vm661_vm3, %v685_v60 }
 0x1a6   : > { %1141 = vrot.lane.b32.xlu0 %v9263_v55, %s8824_s23  ;;  %976 = vrot.lane.b32.xlu1 %v608_v36, %s8831_s11 }
 0x1a8   : > { %v731_v63 = vpop.permute.xlu0 %730  ;;  %v697_v4 = vpop.permute.xlu1 %696 }
 0x1a9   : > { %762 = vst.msk [vmem:[#allocation2 + $0x63] sm:$0x1] %vm661_vm3, %v731_v63  ;;  %721 = vst.msk [vmem:[#allocation2 + $0x10a] sm:$0x1] %vm661_vm3, %v697_v4 }
 0x1aa   : > { %1153 = vrot.lane.b32.xlu0 %v9275_v62, %s8824_s23  ;;  %1139 = vrot.lane.b32.xlu1 %v9279_v3, %s8824_s23 }
 0x1ac   : > { %v743_v6 = vpop.permute.xlu0 %742  ;;  %v729_v8 = vpop.permute.xlu1 %728 }
 0x1ad   : > { %768 = vst.msk [vmem:[#allocation2 + $0xf3] sm:$0x1] %vm661_vm3, %v743_v6  ;;  %761 = vst.msk [vmem:[#allocation2 + $0x4b] sm:$0x1] %vm661_vm3, %v729_v8 }
 0x1ae   : > { %1145 = vrot.lane.b32.xlu0 %v9288_v5, %s8824_s23  ;;  %1143 = vrot.lane.b32.xlu1 %v9291_v7, %s8824_s23 }
 0x1b0   : > { %v775_v9 = vpop.permute.xlu0 %774  ;;  %v733_v11 = vpop.permute.xlu1 %732 }
 0x1b1   : > { %808 = vst.msk [vmem:[#allocation2 + $0x34] sm:$0x1] %vm661_vm3, %v775_v9  ;;  %763 = vst.msk [vmem:[#allocation2 + $0x7b] sm:$0x1] %vm661_vm3, %v733_v11 }
 0x1b2   : > { %1181 = vrot.lane.b32.xlu0 %v9173_v13, %s8825_s24  ;;  %1183 = vrot.lane.b32.xlu1 %v9202_v28, %s8825_s24 }
 0x1b4   : > { %v779_v12 = vpop.permute.xlu0 %778  ;;  %v745_v17 = vpop.permute.xlu1 %744 }
 0x1b5   : > { %810 = vst.msk [vmem:[#allocation2 + $0x64] sm:$0x1] %vm661_vm3, %v779_v12  ;;  %769 = vst.msk [vmem:[#allocation2 + $0x10b] sm:$0x1] %vm661_vm3, %v745_v17 }
 0x1b6   : > { %1185 = vrot.lane.b32.xlu0 %v9255_v52, %s8825_s24  ;;  %1155 = vrot.lane.b32.xlu1 %v9308_v16, %s8824_s23 }
 0x1b8   : > { %v791_v18 = vpop.permute.xlu0 %790  ;;  %v777_v21 = vpop.permute.xlu1 %776 }
 0x1b9   : > { %816 = vst.msk [vmem:[#allocation2 + $0xf4] sm:$0x1] %vm661_vm3, %v791_v18  ;;  %809 = vst.msk [vmem:[#allocation2 + $0x4c] sm:$0x1] %vm661_vm3, %v777_v21 }
 0x1ba   : > { %1189 = vrot.lane.b32.xlu0 %v9263_v55, %s8825_s24  ;;  %1147 = vrot.lane.b32.xlu1 %v9317_v19, %s8824_s23 }
 0x1bc   : > { %v823_v23 = vpop.permute.xlu0 %822  ;;  %v781_v24 = vpop.permute.xlu1 %780 }
 0x1bd   : > { %856 = vst.msk [vmem:[#allocation2 + $0x35] sm:$0x1] %vm661_vm3, %v823_v23  ;;  %811 = vst.msk [vmem:[#allocation2 + $0x7c] sm:$0x1] %vm661_vm3, %v781_v24 }
 0x1be   : > { %1193 = vrot.lane.b32.xlu0 %v9288_v5, %s8825_s24  ;;  %1187 = vrot.lane.b32.xlu1 %v9279_v3, %s8825_s24 }
 0x1c0   : > { %v827_v25 = vpop.permute.xlu0 %826  ;;  %v793_v26 = vpop.permute.xlu1 %792 }
 0x1c1   : > { %858 = vst.msk [vmem:[#allocation2 + $0x65] sm:$0x1] %vm661_vm3, %v827_v25  ;;  %817 = vst.msk [vmem:[#allocation2 + $0x10c] sm:$0x1] %vm661_vm3, %v793_v26 }
 0x1c2   : > { %1197 = vrot.lane.b32.xlu0 %v9188_v20, %s8825_s24  ;;  %1191 = vrot.lane.b32.xlu1 %v9291_v7, %s8825_s24 }
 0x1c4   : > { %v839_v27 = vpop.permute.xlu0 %838  ;;  %v825_v29 = vpop.permute.xlu1 %824 }
 0x1c5   : > { %864 = vst.msk [vmem:[#allocation2 + $0xf5] sm:$0x1] %vm661_vm3, %v839_v27  ;;  %857 = vst.msk [vmem:[#allocation2 + $0x4d] sm:$0x1] %vm661_vm3, %v825_v29 }
 0x1c6   : > { %1201 = vrot.lane.b32.xlu0 %v9275_v62, %s8825_s24  ;;  %1195 = vrot.lane.b32.xlu1 %v9317_v19, %s8825_s24 }
 0x1c8   : > { %v871_v30 = vpop.permute.xlu0 %870  ;;  %v829_v31 = vpop.permute.xlu1 %828 }
 0x1c9   : > { %904 = vst.msk [vmem:[#allocation2 + $0x36] sm:$0x1] %vm661_vm3, %v871_v30  ;;  %859 = vst.msk [vmem:[#allocation2 + $0x7d] sm:$0x1] %vm661_vm3, %v829_v31 }
 0x1ca   : > { %1229 = vrot.lane.b32.xlu0 %v9173_v13, %s8826_s25  ;;  %1199 = vrot.lane.b32.xlu1 %v9216_v33, %s8825_s24 }
 0x1cc   : > { %v875_v32 = vpop.permute.xlu0 %874  ;;  %v841_v34 = vpop.permute.xlu1 %840 }
 0x1cd   : > { %906 = vst.msk [vmem:[#allocation2 + $0x66] sm:$0x1] %vm661_vm3, %v875_v32  ;;  %865 = vst.msk [vmem:[#allocation2 + $0x10d] sm:$0x1] %vm661_vm3, %v841_v34 }
 0x1ce   : > { %1233 = vrot.lane.b32.xlu0 %v9255_v52, %s8826_s25  ;;  %1203 = vrot.lane.b32.xlu1 %v9308_v16, %s8825_s24 }
 0x1d0   : > { %v887_v35 = vpop.permute.xlu0 %886  ;;  %v873_v36 = vpop.permute.xlu1 %872 }
 0x1d1   : > { %912 = vst.msk [vmem:[#allocation2 + $0xf6] sm:$0x1] %vm661_vm3, %v887_v35  ;;  %905 = vst.msk [vmem:[#allocation2 + $0x4e] sm:$0x1] %vm661_vm3, %v873_v36 }
 0x1d2   : > { %1237 = vrot.lane.b32.xlu0 %v9263_v55, %s8826_s25  ;;  %1231 = vrot.lane.b32.xlu1 %v9202_v28, %s8826_s25 }
 0x1d4   : > { %v919_v37 = vpop.permute.xlu0 %918  ;;  %v877_v38 = vpop.permute.xlu1 %876 }
 0x1d5   : > { %952 = vst.msk [vmem:[#allocation2 + $0x37] sm:$0x1] %vm661_vm3, %v919_v37  ;;  %907 = vst.msk [vmem:[#allocation2 + $0x7e] sm:$0x1] %vm661_vm3, %v877_v38 }
 0x1d6   : > { %1241 = vrot.lane.b32.xlu0 %v9288_v5, %s8826_s25  ;;  %1235 = vrot.lane.b32.xlu1 %v9279_v3, %s8826_s25 }
 0x1d8   : > { %v923_v39 = vpop.permute.xlu0 %922  ;;  %v889_v40 = vpop.permute.xlu1 %888 }
 0x1d9   : > { %954 = vst.msk [vmem:[#allocation2 + $0x67] sm:$0x1] %vm661_vm3, %v923_v39  ;;  %913 = vst.msk [vmem:[#allocation2 + $0x10e] sm:$0x1] %vm661_vm3, %v889_v40 }
 0x1da   : > { %1245 = vrot.lane.b32.xlu0 %v9188_v20, %s8826_s25  ;;  %1239 = vrot.lane.b32.xlu1 %v9291_v7, %s8826_s25 }
 0x1dc   : > { %v935_v42 = vpop.permute.xlu0 %934  ;;  %v921_v43 = vpop.permute.xlu1 %920 }
 0x1dd   : > { %960 = vst.msk [vmem:[#allocation2 + $0xf7] sm:$0x1] %vm661_vm3, %v935_v42  ;;  %953 = vst.msk [vmem:[#allocation2 + $0x4f] sm:$0x1] %vm661_vm3, %v921_v43 }
 0x1de   : > { %1249 = vrot.lane.b32.xlu0 %v9275_v62, %s8826_s25  ;;  %1243 = vrot.lane.b32.xlu1 %v9317_v19, %s8826_s25 }
 0x1e0   : > { %v967_v44 = vpop.permute.xlu0 %966  ;;  %v925_v45 = vpop.permute.xlu1 %924 }
 0x1e1   : > { %1000 = vst.msk [vmem:[#allocation2 + $0x38] sm:$0x1] %vm661_vm3, %v967_v44  ;;  %955 = vst.msk [vmem:[#allocation2 + $0x7f] sm:$0x1] %vm661_vm3, %v925_v45 }
 0x1e2   : > { %1277 = vrot.lane.b32.xlu0 %v9173_v13, %s8827_s26  ;;  %1247 = vrot.lane.b32.xlu1 %v9216_v33, %s8826_s25 }
 0x1e4   : > { %v971_v46 = vpop.permute.xlu0 %970  ;;  %v937_v47 = vpop.permute.xlu1 %936 }
 0x1e5   : > { %1002 = vst.msk [vmem:[#allocation2 + $0x68] sm:$0x1] %vm661_vm3, %v971_v46  ;;  %961 = vst.msk [vmem:[#allocation2 + $0x10f] sm:$0x1] %vm661_vm3, %v937_v47 }
 0x1e6   : > { %1281 = vrot.lane.b32.xlu0 %v9255_v52, %s8827_s26  ;;  %1251 = vrot.lane.b32.xlu1 %v9308_v16, %s8826_s25 }
 0x1e8   : > { %v983_v48 = vpop.permute.xlu0 %982  ;;  %v969_v49 = vpop.permute.xlu1 %968 }
 0x1e9   : > { %1008 = vst.msk [vmem:[#allocation2 + $0xf8] sm:$0x1] %vm661_vm3, %v983_v48  ;;  %1001 = vst.msk [vmem:[#allocation2 + $0x50] sm:$0x1] %vm661_vm3, %v969_v49  ;;  %v1774_v48 = vld [vmem:[%s13240_s3] sm:$0xff] }
 0x1ea   : > { %1285 = vrot.lane.b32.xlu0 %v9263_v55, %s8827_s26  ;;  %1279 = vrot.lane.b32.xlu1 %v9202_v28, %s8827_s26 }
 0x1ec   : > { %v1134_v50 = vpop.permute.xlu0 %1133  ;;  %v973_v51 = vpop.permute.xlu1 %972 }
 0x1ed   : > { %1169 = vst.msk [vmem:[#allocation2 + $0x9] sm:$0x1] %vm661_vm3, %v1134_v50  ;;  %1003 = vst.msk [vmem:[#allocation2 + $0x80] sm:$0x1] %vm661_vm3, %v973_v51  ;;  %v1785_v50 = vrot.slane %v1774_v48, %v8974_v15 }
 0x1ee   : > { %1289 = vrot.lane.b32.xlu0 %v9288_v5, %s8827_s26  ;;  %1283 = vrot.lane.b32.xlu1 %v9279_v3, %s8827_s26 }
 0x1f0   : > { %v1150_v53 = vpop.permute.xlu0 %1149  ;;  %v985_v54 = vpop.permute.xlu1 %984 }
 0x1f1   : > { %1177 = vst.msk [vmem:[#allocation2 + $0xc9] sm:$0x1] %vm661_vm3, %v1150_v53  ;;  %1009 = vst.msk [vmem:[#allocation2 + $0x110] sm:$0x1] %vm661_vm3, %v985_v54  ;;  %v1778_v53 = vcombine.high %v1774_v48, %v1774_v48  ;;  %v1793_v54 = vcombine.high %v1785_v50, %v1785_v50 }
 0x1f2   : > { %1293 = vrot.lane.b32.xlu0 %v9188_v20, %s8827_s26  ;;  %1287 = vrot.lane.b32.xlu1 %v9291_v7, %s8827_s26 }
 0x1f4   : > { %v638_v56 = vpop.permute.xlu0 %637  ;;  %v1136_v57 = vpop.permute.xlu1 %1135 }
 0x1f5   : > { %668 = vst.msk [vmem:[#allocation2 + $0x91] sm:$0x1] %vm661_vm3, %v638_v56  ;;  %1170 = vst.msk [vmem:[#allocation2 + $0x21] sm:$0x1] %vm661_vm3, %v1136_v57  ;;  %v1815_v57 = vrot.slane %v1793_v54, %v8974_v15 }
 0x1f6   : > { %1297 = vrot.lane.b32.xlu0 %v9275_v62, %s8827_s26  ;;  %1291 = vrot.lane.b32.xlu1 %v9317_v19, %s8827_s26 }
 0x1f8   : > { %v687_v58 = vpop.permute.xlu0 %686  ;;  %v1152_v59 = vpop.permute.xlu1 %1151 }
 0x1f9   : > { %716 = vst.msk [vmem:[#allocation2 + $0x92] sm:$0x1] %vm661_vm3, %v687_v58  ;;  %1178 = vst.msk [vmem:[#allocation2 + $0xe1] sm:$0x1] %vm661_vm3, %v1152_v59  ;;  %v1825_v59 = vcombine.high %v1815_v57, %v1815_v57 }
 0x1fa   : > { %1325 = vrot.lane.b32.xlu0 %v9173_v13, %s8828_s27  ;;  %1295 = vrot.lane.b32.xlu1 %v9216_v33, %s8827_s26 }
 0x1fc   : > { %v735_v60 = vpop.permute.xlu0 %734  ;;  %v640_v61 = vpop.permute.xlu1 %639 }
 0x1fd   : > { %764 = vst.msk [vmem:[#allocation2 + $0x93] sm:$0x1] %vm661_vm3, %v735_v60  ;;  %669 = vst.msk [vmem:[#allocation2 + $0xa9] sm:$0x1] %vm661_vm3, %v640_v61 }
 0x1fe   : > { %1329 = vrot.lane.b32.xlu0 %v9255_v52, %s8828_s27  ;;  %1299 = vrot.lane.b32.xlu1 %v9308_v16, %s8827_s26 }
 0x200   : > { %v783_v63 = vpop.permute.xlu0 %782  ;;  %v689_v1 = vpop.permute.xlu1 %688 }
 0x201   : > { %812 = vst.msk [vmem:[#allocation2 + $0x94] sm:$0x1] %vm661_vm3, %v783_v63  ;;  %717 = vst.msk [vmem:[#allocation2 + $0xaa] sm:$0x1] %vm661_vm3, %v689_v1 }
 0x202   : > { %1333 = vrot.lane.b32.xlu0 %v9263_v55, %s8828_s27  ;;  %1327 = vrot.lane.b32.xlu1 %v9202_v28, %s8828_s27 }
 0x204   : > { %v831_v4 = vpop.permute.xlu0 %830  ;;  %v737_v6 = vpop.permute.xlu1 %736 }
 0x205   : > { %860 = vst.msk [vmem:[#allocation2 + $0x95] sm:$0x1] %vm661_vm3, %v831_v4  ;;  %765 = vst.msk [vmem:[#allocation2 + $0xab] sm:$0x1] %vm661_vm3, %v737_v6 }
 0x206   : > { %1337 = vrot.lane.b32.xlu0 %v9288_v5, %s8828_s27  ;;  %1331 = vrot.lane.b32.xlu1 %v9279_v3, %s8828_s27 }
 0x208   : > { %v879_v8 = vpop.permute.xlu0 %878  ;;  %v785_v9 = vpop.permute.xlu1 %784 }
 0x209   : > { %908 = vst.msk [vmem:[#allocation2 + $0x96] sm:$0x1] %vm661_vm3, %v879_v8  ;;  %813 = vst.msk [vmem:[#allocation2 + $0xac] sm:$0x1] %vm661_vm3, %v785_v9  ;;  %v9614_v9 = vrot.slane %v1815_v57, %v8980_v22 }
 0x20a   : > { %1341 = vrot.lane.b32.xlu0 %v9188_v20, %s8828_s27  ;;  %1335 = vrot.lane.b32.xlu1 %v9291_v7, %s8828_s27 }
 0x20c   : > { %v927_v10 = vpop.permute.xlu0 %926  ;;  %v833_v11 = vpop.permute.xlu1 %832 }
 0x20d   : > { %956 = vst.msk [vmem:[#allocation2 + $0x97] sm:$0x1] %vm661_vm3, %v927_v10  ;;  %861 = vst.msk [vmem:[#allocation2 + $0xad] sm:$0x1] %vm661_vm3, %v833_v11 }
 0x20e   : > { %1345 = vrot.lane.b32.xlu0 %v9275_v62, %s8828_s27  ;;  %1339 = vrot.lane.b32.xlu1 %v9317_v19, %s8828_s27 }
 0x210   : > { %v975_v12 = vpop.permute.xlu0 %974  ;;  %v881_v14 = vpop.permute.xlu1 %880 }
 0x211   : > { %1004 = vst.msk [vmem:[#allocation2 + $0x98] sm:$0x1] %vm661_vm3, %v975_v12  ;;  %909 = vst.msk [vmem:[#allocation2 + $0xae] sm:$0x1] %vm661_vm3, %v881_v14 }
 0x212   : > { %1373 = vrot.lane.b32.xlu0 %v9173_v13, %s8829_s28  ;;  %1343 = vrot.lane.b32.xlu1 %v9216_v33, %s8828_s27 }
 0x214   : > { %v1138_v17 = vpop.permute.xlu0 %1137  ;;  %v929_v18 = vpop.permute.xlu1 %928 }
 0x215   : > { %1171 = vst.msk [vmem:[#allocation2 + $0x39] sm:$0x1] %vm661_vm3, %v1138_v17  ;;  %957 = vst.msk [vmem:[#allocation2 + $0xaf] sm:$0x1] %vm661_vm3, %v929_v18 }
 0x216   : > { %1377 = vrot.lane.b32.xlu0 %v9255_v52, %s8829_s28  ;;  %1347 = vrot.lane.b32.xlu1 %v9308_v16, %s8828_s27 }
 0x218   : > { %v1142_v21 = vpop.permute.xlu0 %1141  ;;  %v977_v23 = vpop.permute.xlu1 %976 }
 0x219   : > { %1173 = vst.msk [vmem:[#allocation2 + $0x69] sm:$0x1] %vm661_vm3, %v1142_v21  ;;  %1005 = vst.msk [vmem:[#allocation2 + $0xb0] sm:$0x1] %vm661_vm3, %v977_v23 }
 0x21a   : > { %1381 = vrot.lane.b32.xlu0 %v9263_v55, %s8829_s28  ;;  %1375 = vrot.lane.b32.xlu1 %v9202_v28, %s8829_s28 }
 0x21c   : > { %v1154_v24 = vpop.permute.xlu0 %1153  ;;  %v1140_v25 = vpop.permute.xlu1 %1139 }
 0x21d   : > { %1179 = vst.msk [vmem:[#allocation2 + $0xf9] sm:$0x1] %vm661_vm3, %v1154_v24  ;;  %1172 = vst.msk [vmem:[#allocation2 + $0x51] sm:$0x1] %vm661_vm3, %v1140_v25 }
 0x21e   : > { %1385 = vrot.lane.b32.xlu0 %v9288_v5, %s8829_s28  ;;  %1379 = vrot.lane.b32.xlu1 %v9279_v3, %s8829_s28 }
 0x220   : > { %v1146_v26 = vpop.permute.xlu0 %1145  ;;  %v1144_v27 = vpop.permute.xlu1 %1143 }
 0x221   : > { %1175 = vst.msk [vmem:[#allocation2 + $0x99] sm:$0x1] %vm661_vm3, %v1146_v26  ;;  %1174 = vst.msk [vmem:[#allocation2 + $0x81] sm:$0x1] %vm661_vm3, %v1144_v27 }
 0x222   : > { %1389 = vrot.lane.b32.xlu0 %v9188_v20, %s8829_s28  ;;  %1383 = vrot.lane.b32.xlu1 %v9291_v7, %s8829_s28 }
 0x224   : > { %v1182_v29 = vpop.permute.xlu0 %1181  ;;  %v1184_v30 = vpop.permute.xlu1 %1183 }
 0x225   : > { %1217 = vst.msk [vmem:[#allocation2 + $0xa] sm:$0x1] %vm661_vm3, %v1182_v29  ;;  %1218 = vst.msk [vmem:[#allocation2 + $0x22] sm:$0x1] %vm661_vm3, %v1184_v30 }
 0x226   : > { %1393 = vrot.lane.b32.xlu0 %v9275_v62, %s8829_s28  ;;  %1387 = vrot.lane.b32.xlu1 %v9317_v19, %s8829_s28 }
 0x228   : > { %v1186_v31 = vpop.permute.xlu0 %1185  ;;  %v1156_v32 = vpop.permute.xlu1 %1155 }
 0x229   : > { %1219 = vst.msk [vmem:[#allocation2 + $0x3a] sm:$0x1] %vm661_vm3, %v1186_v31  ;;  %1180 = vst.msk [vmem:[#allocation2 + $0x111] sm:$0x1] %vm661_vm3, %v1156_v32 }
 0x22a   : > { %1421 = vrot.lane.b32.xlu0 %v9173_v13, %s8830_s29  ;;  %1391 = vrot.lane.b32.xlu1 %v9216_v33, %s8829_s28 }
 0x22c   : > { %v1190_v34 = vpop.permute.xlu0 %1189  ;;  %v1148_v35 = vpop.permute.xlu1 %1147 }
 0x22d   : > { %1221 = vst.msk [vmem:[#allocation2 + $0x6a] sm:$0x1] %vm661_vm3, %v1190_v34  ;;  %1176 = vst.msk [vmem:[#allocation2 + $0xb1] sm:$0x1] %vm661_vm3, %v1148_v35 }
 0x22e   : > { %1425 = vrot.lane.b32.xlu0 %v9255_v52, %s8830_s29  ;;  %1395 = vrot.lane.b32.xlu1 %v9308_v16, %s8829_s28 }
 0x230   : > { %v1194_v36 = vpop.permute.xlu0 %1193  ;;  %v1188_v37 = vpop.permute.xlu1 %1187 }
 0x231   : > { %1223 = vst.msk [vmem:[#allocation2 + $0x9a] sm:$0x1] %vm661_vm3, %v1194_v36  ;;  %1220 = vst.msk [vmem:[#allocation2 + $0x52] sm:$0x1] %vm661_vm3, %v1188_v37 }
 0x232   : > { %1429 = vrot.lane.b32.xlu0 %v9263_v55, %s8830_s29  ;;  %1423 = vrot.lane.b32.xlu1 %v9202_v28, %s8830_s29 }
 0x234   : > { %v1198_v38 = vpop.permute.xlu0 %1197  ;;  %v1192_v39 = vpop.permute.xlu1 %1191 }
 0x235   : > { %1225 = vst.msk [vmem:[#allocation2 + $0xca] sm:$0x1] %vm661_vm3, %v1198_v38  ;;  %1222 = vst.msk [vmem:[#allocation2 + $0x82] sm:$0x1] %vm661_vm3, %v1192_v39 }
 0x236   : > { %1433 = vrot.lane.b32.xlu0 %v9288_v5, %s8830_s29  ;;  %1427 = vrot.lane.b32.xlu1 %v9279_v3, %s8830_s29 }
 0x238   : > { %v1202_v40 = vpop.permute.xlu0 %1201  ;;  %v1196_v42 = vpop.permute.xlu1 %1195 }
 0x239   : > { %1227 = vst.msk [vmem:[#allocation2 + $0xfa] sm:$0x1] %vm661_vm3, %v1202_v40  ;;  %1224 = vst.msk [vmem:[#allocation2 + $0xb2] sm:$0x1] %vm661_vm3, %v1196_v42 }
 0x23a   : > { %1437 = vrot.lane.b32.xlu0 %v9188_v20, %s8830_s29  ;;  %1431 = vrot.lane.b32.xlu1 %v9291_v7, %s8830_s29 }
 0x23c   : > { %v1230_v0 = vpop.permute.xlu0 %1229  ;;  %v1200_v43 = vpop.permute.xlu1 %1199 }
 0x23d   : > { %1265 = vst.msk [vmem:[#allocation2 + $0xb] sm:$0x1] %vm661_vm3, %v1230_v0  ;;  %1226 = vst.msk [vmem:[#allocation2 + $0xe2] sm:$0x1] %vm661_vm3, %v1200_v43 }
 0x23e   : > { %1441 = vrot.lane.b32.xlu0 %v9275_v62, %s8830_s29  ;;  %1435 = vrot.lane.b32.xlu1 %v9317_v19, %s8830_s29 }
 0x240   : > { %v1234_v44 = vpop.permute.xlu0 %1233  ;;  %v1204_v45 = vpop.permute.xlu1 %1203 }
 0x241   : > { %1267 = vst.msk [vmem:[#allocation2 + $0x3b] sm:$0x1] %vm661_vm3, %v1234_v44  ;;  %1228 = vst.msk [vmem:[#allocation2 + $0x112] sm:$0x1] %vm661_vm3, %v1204_v45 }
 0x242   : > { %1469 = vrot.lane.b32.xlu0 %v9173_v13, %s8831_s11  ;;  %1439 = vrot.lane.b32.xlu1 %v9216_v33, %s8830_s29 }
 0x244   : > { %v1238_v46 = vpop.permute.xlu0 %1237  ;;  %v1232_v47 = vpop.permute.xlu1 %1231 }
 0x245   : > { %1269 = vst.msk [vmem:[#allocation2 + $0x6b] sm:$0x1] %vm661_vm3, %v1238_v46  ;;  %1266 = vst.msk [vmem:[#allocation2 + $0x23] sm:$0x1] %vm661_vm3, %v1232_v47 }
 0x246   : > { %1473 = vrot.lane.b32.xlu0 %v9255_v52, %s8831_s11  ;;  %1443 = vrot.lane.b32.xlu1 %v9308_v16, %s8830_s29 }
 0x248   : > { %v1242_v13 = vpop.permute.xlu0 %1241  ;;  %v1236_v49 = vpop.permute.xlu1 %1235 }
 0x249   : > { %1271 = vst.msk [vmem:[#allocation2 + $0x9b] sm:$0x1] %vm661_vm3, %v1242_v13  ;;  %1268 = vst.msk [vmem:[#allocation2 + $0x53] sm:$0x1] %vm661_vm3, %v1236_v49 }
 0x24a   : > { %1477 = vrot.lane.b32.xlu0 %v9263_v55, %s8831_s11  ;;  %1471 = vrot.lane.b32.xlu1 %v9202_v28, %s8831_s11  ;;  %v9569_v28 = vrot.slane %v1785_v50, %v8974_v15 }
 0x24c   : > { %v1246_v52 = vpop.permute.xlu0 %1245  ;;  %v1240_v51 = vpop.permute.xlu1 %1239  ;;  %v1823_v35 = vcombine.high %v9569_v28, %v9569_v28 }
 0x24d   : > { %1273 = vst.msk [vmem:[#allocation2 + $0xcb] sm:$0x1] %vm661_vm3, %v1246_v52  ;;  %1270 = vst.msk [vmem:[#allocation2 + $0x83] sm:$0x1] %vm661_vm3, %v1240_v51 }
 0x24e   : > { %1481 = vrot.lane.b32.xlu0 %v9288_v5, %s8831_s11  ;;  %1475 = vrot.lane.b32.xlu1 %v9279_v3, %s8831_s11  ;;  %v9573_v5 = vrot.slane %v1778_v53, %v8974_v15  ;;  %v9655_v38 = vrot.slane %v1823_v35, %v8980_v22 }
 0x250   : > { %v1250_v55 = vpop.permute.xlu0 %1249  ;;  %v1244_v56 = vpop.permute.xlu1 %1243  ;;  %v1794_v60 = vcombine.high %v9573_v5, %v9573_v5  ;;  %13370 = vst [vmem:[#allocation6_spill] sm:$0xff] %v9655_v38  ;;  %v1808_v39 = vrot.slane %v9573_v5, %v8974_v15 }
 0x251   : > { %1275 = vst.msk [vmem:[#allocation2 + $0xfb] sm:$0x1] %vm661_vm3, %v1250_v55  ;;  %1272 = vst.msk [vmem:[#allocation2 + $0xb3] sm:$0x1] %vm661_vm3, %v1244_v56 }
 0x252   : > { %1485 = vrot.lane.b32.xlu0 %v9188_v20, %s8831_s11  ;;  %1479 = vrot.lane.b32.xlu1 %v9291_v7, %s8831_s11  ;;  %v9583_v20 = vrot.slane %v9569_v28, %v8980_v22  ;;  %v1822_v63 = vrot.slane %v1794_v60, %v8974_v15  ;;  %v9663_v0 = vrot.slane %v1808_v39, %v8980_v22 }
 0x253   : > { %v1824_v43 = vcombine.high %v1808_v39, %v1808_v39 }
 0x254   : > { %v1278_v3 = vpop.permute.xlu0 %1277  ;;  %v1248_v58 = vpop.permute.xlu1 %1247  ;;  %13369 = vst [vmem:[#allocation5_spill] sm:$0xff] %v9583_v20  ;;  %v9607_v6 = vrot.slane %v1822_v63, %v8980_v22  ;;  %v1826_v8 = vcombine.high %v1822_v63, %v1822_v63  ;;  %13371 = vst [vmem:[#allocation7_spill] sm:$0xff] %v9663_v0 }
 0x255   : > { %1313 = vst.msk [vmem:[#allocation2 + $0xc] sm:$0x1] %vm661_vm3, %v1278_v3  ;;  %1274 = vst.msk [vmem:[#allocation2 + $0xe3] sm:$0x1] %vm661_vm3, %v1248_v58  ;;  %v9669_v46 = vrot.slane %v1824_v43, %v8980_v22 }
 0x256   : > { %1489 = vrot.lane.b32.xlu0 %v9275_v62, %s8831_s11  ;;  %1483 = vrot.lane.b32.xlu1 %v9317_v19, %s8831_s11  ;;  %v9593_v62 = vrot.slane %v1825_v59, %v8980_v22  ;;  %v9601_v19 = vld.sshfl [vmem:[%s13240_s3 + $0x8] sm:$0x33 pattern:$0x75316420]  ;;  %v9620_v12 = vrot.slane %v1826_v8, %v8980_v22 }
 0x257   : > { %13372 = vst [vmem:[#allocation8_spill] sm:$0xff] %v9669_v46  ;;  %v1841_v47 = vrot.slane %v9601_v19, %v8974_v15 }
 0x258   : > { %v1282_v7 = vpop.permute.xlu0 %1281  ;;  %v1252_v61 = vpop.permute.xlu1 %1251 }
 0x259   : > { %1315 = vst.msk [vmem:[#allocation2 + $0x3c] sm:$0x1] %vm661_vm3, %v1282_v7  ;;  %1276 = vst.msk [vmem:[#allocation2 + $0x113] sm:$0x1] %vm661_vm3, %v1252_v61  ;;  %v9677_v49 = vrot.slane %v1841_v47, %v8980_v22  ;;  %v1849_v50 = vcombine.high %v1841_v47, %v1841_v47  ;;  %v13249_v61 = vmov 2  }
 0x25a   : > { %1900 = vperm.xlu0 %8658, %v9583_v20   ;;  %1487 = vrot.lane.b32.xlu1 %v9216_v33, %s8831_s11  ;;  %v1834_v33 = vcombine.high %v9601_v19, %v9601_v19 }
 0x25b   : > { %v9683_v53 = vrot.slane %v1849_v50, %v8980_v22  ;;  %v9742_v50 = vld [vmem:[#allocation2 + $0x18] sm:$0xff] }
 0x25c   : > { %v1286_v1 = vpop.permute.xlu0 %1285  ;;  %v1280_v4 = vpop.permute.xlu1 %1279  ;;  %v1848_v14 = vrot.slane %v1834_v33, %v8974_v15 }
 0x25d   : > { %1317 = vst.msk [vmem:[#allocation2 + $0x6c] sm:$0x1] %vm661_vm3, %v1286_v1  ;;  %1314 = vst.msk [vmem:[#allocation2 + $0x24] sm:$0x1] %vm661_vm3, %v1280_v4 }
 0x25e   : > { %1912 = vperm.xlu0 %8658, %v9593_v62   ;;  %1491 = vrot.lane.b32.xlu1 %v9308_v16, %s8831_s11  ;;  %v9628_v18 = vrot.slane %v1848_v14, %v8980_v22  ;;  %v1850_v21 = vcombine.high %v1848_v14, %v1848_v14 }
 0x260   : > { %v1290_v10 = vpop.permute.xlu0 %1289  ;;  %v1284_v11 = vpop.permute.xlu1 %1283  ;;  %v9635_v25 = vrot.slane %v1850_v21, %v8980_v22 }
 0x261   : > { %1319 = vst.msk [vmem:[#allocation2 + $0x9c] sm:$0x1] %vm661_vm3, %v1290_v10  ;;  %1316 = vst.msk [vmem:[#allocation2 + $0x54] sm:$0x1] %vm661_vm3, %v1284_v11 }
 0x262   : > { %1920 = vperm.xlu0 %8658, %v9607_v6   ;;  %1683 = vperm.xlu1 %8657, %v9614_v9  }
 0x264   : > { %v1294_v17 = vpop.permute.xlu0 %1293  ;;  %v1288_v16 = vpop.permute.xlu1 %1287 }
 0x265   : > { %1321 = vst.msk [vmem:[#allocation2 + $0xcc] sm:$0x1] %vm661_vm3, %v1294_v17  ;;  %1318 = vst.msk [vmem:[#allocation2 + $0x84] sm:$0x1] %vm661_vm3, %v1288_v16 }
 0x266   : > { %1928 = vperm.xlu0 %8658, %v9620_v12   ;;  %1691 = vperm.xlu1 %8657, %v9593_v62  }
 0x268   : > { %v1298_v23 = vpop.permute.xlu0 %1297  ;;  %v1292_v24 = vpop.permute.xlu1 %1291 }
 0x269   : > { %1323 = vst.msk [vmem:[#allocation2 + $0xfc] sm:$0x1] %vm661_vm3, %v1298_v23  ;;  %1320 = vst.msk [vmem:[#allocation2 + $0xb4] sm:$0x1] %vm661_vm3, %v1292_v24 }
 0x26a   : > { %1936 = vperm.xlu0 %8658, %v9628_v18   ;;  %1699 = vperm.xlu1 %8657, %v9607_v6  }
 0x26c   : > { %v1326_v26 = vpop.permute.xlu0 %1325  ;;  %v1296_v27 = vpop.permute.xlu1 %1295 }
 0x26d   : > { %1361 = vst.msk [vmem:[#allocation2 + $0xd] sm:$0x1] %vm661_vm3, %v1326_v26  ;;  %1322 = vst.msk [vmem:[#allocation2 + $0xe4] sm:$0x1] %vm661_vm3, %v1296_v27 }
 0x26e   : > { %1944 = vperm.xlu0 %8658, %v9635_v25   ;;  %1707 = vperm.xlu1 %8657, %v9620_v12  }
 0x270   : > { %v1330_v29 = vpop.permute.xlu0 %1329  ;;  %v1300_v30 = vpop.permute.xlu1 %1299 }
 0x271   : > { %1363 = vst.msk [vmem:[#allocation2 + $0x3d] sm:$0x1] %vm661_vm3, %v1330_v29  ;;  %1324 = vst.msk [vmem:[#allocation2 + $0x114] sm:$0x1] %vm661_vm3, %v1300_v30 }
 0x272   : > { %1715 = vperm.xlu1 %8657, %v9628_v18   ;;  %8661 = vset.pattern.permute.xlu0 %v13249_v61 }
 0x274   : > { %v1334_v31 = vpop.permute.xlu0 %1333  ;;  %v1328_v32 = vpop.permute.xlu1 %1327 }
 0x275   : > { %1365 = vst.msk [vmem:[#allocation2 + $0x6d] sm:$0x1] %vm661_vm3, %v1334_v31  ;;  %1362 = vst.msk [vmem:[#allocation2 + $0x25] sm:$0x1] %vm661_vm3, %v1328_v32 }
 0x276   : > { %1723 = vperm.xlu1 %8657, %v9635_v25  }
 0x278   : > { %v1338_v34 = vpop.permute.xlu0 %1337  ;;  %v1332_v36 = vpop.permute.xlu1 %1331 }
 0x279   : > { %1367 = vst.msk [vmem:[#allocation2 + $0x9d] sm:$0x1] %vm661_vm3, %v1338_v34  ;;  %1364 = vst.msk [vmem:[#allocation2 + $0x55] sm:$0x1] %vm661_vm3, %v1332_v36  ;;  %v9722_v36 = vld [vmem:[#allocation2] sm:$0xff] }
 0x27a   : > { %8659 = vset.pattern.permute.xlu1 %v13251_v41 }
 0x27b   : > { %1904 = vperm.xlu1 %8659, %v9614_v9  }
 0x27c   : > { %v1342_v37 = vpop.permute.xlu0 %1341  ;;  %v1336_v40 = vpop.permute.xlu1 %1335 }
 0x27d   : > { %1369 = vst.msk [vmem:[#allocation2 + $0xcd] sm:$0x1] %vm661_vm3, %v1342_v37  ;;  %1366 = vst.msk [vmem:[#allocation2 + $0x85] sm:$0x1] %vm661_vm3, %v1336_v40 }
 0x27f   : > { %1908 = vperm.xlu1 %8659, %v9655_v38  }
 0x280   : > { %v1346_v42 = vpop.permute.xlu0 %1345  ;;  %v1340_v44 = vpop.permute.xlu1 %1339 }
 0x281   : > { %1371 = vst.msk [vmem:[#allocation2 + $0xfd] sm:$0x1] %vm661_vm3, %v1346_v42  ;;  %1368 = vst.msk [vmem:[#allocation2 + $0xb5] sm:$0x1] %vm661_vm3, %v1340_v44 }
 0x283   : > { %1916 = vperm.xlu1 %8659, %v9663_v0  }
 0x284   : > { %v1374_v45 = vpop.permute.xlu0 %1373  ;;  %v1344_v48 = vpop.permute.xlu1 %1343 }
 0x285   : > { %1409 = vst.msk [vmem:[#allocation2 + $0xe] sm:$0x1] %vm661_vm3, %v1374_v45  ;;  %1370 = vst.msk [vmem:[#allocation2 + $0xe5] sm:$0x1] %vm661_vm3, %v1344_v48 }
 0x287   : > { %1924 = vperm.xlu1 %8659, %v9669_v46  }
 0x288   : > { %v1378_v13 = vpop.permute.xlu0 %1377  ;;  %v1348_v52 = vpop.permute.xlu1 %1347 }
 0x289   : > { %1411 = vst.msk [vmem:[#allocation2 + $0x3e] sm:$0x1] %vm661_vm3, %v1378_v13  ;;  %1372 = vst.msk [vmem:[#allocation2 + $0x115] sm:$0x1] %vm661_vm3, %v1348_v52 }
 0x28b   : > { %1932 = vperm.xlu1 %8659, %v9677_v49  }
 0x28c   : > { %v1382_v51 = vpop.permute.xlu0 %1381  ;;  %v1376_v54 = vpop.permute.xlu1 %1375 }
 0x28d   : > { %1413 = vst.msk [vmem:[#allocation2 + $0x6e] sm:$0x1] %vm661_vm3, %v1382_v51  ;;  %1410 = vst.msk [vmem:[#allocation2 + $0x26] sm:$0x1] %vm661_vm3, %v1376_v54 }
 0x28f   : > { %1940 = vperm.xlu1 %8659, %v9683_v53  }
 0x290   : > { %v1386_v55 = vpop.permute.xlu0 %1385  ;;  %v1380_v56 = vpop.permute.xlu1 %1379 }
 0x291   : > { %1415 = vst.msk [vmem:[#allocation2 + $0x9e] sm:$0x1] %vm661_vm3, %v1386_v55  ;;  %1412 = vst.msk [vmem:[#allocation2 + $0x56] sm:$0x1] %vm661_vm3, %v1380_v56  ;;  %v9750_v56 = vld [vmem:[#allocation2 + $0x30] sm:$0xff] }
 0x293   : > { %8660 = vset.pattern.permute.xlu1 %v13249_v61 }
 0x294   : > { %v1390_v28 = vpop.permute.xlu0 %1389  ;;  %v1384_v57 = vpop.permute.xlu1 %1383 }
 0x295   : > { %1417 = vst.msk [vmem:[#allocation2 + $0xce] sm:$0x1] %vm661_vm3, %v1390_v28  ;;  %1414 = vst.msk [vmem:[#allocation2 + $0x86] sm:$0x1] %vm661_vm3, %v1384_v57 }
 0x298   : > { %v1394_v5 = vpop.permute.xlu0 %1393  ;;  %v1388_v3 = vpop.permute.xlu1 %1387 }
 0x299   : > { %1419 = vst.msk [vmem:[#allocation2 + $0xfe] sm:$0x1] %vm661_vm3, %v1394_v5  ;;  %1416 = vst.msk [vmem:[#allocation2 + $0xb6] sm:$0x1] %vm661_vm3, %v1388_v3 }
 0x29c   : > { %v1422_v58 = vpop.permute.xlu0 %1421  ;;  %v1392_v59 = vpop.permute.xlu1 %1391 }
 0x29d   : > { %1457 = vst.msk [vmem:[#allocation2 + $0xf] sm:$0x1] %vm661_vm3, %v1422_v58  ;;  %1418 = vst.msk [vmem:[#allocation2 + $0xe6] sm:$0x1] %vm661_vm3, %v1392_v59  ;;  %v9758_v59 = vld [vmem:[#allocation2 + $0x48] sm:$0xff] }
 0x2a0   : > { %v1426_v60 = vpop.permute.xlu0 %1425  ;;  %v1396_v7 = vpop.permute.xlu1 %1395 }
 0x2a1   : > { %1459 = vst.msk [vmem:[#allocation2 + $0x3f] sm:$0x1] %vm661_vm3, %v1426_v60  ;;  %1420 = vst.msk [vmem:[#allocation2 + $0x116] sm:$0x1] %vm661_vm3, %v1396_v7 }
 0x2a4   : > { %v1430_v63 = vpop.permute.xlu0 %1429  ;;  %v1424_v19 = vpop.permute.xlu1 %1423  ;;  %v9724_v37 = vld [vmem:[#allocation2 + $0x8] sm:$0xff] }
 0x2a5   : > { %1461 = vst.msk [vmem:[#allocation2 + $0x6f] sm:$0x1] %vm661_vm3, %v1430_v63  ;;  %1458 = vst.msk [vmem:[#allocation2 + $0x27] sm:$0x1] %vm661_vm3, %v1424_v19 }
 0x2a8   : > { %v1434_v1 = vpop.permute.xlu0 %1433  ;;  %v1428_v4 = vpop.permute.xlu1 %1427  ;;  %v9752_v28 = vld [vmem:[#allocation2 + $0x38] sm:$0xff] }
 0x2a9   : > { %1463 = vst.msk [vmem:[#allocation2 + $0x9f] sm:$0x1] %vm661_vm3, %v1434_v1  ;;  %1460 = vst.msk [vmem:[#allocation2 + $0x57] sm:$0x1] %vm661_vm3, %v1428_v4  ;;  %v9766_v1 = vld [vmem:[#allocation2 + $0x60] sm:$0xff] }
 0x2ac   : > { %v1438_v8 = vpop.permute.xlu0 %1437  ;;  %v1432_v33 = vpop.permute.xlu1 %1431  ;;  %v9744_v52 = vld [vmem:[#allocation2 + $0x20] sm:$0xff]  ;;  %v9768_v4 = vld [vmem:[#allocation2 + $0x68] sm:$0xff] }
 0x2ad   : > { %1465 = vst.msk [vmem:[#allocation2 + $0xcf] sm:$0x1] %vm661_vm3, %v1438_v8  ;;  %1462 = vst.msk [vmem:[#allocation2 + $0x87] sm:$0x1] %vm661_vm3, %v1432_v33 }
 0x2b0   : > { %v1442_v10 = vpop.permute.xlu0 %1441  ;;  %v1436_v11 = vpop.permute.xlu1 %1435  ;;  %v9760_v60 = vld [vmem:[#allocation2 + $0x50] sm:$0xff] }
 0x2b1   : > { %1467 = vst.msk [vmem:[#allocation2 + $0xff] sm:$0x1] %vm661_vm3, %v1442_v10  ;;  %1464 = vst.msk [vmem:[#allocation2 + $0xb7] sm:$0x1] %vm661_vm3, %v1436_v11  ;;  %v9774_v11 = vld [vmem:[#allocation2 + $0x78] sm:$0xff] }
 0x2b4   : > { %v1470_v14 = vpop.permute.xlu0 %1469  ;;  %v1440_v17 = vpop.permute.xlu1 %1439 }
 0x2b5   : > { %1505 = vst.msk [vmem:[#allocation2 + $0x10] sm:$0x1] %vm661_vm3, %v1470_v14  ;;  %1466 = vst.msk [vmem:[#allocation2 + $0xe7] sm:$0x1] %vm661_vm3, %v1440_v17  ;;  %v9776_v14 = vld [vmem:[#allocation2 + $0x80] sm:$0xff] }
 0x2b8   : > { %v1474_v16 = vpop.permute.xlu0 %1473  ;;  %v1444_v21 = vpop.permute.xlu1 %1443 }
 0x2b9   : > { %1507 = vst.msk [vmem:[#allocation2 + $0x40] sm:$0x1] %vm661_vm3, %v1474_v16  ;;  %1468 = vst.msk [vmem:[#allocation2 + $0x117] sm:$0x1] %vm661_vm3, %v1444_v21 }
 0x2bc   : > { %v1478_v23 = vpop.permute.xlu0 %1477  ;;  %v1472_v24 = vpop.permute.xlu1 %1471 }
 0x2bd   : > { %1509 = vst.msk [vmem:[#allocation2 + $0x70] sm:$0x1] %vm661_vm3, %v1478_v23  ;;  %1506 = vst.msk [vmem:[#allocation2 + $0x28] sm:$0x1] %vm661_vm3, %v1472_v24  ;;  %v9782_v23 = vld [vmem:[#allocation2 + $0x90] sm:$0xff]  ;;  %v9784_v24 = vld [vmem:[#allocation2 + $0x98] sm:$0xff] }
 0x2c0   : > { %v1482_v26 = vpop.permute.xlu0 %1481  ;;  %v1476_v27 = vpop.permute.xlu1 %1475 }
 0x2c1   : > { %1511 = vst.msk [vmem:[#allocation2 + $0xa0] sm:$0x1] %vm661_vm3, %v1482_v26  ;;  %1508 = vst.msk [vmem:[#allocation2 + $0x58] sm:$0x1] %vm661_vm3, %v1476_v27 }
 0x2c4   : > { %v1486_v29 = vpop.permute.xlu0 %1485  ;;  %v1480_v30 = vpop.permute.xlu1 %1479 }
 0x2c5   : > { %1513 = vst.msk [vmem:[#allocation2 + $0xd0] sm:$0x1] %vm661_vm3, %v1486_v29  ;;  %1510 = vst.msk [vmem:[#allocation2 + $0x88] sm:$0x1] %vm661_vm3, %v1480_v30  ;;  %v9790_v30 = vld [vmem:[#allocation2 + $0xa8] sm:$0xff] }
 0x2c8   : > { %v1490_v31 = vpop.permute.xlu0 %1489  ;;  %v1484_v32 = vpop.permute.xlu1 %1483 }
 0x2c9   : > { %1515 = vst.msk [vmem:[#allocation2 + $0x100] sm:$0x1] %vm661_vm3, %v1490_v31  ;;  %1512 = vst.msk [vmem:[#allocation2 + $0xb8] sm:$0x1] %vm661_vm3, %v1484_v32  ;;  %v9792_v31 = vld [vmem:[#allocation2 + $0xb0] sm:$0xff] }
 0x2cc   : > { %v1488_v34 = vpop.permute.xlu1 %1487 }
 0x2cd   : > { %1514 = vst.msk [vmem:[#allocation2 + $0xe8] sm:$0x1] %vm661_vm3, %v1488_v34 }
 0x2d0   : > { %v1492_v35 = vpop.permute.xlu1 %1491 }
 0x2d1   : > { %1516 = vst.msk [vmem:[#allocation2 + $0x118] sm:$0x1] %vm661_vm3, %v1492_v35 }
 0x2d5   : > { %v1901_v39 = vpop.permute.xlu0 %1900 }
 0x2d6   : > { %v1947_v40 = vmul.f32 %v1901_v39, %v9722_v36  ;;  %v1948_v42 = vmul.f32 %v1901_v39, %v9724_v37  ;;  %v9798_v39 = vld [vmem:[#allocation2 + $0xc0] sm:$0xff] }
 0x2d8   : > { %1997 = vrot.lane.b32.xlu0 %v1948_v42, %s8834_s16  ;;  %1995 = vrot.lane.b32.xlu1 %v1947_v40, %s8834_s16  ;;  %v9800_v40 = vld [vmem:[#allocation2 + $0xc8] sm:$0xff] }
 0x2d9   : > { %v1913_v58 = vpop.permute.xlu0 %1912 }
 0x2da   : > { %v1953_v7 = vmul.f32 %v1913_v58, %v9758_v59  ;;  %v1954_v63 = vmul.f32 %v1913_v58, %v9760_v60 }
 0x2dd   : > { %v9730_v43 = vpop.permute.xlu1 %1683  ;;  %v1921_v10 = vpop.permute.xlu0 %1920 }
 0x2de   : > { %13373 = vst [vmem:[#allocation9_spill] sm:$0xff] %v9730_v43  ;;  %v1957_v17 = vmul.f32 %v1921_v10, %v9774_v11  ;;  %v1958_v16 = vmul.f32 %v1921_v10, %v9776_v14  ;;  %v9822_v10 = vld [vmem:[#allocation2 + $0x108] sm:$0xff] }
 0x2e1   : > { %v9732_v44 = vpop.permute.xlu1 %1691  ;;  %v1929_v29 = vpop.permute.xlu0 %1928 }
 0x2e2   : > { %13374 = vst [vmem:[#allocation10_spill] sm:$0xff] %v9732_v44  ;;  %v1961_v32 = vmul.f32 %v1929_v29, %v9790_v30  ;;  %v1962_v34 = vmul.f32 %v1929_v29, %v9792_v31 }
 0x2e5   : > { %v9734_v45 = vpop.permute.xlu1 %1699 }
 0x2e6   : > { %13375 = vst [vmem:[#allocation11_spill] sm:$0xff] %v9734_v45 }
 0x2e9   : > { %v9736_v47 = vpop.permute.xlu1 %1707 }
 0x2ea   : > { %13376 = vst [vmem:[#allocation12_spill] sm:$0xff] %v9736_v47 }
 0x2ed   : > { %v9738_v48 = vpop.permute.xlu1 %1715 }
 0x2ee   : > { %13377 = vst [vmem:[#allocation13_spill] sm:$0xff] %v9738_v48 }
 0x2f1   : > { %v9740_v13 = vpop.permute.xlu1 %1723 }
 0x2f2   : > { %13378 = vst [vmem:[#allocation14_spill] sm:$0xff] %v9740_v13 }
 0x2f6   : > { %v1905_v51 = vpop.permute.xlu1 %1904 }
 0x2f7   : > { %v1949_v54 = vmul.f32 %v1905_v51, %v9742_v50  ;;  %v1950_v55 = vmul.f32 %v1905_v51, %v9744_v52 }
 0x2f9   : > { %2001 = vrot.lane.b32.xlu0 %v1950_v55, %s8834_s16  ;;  %1999 = vrot.lane.b32.xlu1 %v1949_v54, %s8834_s16  ;;  %v1937_v54 = vpop.permute.xlu0 %1936  ;;  %v9806_v55 = vld [vmem:[#allocation2 + $0xd8] sm:$0xff] }
 0x2fa   : > { %v1909_v57 = vpop.permute.xlu1 %1908 }
 0x2fb   : > { %v1951_v5 = vmul.f32 %v1909_v57, %v9750_v56  ;;  %v1952_v3 = vmul.f32 %v1909_v57, %v9752_v28  ;;  %v9808_v57 = vld [vmem:[#allocation2 + $0xe0] sm:$0xff] }
 0x2fd   : > { %2005 = vrot.lane.b32.xlu0 %v1952_v3, %s8834_s16  ;;  %2003 = vrot.lane.b32.xlu1 %v1951_v5, %s8834_s16  ;;  %v1965_v5 = vmul.f32 %v1937_v54, %v9806_v55  ;;  %v1966_v3 = vmul.f32 %v1937_v54, %v9808_v57 }
 0x2fe   : > { %v1917_v19 = vpop.permute.xlu1 %1916 }
 0x2ff   : > { %v1955_v8 = vmul.f32 %v1917_v19, %v9766_v1  ;;  %v1956_v33 = vmul.f32 %v1917_v19, %v9768_v4 }
 0x301   : > { %2009 = vrot.lane.b32.xlu0 %v1954_v63, %s8834_s16  ;;  %2007 = vrot.lane.b32.xlu1 %v1953_v7, %s8834_s16  ;;  %v9814_v7 = vld [vmem:[#allocation2 + $0xf0] sm:$0xff]  ;;  %v9816_v63 = vld [vmem:[#allocation2 + $0xf8] sm:$0xff] }
 0x302   : > { %v1925_v21 = vpop.permute.xlu1 %1924 }
 0x303   : > { %v1959_v26 = vmul.f32 %v1925_v21, %v9782_v23  ;;  %v1960_v27 = vmul.f32 %v1925_v21, %v9784_v24 }
 0x305   : > { %2013 = vrot.lane.b32.xlu0 %v1956_v33, %s8834_s16  ;;  %2011 = vrot.lane.b32.xlu1 %v1955_v8, %s8834_s16  ;;  %v1945_v33 = vpop.permute.xlu0 %1944 }
 0x306   : > { %v1933_v35 = vpop.permute.xlu1 %1932 }
 0x307   : > { %v1963_v42 = vmul.f32 %v1933_v35, %v9798_v39  ;;  %v1964_v51 = vmul.f32 %v1933_v35, %v9800_v40 }
 0x309   : > { %2017 = vrot.lane.b32.xlu0 %v1958_v16, %s8834_s16  ;;  %2015 = vrot.lane.b32.xlu1 %v1957_v17, %s8834_s16  ;;  %v9824_v17 = vld [vmem:[#allocation2 + $0x110] sm:$0xff]  ;;  %v1969_v16 = vmul.f32 %v1945_v33, %v9822_v10 }
 0x30a   : > { %v1941_v58 = vpop.permute.xlu1 %1940  ;;  %v1970_v21 = vmul.f32 %v1945_v33, %v9824_v17 }
 0x30b   : > { %v1967_v19 = vmul.f32 %v1941_v58, %v9814_v7  ;;  %v1968_v8 = vmul.f32 %v1941_v58, %v9816_v63 }
 0x30d   : > { %2021 = vrot.lane.b32.xlu0 %v1960_v27, %s8834_s16  ;;  %2019 = vrot.lane.b32.xlu1 %v1959_v26, %s8834_s16  ;;  %v13247_v26 = vmov 3  }
 0x311   : > { %2025 = vrot.lane.b32.xlu0 %v1962_v34, %s8834_s16  ;;  %2023 = vrot.lane.b32.xlu1 %v1961_v32, %s8834_s16 }
 0x315   : > { %2029 = vrot.lane.b32.xlu0 %v1964_v51, %s8834_s16  ;;  %2027 = vrot.lane.b32.xlu1 %v1963_v42, %s8834_s16 }
 0x319   : > { %2033 = vrot.lane.b32.xlu0 %v1966_v3, %s8834_s16  ;;  %2031 = vrot.lane.b32.xlu1 %v1965_v5, %s8834_s16 }
 0x31d   : > { %2037 = vrot.lane.b32.xlu0 %v1968_v8, %s8834_s16  ;;  %2035 = vrot.lane.b32.xlu1 %v1967_v19, %s8834_s16 }
 0x321   : > { %2041 = vrot.lane.b32.xlu0 %v1970_v21, %s8834_s16  ;;  %2039 = vrot.lane.b32.xlu1 %v1969_v16, %s8834_s16 }
 0x325   : > { %2221 = vperm.xlu0 %8661, %v9614_v9   ;;  %2217 = vperm.xlu1 %8660, %v9583_v20  }
 0x329   : > { %2233 = vperm.xlu0 %8661, %v9663_v0   ;;  %2225 = vperm.xlu1 %8660, %v9655_v38  }
 0x32d   : > { %2241 = vperm.xlu0 %8661, %v9669_v46   ;;  %2229 = vperm.xlu1 %8660, %v9593_v62  }
 0x331   : > { %2249 = vperm.xlu0 %8661, %v9677_v49   ;;  %2237 = vperm.xlu1 %8660, %v9607_v6  }
 0x335   : > { %2257 = vperm.xlu0 %8661, %v9683_v53   ;;  %2245 = vperm.xlu1 %8660, %v9620_v12  }
 0x339   : > { %2253 = vperm.xlu1 %8660, %v9628_v18   ;;  %8662 = vset.pattern.permute.xlu0 %v13247_v26 }
 0x33d   : > { %2261 = vperm.xlu1 %8660, %v9635_v25  }
 0x341   : > { %8663 = vset.pattern.permute.xlu1 %v13247_v26 }
 0x34a   : > { %v9844_v27 = vpop.permute.xlu0 %1997  ;;  %v9846_v29 = vpop.permute.xlu1 %1995 }
 0x34b   : > { %13379 = vst [vmem:[#allocation15_spill] sm:$0xff] %v9844_v27  ;;  %13380 = vst [vmem:[#allocation16_spill] sm:$0xff] %v9846_v29 }
 0x36b   : > { %v9848_v32 = vpop.permute.xlu0 %2001  ;;  %v9850_v34 = vpop.permute.xlu1 %1999 }
 0x36c   : > { %13381 = vst [vmem:[#allocation17_spill] sm:$0xff] %v9848_v32  ;;  %13382 = vst [vmem:[#allocation18_spill] sm:$0xff] %v9850_v34 }
 0x36f   : > { %v9852_v35 = vpop.permute.xlu0 %2005  ;;  %v9854_v42 = vpop.permute.xlu1 %2003 }
 0x370   : > { %13383 = vst [vmem:[#allocation19_spill] sm:$0xff] %v9852_v35  ;;  %13384 = vst [vmem:[#allocation20_spill] sm:$0xff] %v9854_v42 }
 0x373   : > { %v9856_v51 = vpop.permute.xlu0 %2009  ;;  %v9858_v54 = vpop.permute.xlu1 %2007 }
 0x374   : > { %13385 = vst [vmem:[#allocation21_spill] sm:$0xff] %v9856_v51  ;;  %13386 = vst [vmem:[#allocation22_spill] sm:$0xff] %v9858_v54 }
 0x377   : > { %v9860_v5 = vpop.permute.xlu0 %2013  ;;  %v9862_v3 = vpop.permute.xlu1 %2011 }
 0x378   : > { %13387 = vst [vmem:[#allocation23_spill] sm:$0xff] %v9860_v5  ;;  %13388 = vst [vmem:[#allocation24_spill] sm:$0xff] %v9862_v3 }
 0x37b   : > { %v9864_v58 = vpop.permute.xlu0 %2017  ;;  %v9866_v19 = vpop.permute.xlu1 %2015 }
 0x37c   : > { %13389 = vst [vmem:[#allocation25_spill] sm:$0xff] %v9864_v58  ;;  %13390 = vst [vmem:[#allocation26_spill] sm:$0xff] %v9866_v19 }
 0x37f   : > { %v9868_v8 = vpop.permute.xlu1 %2019  ;;  %v9870_v33 = vpop.permute.xlu0 %2021 }
 0x380   : > { %13391 = vst [vmem:[#allocation27_spill] sm:$0xff] %v9868_v8  ;;  %13392 = vst [vmem:[#allocation28_spill] sm:$0xff] %v9870_v33 }
 0x383   : > { %v9872_v16 = vpop.permute.xlu1 %2023  ;;  %v9874_v21 = vpop.permute.xlu0 %2025 }
 0x384   : > { %13393 = vst [vmem:[#allocation29_spill] sm:$0xff] %v9872_v16  ;;  %13394 = vst [vmem:[#allocation30_spill] sm:$0xff] %v9874_v21 }
 0x387   : > { %v9876_v26 = vpop.permute.xlu1 %2027  ;;  %v9878_v61 = vpop.permute.xlu0 %2029 }
 0x388   : > { %13395 = vst [vmem:[#allocation31_spill] sm:$0xff] %v9876_v26  ;;  %13396 = vst [vmem:[#allocation32_spill] sm:$0xff] %v9878_v61 }
 0x38b   : > { %v9880_v41 = vpop.permute.xlu1 %2031  ;;  %v9882_v2 = vpop.permute.xlu0 %2033 }
 0x38c   : > { %13397 = vst [vmem:[#allocation33_spill] sm:$0xff] %v9880_v41  ;;  %13398 = vst [vmem:[#allocation34_spill] sm:$0xff] %v9882_v2 }
 0x38f   : > { %v9884_v5 = vpop.permute.xlu1 %2035  ;;  %v9886_v3 = vpop.permute.xlu0 %2037 }
 0x390   : > { %13399 = vst [vmem:[#allocation35_spill] sm:$0xff] %v9884_v5  ;;  %13400 = vst [vmem:[#allocation36_spill] sm:$0xff] %v9886_v3 }
 0x393   : > { %v9888_v35 = vpop.permute.xlu1 %2039  ;;  %v9890_v8 = vpop.permute.xlu0 %2041 }
 0x394   : > { %13401 = vst [vmem:[#allocation37_spill] sm:$0xff] %v9888_v35  ;;  %13402 = vst [vmem:[#allocation38_spill] sm:$0xff] %v9890_v8 }
 0x3a0   : > { %v2218_v33 = vpop.permute.xlu1 %2217  ;;  %v2222_v26 = vpop.permute.xlu0 %2221 }
 0x3a1   : > { %v2264_v42 = vmul.f32 %v2218_v33, %v9722_v36  ;;  %v2265_v27 = vmul.f32 %v2218_v33, %v9724_v37  ;;  %v2266_v5 = vmul.f32 %v2222_v26, %v9742_v50  ;;  %v2267_v3 = vmul.f32 %v2222_v26, %v9744_v52 }
 0x3a3   : > { %2314 = vrot.lane.b32.xlu1 %v2265_v27, %s8836_s17  ;;  %2312 = vrot.lane.b32.xlu0 %v2264_v42, %s8836_s17 }
 0x3a4   : > { %v2226_v61 = vpop.permute.xlu1 %2225  ;;  %v2234_v8 = vpop.permute.xlu0 %2233 }
 0x3a5   : > { %v2268_v29 = vmul.f32 %v2226_v61, %v9750_v56  ;;  %v2269_v35 = vmul.f32 %v2226_v61, %v9752_v28  ;;  %v2272_v26 = vmul.f32 %v2234_v8, %v9766_v1 }
 0x3a7   : > { %2318 = vrot.lane.b32.xlu1 %v2267_v3, %s8836_s17  ;;  %2316 = vrot.lane.b32.xlu0 %v2266_v5, %s8836_s17  ;;  %v2273_v5 = vmul.f32 %v2234_v8, %v9768_v4 }
 0x3a8   : > { %v2230_v33 = vpop.permute.xlu1 %2229 }
 0x3a9   : > { %v2270_v27 = vmul.f32 %v2230_v33, %v9758_v59  ;;  %v2271_v42 = vmul.f32 %v2230_v33, %v9760_v60 }
 0x3ab   : > { %2322 = vrot.lane.b32.xlu1 %v2269_v35, %s8836_s17  ;;  %2320 = vrot.lane.b32.xlu0 %v2268_v29, %s8836_s17  ;;  %v2242_v35 = vpop.permute.xlu0 %2241 }
 0x3ac   : > { %v2238_v3 = vpop.permute.xlu1 %2237  ;;  %v2276_v33 = vmul.f32 %v2242_v35, %v9782_v23 }
 0x3ad   : > { %v2274_v61 = vmul.f32 %v2238_v3, %v9774_v11  ;;  %v2275_v29 = vmul.f32 %v2238_v3, %v9776_v14 }
 0x3af   : > { %2326 = vrot.lane.b32.xlu1 %v2271_v42, %s8836_s17  ;;  %2324 = vrot.lane.b32.xlu0 %v2270_v27, %s8836_s17  ;;  %v2277_v27 = vmul.f32 %v2242_v35, %v9784_v24 }
 0x3b0   : > { %v2246_v42 = vpop.permute.xlu1 %2245 }
 0x3b1   : > { %v2278_v8 = vmul.f32 %v2246_v42, %v9790_v30 }
 0x3b3   : > { %2330 = vrot.lane.b32.xlu1 %v2273_v5, %s8836_s17  ;;  %2328 = vrot.lane.b32.xlu0 %v2272_v26, %s8836_s17  ;;  %v2279_v26 = vmul.f32 %v2246_v42, %v9792_v31  ;;  %v2250_v5 = vpop.permute.xlu0 %2249 }
 0x3b4   : > { %v2280_v3 = vmul.f32 %v2250_v5, %v9798_v39 }
 0x3b7   : > { %2334 = vrot.lane.b32.xlu1 %v2275_v29, %s8836_s17  ;;  %2332 = vrot.lane.b32.xlu0 %v2274_v61, %s8836_s17  ;;  %v2281_v61 = vmul.f32 %v2250_v5, %v9800_v40  ;;  %v2254_v29 = vpop.permute.xlu1 %2253 }
 0x3b8   : > { %v2282_v35 = vmul.f32 %v2254_v29, %v9806_v55 }
 0x3bb   : > { %2338 = vrot.lane.b32.xlu1 %v2277_v27, %s8836_s17  ;;  %2336 = vrot.lane.b32.xlu0 %v2276_v33, %s8836_s17  ;;  %v2283_v33 = vmul.f32 %v2254_v29, %v9808_v57  ;;  %v2258_v27 = vpop.permute.xlu0 %2257 }
 0x3bc   : > { %v2284_v42 = vmul.f32 %v2258_v27, %v9814_v7 }
 0x3bf   : > { %2342 = vrot.lane.b32.xlu1 %v2279_v26, %s8836_s17  ;;  %2340 = vrot.lane.b32.xlu0 %v2278_v8, %s8836_s17  ;;  %v2285_v8 = vmul.f32 %v2258_v27, %v9816_v63  ;;  %v2262_v26 = vpop.permute.xlu1 %2261 }
 0x3c0   : > { %v2286_v5 = vmul.f32 %v2262_v26, %v9822_v10 }
 0x3c3   : > { %2346 = vrot.lane.b32.xlu1 %v2281_v61, %s8836_s17  ;;  %2344 = vrot.lane.b32.xlu0 %v2280_v3, %s8836_s17  ;;  %v2287_v3 = vmul.f32 %v2262_v26, %v9824_v17  ;;  %v13257_v61 = vmov 4  }
 0x3c7   : > { %2350 = vrot.lane.b32.xlu1 %v2283_v33, %s8836_s17  ;;  %2348 = vrot.lane.b32.xlu0 %v2282_v35, %s8836_s17  ;;  %v13255_v33 = vmov 5  }
 0x3cb   : > { %2354 = vrot.lane.b32.xlu1 %v2285_v8, %s8836_s17  ;;  %2352 = vrot.lane.b32.xlu0 %v2284_v42, %s8836_s17 }
 0x3cf   : > { %2358 = vrot.lane.b32.xlu1 %v2287_v3, %s8836_s17  ;;  %2356 = vrot.lane.b32.xlu0 %v2286_v5, %s8836_s17 }
 0x3d3   : > { %2538 = vperm.xlu1 %8663, %v9614_v9   ;;  %2534 = vperm.xlu0 %8662, %v9583_v20  }
 0x3d7   : > { %2542 = vperm.xlu1 %8663, %v9655_v38   ;;  %2546 = vperm.xlu0 %8662, %v9593_v62  }
 0x3db   : > { %2550 = vperm.xlu1 %8663, %v9663_v0   ;;  %2554 = vperm.xlu0 %8662, %v9607_v6  }
 0x3df   : > { %2558 = vperm.xlu1 %8663, %v9669_v46   ;;  %2562 = vperm.xlu0 %8662, %v9620_v12  }
 0x3e3   : > { %2566 = vperm.xlu1 %8663, %v9677_v49   ;;  %2570 = vperm.xlu0 %8662, %v9628_v18  }
 0x3e7   : > { %2574 = vperm.xlu1 %8663, %v9683_v53   ;;  %2578 = vperm.xlu0 %8662, %v9635_v25  }
 0x3eb   : > { %8664 = vset.pattern.permute.xlu1 %v13257_v61  ;;  %8665 = vset.pattern.permute.xlu0 %v13257_v61 }
 0x3ec   : > { %2888 = vperm.xlu1 %8664, %v9583_v20   ;;  %2892 = vperm.xlu0 %8665, %v9614_v9  }
 0x3f0   : > { %2896 = vperm.xlu1 %8664, %v9655_v38   ;;  %2904 = vperm.xlu0 %8665, %v9663_v0  }
 0x3f4   : > { %2900 = vperm.xlu1 %8664, %v9593_v62   ;;  %2912 = vperm.xlu0 %8665, %v9669_v46  }
 0x3f8   : > { %2908 = vperm.xlu1 %8664, %v9607_v6   ;;  %2920 = vperm.xlu0 %8665, %v9677_v49  }
 0x3fc   : > { %2916 = vperm.xlu1 %8664, %v9620_v12   ;;  %2928 = vperm.xlu0 %8665, %v9683_v53  }
 0x400   : > { %2924 = vperm.xlu1 %8664, %v9628_v18   ;;  %8666 = vset.pattern.permute.xlu0 %v13255_v33 }
 0x404   : > { %2932 = vperm.xlu1 %8664, %v9635_v25  }
 0x408   : > { %8667 = vset.pattern.permute.xlu1 %v13255_v33 }
 0x415   : > { %v9966_v9 = vpop.permute.xlu0 %2312  ;;  %v9968_v29 = vpop.permute.xlu1 %2314 }
 0x416   : > { %13403 = vst [vmem:[#allocation39_spill] sm:$0xff] %v9966_v9  ;;  %13404 = vst [vmem:[#allocation40_spill] sm:$0xff] %v9968_v29 }
 0x419   : > { %v9970_v35 = vpop.permute.xlu0 %2316  ;;  %v9972_v62 = vpop.permute.xlu1 %2318 }
 0x41a   : > { %13405 = vst [vmem:[#allocation41_spill] sm:$0xff] %v9970_v35  ;;  %13406 = vst [vmem:[#allocation42_spill] sm:$0xff] %v9972_v62 }
 0x41d   : > { %v9976_v6 = vpop.permute.xlu0 %2320  ;;  %v9978_v12 = vpop.permute.xlu1 %2322 }
 0x41e   : > { %13407 = vst [vmem:[#allocation43_spill] sm:$0xff] %v9976_v6  ;;  %13408 = vst [vmem:[#allocation44_spill] sm:$0xff] %v9978_v12 }
 0x421   : > { %v9980_v18 = vpop.permute.xlu0 %2324  ;;  %v9982_v25 = vpop.permute.xlu1 %2326 }
 0x422   : > { %13409 = vst [vmem:[#allocation45_spill] sm:$0xff] %v9980_v18  ;;  %13410 = vst [vmem:[#allocation46_spill] sm:$0xff] %v9982_v25  ;;  %v10050_v18 = vld [vmem:[#allocation2 + $0x40] sm:$0x3] }
 0x425   : > { %v9984_v49 = vpop.permute.xlu0 %2328  ;;  %v9986_v53 = vpop.permute.xlu1 %2330 }
 0x426   : > { %13411 = vst [vmem:[#allocation47_spill] sm:$0xff] %v9984_v49  ;;  %13412 = vst [vmem:[#allocation48_spill] sm:$0xff] %v9986_v53 }
 0x429   : > { %v9988_v27 = vpop.permute.xlu0 %2332  ;;  %v9990_v42 = vpop.permute.xlu1 %2334 }
 0x42a   : > { %13413 = vst [vmem:[#allocation49_spill] sm:$0xff] %v9988_v27  ;;  %13414 = vst [vmem:[#allocation50_spill] sm:$0xff] %v9990_v42  ;;  %v10042_v42 = vld [vmem:[#allocation2 + $0x10] sm:$0x3] }
 0x42d   : > { %v9992_v8 = vpop.permute.xlu0 %2336  ;;  %v9994_v26 = vpop.permute.xlu1 %2338 }
 0x42e   : > { %13415 = vst [vmem:[#allocation51_spill] sm:$0xff] %v9992_v8  ;;  %13416 = vst [vmem:[#allocation52_spill] sm:$0xff] %v9994_v26 }
 0x431   : > { %v9996_v5 = vpop.permute.xlu0 %2340  ;;  %v9998_v3 = vpop.permute.xlu1 %2342 }
 0x432   : > { %13417 = vst [vmem:[#allocation53_spill] sm:$0xff] %v9996_v5  ;;  %13418 = vst [vmem:[#allocation54_spill] sm:$0xff] %v9998_v3  ;;  %v10040_v5 = vld [vmem:[#allocation2 + $0x28] sm:$0x3] }
 0x435   : > { %v10000_v33 = vpop.permute.xlu0 %2344  ;;  %v10002_v61 = vpop.permute.xlu1 %2346 }
 0x436   : > { %13419 = vst [vmem:[#allocation55_spill] sm:$0xff] %v10000_v33  ;;  %13420 = vst [vmem:[#allocation56_spill] sm:$0xff] %v10002_v61 }
 0x439   : > { %v10004_v12 = vpop.permute.xlu0 %2348  ;;  %v10006_v49 = vpop.permute.xlu1 %2350 }
 0x43a   : > { %13421 = vst [vmem:[#allocation57_spill] sm:$0xff] %v10004_v12  ;;  %13422 = vst [vmem:[#allocation58_spill] sm:$0xff] %v10006_v49 }
 0x43d   : > { %v10008_v53 = vpop.permute.xlu0 %2352  ;;  %v10010_v6 = vpop.permute.xlu1 %2354 }
 0x43e   : > { %13423 = vst [vmem:[#allocation59_spill] sm:$0xff] %v10008_v53  ;;  %13424 = vst [vmem:[#allocation60_spill] sm:$0xff] %v10010_v6 }
 0x441   : > { %v10012_v29 = vpop.permute.xlu0 %2356  ;;  %v10014_v8 = vpop.permute.xlu1 %2358 }
 0x442   : > { %13425 = vst [vmem:[#allocation61_spill] sm:$0xff] %v10012_v29  ;;  %13426 = vst [vmem:[#allocation62_spill] sm:$0xff] %v10014_v8 }
 0x44e   : > { %v10016_v26 = vpop.permute.xlu0 %2534  ;;  %v10018_v9 = vpop.permute.xlu1 %2538 }
 0x44f   : > { %13427 = vst [vmem:[#allocation63_spill] sm:$0xff] %v10016_v26  ;;  %13428 = vst [vmem:[#allocation64_spill] sm:$0xff] %v10018_v9 }
 0x452   : > { %v10020_v3 = vpop.permute.xlu0 %2546  ;;  %v10022_v33 = vpop.permute.xlu1 %2542 }
 0x453   : > { %13429 = vst [vmem:[#allocation65_spill] sm:$0xff] %v10020_v3  ;;  %13430 = vst [vmem:[#allocation66_spill] sm:$0xff] %v10022_v33 }
 0x456   : > { %v10024_v61 = vpop.permute.xlu0 %2554  ;;  %v10026_v12 = vpop.permute.xlu1 %2550 }
 0x457   : > { %13431 = vst [vmem:[#allocation67_spill] sm:$0xff] %v10024_v61  ;;  %13432 = vst [vmem:[#allocation68_spill] sm:$0xff] %v10026_v12 }
 0x45a   : > { %v10028_v49 = vpop.permute.xlu0 %2562  ;;  %v10030_v53 = vpop.permute.xlu1 %2558 }
 0x45b   : > { %13433 = vst [vmem:[#allocation69_spill] sm:$0xff] %v10028_v49  ;;  %13434 = vst [vmem:[#allocation70_spill] sm:$0xff] %v10030_v53 }
 0x45e   : > { %v10032_v6 = vpop.permute.xlu0 %2570  ;;  %v10034_v29 = vpop.permute.xlu1 %2566 }
 0x45f   : > { %13435 = vst [vmem:[#allocation71_spill] sm:$0xff] %v10032_v6  ;;  %13436 = vst [vmem:[#allocation72_spill] sm:$0xff] %v10034_v29 }
 0x462   : > { %v10036_v8 = vpop.permute.xlu0 %2578  ;;  %v10038_v26 = vpop.permute.xlu1 %2574 }
 0x463   : > { %13437 = vst [vmem:[#allocation73_spill] sm:$0xff] %v10036_v8  ;;  %13438 = vst [vmem:[#allocation74_spill] sm:$0xff] %v10038_v26 }
 0x467   : > { %v2893_v3 = vpop.permute.xlu0 %2892  ;;  %v2889_v33 = vpop.permute.xlu1 %2888 }
 0x468   : > { %v2938_v12 = vmul.f32 %v2893_v3, %v9742_v50  ;;  %v2939_v49 = vmul.f32 %v2893_v3, %v9744_v52  ;;  %v2940_v53 = vmul.f32 %v2893_v3, %v10040_v5  ;;  %v2935_v6 = vmul.f32 %v2889_v33, %v9722_v36 }
 0x469   : > { %v2936_v29 = vmul.f32 %v2889_v33, %v9724_v37  ;;  %v2937_v8 = vmul.f32 %v2889_v33, %v10042_v42 }
 0x46a   : > { %v3007_v61 = vrot.slane %v2935_v6, 1  ;;  %v3012_v62 = vrot.slane %v2938_v12, 1  ;;  %v3013_v9 = vrot.slane %v2939_v49, 1  ;;  %v3015_v35 = vrot.slane %v2940_v53, 1  ;;  %v10059_v6 = vld [vmem:[#allocation2 + $0x58] sm:$0x3] }
 0x46b   : > { %v3008_v26 = vrot.slane %v2936_v29, 1  ;;  %v3010_v27 = vrot.slane %v2937_v8, 1  ;;  %v2897_v25 = vpop.permute.xlu1 %2896  ;;  %v2905_v21 = vpop.permute.xlu0 %2904 }
 0x46c   : > { %v2941_v41 = vmul.f32 %v2897_v25, %v9750_v56  ;;  %v2942_v3 = vmul.f32 %v2897_v25, %v9752_v28  ;;  %v2943_v2 = vmul.f32 %v2897_v25, %v10050_v18  ;;  %v3016_v8 = vsel %vm2653_vm5, %v3013_v9, %v3015_v35 }
 0x46d   : > { %v3011_v16 = vsel %vm2653_vm5, %v3008_v26, %v3010_v27  ;;  %v3009_v33 = vsel %vm2653_vm5, %v3007_v61, %v3008_v26  ;;  %v3014_v61 = vsel %vm2653_vm5, %v3012_v62, %v3013_v9  ;;  %v10077_v62 = vld [vmem:[#allocation2 + $0x88] sm:$0x3] }
 0x46e   : > { %3069 = vrot.lane.b32.xlu1 %v3011_v16, %s8834_s16  ;;  %3067 = vrot.lane.b32.xlu0 %v3009_v33, %s8834_s16  ;;  %v3017_v12 = vrot.slane %v2941_v41, 1  ;;  %v3018_v49 = vrot.slane %v2942_v3, 1  ;;  %v3020_v53 = vrot.slane %v2943_v2, 1  ;;  %v10068_v16 = vld [vmem:[#allocation2 + $0x70] sm:$0x3]  ;;  %v2947_v41 = vmul.f32 %v2905_v21, %v9766_v1 }
 0x46f   : > { %v2901_v29 = vpop.permute.xlu1 %2900  ;;  %v2948_v2 = vmul.f32 %v2905_v21, %v9768_v4  ;;  %v2949_v35 = vmul.f32 %v2905_v21, %v10068_v16  ;;  %v2913_v21 = vpop.permute.xlu0 %2912 }
 0x470   : > { %v2944_v19 = vmul.f32 %v2901_v29, %v9758_v59  ;;  %v2945_v25 = vmul.f32 %v2901_v29, %v9760_v60  ;;  %v2946_v27 = vmul.f32 %v2901_v29, %v10059_v6  ;;  %v3021_v26 = vsel %vm2653_vm5, %v3018_v49, %v3020_v53 }
 0x471   : > { %v3019_v9 = vsel %vm2653_vm5, %v3017_v12, %v3018_v49  ;;  %v3030_v54 = vrot.slane %v2949_v35, 1  ;;  %v10086_v49 = vld [vmem:[#allocation2 + $0xa0] sm:$0x3] }
 0x472   : > { %3073 = vrot.lane.b32.xlu1 %v3016_v8, %s8834_s16  ;;  %3071 = vrot.lane.b32.xlu0 %v3014_v61, %s8834_s16  ;;  %v3022_v3 = vrot.slane %v2944_v19, 1  ;;  %v3023_v33 = vrot.slane %v2945_v25, 1  ;;  %v3025_v58 = vrot.slane %v2946_v27, 1  ;;  %v3027_v8 = vrot.slane %v2947_v41, 1 }
 0x473   : > { %v2909_v29 = vpop.permute.xlu1 %2908  ;;  %v3028_v61 = vrot.slane %v2948_v2, 1  ;;  %v2953_v27 = vmul.f32 %v2913_v21, %v9782_v23  ;;  %v2954_v41 = vmul.f32 %v2913_v21, %v9784_v24  ;;  %v2955_v2 = vmul.f32 %v2913_v21, %v10086_v49  ;;  %v2921_v21 = vpop.permute.xlu0 %2920 }
 0x474   : > { %v2950_v51 = vmul.f32 %v2909_v29, %v9774_v11  ;;  %v2951_v53 = vmul.f32 %v2909_v29, %v9776_v14  ;;  %v2952_v19 = vmul.f32 %v2909_v29, %v10077_v62  ;;  %v3026_v25 = vsel %vm2653_vm5, %v3023_v33, %v3025_v58 }
 0x475   : > { %v3024_v12 = vsel %vm2653_vm5, %v3022_v3, %v3023_v33  ;;  %v3031_v35 = vsel %vm2653_vm5, %v3028_v61, %v3030_v54  ;;  %v3029_v3 = vsel %vm2653_vm5, %v3027_v8, %v3028_v61  ;;  %v10095_v33 = vld [vmem:[#allocation2 + $0xb8] sm:$0x3]  ;;  %v3040_v34 = vrot.slane %v2955_v2, 1  ;;  %v10104_v61 = vld [vmem:[#allocation2 + $0xd0] sm:$0x3] }
 0x476   : > { %3077 = vrot.lane.b32.xlu1 %v3021_v26, %s8834_s16  ;;  %3075 = vrot.lane.b32.xlu0 %v3019_v9, %s8834_s16  ;;  %v3032_v26 = vrot.slane %v2950_v51, 1  ;;  %v3033_v29 = vrot.slane %v2951_v53, 1  ;;  %v3035_v9 = vrot.slane %v2952_v19, 1  ;;  %v2959_v19 = vmul.f32 %v2921_v21, %v9798_v39 }
 0x477   : > { %v2917_v58 = vpop.permute.xlu1 %2916 }
 0x478   : > { %v2956_v32 = vmul.f32 %v2917_v58, %v9790_v30  ;;  %v2957_v54 = vmul.f32 %v2917_v58, %v9792_v31  ;;  %v2958_v51 = vmul.f32 %v2917_v58, %v10095_v33  ;;  %v3036_v53 = vsel %vm2653_vm5, %v3033_v29, %v3035_v9 }
 0x479   : > { %v3034_v8 = vsel %vm2653_vm5, %v3032_v26, %v3033_v29  ;;  %v10113_v29 = vld [vmem:[#allocation2 + $0xe8] sm:$0x3] }
 0x47a   : > { %3081 = vrot.lane.b32.xlu1 %v3026_v25, %s8834_s16  ;;  %3079 = vrot.lane.b32.xlu0 %v3024_v12, %s8834_s16  ;;  %v3037_v25 = vrot.slane %v2953_v27, 1  ;;  %v3038_v12 = vrot.slane %v2954_v41, 1  ;;  %v2960_v27 = vmul.f32 %v2921_v21, %v9800_v40  ;;  %v2961_v41 = vmul.f32 %v2921_v21, %v10104_v61  ;;  %v2929_v21 = vpop.permute.xlu0 %2928 }
 0x47b   : > { %v3043_v58 = vrot.slane %v2957_v54, 1  ;;  %v2925_v9 = vpop.permute.xlu1 %2924 }
 0x47c   : > { %v3041_v2 = vsel %vm2653_vm5, %v3038_v12, %v3040_v34  ;;  %v3039_v26 = vsel %vm2653_vm5, %v3037_v25, %v3038_v12  ;;  %v3050_v13 = vrot.slane %v2961_v41, 1  ;;  %v2962_v48 = vmul.f32 %v2925_v9, %v9806_v55  ;;  %v10122_v12 = vld [vmem:[#allocation2 + $0x100] sm:$0x3] }
 0x47d   : > { %v2963_v34 = vmul.f32 %v2925_v9, %v9808_v57  ;;  %v2967_v41 = vmul.f32 %v2929_v21, %v10122_v12 }
 0x47e   : > { %3085 = vrot.lane.b32.xlu1 %v3031_v35, %s8834_s16  ;;  %3083 = vrot.lane.b32.xlu0 %v3029_v3, %s8834_s16  ;;  %v3042_v35 = vrot.slane %v2956_v32, 1  ;;  %v3045_v3 = vrot.slane %v2958_v51, 1  ;;  %v2964_v32 = vmul.f32 %v2925_v9, %v10113_v29  ;;  %v3163_v51 = vld [vmem:[%s13240_s3] sm:$0xff] }
 0x47f   : > { %v2933_v9 = vpop.permute.xlu1 %2932  ;;  %v3060_v44 = vrot.slane %v2967_v41, 1 }
 0x480   : > { %v3046_v54 = vsel %vm2653_vm5, %v3043_v58, %v3045_v3  ;;  %v3044_v25 = vsel %vm2653_vm5, %v3042_v35, %v3043_v58  ;;  %v3052_v3 = vrot.slane %v2962_v48, 1  ;;  %v3053_v35 = vrot.slane %v2963_v34, 1 }
 0x481   : > { %v3055_v58 = vrot.slane %v2964_v32, 1  ;;  %v2969_v48 = vmul.f32 %v2933_v9, %v9824_v17  ;;  %v3167_v32 = vcombine.high %v3163_v51, %v3163_v51 }
 0x482   : > { %3089 = vrot.lane.b32.xlu1 %v3036_v53, %s8834_s16  ;;  %3087 = vrot.lane.b32.xlu0 %v3034_v8, %s8834_s16  ;;  %v3047_v53 = vrot.slane %v2959_v19, 1  ;;  %v3048_v8 = vrot.slane %v2960_v27, 1  ;;  %v2965_v19 = vmul.f32 %v2929_v21, %v9814_v7  ;;  %v2966_v27 = vmul.f32 %v2929_v21, %v9816_v63 }
 0x483   : > { %v2968_v21 = vmul.f32 %v2933_v9, %v9822_v10  ;;  %v3056_v34 = vsel %vm2653_vm5, %v3053_v35, %v3055_v58 }
 0x484   : > { %v3057_v47 = vrot.slane %v2965_v19, 1  ;;  %v3058_v45 = vrot.slane %v2966_v27, 1 }
 0x485   : > { %v3062_v41 = vrot.slane %v2968_v21, 1 }
 0x486   : > { %3093 = vrot.lane.b32.xlu1 %v3041_v2, %s8834_s16  ;;  %3091 = vrot.lane.b32.xlu0 %v3039_v26, %s8834_s16  ;;  %v3051_v2 = vsel %vm2653_vm5, %v3048_v8, %v3050_v13  ;;  %v3049_v26 = vsel %vm2653_vm5, %v3047_v53, %v3048_v8  ;;  %v3054_v53 = vsel %vm2653_vm5, %v3052_v3, %v3053_v35 }
 0x487   : > { %v3061_v19 = vsel %vm2653_vm5, %v3058_v45, %v3060_v44  ;;  %v3059_v43 = vsel %vm2653_vm5, %v3057_v47, %v3058_v45  ;;  %v3181_v35 = vrot.slane %v3167_v32, %v8974_v15 }
 0x489   : > { %v3183_v47 = vcombine.high %v3181_v35, %v3181_v35 }
 0x48a   : > { %3097 = vrot.lane.b32.xlu1 %v3046_v54, %s8834_s16  ;;  %3095 = vrot.lane.b32.xlu0 %v3044_v25, %s8834_s16  ;;  %v3174_v54 = vrot.slane %v3163_v51, %v8974_v15  ;;  %v10135_v25 = vld [vmem:[#allocation2 + $0x118] sm:$0x3] }
 0x48b   : > { %v2970_v13 = vmul.f32 %v2933_v9, %v10135_v25 }
 0x48c   : > { %v3182_v8 = vcombine.high %v3174_v54, %v3174_v54  ;;  %v3190_v27 = vrot.slane %v3174_v54, %v8974_v15  ;;  %v3197_v54 = vrot.slane %v3181_v35, %v8974_v15 }
 0x48e   : > { %3101 = vrot.lane.b32.xlu1 %v3051_v2, %s8834_s16  ;;  %3099 = vrot.lane.b32.xlu0 %v3049_v26, %s8834_s16  ;;  %v3063_v2 = vrot.slane %v2969_v48, 1  ;;  %v3065_v26 = vrot.slane %v2970_v13, 1  ;;  %v3204_v3 = vrot.slane %v3182_v8, %v8974_v15  ;;  %v10154_v44 = vrot.slane %v3190_v27, %v8980_v22 }
 0x48f   : > { %v3212_v9 = vcombine.high %v3190_v27, %v3190_v27  ;;  %v3211_v13 = vrot.slane %v3183_v47, %v8974_v15  ;;  %v3213_v8 = vcombine.high %v3197_v54, %v3197_v54 }
 0x490   : > { %v3066_v58 = vsel %vm2653_vm5, %v3063_v2, %v3065_v26  ;;  %v3064_v51 = vsel %vm2653_vm5, %v3062_v41, %v3063_v2  ;;  %v10159_v45 = vrot.slane %v3204_v3, %v8980_v22 }
 0x491   : > { %v10165_v21 = vrot.slane %v3212_v9, %v8980_v22  ;;  %v10180_v32 = vrot.slane %v3211_v13, %v8980_v22  ;;  %v10186_v2 = vrot.slane %v3213_v8, %v8980_v22 }
 0x492   : > { %3105 = vrot.lane.b32.xlu1 %v3056_v34, %s8834_s16  ;;  %3103 = vrot.lane.b32.xlu0 %v3054_v53, %s8834_s16  ;;  %v8604_v34 = vld.sshfl [vmem:[%s13240_s3 + $0x8] sm:$0x33 pattern:$0x75316420]  ;;  %v10175_v53 = vrot.slane %v3197_v54, %v8980_v22  ;;  %v13278_v54 = vmov 6  }
 0x493   : > { %v3223_v27 = vcombine.high %v8604_v34, %v8604_v34  ;;  %v3230_v41 = vrot.slane %v8604_v34, %v8974_v15 }
 0x495   : > { %v10193_v35 = vrot.slane %v3230_v41, %v8980_v22 }
 0x496   : > { %3109 = vrot.lane.b32.xlu1 %v3061_v19, %s8834_s16  ;;  %3107 = vrot.lane.b32.xlu0 %v3059_v43, %s8834_s16  ;;  %v3214_v43 = vcombine.high %v3204_v3, %v3204_v3  ;;  %v3215_v19 = vcombine.high %v3211_v13, %v3211_v13  ;;  %v3237_v3 = vrot.slane %v3223_v27, %v8974_v15 }
 0x498   : > { %v10168_v48 = vrot.slane %v3214_v43, %v8980_v22  ;;  %v10189_v26 = vrot.slane %v3215_v19, %v8980_v22  ;;  %v3239_v9 = vcombine.high %v3237_v3, %v3237_v3 }
 0x49a   : > { %3113 = vrot.lane.b32.xlu1 %v3066_v58, %s8834_s16  ;;  %3111 = vrot.lane.b32.xlu0 %v3064_v51, %s8834_s16  ;;  %v10198_v58 = vrot.slane %v3237_v3, %v8980_v22  ;;  %v3238_v51 = vcombine.high %v3230_v41, %v3230_v41  ;;  %v10206_v47 = vrot.slane %v3239_v9, %v8980_v22 }
 0x49c   : > { %v10203_v43 = vrot.slane %v3238_v51, %v8980_v22 }
 0x49e   : > { %3293 = vperm.xlu1 %8667, %v10159_v45   ;;  %3289 = vperm.xlu0 %8666, %v10154_v44  }
 0x4a2   : > { %3297 = vperm.xlu1 %8667, %v10165_v21   ;;  %3301 = vperm.xlu0 %8666, %v10168_v48  }
 0x4a6   : > { %3305 = vperm.xlu1 %8667, %v10175_v53   ;;  %3309 = vperm.xlu0 %8666, %v10180_v32  }
 0x4aa   : > { %3313 = vperm.xlu1 %8667, %v10186_v2   ;;  %3317 = vperm.xlu0 %8666, %v10189_v26  }
 0x4ae   : > { %3321 = vperm.xlu1 %8667, %v10193_v35   ;;  %3325 = vperm.xlu0 %8666, %v10198_v58  }
 0x4b2   : > { %3329 = vperm.xlu1 %8667, %v10203_v43   ;;  %3333 = vperm.xlu0 %8666, %v10206_v47  }
 0x4b6   : > { %8668 = vset.pattern.permute.xlu1 %v13278_v54  ;;  %8669 = vset.pattern.permute.xlu0 %v13278_v54 }
 0x4e0   : > { %v10212_v13 = vpop.permute.xlu0 %3067  ;;  %v10214_v34 = vpop.permute.xlu1 %3069 }
 0x4e1   : > { %13439 = vst [vmem:[#allocation75_spill] sm:$0xff] %v10212_v13  ;;  %13440 = vst [vmem:[#allocation76_spill] sm:$0xff] %v10214_v34 }
 0x4e4   : > { %v10216_v8 = vpop.permute.xlu0 %3071  ;;  %v10218_v19 = vpop.permute.xlu1 %3073 }
 0x4e5   : > { %13441 = vst [vmem:[#allocation77_spill] sm:$0xff] %v10216_v8  ;;  %13442 = vst [vmem:[#allocation78_spill] sm:$0xff] %v10218_v19 }
 0x4e8   : > { %v10220_v27 = vpop.permute.xlu0 %3075  ;;  %v10222_v41 = vpop.permute.xlu1 %3077 }
 0x4e9   : > { %13443 = vst [vmem:[#allocation79_spill] sm:$0xff] %v10220_v27  ;;  %13444 = vst [vmem:[#allocation80_spill] sm:$0xff] %v10222_v41 }
 0x4ec   : > { %v10224_v3 = vpop.permute.xlu0 %3079  ;;  %v10226_v51 = vpop.permute.xlu1 %3081 }
 0x4ed   : > { %13445 = vst [vmem:[#allocation81_spill] sm:$0xff] %v10224_v3  ;;  %13446 = vst [vmem:[#allocation82_spill] sm:$0xff] %v10226_v51 }
 0x4f0   : > { %v10228_v9 = vpop.permute.xlu0 %3083  ;;  %v10230_v46 = vpop.permute.xlu1 %3085 }
 0x4f1   : > { %13447 = vst [vmem:[#allocation83_spill] sm:$0xff] %v10228_v9  ;;  %13448 = vst [vmem:[#allocation84_spill] sm:$0xff] %v10230_v46 }
 0x4f4   : > { %v10232_v54 = vpop.permute.xlu0 %3087  ;;  %v10234_v13 = vpop.permute.xlu1 %3089 }
 0x4f5   : > { %13449 = vst [vmem:[#allocation85_spill] sm:$0xff] %v10232_v54  ;;  %13450 = vst [vmem:[#allocation86_spill] sm:$0xff] %v10234_v13 }
 0x4f8   : > { %v10236_v34 = vpop.permute.xlu0 %3091  ;;  %v10238_v8 = vpop.permute.xlu1 %3093 }
 0x4f9   : > { %13451 = vst [vmem:[#allocation87_spill] sm:$0xff] %v10236_v34  ;;  %13452 = vst [vmem:[#allocation88_spill] sm:$0xff] %v10238_v8 }
 0x4fc   : > { %v10240_v19 = vpop.permute.xlu0 %3095  ;;  %v10242_v27 = vpop.permute.xlu1 %3097 }
 0x4fd   : > { %13453 = vst [vmem:[#allocation89_spill] sm:$0xff] %v10240_v19  ;;  %13454 = vst [vmem:[#allocation90_spill] sm:$0xff] %v10242_v27 }
 0x500   : > { %v10244_v41 = vpop.permute.xlu0 %3099  ;;  %v10246_v3 = vpop.permute.xlu1 %3101 }
 0x501   : > { %13455 = vst [vmem:[#allocation91_spill] sm:$0xff] %v10244_v41  ;;  %13456 = vst [vmem:[#allocation92_spill] sm:$0xff] %v10246_v3 }
 0x504   : > { %v10248_v51 = vpop.permute.xlu0 %3103  ;;  %v10250_v9 = vpop.permute.xlu1 %3105 }
 0x505   : > { %13457 = vst [vmem:[#allocation93_spill] sm:$0xff] %v10248_v51  ;;  %13458 = vst [vmem:[#allocation94_spill] sm:$0xff] %v10250_v9 }
 0x508   : > { %v10252_v46 = vpop.permute.xlu0 %3107  ;;  %v10254_v54 = vpop.permute.xlu1 %3109 }
 0x509   : > { %13459 = vst [vmem:[#allocation95_spill] sm:$0xff] %v10252_v46  ;;  %13460 = vst [vmem:[#allocation96_spill] sm:$0xff] %v10254_v54 }
 0x50c   : > { %v10256_v13 = vpop.permute.xlu0 %3111  ;;  %v10258_v34 = vpop.permute.xlu1 %3113 }
 0x50d   : > { %13461 = vst [vmem:[#allocation97_spill] sm:$0xff] %v10256_v13  ;;  %13462 = vst [vmem:[#allocation98_spill] sm:$0xff] %v10258_v34 }
 0x519   : > { %v3290_v8 = vpop.permute.xlu0 %3289  ;;  %v3294_v19 = vpop.permute.xlu1 %3293 }
 0x51a   : > { %v3336_v27 = vmul.f32 %v3290_v8, %v9722_v36  ;;  %v3337_v41 = vmul.f32 %v3290_v8, %v9724_v37  ;;  %v3338_v3 = vmul.f32 %v3290_v8, %v10042_v42  ;;  %v3339_v51 = vmul.f32 %v3294_v19, %v9742_v50 }
 0x51b   : > { %v3340_v9 = vmul.f32 %v3294_v19, %v9744_v52  ;;  %v3341_v46 = vmul.f32 %v3294_v19, %v10040_v5 }
 0x51c   : > { %v3408_v0 = vrot.slane %v3336_v27, 1  ;;  %v3409_v54 = vrot.slane %v3337_v41, 1  ;;  %v3411_v38 = vrot.slane %v3338_v3, 1  ;;  %v3413_v20 = vrot.slane %v3339_v51, 1 }
 0x51d   : > { %v3298_v13 = vpop.permute.xlu1 %3297  ;;  %v3414_v34 = vrot.slane %v3340_v9, 1  ;;  %v3416_v22 = vrot.slane %v3341_v46, 1  ;;  %v3302_v36 = vpop.permute.xlu0 %3301 }
 0x51e   : > { %v3342_v15 = vmul.f32 %v3298_v13, %v9750_v56  ;;  %v3343_v37 = vmul.f32 %v3298_v13, %v9752_v28  ;;  %v3344_v8 = vmul.f32 %v3298_v13, %v10050_v18  ;;  %v3412_v50 = vsel %vm2653_vm5, %v3409_v54, %v3411_v38 }
 0x51f   : > { %v3410_v52 = vsel %vm2653_vm5, %v3408_v0, %v3409_v54  ;;  %3470 = vrot.lane.b32.xlu0 %v3412_v50, %s8836_s17  ;;  %v3345_v19 = vmul.f32 %v3302_v36, %v9758_v59  ;;  %v3346_v27 = vmul.f32 %v3302_v36, %v9760_v60  ;;  %v3347_v46 = vmul.f32 %v3302_v36, %v10059_v6 }
 0x520   : > { %3468 = vrot.lane.b32.xlu1 %v3410_v52, %s8836_s17  ;;  %v3418_v56 = vrot.slane %v3342_v15, 1  ;;  %v3419_v41 = vrot.slane %v3343_v37, 1  ;;  %v3421_v3 = vrot.slane %v3344_v8, 1  ;;  %v3417_v13 = vsel %vm2653_vm5, %v3414_v34, %v3416_v22 }
 0x521   : > { %v3306_v28 = vpop.permute.xlu1 %3305  ;;  %v3415_v38 = vsel %vm2653_vm5, %v3413_v20, %v3414_v34  ;;  %v3423_v0 = vrot.slane %v3345_v19, 1  ;;  %v3424_v54 = vrot.slane %v3346_v27, 1  ;;  %v3426_v51 = vrot.slane %v3347_v46, 1  ;;  %v3310_v60 = vpop.permute.xlu0 %3309 }
 0x522   : > { %v3348_v59 = vmul.f32 %v3306_v28, %v9766_v1  ;;  %v3349_v9 = vmul.f32 %v3306_v28, %v9768_v4  ;;  %v3350_v15 = vmul.f32 %v3306_v28, %v10068_v16  ;;  %v3422_v36 = vsel %vm2653_vm5, %v3419_v41, %v3421_v3 }
 0x523   : > { %3474 = vrot.lane.b32.xlu0 %v3417_v13, %s8836_s17  ;;  %v3420_v22 = vsel %vm2653_vm5, %v3418_v56, %v3419_v41  ;;  %v3351_v20 = vmul.f32 %v3310_v60, %v9774_v11  ;;  %v3352_v34 = vmul.f32 %v3310_v60, %v9776_v14  ;;  %v3353_v37 = vmul.f32 %v3310_v60, %v10077_v62 }
 0x524   : > { %3472 = vrot.lane.b32.xlu1 %v3415_v38, %s8836_s17  ;;  %v3428_v1 = vrot.slane %v3348_v59, 1  ;;  %v3429_v8 = vrot.slane %v3349_v9, 1  ;;  %v3431_v50 = vrot.slane %v3350_v15, 1  ;;  %v3427_v52 = vsel %vm2653_vm5, %v3424_v54, %v3426_v51 }
 0x525   : > { %v3314_v4 = vpop.permute.xlu1 %3313  ;;  %v3425_v19 = vsel %vm2653_vm5, %v3423_v0, %v3424_v54  ;;  %v3433_v27 = vrot.slane %v3351_v20, 1  ;;  %v3434_v46 = vrot.slane %v3352_v34, 1  ;;  %v3436_v56 = vrot.slane %v3353_v37, 1  ;;  %v3318_v14 = vpop.permute.xlu0 %3317 }
 0x526   : > { %v3354_v11 = vmul.f32 %v3314_v4, %v9782_v23  ;;  %v3355_v41 = vmul.f32 %v3314_v4, %v9784_v24  ;;  %v3356_v3 = vmul.f32 %v3314_v4, %v10086_v49  ;;  %v3432_v28 = vsel %vm2653_vm5, %v3429_v8, %v3431_v50 }
 0x527   : > { %3478 = vrot.lane.b32.xlu0 %v3422_v36, %s8836_s17  ;;  %v3430_v13 = vsel %vm2653_vm5, %v3428_v1, %v3429_v8  ;;  %v3357_v38 = vmul.f32 %v3318_v14, %v9790_v30  ;;  %v3358_v0 = vmul.f32 %v3318_v14, %v9792_v31  ;;  %v3359_v54 = vmul.f32 %v3318_v14, %v10095_v33 }
 0x528   : > { %3476 = vrot.lane.b32.xlu1 %v3420_v22, %s8836_s17  ;;  %v3438_v23 = vrot.slane %v3354_v11, 1  ;;  %v3439_v51 = vrot.slane %v3355_v41, 1  ;;  %v3441_v59 = vrot.slane %v3356_v3, 1  ;;  %v3437_v60 = vsel %vm2653_vm5, %v3434_v46, %v3436_v56 }
 0x529   : > { %v3322_v24 = vpop.permute.xlu1 %3321  ;;  %v3435_v9 = vsel %vm2653_vm5, %v3433_v27, %v3434_v46  ;;  %v3443_v15 = vrot.slane %v3357_v38, 1  ;;  %v3444_v36 = vrot.slane %v3358_v0, 1  ;;  %v3446_v22 = vrot.slane %v3359_v54, 1  ;;  %v3326_v31 = vpop.permute.xlu0 %3325 }
 0x52a   : > { %v3360_v30 = vmul.f32 %v3322_v24, %v9798_v39  ;;  %v3361_v20 = vmul.f32 %v3322_v24, %v9800_v40  ;;  %v3362_v34 = vmul.f32 %v3322_v24, %v10104_v61  ;;  %v3442_v37 = vsel %vm2653_vm5, %v3439_v51, %v3441_v59 }
 0x52b   : > { %3482 = vrot.lane.b32.xlu0 %v3427_v52, %s8836_s17  ;;  %v3440_v1 = vsel %vm2653_vm5, %v3438_v23, %v3439_v51  ;;  %v3363_v8 = vmul.f32 %v3326_v31, %v9806_v55  ;;  %v3364_v50 = vmul.f32 %v3326_v31, %v9808_v57  ;;  %v3365_v4 = vmul.f32 %v3326_v31, %v10113_v29 }
 0x52c   : > { %3480 = vrot.lane.b32.xlu1 %v3425_v19, %s8836_s17  ;;  %v3448_v39 = vrot.slane %v3360_v30, 1  ;;  %v3449_v52 = vrot.slane %v3361_v20, 1  ;;  %v3451_v19 = vrot.slane %v3362_v34, 1  ;;  %v3447_v27 = vsel %vm2653_vm5, %v3444_v36, %v3446_v22 }
 0x52d   : > { %v3330_v40 = vpop.permute.xlu1 %3329  ;;  %v3445_v46 = vsel %vm2653_vm5, %v3443_v15, %v3444_v36  ;;  %v3453_v56 = vrot.slane %v3363_v8, 1  ;;  %v3454_v11 = vrot.slane %v3364_v50, 1  ;;  %v3456_v14 = vrot.slane %v3365_v4, 1  ;;  %v3334_v57 = vpop.permute.xlu0 %3333 }
 0x52e   : > { %v3366_v55 = vmul.f32 %v3330_v40, %v9814_v7  ;;  %v3367_v41 = vmul.f32 %v3330_v40, %v9816_v63  ;;  %v3368_v3 = vmul.f32 %v3330_v40, %v10122_v12  ;;  %v3369_v38 = vmul.f32 %v3334_v57, %v9822_v10 }
 0x52f   : > { %3486 = vrot.lane.b32.xlu0 %v3432_v28, %s8836_s17  ;;  %v3452_v28 = vsel %vm2653_vm5, %v3449_v52, %v3451_v19  ;;  %v3370_v0 = vmul.f32 %v3334_v57, %v9824_v17  ;;  %v3371_v54 = vmul.f32 %v3334_v57, %v10135_v25  ;;  %v3457_v63 = vsel %vm2653_vm5, %v3454_v11, %v3456_v14 }
 0x530   : > { %3484 = vrot.lane.b32.xlu1 %v3430_v13, %s8836_s17  ;;  %v3450_v13 = vsel %vm2653_vm5, %v3448_v39, %v3449_v52  ;;  %v3458_v7 = vrot.slane %v3366_v55, 1  ;;  %v3459_v23 = vrot.slane %v3367_v41, 1  ;;  %v3461_v51 = vrot.slane %v3368_v3, 1 }
 0x531   : > { %v3455_v59 = vsel %vm2653_vm5, %v3453_v56, %v3454_v11  ;;  %v3463_v24 = vrot.slane %v3369_v38, 1  ;;  %v13289_v22 = vmov 7  }
 0x532   : > { %v3462_v10 = vsel %vm2653_vm5, %v3459_v23, %v3461_v51  ;;  %v3460_v17 = vsel %vm2653_vm5, %v3458_v7, %v3459_v23  ;;  %v10445_v7 = vld [vmem:[#allocation2 + $0x8] sm:$0xff] }
 0x533   : > { %3490 = vrot.lane.b32.xlu0 %v3437_v60, %s8836_s17  ;;  %v3464_v60 = vrot.slane %v3370_v0, 1  ;;  %v10442_v0 = vld [vmem:[#allocation2] sm:$0xff] }
 0x534   : > { %3488 = vrot.lane.b32.xlu1 %v3435_v9, %s8836_s17  ;;  %v3466_v9 = vrot.slane %v3371_v54, 1 }
 0x535   : > { %v3465_v36 = vsel %vm2653_vm5, %v3463_v24, %v3464_v60 }
 0x536   : > { %v3467_v15 = vsel %vm2653_vm5, %v3464_v60, %v3466_v9 }
 0x537   : > { %3494 = vrot.lane.b32.xlu0 %v3442_v37, %s8836_s17 }
 0x538   : > { %3492 = vrot.lane.b32.xlu1 %v3440_v1, %s8836_s17 }
 0x53b   : > { %3498 = vrot.lane.b32.xlu0 %v3447_v27, %s8836_s17 }
 0x53c   : > { %3496 = vrot.lane.b32.xlu1 %v3445_v46, %s8836_s17 }
 0x53f   : > { %3502 = vrot.lane.b32.xlu0 %v3452_v28, %s8836_s17 }
 0x540   : > { %3500 = vrot.lane.b32.xlu1 %v3450_v13, %s8836_s17 }
 0x543   : > { %3506 = vrot.lane.b32.xlu0 %v3457_v63, %s8836_s17 }
 0x544   : > { %3504 = vrot.lane.b32.xlu1 %v3455_v59, %s8836_s17 }
 0x547   : > { %3510 = vrot.lane.b32.xlu0 %v3462_v10, %s8836_s17 }
 0x548   : > { %3508 = vrot.lane.b32.xlu1 %v3460_v17, %s8836_s17 }
 0x54b   : > { %3514 = vrot.lane.b32.xlu0 %v3467_v15, %s8836_s17  ;;  %v10455_v15 = vld [vmem:[#allocation2 + $0x18] sm:$0xff] }
 0x54c   : > { %3512 = vrot.lane.b32.xlu1 %v3465_v36, %s8836_s17 }
 0x54f   : > { %3694 = vperm.xlu0 %8669, %v10159_v45  }
 0x550   : > { %3690 = vperm.xlu1 %8668, %v10154_v44  }
 0x553   : > { %3706 = vperm.xlu0 %8669, %v10175_v53  }
 0x554   : > { %3698 = vperm.xlu1 %8668, %v10165_v21  }
 0x557   : > { %3714 = vperm.xlu0 %8669, %v10186_v2  }
 0x558   : > { %3702 = vperm.xlu1 %8668, %v10168_v48  }
 0x55b   : > { %3722 = vperm.xlu0 %8669, %v10193_v35  }
 0x55c   : > { %3710 = vperm.xlu1 %8668, %v10180_v32  }
 0x55f   : > { %3730 = vperm.xlu0 %8669, %v10203_v43  }
 0x560   : > { %3718 = vperm.xlu1 %8668, %v10189_v26  }
 0x563   : > { %8670 = vset.pattern.permute.xlu0 %v13289_v22 }
 0x564   : > { %3726 = vperm.xlu1 %8668, %v10198_v58   ;;  %4044 = vperm.xlu0 %8670, %v10154_v44  }
 0x568   : > { %3734 = vperm.xlu1 %8668, %v10206_v47   ;;  %4056 = vperm.xlu0 %8670, %v10168_v48  }
 0x56c   : > { %8671 = vset.pattern.permute.xlu1 %v13289_v22  ;;  %4064 = vperm.xlu0 %8670, %v10180_v32   ;;  %v10462_v22 = vld [vmem:[#allocation2 + $0x48] sm:$0xff] }
 0x56d   : > { %4048 = vperm.xlu1 %8671, %v10159_v45  }
 0x570   : > { %4072 = vperm.xlu0 %8670, %v10189_v26  }
 0x571   : > { %4052 = vperm.xlu1 %8671, %v10165_v21   ;;  %v13287_v21 = vmov 8  }
 0x574   : > { %4080 = vperm.xlu0 %8670, %v10198_v58  }
 0x575   : > { %4060 = vperm.xlu1 %8671, %v10175_v53  }
 0x578   : > { %4088 = vperm.xlu0 %8670, %v10206_v47  }
 0x579   : > { %4068 = vperm.xlu1 %8671, %v10186_v2  }
 0x57c   : > { %8673 = vset.pattern.permute.xlu0 %v13287_v21 }
 0x57d   : > { %4076 = vperm.xlu1 %8671, %v10193_v35  }
 0x581   : > { %4084 = vperm.xlu1 %8671, %v10203_v43  }
 0x585   : > { %8672 = vset.pattern.permute.xlu1 %v13287_v21 }
 0x591   : > { %v10370_v44 = vpop.permute.xlu0 %3470 }
 0x592   : > { %13463 = vst [vmem:[#allocation99_spill] sm:$0xff] %v10370_v44  ;;  %v10372_v48 = vpop.permute.xlu1 %3468 }
 0x593   : > { %13464 = vst [vmem:[#allocation100_spill] sm:$0xff] %v10372_v48 }
 0x595   : > { %v10374_v45 = vpop.permute.xlu0 %3474 }
 0x596   : > { %13465 = vst [vmem:[#allocation101_spill] sm:$0xff] %v10374_v45  ;;  %v10376_v32 = vpop.permute.xlu1 %3472  ;;  %v13555_v45 = vld [vmem:[#allocation30_spill] sm:$0xff] }
 0x597   : > { %13466 = vst [vmem:[#allocation102_spill] sm:$0xff] %v10376_v32 }
 0x599   : > { %v10380_v53 = vpop.permute.xlu0 %3478 }
 0x59a   : > { %13467 = vst [vmem:[#allocation103_spill] sm:$0xff] %v10380_v53  ;;  %v10382_v2 = vpop.permute.xlu1 %3476  ;;  %v10524_v53 = vld [vmem:[#allocation2 + $0xc0] sm:$0xff] }
 0x59b   : > { %13468 = vst [vmem:[#allocation104_spill] sm:$0xff] %v10382_v2 }
 0x59d   : > { %v10384_v26 = vpop.permute.xlu0 %3482 }
 0x59e   : > { %13469 = vst [vmem:[#allocation105_spill] sm:$0xff] %v10384_v26  ;;  %v10386_v35 = vpop.permute.xlu1 %3480 }
 0x59f   : > { %13470 = vst [vmem:[#allocation106_spill] sm:$0xff] %v10386_v35 }
 0x5a1   : > { %v10388_v58 = vpop.permute.xlu0 %3486 }
 0x5a2   : > { %13471 = vst [vmem:[#allocation107_spill] sm:$0xff] %v10388_v58  ;;  %v10390_v43 = vpop.permute.xlu1 %3484  ;;  %v10502_v58 = vld [vmem:[#allocation2 + $0x90] sm:$0xff] }
 0x5a3   : > { %13472 = vst [vmem:[#allocation108_spill] sm:$0xff] %v10390_v43 }
 0x5a5   : > { %v10392_v47 = vpop.permute.xlu0 %3490 }
 0x5a6   : > { %13473 = vst [vmem:[#allocation109_spill] sm:$0xff] %v10392_v47  ;;  %v10394_v30 = vpop.permute.xlu1 %3488 }
 0x5a7   : > { %13474 = vst [vmem:[#allocation110_spill] sm:$0xff] %v10394_v30 }
 0x5a9   : > { %v10396_v31 = vpop.permute.xlu0 %3494 }
 0x5aa   : > { %13475 = vst [vmem:[#allocation111_spill] sm:$0xff] %v10396_v31  ;;  %v10398_v20 = vpop.permute.xlu1 %3492  ;;  %v10480_v31 = vld [vmem:[#allocation2 + $0x60] sm:$0xff] }
 0x5ab   : > { %13476 = vst [vmem:[#allocation112_spill] sm:$0xff] %v10398_v20 }
 0x5ad   : > { %v10400_v34 = vpop.permute.xlu0 %3498 }
 0x5ae   : > { %13477 = vst [vmem:[#allocation113_spill] sm:$0xff] %v10400_v34  ;;  %v10402_v37 = vpop.permute.xlu1 %3496  ;;  %v10737_v34 = vld [vmem:[#allocation2 + $0xe8] sm:$0x3] }
 0x5af   : > { %13478 = vst [vmem:[#allocation114_spill] sm:$0xff] %v10402_v37  ;;  %13534 = vst [vmem:[#allocation159_spill] sm:$0xff] %v10737_v34 }
 0x5b1   : > { %v10404_v1 = vpop.permute.xlu0 %3502 }
 0x5b2   : > { %13479 = vst [vmem:[#allocation115_spill] sm:$0xff] %v10404_v1  ;;  %v10406_v8 = vpop.permute.xlu1 %3500 }
 0x5b3   : > { %13480 = vst [vmem:[#allocation116_spill] sm:$0xff] %v10406_v8 }
 0x5b5   : > { %v10408_v50 = vpop.permute.xlu0 %3506 }
 0x5b6   : > { %13481 = vst [vmem:[#allocation117_spill] sm:$0xff] %v10408_v50  ;;  %v10410_v4 = vpop.permute.xlu1 %3504  ;;  %v10719_v50 = vld [vmem:[#allocation2 + $0xb8] sm:$0x3] }
 0x5b7   : > { %13482 = vst [vmem:[#allocation118_spill] sm:$0xff] %v10410_v4 }
 0x5b9   : > { %v10412_v39 = vpop.permute.xlu0 %3510 }
 0x5ba   : > { %13483 = vst [vmem:[#allocation119_spill] sm:$0xff] %v10412_v39  ;;  %v10414_v52 = vpop.permute.xlu1 %3508 }
 0x5bb   : > { %13484 = vst [vmem:[#allocation120_spill] sm:$0xff] %v10414_v52  ;;  %v10472_v52 = vld [vmem:[#allocation2 + $0x38] sm:$0xff] }
 0x5bd   : > { %v10416_v19 = vpop.permute.xlu0 %3514 }
 0x5be   : > { %13485 = vst [vmem:[#allocation121_spill] sm:$0xff] %v10416_v19  ;;  %v10418_v40 = vpop.permute.xlu1 %3512  ;;  %v10469_v19 = vld [vmem:[#allocation2 + $0x30] sm:$0xff] }
 0x5bf   : > { %13486 = vst [vmem:[#allocation122_spill] sm:$0xff] %v10418_v40 }
 0x5ca   : > { %v10420_v27 = vpop.permute.xlu0 %3694 }
 0x5cb   : > { %13487 = vst [vmem:[#allocation123_spill] sm:$0xff] %v10420_v27  ;;  %v10422_v46 = vpop.permute.xlu1 %3690  ;;  %v13554_v27 = vld [vmem:[#allocation26_spill] sm:$0xff] }
 0x5cc   : > { %13488 = vst [vmem:[#allocation124_spill] sm:$0xff] %v10422_v46 }
 0x5ce   : > { %v10424_v56 = vpop.permute.xlu0 %3706 }
 0x5cf   : > { %13489 = vst [vmem:[#allocation125_spill] sm:$0xff] %v10424_v56  ;;  %v10426_v11 = vpop.permute.xlu1 %3698  ;;  %v10701_v56 = vld [vmem:[#allocation2 + $0x88] sm:$0x3] }
 0x5d0   : > { %13490 = vst [vmem:[#allocation126_spill] sm:$0xff] %v10426_v11 }
 0x5d2   : > { %v10428_v14 = vpop.permute.xlu0 %3714 }
 0x5d3   : > { %13491 = vst [vmem:[#allocation127_spill] sm:$0xff] %v10428_v14  ;;  %v10430_v55 = vpop.permute.xlu1 %3702 }
 0x5d4   : > { %13492 = vst [vmem:[#allocation128_spill] sm:$0xff] %v10430_v55 }
 0x5d6   : > { %v10432_v57 = vpop.permute.xlu0 %3722 }
 0x5d7   : > { %13493 = vst [vmem:[#allocation129_spill] sm:$0xff] %v10432_v57  ;;  %v10434_v41 = vpop.permute.xlu1 %3710 }
 0x5d8   : > { %13494 = vst [vmem:[#allocation130_spill] sm:$0xff] %v10434_v41 }
 0x5da   : > { %v10436_v3 = vpop.permute.xlu0 %3730 }
 0x5db   : > { %13495 = vst [vmem:[#allocation131_spill] sm:$0xff] %v10436_v3  ;;  %v10438_v28 = vpop.permute.xlu1 %3718  ;;  %v10564_v3 = vld [vmem:[#allocation2 + $0x110] sm:$0xff] }
 0x5dc   : > { %13496 = vst [vmem:[#allocation132_spill] sm:$0xff] %v10438_v28 }
 0x5df   : > { %v10440_v13 = vpop.permute.xlu1 %3726  ;;  %v4045_v38 = vpop.permute.xlu0 %4044 }
 0x5e0   : > { %13497 = vst [vmem:[#allocation133_spill] sm:$0xff] %v10440_v13  ;;  %v4091_v54 = vmul.f32 %v10442_v0, %v4045_v38  ;;  %v4092_v23 = vmul.f32 %v10445_v7, %v4045_v38  ;;  %v4093_v51 = vmul.f32 %v4045_v38, %v10042_v42  ;;  %v10458_v38 = vld [vmem:[#allocation2 + $0x20] sm:$0xff] }
 0x5e2   : > { %v4163_v63 = vrot.slane %v4091_v54, 2  ;;  %v4164_v59 = vrot.slane %v4092_v23, 2  ;;  %v4166_v24 = vrot.slane %v4093_v51, 2 }
 0x5e3   : > { %v10449_v60 = vpop.permute.xlu1 %3734  ;;  %v4057_v42 = vpop.permute.xlu0 %4056 }
 0x5e4   : > { %13498 = vst [vmem:[#allocation134_spill] sm:$0xff] %v10449_v60  ;;  %v4167_v9 = vsel %vm3809_vm6, %v4164_v59, %v4166_v24  ;;  %v4165_v10 = vsel %vm3809_vm6, %v4163_v63, %v4164_v59  ;;  %v4100_v63 = vmul.f32 %v10462_v22, %v4057_v42  ;;  %v10465_v59 = vld [vmem:[#allocation2 + $0x50] sm:$0xff]  ;;  %v4102_v40 = vmul.f32 %v4057_v42, %v10059_v6 }
 0x5e5   : > { %4225 = vrot.lane.b32.xlu0 %v4167_v9, %s8834_s16  ;;  %4223 = vrot.lane.b32.xlu1 %v4165_v10, %s8834_s16  ;;  %v4101_v10 = vmul.f32 %v10465_v59, %v4057_v42 }
 0x5e6   : > { %v4178_v1 = vrot.slane %v4100_v63, 2  ;;  %v4181_v13 = vrot.slane %v4102_v40, 2  ;;  %v10491_v40 = vld [vmem:[#allocation2 + $0x78] sm:$0xff] }
 0x5e7   : > { %v4179_v8 = vrot.slane %v4101_v10, 2  ;;  %v10494_v10 = vld [vmem:[#allocation2 + $0x80] sm:$0xff] }
 0x5e8   : > { %v4049_v17 = vpop.permute.xlu1 %4048 }
 0x5e9   : > { %v4094_v36 = vmul.f32 %v10455_v15, %v4049_v17  ;;  %v4095_v54 = vmul.f32 %v10458_v38, %v4049_v17  ;;  %v4096_v23 = vmul.f32 %v4049_v17, %v10040_v5 }
 0x5eb   : > { %v4168_v51 = vrot.slane %v4094_v36, 2  ;;  %v4169_v24 = vrot.slane %v4095_v54, 2  ;;  %v4171_v21 = vrot.slane %v4096_v23, 2 }
 0x5ec   : > { %v4053_v9 = vpop.permute.xlu1 %4052 }
 0x5ed   : > { %v4097_v39 = vmul.f32 %v10469_v19, %v4053_v9  ;;  %v4098_v5 = vmul.f32 %v10472_v52, %v4053_v9  ;;  %v4099_v17 = vmul.f32 %v4053_v9, %v10050_v18  ;;  %v4172_v36 = vsel %vm3809_vm6, %v4169_v24, %v4171_v21  ;;  %v4065_v18 = vpop.permute.xlu0 %4064  ;;  %v10483_v9 = vld [vmem:[#allocation2 + $0x68] sm:$0xff] }
 0x5ee   : > { %v4170_v54 = vsel %vm3809_vm6, %v4168_v51, %v4169_v24  ;;  %4229 = vrot.lane.b32.xlu0 %v4172_v36, %s8834_s16  ;;  %v4106_v63 = vmul.f32 %v10491_v40, %v4065_v18 }
 0x5ef   : > { %v4173_v23 = vrot.slane %v4097_v39, 2  ;;  %4227 = vrot.lane.b32.xlu1 %v4170_v54, %s8834_s16  ;;  %v4174_v6 = vrot.slane %v4098_v5, 2  ;;  %v4176_v42 = vrot.slane %v4099_v17, 2  ;;  %v4107_v5 = vmul.f32 %v10494_v10, %v4065_v18 }
 0x5f0   : > { %v4061_v60 = vpop.permute.xlu1 %4060  ;;  %v4108_v17 = vmul.f32 %v4065_v18, %v10077_v62  ;;  %v10505_v18 = vld [vmem:[#allocation2 + $0x98] sm:$0xff] }
 0x5f1   : > { %v4103_v20 = vmul.f32 %v10480_v31, %v4061_v60  ;;  %v4104_v21 = vmul.f32 %v10483_v9, %v4061_v60  ;;  %v4105_v39 = vmul.f32 %v4061_v60, %v10068_v16  ;;  %v4177_v51 = vsel %vm3809_vm6, %v4174_v6, %v4176_v42  ;;  %v4073_v62 = vpop.permute.xlu0 %4072 }
 0x5f2   : > { %v4175_v24 = vsel %vm3809_vm6, %v4173_v23, %v4174_v6  ;;  %4233 = vrot.lane.b32.xlu0 %v4177_v51, %s8834_s16  ;;  %v4182_v16 = vsel %vm3809_vm6, %v4179_v8, %v4181_v13  ;;  %v4180_v6 = vsel %vm3809_vm6, %v4178_v1, %v4179_v8  ;;  %v4188_v42 = vrot.slane %v4106_v63, 2  ;;  %v10516_v63 = vld [vmem:[#allocation2 + $0xb0] sm:$0xff] }
 0x5f3   : > { %4231 = vrot.lane.b32.xlu1 %v4175_v24, %s8834_s16  ;;  %v4183_v60 = vrot.slane %v4103_v20, 2  ;;  %v4184_v36 = vrot.slane %v4104_v21, 2  ;;  %v4186_v54 = vrot.slane %v4105_v39, 2  ;;  %v4189_v51 = vrot.slane %v4107_v5, 2  ;;  %v10513_v21 = vld [vmem:[#allocation2 + $0xa8] sm:$0xff] }
 0x5f4   : > { %v4069_v23 = vpop.permute.xlu1 %4068  ;;  %v4191_v24 = vrot.slane %v4108_v17, 2  ;;  %v4112_v39 = vmul.f32 %v10513_v21, %v4073_v62  ;;  %v4113_v5 = vmul.f32 %v10516_v63, %v4073_v62  ;;  %v4114_v17 = vmul.f32 %v4073_v62, %v10095_v33  ;;  %v10527_v62 = vld [vmem:[#allocation2 + $0xc8] sm:$0xff] }
 0x5f5   : > { %v4109_v43 = vmul.f32 %v10502_v58, %v4069_v23  ;;  %v4110_v20 = vmul.f32 %v10505_v18, %v4069_v23  ;;  %v4111_v13 = vmul.f32 %v4069_v23, %v10086_v49  ;;  %v4187_v1 = vsel %vm3809_vm6, %v4184_v36, %v4186_v54  ;;  %v4081_v33 = vpop.permute.xlu0 %4080  ;;  %13499 = vst [vmem:[#allocation135_spill] sm:$0xff] %v10527_v62 }
 0x5f6   : > { %4237 = vrot.lane.b32.xlu0 %v4182_v16, %s8834_s16  ;;  %v4185_v8 = vsel %vm3809_vm6, %v4183_v60, %v4184_v36  ;;  %v4192_v49 = vsel %vm3809_vm6, %v4189_v51, %v4191_v24  ;;  %v4190_v36 = vsel %vm3809_vm6, %v4188_v42, %v4189_v51 }
 0x5f7   : > { %4235 = vrot.lane.b32.xlu1 %v4180_v6, %s8834_s16  ;;  %v4193_v16 = vrot.slane %v4109_v43, 2  ;;  %v4194_v54 = vrot.slane %v4110_v20, 2  ;;  %v4196_v23 = vrot.slane %v4111_v13, 2  ;;  %v4198_v6 = vrot.slane %v4112_v39, 2  ;;  %v10535_v20 = vld [vmem:[#allocation2 + $0xd8] sm:$0xff]  ;;  %v10538_v39 = vld [vmem:[#allocation2 + $0xe0] sm:$0xff] }
 0x5f8   : > { %v4077_v60 = vpop.permute.xlu1 %4076  ;;  %v4118_v13 = vmul.f32 %v10535_v20, %v4081_v33 }
 0x5f9   : > { %v4115_v2 = vmul.f32 %v10524_v53, %v4077_v60  ;;  %v4116_v43 = vmul.f32 %v10527_v62, %v4077_v60  ;;  %v4117_v24 = vmul.f32 %v4077_v60, %v10104_v61  ;;  %v4197_v42 = vsel %vm3809_vm6, %v4194_v54, %v4196_v23 }
 0x5fa   : > { %4241 = vrot.lane.b32.xlu0 %v4187_v1, %s8834_s16  ;;  %v4199_v1 = vrot.slane %v4113_v5, 2  ;;  %v4195_v51 = vsel %vm3809_vm6, %v4193_v16, %v4194_v54  ;;  %v4119_v5 = vmul.f32 %v10538_v39, %v4081_v33 }
 0x5fb   : > { %4239 = vrot.lane.b32.xlu1 %v4185_v8, %s8834_s16  ;;  %v4201_v8 = vrot.slane %v4114_v17, 2  ;;  %v4120_v17 = vmul.f32 %v4081_v33, %v10113_v29  ;;  %v4204_v23 = vrot.slane %v4116_v43, 2  ;;  %v4206_v60 = vrot.slane %v4117_v24, 2  ;;  %v10549_v29 = vld [vmem:[#allocation2 + $0xf0] sm:$0xff]  ;;  %v10552_v33 = vld [vmem:[#allocation2 + $0xf8] sm:$0xff] }
 0x5fc   : > { %v4085_v16 = vpop.permute.xlu1 %4084  ;;  %v4200_v54 = vsel %vm3809_vm6, %v4198_v6, %v4199_v1  ;;  %13500 = vst [vmem:[#allocation136_spill] sm:$0xff] %v10549_v29  ;;  %13501 = vst [vmem:[#allocation137_spill] sm:$0xff] %v10552_v33 }
 0x5fd   : > { %v4202_v61 = vsel %vm3809_vm6, %v4199_v1, %v4201_v8  ;;  %v4211_v28 = vrot.slane %v4120_v17, 2  ;;  %v4089_v8 = vpop.permute.xlu0 %4088  ;;  %v4122_v6 = vmul.f32 %v10552_v33, %v4085_v16  ;;  %v4123_v1 = vmul.f32 %v4085_v16, %v10122_v12 }
 0x5fe   : > { %4245 = vrot.lane.b32.xlu0 %v4192_v49, %s8834_s16  ;;  %v4203_v49 = vrot.slane %v4115_v2, 2  ;;  %v4121_v2 = vmul.f32 %v10549_v29, %v4085_v16  ;;  %v4207_v43 = vsel %vm3809_vm6, %v4204_v23, %v4206_v60  ;;  %v4125_v41 = vmul.f32 %v10564_v3, %v4089_v8 }
 0x5ff   : > { %4243 = vrot.lane.b32.xlu1 %v4190_v36, %s8834_s16  ;;  %v4319_v36 = vld [vmem:[%s13240_s3] sm:$0xff]  ;;  %v4126_v12 = vmul.f32 %v4089_v8, %v10135_v25  ;;  %v4216_v16 = vrot.slane %v4123_v1, 2 }
 0x600   : > { %v4205_v24 = vsel %vm3809_vm6, %v4203_v49, %v4204_v23  ;;  %v4323_v17 = vcombine.high %v4319_v36, %v4319_v36  ;;  %v4213_v49 = vrot.slane %v4121_v2, 2  ;;  %v4214_v23 = vrot.slane %v4122_v6, 2  ;;  %v13503_v6 = vld [vmem:[#allocation4_spill] sm:$0xff] }
 0x601   : > { %v4219_v48 = vrot.slane %v4125_v41, 2  ;;  %v4221_v57 = vrot.slane %v4126_v12, 2 }
 0x602   : > { %4249 = vrot.lane.b32.xlu0 %v4197_v42, %s8834_s16  ;;  %v4208_v42 = vrot.slane %v4118_v13, 2  ;;  %v13502_v13 = vld [vmem:[#allocation3_spill] sm:$0xff]  ;;  %v4217_v55 = vsel %vm3809_vm6, %v4214_v23, %v4216_v16  ;;  %v4215_v25 = vsel %vm3809_vm6, %v4213_v49, %v4214_v23 }
 0x603   : > { %4247 = vrot.lane.b32.xlu1 %v4195_v51, %s8834_s16  ;;  %v4209_v51 = vrot.slane %v4119_v5, 2  ;;  %v4330_v5 = vrot.slane %v4319_v36, %v13502_v13  ;;  %v4337_v44 = vrot.slane %v4323_v17, %v13502_v13 }
 0x605   : > { %v4212_v60 = vsel %vm3809_vm6, %v4209_v51, %v4211_v28  ;;  %v4338_v36 = vcombine.high %v4330_v5, %v4330_v5  ;;  %v4339_v12 = vcombine.high %v4337_v44, %v4337_v44 }
 0x606   : > { %4253 = vrot.lane.b32.xlu0 %v4202_v61, %s8834_s16  ;;  %v10561_v61 = vld [vmem:[#allocation2 + $0x108] sm:$0xff] }
 0x607   : > { %4251 = vrot.lane.b32.xlu1 %v4200_v54, %s8834_s16  ;;  %v4124_v54 = vmul.f32 %v10561_v61, %v4089_v8  ;;  %v4360_v28 = vrot.slane %v4338_v36, %v13502_v13  ;;  %v4353_v8 = vrot.slane %v4337_v44, %v13502_v13  ;;  %v4367_v16 = vrot.slane %v4339_v12, %v13502_v13 }
 0x609   : > { %v4403_v1 = vrot.slane %v4360_v28, %v13503_v6  ;;  %v4415_v17 = vrot.slane %v4353_v8, %v13503_v6 }
 0x60a   : > { %4257 = vrot.lane.b32.xlu0 %v4207_v43, %s8834_s16  ;;  %v4210_v43 = vsel %vm3809_vm6, %v4208_v42, %v4209_v51  ;;  %v4346_v42 = vrot.slane %v4330_v5, %v13502_v13  ;;  %v4222_v51 = vsel %vm3809_vm6, %v4219_v48, %v4221_v57  ;;  %v4369_v57 = vcombine.high %v4353_v8, %v4353_v8 }
 0x60b   : > { %4255 = vrot.lane.b32.xlu1 %v4205_v24, %s8834_s16  ;;  %v4218_v24 = vrot.slane %v4124_v54, 2  ;;  %v4370_v5 = vcombine.high %v4360_v28, %v4360_v28 }
 0x60c   : > { %v4368_v41 = vcombine.high %v4346_v42, %v4346_v42  ;;  %v4423_v49 = vrot.slane %v4369_v57, %v13503_v6  ;;  %v8727_v57 = vld.sshfl [vmem:[%s13240_s3 + $0x8] sm:$0x33 pattern:$0x75316420] }
 0x60d   : > { %v4220_v2 = vsel %vm3809_vm6, %v4218_v24, %v4219_v48  ;;  %v8607_v48 = vld.sshfl [vmem:[%s13240_s3 + $0x8] sm:$0x33 pattern:$0x75316420]  ;;  %v4411_v23 = vrot.slane %v4370_v5, %v13503_v6  ;;  %v4419_v24 = vrot.slane %v4367_v16, %v13503_v6  ;;  %v1620_v5 = vrot.slane %v8727_v57, %v13502_v13 }
 0x60e   : > { %4261 = vrot.lane.b32.xlu0 %v4212_v60, %s8834_s16  ;;  %v4407_v54 = vrot.slane %v4368_v41, %v13503_v6  ;;  %v4386_v60 = vrot.slane %v8607_v48, %v13502_v13  ;;  %v4379_v28 = vcombine.high %v8607_v48, %v8607_v48  ;;  %v13504_v41 = vmov 0   ;;  %v13508_v48 = vld [vmem:[#allocation8_spill] sm:$0xff] }
 0x60f   : > { %4259 = vrot.lane.b32.xlu1 %v4210_v43, %s8834_s16  ;;  %v1665_v12 = vrot.slane %v1620_v5, %v13503_v6 }
 0x610   : > { %v4431_v43 = vrot.slane %v4386_v60, %v13503_v6  ;;  %v4394_v36 = vcombine.high %v4386_v60, %v4386_v60  ;;  %v1628_v60 = vcombine.high %v1620_v5, %v1620_v5 }
 0x612   : > { %4265 = vrot.lane.b32.xlu0 %v4217_v55, %s8834_s16  ;;  %v4399_v55 = vrot.slane %v4346_v42, %v13503_v6  ;;  %v4439_v44 = vrot.slane %v4394_v36, %v13503_v6 }
 0x613   : > { %4263 = vrot.lane.b32.xlu1 %v4215_v25, %s8834_s16  ;;  %v4371_v25 = vcombine.high %v4367_v16, %v4367_v16 }
 0x615   : > { %v4427_v42 = vrot.slane %v4371_v25, %v13503_v6 }
 0x616   : > { %4269 = vrot.lane.b32.xlu0 %v4222_v51, %s8834_s16  ;;  %v4393_v51 = vrot.slane %v4379_v28, %v13502_v13 }
 0x617   : > { %4267 = vrot.lane.b32.xlu1 %v4220_v2, %s8834_s16 }
 0x618   : > { %v4435_v2 = vrot.slane %v4393_v51, %v13503_v6  ;;  %v4395_v8 = vcombine.high %v4393_v51, %v4393_v51 }
 0x61a   : > { %4449 = vperm.xlu0 %8673, %v4403_v1   ;;  %v4443_v1 = vrot.slane %v4395_v8, %v13503_v6 }
 0x61b   : > { %4445 = vperm.xlu1 %8672, %v4399_v55   ;;  %v13505_v55 = vld [vmem:[#allocation5_spill] sm:$0xff] }
 0x61e   : > { %4461 = vperm.xlu0 %8673, %v4415_v17   ;;  %v13506_v17 = vld [vmem:[#allocation6_spill] sm:$0xff] }
 0x61f   : > { %4453 = vperm.xlu1 %8672, %v4407_v54   ;;  %v13507_v54 = vld [vmem:[#allocation7_spill] sm:$0xff] }
 0x622   : > { %4469 = vperm.xlu0 %8673, %v4423_v49   ;;  %v1673_v49 = vrot.slane %v1628_v60, %v13503_v6 }
 0x623   : > { %4457 = vperm.xlu1 %8672, %v4411_v23  }
 0x626   : > { %4477 = vperm.xlu0 %8673, %v4431_v43  }
 0x627   : > { %4465 = vperm.xlu1 %8672, %v4419_v24  }
 0x62a   : > { %4485 = vperm.xlu0 %8673, %v4439_v44  }
 0x62b   : > { %4473 = vperm.xlu1 %8672, %v4427_v42  }
 0x62e   : > { %8674 = vset.pattern.permute.xlu0 %v13504_v41 }
 0x62f   : > { %4481 = vperm.xlu1 %8672, %v4435_v2   ;;  %1679 = vperm.xlu0 %8674, %v13505_v55  }
 0x633   : > { %4489 = vperm.xlu1 %8672, %v4443_v1   ;;  %1687 = vperm.xlu0 %8674, %v13506_v17  }
 0x637   : > { %8675 = vset.pattern.permute.xlu1 %v13504_v41  ;;  %1695 = vperm.xlu0 %8674, %v13507_v54  }
 0x63b   : > { %1703 = vperm.xlu0 %8674, %v13508_v48  }
 0x63f   : > { %1711 = vperm.xlu0 %8674, %v1665_v12  }
 0x643   : > { %1719 = vperm.xlu0 %8674, %v1673_v49  }
 0x657   : > { %v10614_v23 = vpop.permute.xlu0 %4225  ;;  %v10616_v16 = vpop.permute.xlu1 %4223 }
 0x658   : > { %13509 = vst [vmem:[#allocation5_spill] sm:$0xff] %v10614_v23  ;;  %13510 = vst [vmem:[#allocation6_spill] sm:$0xff] %v10616_v16 }
 0x660   : > { %v10618_v43 = vpop.permute.xlu0 %4229 }
 0x661   : > { %13511 = vst [vmem:[#allocation7_spill] sm:$0xff] %v10618_v43  ;;  %v10620_v36 = vpop.permute.xlu1 %4227 }
 0x662   : > { %13512 = vst [vmem:[#allocation8_spill] sm:$0xff] %v10620_v36 }
 0x664   : > { %v10622_v24 = vpop.permute.xlu0 %4233 }
 0x665   : > { %13513 = vst [vmem:[#allocation138_spill] sm:$0xff] %v10622_v24  ;;  %v10624_v25 = vpop.permute.xlu1 %4231 }
 0x666   : > { %13514 = vst [vmem:[#allocation139_spill] sm:$0xff] %v10624_v25 }
 0x668   : > { %v10626_v28 = vpop.permute.xlu0 %4237 }
 0x669   : > { %13515 = vst [vmem:[#allocation140_spill] sm:$0xff] %v10626_v28  ;;  %v10628_v44 = vpop.permute.xlu1 %4235 }
 0x66a   : > { %13516 = vst [vmem:[#allocation141_spill] sm:$0xff] %v10628_v44 }
 0x66c   : > { %v10630_v42 = vpop.permute.xlu0 %4241 }
 0x66d   : > { %13517 = vst [vmem:[#allocation142_spill] sm:$0xff] %v10630_v42  ;;  %v10632_v51 = vpop.permute.xlu1 %4239 }
 0x66e   : > { %13518 = vst [vmem:[#allocation143_spill] sm:$0xff] %v10632_v51 }
 0x670   : > { %v10634_v2 = vpop.permute.xlu0 %4245 }
 0x671   : > { %13519 = vst [vmem:[#allocation144_spill] sm:$0xff] %v10634_v2  ;;  %v10636_v8 = vpop.permute.xlu1 %4243 }
 0x672   : > { %13520 = vst [vmem:[#allocation145_spill] sm:$0xff] %v10636_v8  ;;  %v10664_v8 = vld [vmem:[#allocation2 + $0x28] sm:$0x3] }
 0x674   : > { %v10638_v1 = vpop.permute.xlu0 %4249 }
 0x675   : > { %13521 = vst [vmem:[#allocation146_spill] sm:$0xff] %v10638_v1  ;;  %v10640_v55 = vpop.permute.xlu1 %4247 }
 0x676   : > { %13522 = vst [vmem:[#allocation147_spill] sm:$0xff] %v10640_v55 }
 0x678   : > { %v10642_v17 = vpop.permute.xlu0 %4253 }
 0x679   : > { %13523 = vst [vmem:[#allocation148_spill] sm:$0xff] %v10642_v17  ;;  %v10644_v54 = vpop.permute.xlu1 %4251 }
 0x67a   : > { %13524 = vst [vmem:[#allocation149_spill] sm:$0xff] %v10644_v54 }
 0x67c   : > { %v10646_v57 = vpop.permute.xlu0 %4257 }
 0x67d   : > { %13525 = vst [vmem:[#allocation150_spill] sm:$0xff] %v10646_v57  ;;  %v10648_v5 = vpop.permute.xlu1 %4255 }
 0x67e   : > { %13526 = vst [vmem:[#allocation151_spill] sm:$0xff] %v10648_v5  ;;  %v10669_v5 = vld [vmem:[#allocation2 + $0x10] sm:$0x3] }
 0x680   : > { %v10650_v48 = vpop.permute.xlu0 %4261 }
 0x681   : > { %13527 = vst [vmem:[#allocation152_spill] sm:$0xff] %v10650_v48  ;;  %v10652_v12 = vpop.permute.xlu1 %4259 }
 0x682   : > { %13528 = vst [vmem:[#allocation153_spill] sm:$0xff] %v10652_v12 }
 0x684   : > { %v10654_v60 = vpop.permute.xlu0 %4265 }
 0x685   : > { %13529 = vst [vmem:[#allocation154_spill] sm:$0xff] %v10654_v60  ;;  %v10656_v49 = vpop.permute.xlu1 %4263 }
 0x686   : > { %13530 = vst [vmem:[#allocation155_spill] sm:$0xff] %v10656_v49 }
 0x688   : > { %v10658_v41 = vpop.permute.xlu0 %4269 }
 0x689   : > { %13531 = vst [vmem:[#allocation156_spill] sm:$0xff] %v10658_v41  ;;  %v10660_v1 = vpop.permute.xlu1 %4267 }
 0x68a   : > { %13532 = vst [vmem:[#allocation157_spill] sm:$0xff] %v10660_v1 }
 0x695   : > { %v4450_v55 = vpop.permute.xlu0 %4449 }
 0x696   : > { %v4446_v17 = vpop.permute.xlu1 %4445  ;;  %v4495_v54 = vmul.f32 %v10455_v15, %v4450_v55  ;;  %v4496_v57 = vmul.f32 %v10458_v38, %v4450_v55  ;;  %v4497_v48 = vmul.f32 %v10664_v8, %v4450_v55  ;;  %v10674_v55 = vld [vmem:[#allocation2 + $0x40] sm:$0x3] }
 0x697   : > { %v4492_v12 = vmul.f32 %v10442_v0, %v4446_v17  ;;  %v4493_v60 = vmul.f32 %v10445_v7, %v4446_v17  ;;  %v4494_v41 = vmul.f32 %v10669_v5, %v4446_v17 }
 0x698   : > { %v4569_v51 = vrot.slane %v4495_v54, 2  ;;  %v4570_v44 = vrot.slane %v4496_v57, 2  ;;  %v4572_v28 = vrot.slane %v4497_v48, 2 }
 0x699   : > { %v4564_v49 = vrot.slane %v4492_v12, 2  ;;  %v4565_v1 = vrot.slane %v4493_v60, 2  ;;  %v4567_v2 = vrot.slane %v4494_v41, 2  ;;  %v4462_v12 = vpop.permute.xlu0 %4461 }
 0x69a   : > { %v4454_v42 = vpop.permute.xlu1 %4453  ;;  %v4573_v48 = vsel %vm3809_vm6, %v4570_v44, %v4572_v28 }
 0x69b   : > { %v4498_v24 = vmul.f32 %v10469_v19, %v4454_v42  ;;  %v4499_v25 = vmul.f32 %v10472_v52, %v4454_v42  ;;  %v4500_v36 = vmul.f32 %v10674_v55, %v4454_v42  ;;  %v4568_v43 = vsel %vm3809_vm6, %v4565_v1, %v4567_v2  ;;  %v10684_v42 = vld [vmem:[#allocation2 + $0x58] sm:$0x3] }
 0x69c   : > { %v4566_v23 = vsel %vm3809_vm6, %v4564_v49, %v4565_v1  ;;  %4626 = vrot.lane.b32.xlu1 %v4568_v43, %s8836_s17  ;;  %v4571_v1 = vsel %vm3809_vm6, %v4569_v51, %v4570_v44  ;;  %v4505_v43 = vmul.f32 %v10483_v9, %v4462_v12 }
 0x69d   : > { %4624 = vrot.lane.b32.xlu0 %v4566_v23, %s8836_s17  ;;  %v4574_v17 = vrot.slane %v4498_v24, 2  ;;  %v4575_v54 = vrot.slane %v4499_v25, 2  ;;  %v4577_v57 = vrot.slane %v4500_v36, 2  ;;  %v4504_v23 = vmul.f32 %v10480_v31, %v4462_v12  ;;  %v10692_v36 = vld [vmem:[#allocation2 + $0x70] sm:$0x3]  ;;  %v4470_v11 = vpop.permute.xlu0 %4469 }
 0x69e   : > { %v4458_v41 = vpop.permute.xlu1 %4457  ;;  %v4506_v24 = vmul.f32 %v10692_v36, %v4462_v12 }
 0x69f   : > { %v4501_v60 = vmul.f32 %v10462_v22, %v4458_v41  ;;  %v4502_v16 = vmul.f32 %v10465_v59, %v4458_v41  ;;  %v4503_v2 = vmul.f32 %v10684_v42, %v4458_v41  ;;  %v4578_v25 = vsel %vm3809_vm6, %v4575_v54, %v4577_v57 }
 0x6a0   : > { %4630 = vrot.lane.b32.xlu1 %v4573_v48, %s8836_s17  ;;  %v4576_v44 = vsel %vm3809_vm6, %v4574_v17, %v4575_v54  ;;  %v4584_v51 = vrot.slane %v4504_v23, 2  ;;  %v4585_v48 = vrot.slane %v4505_v43, 2  ;;  %v4510_v54 = vmul.f32 %v10502_v58, %v4470_v11 }
 0x6a1   : > { %4628 = vrot.lane.b32.xlu0 %v4571_v1, %s8836_s17  ;;  %v4579_v28 = vrot.slane %v4501_v60, 2  ;;  %v4580_v49 = vrot.slane %v4502_v16, 2  ;;  %v4582_v14 = vrot.slane %v4503_v2, 2  ;;  %v4587_v1 = vrot.slane %v4506_v24, 2  ;;  %v10710_v2 = vld [vmem:[#allocation2 + $0xa0] sm:$0x3]  ;;  %v4478_v46 = vpop.permute.xlu0 %4477 }
 0x6a2   : > { %v4466_v41 = vpop.permute.xlu1 %4465  ;;  %v4511_v60 = vmul.f32 %v10505_v18, %v4470_v11  ;;  %v4512_v23 = vmul.f32 %v10710_v2, %v4470_v11 }
 0x6a3   : > { %v4507_v4 = vmul.f32 %v10491_v40, %v4466_v41  ;;  %v4508_v12 = vmul.f32 %v10494_v10, %v4466_v41  ;;  %v4509_v16 = vmul.f32 %v10701_v56, %v4466_v41  ;;  %v4583_v57 = vsel %vm3809_vm6, %v4580_v49, %v4582_v14 }
 0x6a4   : > { %4634 = vrot.lane.b32.xlu1 %v4578_v25, %s8836_s17  ;;  %v4581_v17 = vsel %vm3809_vm6, %v4579_v28, %v4580_v49  ;;  %v4588_v43 = vsel %vm3809_vm6, %v4585_v48, %v4587_v1  ;;  %v4586_v28 = vsel %vm3809_vm6, %v4584_v51, %v4585_v48  ;;  %v4594_v49 = vrot.slane %v4510_v54, 2 }
 0x6a5   : > { %4632 = vrot.lane.b32.xlu0 %v4576_v44, %s8836_s17  ;;  %v4589_v24 = vrot.slane %v4507_v4, 2  ;;  %v4590_v25 = vrot.slane %v4508_v12, 2  ;;  %v4592_v41 = vrot.slane %v4509_v16, 2  ;;  %v4595_v44 = vrot.slane %v4511_v60, 2  ;;  %v10728_v16 = vld [vmem:[#allocation2 + $0xd0] sm:$0x3]  ;;  %v4486_v37 = vpop.permute.xlu0 %4485 }
 0x6a6   : > { %v4474_v14 = vpop.permute.xlu1 %4473  ;;  %v4516_v48 = vmul.f32 %v10524_v53, %v4478_v46  ;;  %v4517_v12 = vmul.f32 %v10527_v62, %v4478_v46  ;;  %13533 = vst [vmem:[#allocation158_spill] sm:$0xff] %v10728_v16  ;;  %v4518_v54 = vmul.f32 %v10728_v16, %v4478_v46  ;;  %v13558_v16 = vld [vmem:[#allocation33_spill] sm:$0xff]  ;;  %v13559_v62 = vld [vmem:[#allocation38_spill] sm:$0xff] }
 0x6a7   : > { %v4514_v11 = vmul.f32 %v10516_v63, %v4474_v14  ;;  %v4515_v4 = vmul.f32 %v10719_v50, %v4474_v14  ;;  %v4593_v1 = vsel %vm3809_vm6, %v4590_v25, %v4592_v41  ;;  %v4591_v51 = vsel %vm3809_vm6, %v4589_v24, %v4590_v25 }
 0x6a8   : > { %4638 = vrot.lane.b32.xlu1 %v4583_v57, %s8836_s17  ;;  %v4597_v57 = vrot.slane %v4512_v23, 2  ;;  %v4596_v24 = vsel %vm3809_vm6, %v4594_v49, %v4595_v44  ;;  %v4604_v25 = vrot.slane %v4516_v48, 2  ;;  %v10749_v48 = vld [vmem:[#allocation2 + $0x100] sm:$0x3] }
 0x6a9   : > { %4636 = vrot.lane.b32.xlu0 %v4581_v17, %s8836_s17  ;;  %v4513_v17 = vmul.f32 %v10513_v21, %v4474_v14  ;;  %v4602_v14 = vrot.slane %v4515_v4, 2  ;;  %v4523_v4 = vmul.f32 %v10552_v33, %v4486_v37  ;;  %13535 = vst [vmem:[#allocation160_spill] sm:$0xff] %v10749_v48  ;;  %v13557_v33 = vld [vmem:[#allocation34_spill] sm:$0xff] }
 0x6aa   : > { %v4598_v60 = vsel %vm3809_vm6, %v4595_v44, %v4597_v57  ;;  %v4482_v41 = vpop.permute.xlu1 %4481  ;;  %v4720_v44 = vld [vmem:[%s13241_s4] sm:$0xff] }
 0x6ab   : > { %v4599_v23 = vrot.slane %v4513_v17, 2  ;;  %v4520_v46 = vmul.f32 %v10538_v39, %v4482_v41  ;;  %v4521_v57 = vmul.f32 %v10737_v34, %v4482_v41 }
 0x6ac   : > { %4642 = vrot.lane.b32.xlu1 %v4588_v43, %s8836_s17  ;;  %v4600_v43 = vrot.slane %v4514_v11, 2  ;;  %v4522_v11 = vmul.f32 %v10549_v29, %v4486_v37 }
 0x6ad   : > { %4640 = vrot.lane.b32.xlu0 %v4586_v28, %s8836_s17  ;;  %v4605_v28 = vrot.slane %v4517_v12, 2  ;;  %v4524_v12 = vmul.f32 %v10749_v48, %v4486_v37 }
 0x6ae   : > { %v4603_v17 = vsel %vm3809_vm6, %v4600_v43, %v4602_v14  ;;  %v4601_v49 = vsel %vm3809_vm6, %v4599_v23, %v4600_v43  ;;  %v4610_v23 = vrot.slane %v4520_v46, 2  ;;  %v4612_v43 = vrot.slane %v4521_v57, 2  ;;  %v4490_v14 = vpop.permute.xlu1 %4489 }
 0x6af   : > { %v4617_v30 = vrot.slane %v4524_v12, 2  ;;  %v4525_v47 = vmul.f32 %v10561_v61, %v4490_v14  ;;  %v4526_v37 = vmul.f32 %v10564_v3, %v4490_v14  ;;  %v4724_v57 = vcombine.high %v4720_v44, %v4720_v44 }
 0x6b0   : > { %4646 = vrot.lane.b32.xlu1 %v4593_v1, %s8836_s17  ;;  %v4607_v1 = vrot.slane %v4518_v54, 2  ;;  %v4613_v46 = vsel %vm3809_vm6, %v4610_v23, %v4612_v43 }
 0x6b1   : > { %4644 = vrot.lane.b32.xlu0 %v4591_v51, %s8836_s17  ;;  %v4519_v51 = vmul.f32 %v10535_v20, %v4482_v41  ;;  %v4606_v41 = vsel %vm3809_vm6, %v4604_v25, %v4605_v28  ;;  %v4619_v12 = vrot.slane %v4525_v47, 2 }
 0x6b2   : > { %v4608_v54 = vsel %vm3809_vm6, %v4605_v28, %v4607_v1  ;;  %v10759_v1 = vld [vmem:[#allocation2 + $0x118] sm:$0x3] }
 0x6b3   : > { %13536 = vst [vmem:[#allocation161_spill] sm:$0xff] %v10759_v1 }
 0x6b4   : > { %4650 = vrot.lane.b32.xlu1 %v4598_v60, %s8836_s17  ;;  %v4609_v60 = vrot.slane %v4519_v51, 2  ;;  %v4527_v51 = vmul.f32 %v10759_v1, %v4490_v14 }
 0x6b5   : > { %4648 = vrot.lane.b32.xlu0 %v4596_v24, %s8836_s17  ;;  %v4731_v24 = vrot.slane %v4720_v44, %v13502_v13 }
 0x6b6   : > { %v4611_v25 = vsel %vm3809_vm6, %v4609_v60, %v4610_v23  ;;  %v4738_v23 = vrot.slane %v4724_v57, %v13502_v13 }
 0x6b7   : > { %v4739_v28 = vcombine.high %v4731_v24, %v4731_v24 }
 0x6b8   : > { %4654 = vrot.lane.b32.xlu1 %v4603_v17, %s8836_s17  ;;  %v4614_v17 = vrot.slane %v4522_v11, 2 }
 0x6b9   : > { %4652 = vrot.lane.b32.xlu0 %v4601_v49, %s8836_s17  ;;  %v4615_v49 = vrot.slane %v4523_v4, 2  ;;  %v4747_v4 = vrot.slane %v4731_v24, %v13502_v13  ;;  %v4761_v60 = vrot.slane %v4739_v28, %v13502_v13 }
 0x6bb   : > { %v4618_v11 = vsel %vm3809_vm6, %v4615_v49, %v4617_v30  ;;  %v4616_v35 = vsel %vm3809_vm6, %v4614_v17, %v4615_v49  ;;  %v4800_v30 = vrot.slane %v4747_v4, %v13503_v6  ;;  %v4769_v14 = vcombine.high %v4747_v4, %v4747_v4 }
 0x6bc   : > { %4658 = vrot.lane.b32.xlu1 %v4608_v54, %s8836_s17  ;;  %v4620_v54 = vrot.slane %v4526_v37, 2  ;;  %v4804_v47 = vrot.slane %v4761_v60, %v13503_v6  ;;  %v4771_v24 = vcombine.high %v4761_v60, %v4761_v60  ;;  %v4740_v17 = vcombine.high %v4738_v23, %v4738_v23 }
 0x6bd   : > { %4656 = vrot.lane.b32.xlu0 %v4606_v41, %s8836_s17  ;;  %v4622_v41 = vrot.slane %v4527_v51, 2  ;;  %v4808_v49 = vrot.slane %v4769_v14, %v13503_v6 }
 0x6be   : > { %v4621_v44 = vsel %vm3809_vm6, %v4619_v12, %v4620_v54  ;;  %v4812_v37 = vrot.slane %v4771_v24, %v13503_v6  ;;  %v4768_v51 = vrot.slane %v4740_v17, %v13502_v13  ;;  %v13537_v24 = vmov 1   ;;  %v10797_v17 = vpop.permute.xlu0 %1679 }
 0x6bf   : > { %v4623_v43 = vsel %vm3809_vm6, %v4620_v54, %v4622_v41  ;;  %13538 = vst [vmem:[#allocation162_spill] sm:$0xff] %v10797_v17  ;;  %v13556_v17 = vld [vmem:[#allocation29_spill] sm:$0xff] }
 0x6c0   : > { %4662 = vrot.lane.b32.xlu1 %v4613_v46, %s8836_s17  ;;  %v8608_v46 = vld.sshfl [vmem:[%s13241_s4 + $0x8] sm:$0x33 pattern:$0x75316420]  ;;  %v4820_v57 = vrot.slane %v4768_v51, %v13503_v6 }
 0x6c1   : > { %4660 = vrot.lane.b32.xlu0 %v4611_v25, %s8836_s17  ;;  %v4780_v4 = vcombine.high %v8608_v46, %v8608_v46  ;;  %v4787_v12 = vrot.slane %v8608_v46, %v13502_v13 }
 0x6c3   : > { %v4794_v60 = vrot.slane %v4780_v4, %v13502_v13  ;;  %v13544_v4 = vld [vmem:[#allocation11_spill] sm:$0xff] }
 0x6c4   : > { %4666 = vrot.lane.b32.xlu1 %v4618_v11, %s8836_s17  ;;  %v4772_v11 = vcombine.high %v4768_v51, %v4768_v51  ;;  %v13542_v51 = vld [vmem:[#allocation9_spill] sm:$0xff] }
 0x6c5   : > { %4664 = vrot.lane.b32.xlu0 %v4616_v35, %s8836_s17  ;;  %v4754_v35 = vrot.slane %v4738_v23, %v13502_v13  ;;  %v4832_v23 = vrot.slane %v4787_v12, %v13503_v6  ;;  %v1728_v46 = vmul.f32 %v10455_v15, %v13542_v51 }
 0x6c6   : > { %v4828_v41 = vrot.slane %v4772_v11, %v13503_v6 }
 0x6c7   : > { %v4816_v25 = vrot.slane %v4754_v35, %v13503_v6  ;;  %v4770_v28 = vcombine.high %v4754_v35, %v4754_v35  ;;  %v10799_v35 = vpop.permute.xlu0 %1687 }
 0x6c8   : > { %4670 = vrot.lane.b32.xlu1 %v4623_v43, %s8836_s17  ;;  %v4836_v43 = vrot.slane %v4794_v60, %v13503_v6  ;;  %13539 = vst [vmem:[#allocation163_spill] sm:$0xff] %v10799_v35  ;;  %v13553_v35 = vld [vmem:[#allocation25_spill] sm:$0xff] }
 0x6c9   : > { %4668 = vrot.lane.b32.xlu0 %v4621_v44, %s8836_s17  ;;  %v4824_v54 = vrot.slane %v4770_v28, %v13503_v6  ;;  %v4795_v44 = vcombine.high %v4787_v12, %v4787_v12  ;;  %v13543_v28 = vld [vmem:[#allocation10_spill] sm:$0xff]  ;;  %v1736_v12 = vmul.f32 %v10491_v40, %v13544_v4 }
 0x6ca   : > { %v1733_v11 = vmul.f32 %v10465_v59, %v13543_v28 }
 0x6cb   : > { %v4840_v14 = vrot.slane %v4795_v44, %v13503_v6  ;;  %v13547_v44 = vld [vmem:[#allocation13_spill] sm:$0xff]  ;;  %v2077_v32 = vadd.f32 %v13554_v27, %v1736_v12 }
 0x6cc   : > { %4850 = vperm.xlu1 %8675, %v4804_v47   ;;  %v13566_v12 = vld [vmem:[#allocation49_spill] sm:$0xff] }
 0x6cd   : > { %4846 = vperm.xlu0 %8674, %v4800_v30   ;;  %v4796_v30 = vcombine.high %v4794_v60, %v4794_v60 }
 0x6cf   : > { %v4844_v47 = vrot.slane %v4796_v30, %v13503_v6  ;;  %v1744_v30 = vmul.f32 %v10535_v20, %v13547_v44  ;;  %v13550_v6 = vld [vmem:[#allocation18_spill] sm:$0xff] }
 0x6d0   : > { %4854 = vperm.xlu1 %8675, %v4808_v49   ;;  %v10801_v49 = vpop.permute.xlu0 %1695  ;;  %v2069_v13 = vadd.f32 %v13550_v6, %v1728_v46  ;;  %v13561_v46 = vld [vmem:[#allocation41_spill] sm:$0xff] }
 0x6d1   : > { %4858 = vperm.xlu0 %8674, %v4812_v37   ;;  %13540 = vst [vmem:[#allocation164_spill] sm:$0xff] %v10801_v49  ;;  %v13552_v49 = vld [vmem:[#allocation22_spill] sm:$0xff] }
 0x6d4   : > { %4862 = vperm.xlu1 %8675, %v4816_v25   ;;  %v10803_v37 = vpop.permute.xlu0 %1703  ;;  %v1729_v25 = vmul.f32 %v10458_v38, %v13542_v51 }
 0x6d5   : > { %4866 = vperm.xlu0 %8674, %v4820_v57   ;;  %13541 = vst [vmem:[#allocation165_spill] sm:$0xff] %v10803_v37  ;;  %v1732_v57 = vmul.f32 %v10462_v22, %v13543_v28  ;;  %v13551_v37 = vld [vmem:[#allocation21_spill] sm:$0xff] }
 0x6d8   : > { %4870 = vperm.xlu1 %8675, %v4824_v54   ;;  %v1737_v54 = vmul.f32 %v10494_v10, %v13544_v4  ;;  %v13549_v4 = vld [vmem:[#allocation17_spill] sm:$0xff] }
 0x6d9   : > { %4874 = vperm.xlu0 %8674, %v4828_v41   ;;  %v13545_v41 = vld [vmem:[#allocation12_spill] sm:$0xff] }
 0x6da   : > { %v1740_v60 = vmul.f32 %v10513_v21, %v13545_v41  ;;  %v2078_v26 = vadd.f32 %v13553_v35, %v1737_v54  ;;  %v10858_v54 = vadd.f32 %v13566_v12, %v2077_v32  ;;  %v13572_v32 = vld [vmem:[#allocation65_spill] sm:$0xff] }
 0x6dc   : > { %4878 = vperm.xlu1 %8675, %v4832_v23   ;;  %v1741_v23 = vmul.f32 %v10516_v63, %v13545_v41  ;;  %v2074_v41 = vadd.f32 %v13551_v37, %v1733_v11  ;;  %v2081_v48 = vadd.f32 %v13556_v17, %v1740_v60  ;;  %v2386_v37 = vadd.f32 %v13561_v46, %v2069_v13  ;;  %v13562_v11 = vld [vmem:[#allocation64_spill] sm:$0xff]  ;;  %v13563_v17 = vld [vmem:[#allocation42_spill] sm:$0xff] }
 0x6dd   : > { %4882 = vperm.xlu0 %8674, %v4836_v43   ;;  %v10821_v43 = vpop.permute.xlu0 %1711  ;;  %v2585_v27 = vmul.f32 %v10458_v38, %v13562_v11  ;;  %v13569_v38 = vld [vmem:[#allocation53_spill] sm:$0xff] }
 0x6de   : > { %13546 = vst [vmem:[#allocation9_spill] sm:$0xff] %v10821_v43  ;;  %v2073_v43 = vadd.f32 %v13552_v49, %v1732_v57  ;;  %v2584_v49 = vmul.f32 %v10455_v15, %v13562_v11  ;;  %v13568_v15 = vld [vmem:[#allocation50_spill] sm:$0xff] }
 0x6df   : > { %v10863_v60 = vadd.f32 %v13568_v15, %v2078_v26  ;;  %v2591_v26 = vmul.f32 %v10465_v59, %v13572_v32  ;;  %v2660_v46 = vrot.slane %v2585_v27, 1  ;;  %v13579_v27 = vld [vmem:[#allocation66_spill] sm:$0xff] }
 0x6e0   : > { %4886 = vperm.xlu1 %8675, %v4840_v14   ;;  %v1745_v14 = vmul.f32 %v10538_v39, %v13547_v44  ;;  %v2082_v44 = vadd.f32 %v13555_v45, %v1741_v23  ;;  %v2586_v45 = vmul.f32 %v10664_v8, %v13562_v11  ;;  %v10866_v23 = vadd.f32 %v13569_v38, %v2081_v48  ;;  %v13574_v11 = vld [vmem:[#allocation58_spill] sm:$0xff] }
 0x6e1   : > { %4890 = vperm.xlu0 %8674, %v4844_v47   ;;  %v13548_v47 = vld [vmem:[#allocation14_spill] sm:$0xff]  ;;  %v10860_v13 = vpop.permute.xlu0 %1719  ;;  %v2592_v48 = vmul.f32 %v10684_v42, %v13572_v32  ;;  %v2670_v38 = vrot.slane %v2591_v26, 1 }
 0x6e2   : > { %v1748_v51 = vmul.f32 %v10561_v61, %v13548_v47  ;;  %v1749_v28 = vmul.f32 %v10564_v3, %v13548_v47  ;;  %v2086_v29 = vadd.f32 %v13557_v33, %v1745_v14  ;;  %v2085_v47 = vadd.f32 %v13558_v16, %v1744_v30  ;;  %v13564_v33 = vld [vmem:[#allocation45_spill] sm:$0xff]  ;;  %v13565_v16 = vld [vmem:[#allocation46_spill] sm:$0xff]  ;;  %13567 = vst [vmem:[#allocation10_spill] sm:$0xff] %v10860_v13 }
 0x6e3   : > { %v10852_v57 = vadd.f32 %v13564_v33, %v2073_v43  ;;  %v13570_v30 = vld [vmem:[#allocation54_spill] sm:$0xff] }
 0x6e4   : > { %v10869_v14 = vadd.f32 %v13570_v30, %v2082_v44  ;;  %v2672_v30 = vrot.slane %v2592_v48, 1 }
 0x6e5   : > { %8677 = vset.pattern.permute.xlu0 %v13537_v24  ;;  %v2070_v24 = vadd.f32 %v13549_v4, %v1729_v25  ;;  %v2090_v25 = vadd.f32 %v13559_v62, %v1749_v28  ;;  %v13560_v4 = vld [vmem:[#allocation37_spill] sm:$0xff]  ;;  %v10855_v62 = vadd.f32 %v13565_v16, %v2074_v41  ;;  %v2590_v28 = vmul.f32 %v10462_v22, %v13572_v32  ;;  %v13576_v16 = vld [vmem:[#allocation62_spill] sm:$0xff] }
 0x6e6   : > { %v2089_v6 = vadd.f32 %v13560_v4, %v1748_v51  ;;  %v13573_v41 = vld [vmem:[#allocation57_spill] sm:$0xff]  ;;  %v2659_v4 = vrot.slane %v2584_v49, 1 }
 0x6e7   : > { %v2387_v35 = vadd.f32 %v13563_v17, %v2070_v24  ;;  %v13571_v24 = vld [vmem:[#allocation63_spill] sm:$0xff]  ;;  %v10886_v44 = vadd.f32 %v13573_v41, %v2085_v47  ;;  %v10889_v17 = vadd.f32 %v13574_v11, %v2086_v29  ;;  %v10895_v22 = vadd.f32 %v13576_v16, %v2090_v25  ;;  %v13581_v16 = vld [vmem:[#allocation68_spill] sm:$0xff] }
 0x6e8   : > { %v10873_v43 = vmul.f32 %v10442_v0, %v13571_v24  ;;  %v10877_v51 = vmul.f32 %v10445_v7, %v13571_v24  ;;  %v2662_v0 = vrot.slane %v2586_v45, 1  ;;  %v13575_v7 = vld [vmem:[#allocation61_spill] sm:$0xff]  ;;  %v10899_v59 = vmul.f32 %v10669_v5, %v13571_v24  ;;  %v13580_v24 = vld [vmem:[#allocation67_spill] sm:$0xff] }
 0x6e9   : > { %v10892_v33 = vadd.f32 %v13575_v7, %v2089_v6  ;;  %13577 = vst [vmem:[#allocation11_spill] sm:$0xff] %v10895_v22  ;;  %v10908_v29 = vmul.f32 %v10469_v19, %v13579_v27  ;;  %v10912_v6 = vmul.f32 %v10472_v52, %v13579_v27  ;;  %v10916_v25 = vmul.f32 %v10674_v55, %v13579_v27  ;;  %v13584_v45 = vld [vmem:[#allocation69_spill] sm:$0xff] }
 0x6ea   : > { %v2669_v15 = vrot.slane %v2590_v28, 1  ;;  %v2596_v32 = vmul.f32 %v10491_v40, %v13580_v24  ;;  %v2597_v19 = vmul.f32 %v10494_v10, %v13580_v24  ;;  %v2661_v41 = vsel %vm2653_vm5, %v2659_v4, %v2660_v46 }
 0x6eb   : > { %v2663_v52 = vsel %vm2653_vm5, %v2660_v46, %v2662_v0  ;;  %v2598_v7 = vmul.f32 %v10701_v56, %v13580_v24  ;;  %v10930_v28 = vmul.f32 %v10480_v31, %v13581_v16  ;;  %v10934_v26 = vmul.f32 %v10483_v9, %v13581_v16 }
 0x6ec   : > { %v10945_v0 = vmul.f32 %v10692_v36, %v13581_v16  ;;  %v10947_v31 = vadd.f32 %v2661_v41, %v2386_v37  ;;  %v10949_v27 = vadd.f32 %v2663_v52, %v2387_v35  ;;  %v2671_v9 = vsel %vm2653_vm5, %v2669_v15, %v2670_v38  ;;  %v13589_v37 = vld [vmem:[#allocation73_spill] sm:$0xff] }
 0x6ed   : > { %v2673_v24 = vsel %vm2653_vm5, %v2670_v38, %v2672_v30  ;;  %v2679_v11 = vrot.slane %v2596_v32, 1  ;;  %v2680_v49 = vrot.slane %v2597_v19, 1  ;;  %v2602_v48 = vmul.f32 %v10513_v21, %v13584_v45  ;;  %v13587_v30 = vld [vmem:[#allocation70_spill] sm:$0xff]  ;;  %v13588_v32 = vld [vmem:[#allocation71_spill] sm:$0xff] }
 0x6ee   : > { %v2603_v46 = vmul.f32 %v10516_v63, %v13584_v45  ;;  %v2682_v4 = vrot.slane %v2598_v7, 1  ;;  %v2604_v35 = vmul.f32 %v10719_v50, %v13584_v45  ;;  %v10968_v21 = vmul.f32 %v10502_v58, %v13587_v30 }
 0x6ef   : > { %v2608_v63 = vmul.f32 %v10535_v20, %v13588_v32  ;;  %v2609_v19 = vmul.f32 %v10538_v39, %v13588_v32  ;;  %v2600_v52 = vmul.f32 %v10505_v18, %v13587_v30  ;;  %v2610_v45 = vmul.f32 %v10737_v34, %v13588_v32  ;;  %v13592_v34 = vld [vmem:[#allocation72_spill] sm:$0xff] }
 0x6f0   : > { %v10979_v7 = vadd.f32 %v2671_v9, %v10852_v57  ;;  %v10982_v38 = vadd.f32 %v2673_v24, %v10855_v62  ;;  %v2689_v58 = vrot.slane %v2602_v48, 1  ;;  %v2690_v16 = vrot.slane %v2603_v46, 1 }
 0x6f1   : > { %v2614_v20 = vmul.f32 %v10561_v61, %v13589_v37  ;;  %v2615_v39 = vmul.f32 %v10564_v3, %v13589_v37  ;;  %v2692_v22 = vrot.slane %v2604_v35, 1  ;;  %v2601_v18 = vmul.f32 %v10710_v2, %v13587_v30 }
 0x6f2   : > { %v2681_v32 = vsel %vm2653_vm5, %v2679_v11, %v2680_v49  ;;  %v2683_v57 = vsel %vm2653_vm5, %v2680_v49, %v2682_v4  ;;  %v2684_v48 = vrot.slane %v10968_v21, 1  ;;  %v2699_v46 = vrot.slane %v2608_v63, 1  ;;  %v13593_v11 = vld [vmem:[#allocation135_spill] sm:$0xff]  ;;  %v13594_v49 = vld [vmem:[#allocation158_spill] sm:$0xff] }
 0x6f3   : > { %v2700_v24 = vrot.slane %v2609_v19, 1  ;;  %v2616_v61 = vmul.f32 %v10759_v1, %v13589_v37  ;;  %v2685_v3 = vrot.slane %v2600_v52, 1  ;;  %v2702_v35 = vrot.slane %v2610_v45, 1  ;;  %v13595_v63 = vld [vmem:[#allocation74_spill] sm:$0xff]  ;;  %v13596_v19 = vld [vmem:[#allocation136_spill] sm:$0xff]  ;;  %v13597_v37 = vld [vmem:[#allocation137_spill] sm:$0xff] }
 0x6f4   : > { %v2605_v30 = vmul.f32 %v10524_v53, %v13592_v34  ;;  %v2606_v13 = vmul.f32 %v13593_v11, %v13592_v34  ;;  %v2607_v4 = vmul.f32 %v13594_v49, %v13592_v34  ;;  %v2691_v21 = vsel %vm2653_vm5, %v2689_v58, %v2690_v16  ;;  %v13598_v45 = vld [vmem:[#allocation160_spill] sm:$0xff] }
 0x6f5   : > { %v2612_v52 = vmul.f32 %v13597_v37, %v13595_v63  ;;  %v2613_v1 = vmul.f32 %v13598_v45, %v13595_v63  ;;  %v2693_v53 = vsel %vm2653_vm5, %v2690_v16, %v2692_v22  ;;  %v2687_v34 = vrot.slane %v2601_v18, 1 }
 0x6f6   : > { %v2701_v58 = vsel %vm2653_vm5, %v2699_v46, %v2700_v24  ;;  %v2703_v37 = vsel %vm2653_vm5, %v2700_v24, %v2702_v35  ;;  %v2753_v22 = vadd.f32 %v2693_v53, %v10869_v14  ;;  %v13601_v14 = vrot.slane %v10873_v43, 1 }
 0x6f7   : > { %v2705_v18 = vrot.slane %v2612_v52, 1  ;;  %v13607_v43 = vrot.slane %v10916_v25, 1  ;;  %v11079_v25 = vsel %vm2653_vm5, %v2684_v48, %v2685_v3 }
 0x70e   : > { %v10903_v47 = vpop.permute.xlu1 %4626 }
 0x70f   : > { %v10901_v12 = vpop.permute.xlu0 %4624  ;;  %13578 = vst [vmem:[#allocation12_spill] sm:$0xff] %v10903_v47  ;;  %v2697_v47 = vrot.slane %v2607_v4, 1  ;;  %v13611_v4 = vrot.slane %v10945_v0, 1 }
 0x712   : > { %v10938_v10 = vpop.permute.xlu1 %4630 }
 0x713   : > { %v10936_v40 = vpop.permute.xlu0 %4628  ;;  %13583 = vst [vmem:[#allocation14_spill] sm:$0xff] %v10938_v10  ;;  %v2694_v10 = vrot.slane %v2605_v30, 1  ;;  %v13610_v30 = vrot.slane %v10930_v28, 1  ;;  %v13613_v28 = vld [vmem:[#allocation77_spill] sm:$0xff] }
 0x714   : > { %13582 = vst [vmem:[#allocation13_spill] sm:$0xff] %v10936_v40  ;;  %v2749_v40 = vadd.f32 %v2683_v57, %v10863_v60  ;;  %v3141_v53 = vadd.f32 %v13613_v28, %v10947_v31  ;;  %v13620_v31 = vld [vmem:[#allocation82_spill] sm:$0xff] }
 0x716   : > { %v10963_v15 = vpop.permute.xlu1 %4634 }
 0x717   : > { %v10961_v41 = vpop.permute.xlu0 %4632  ;;  %13586 = vst [vmem:[#allocation18_spill] sm:$0xff] %v10963_v15  ;;  %v2611_v15 = vmul.f32 %v13596_v19, %v13595_v63  ;;  %v2695_v19 = vrot.slane %v2606_v13, 1  ;;  %v2752_v63 = vadd.f32 %v2691_v21, %v10866_v23  ;;  %v2757_v13 = vadd.f32 %v2703_v37, %v10889_v17 }
 0x718   : > { %13585 = vst [vmem:[#allocation17_spill] sm:$0xff] %v10961_v41  ;;  %v13600_v23 = vrot.slane %v10877_v51, 1  ;;  %v13605_v17 = vrot.slane %v10912_v6, 1  ;;  %v13609_v51 = vrot.slane %v10934_v26, 1  ;;  %v11082_v6 = vsel %vm2653_vm5, %v2685_v3, %v2687_v34  ;;  %v13618_v3 = vld [vmem:[#allocation78_spill] sm:$0xff]  ;;  %v13619_v34 = vld [vmem:[#allocation81_spill] sm:$0xff] }
 0x719   : > { %v2704_v45 = vrot.slane %v2611_v15, 1  ;;  %v11085_v52 = vsel %vm2653_vm5, %v2694_v10, %v2695_v19  ;;  %v3142_v10 = vadd.f32 %v13618_v3, %v10949_v27  ;;  %v3145_v37 = vadd.f32 %v13619_v34, %v10979_v7  ;;  %v13627_v7 = vld [vmem:[#allocation94_spill] sm:$0xff]  ;;  %v8743_v3 = vld [vmem:[#allocation2 + $0x20] sm:$0xff] }
 0x71a   : > { %v10994_v62 = vpop.permute.xlu1 %4638  ;;  %v11038_v57 = vsel %vm2653_vm5, %v13601_v14, %v13600_v23  ;;  %v13608_v35 = vmov %v13605_v17  ;;  %v13623_v14 = vld [vmem:[#allocation89_spill] sm:$0xff] }
 0x71b   : > { %v10992_v9 = vpop.permute.xlu0 %4636  ;;  %13591 = vst [vmem:[#allocation22_spill] sm:$0xff] %v10994_v62  ;;  %v2710_v62 = vrot.slane %v2615_v39, 1  ;;  %v2748_v39 = vadd.f32 %v2681_v32, %v10858_v54  ;;  %v2756_v54 = vadd.f32 %v2701_v58, %v10886_v44  ;;  %v13603_v44 = vmov %v13600_v23 }
 0x71c   : > { %13590 = vst [vmem:[#allocation21_spill] sm:$0xff] %v10992_v9  ;;  %v2709_v9 = vrot.slane %v2614_v20, 1  ;;  %v2712_v20 = vrot.slane %v2616_v61, 1  ;;  %v2707_v61 = vrot.slane %v2613_v1, 1  ;;  %v13602_v1 = vrot.slane %v10899_v59, 1 }
 0x71d   : > { %v11062_v59 = vsel %vm2653_vm5, %v13608_v35, %v13607_v43  ;;  %v11093_v26 = vsel %vm2653_vm5, %v2704_v45, %v2705_v18  ;;  %v13622_v45 = vld [vmem:[#allocation86_spill] sm:$0xff]  ;;  %v13626_v35 = vld [vmem:[#allocation93_spill] sm:$0xff] }
 0x71e   : > { %v11015_v11 = vpop.permute.xlu1 %4642  ;;  %v2711_v16 = vsel %vm2653_vm5, %v2709_v9, %v2710_v62  ;;  %v11031_v60 = vsel %vm2653_vm5, %v2710_v62, %v2712_v20  ;;  %v11045_v15 = vsel %vm2653_vm5, %v13603_v44, %v13602_v1  ;;  %v13606_v62 = vrot.slane %v10908_v29, 1  ;;  %13614 = vst [vmem:[#allocation30_spill] sm:$0xff] %v11093_v26  ;;  %v13624_v1 = vld [vmem:[#allocation162_spill] sm:$0xff] }
 0x71f   : > { %v11013_v41 = vpop.permute.xlu0 %4640  ;;  %13599 = vst [vmem:[#allocation25_spill] sm:$0xff] %v11031_v60  ;;  %v11048_v9 = vadd.f32 %v2711_v16, %v10892_v33  ;;  %v11069_v33 = vsel %vm2653_vm5, %v13610_v30, %v13609_v51  ;;  %v13612_v29 = vmov %v13609_v51  ;;  %v11090_v20 = vsel %vm2653_vm5, %v2695_v19, %v2697_v47  ;;  %v13621_v19 = vld [vmem:[#allocation85_spill] sm:$0xff]  ;;  %v13625_v43 = vld [vmem:[#allocation90_spill] sm:$0xff] }
 0x720   : > { %v11055_v24 = vsel %vm2653_vm5, %v13606_v62, %v13605_v17  ;;  %v11076_v21 = vsel %vm2653_vm5, %v13612_v29, %v13611_v4  ;;  %v11096_v0 = vsel %vm2653_vm5, %v2705_v18, %v2707_v61  ;;  %v3146_v47 = vadd.f32 %v13620_v31, %v10982_v38  ;;  %v8740_v61 = vld [vmem:[#allocation2] sm:$0xff]  ;;  %v8741_v17 = vld [vmem:[#allocation2 + $0x8] sm:$0xff]  ;;  %v13628_v4 = vld [vmem:[#allocation101_spill] sm:$0xff] }
 0x721   : > { %13604 = vst [vmem:[#allocation26_spill] sm:$0xff] %v11048_v9  ;;  %13615 = vst [vmem:[#allocation29_spill] sm:$0xff] %v11096_v0  ;;  %v3149_v16 = vadd.f32 %v13621_v19, %v2748_v39  ;;  %v3150_v23 = vadd.f32 %v13622_v45, %v2749_v40  ;;  %v3153_v18 = vadd.f32 %v13623_v14, %v2752_v63  ;;  %v13629_v39 = vld [vmem:[#allocation102_spill] sm:$0xff]  ;;  %v13630_v63 = vld [vmem:[#allocation123_spill] sm:$0xff] }
 0x722   : > { %v11027_v46 = vpop.permute.xlu1 %4646  ;;  %v1726_v44 = vmul.f32 %v8740_v61, %v13624_v1  ;;  %v1727_v62 = vmul.f32 %v8741_v17, %v13624_v1  ;;  %v3154_v27 = vadd.f32 %v13625_v43, %v2753_v22  ;;  %v3157_v51 = vadd.f32 %v13626_v35, %v2756_v54  ;;  %v8742_v40 = vld [vmem:[#allocation2 + $0x18] sm:$0xff]  ;;  %v13631_v22 = vld [vmem:[#allocation105_spill] sm:$0xff] }
 0x723   : > { %v11025_v32 = vpop.permute.xlu0 %4644  ;;  %v3158_v30 = vadd.f32 %v13627_v7, %v2757_v13  ;;  %v11117_v38 = vadd.f32 %v13628_v4, %v3142_v10  ;;  %v11120_v29 = vadd.f32 %v13629_v39, %v3141_v53  ;;  %v3740_v28 = vmul.f32 %v8742_v40, %v13630_v63  ;;  %v13632_v54 = vld [vmem:[#allocation106_spill] sm:$0xff]  ;;  %v13633_v10 = vld [vmem:[#allocation109_spill] sm:$0xff] }
 0x724   : > { %v3741_v34 = vmul.f32 %v8743_v3, %v13630_v63  ;;  %v3742_v31 = vmul.f32 %v10664_v8, %v13630_v63  ;;  %v11127_v19 = vadd.f32 %v13631_v22, %v3146_v47  ;;  %v11130_v13 = vadd.f32 %v13632_v54, %v3145_v37  ;;  %v13634_v53 = vld [vmem:[#allocation110_spill] sm:$0xff]  ;;  %v13637_v35 = vld [vmem:[#allocation113_spill] sm:$0xff]  ;;  %v13641_v47 = vld [vmem:[#allocation16_spill] sm:$0xff] }
 0x725   : > { %v11133_v45 = vadd.f32 %v13633_v10, %v3150_v23  ;;  %v11136_v14 = vadd.f32 %v13634_v53, %v3149_v16  ;;  %v11143_v7 = vadd.f32 %v13637_v35, %v3154_v27  ;;  %v13639_v8 = vld [vmem:[#allocation114_spill] sm:$0xff]  ;;  %v2067_v39 = vadd.f32 %v13641_v47, %v1726_v44  ;;  %v13642_v37 = vld [vmem:[#allocation15_spill] sm:$0xff]  ;;  %v13643_v63 = vld [vmem:[#allocation117_spill] sm:$0xff] }
 0x726   : > { %v11100_v58 = vpop.permute.xlu1 %4650  ;;  %v11146_v4 = vadd.f32 %v13639_v8, %v3153_v18  ;;  %v2068_v40 = vadd.f32 %v13642_v37, %v1727_v62  ;;  %v11151_v23 = vadd.f32 %v13643_v63, %v3158_v30  ;;  %v13645_v3 = vld [vmem:[#allocation124_spill] sm:$0xff]  ;;  %v3815_v27 = vrot.slane %v3740_v28, 2  ;;  %v8744_v18 = vld [vmem:[#allocation2 + $0x60] sm:$0xff]  ;;  %v13646_v35 = vld [vmem:[#allocation125_spill] sm:$0xff] }
 0x727   : > { %v11098_v48 = vpop.permute.xlu0 %4648  ;;  %13617 = vst [vmem:[#allocation33_spill] sm:$0xff] %v11100_v58  ;;  %13638 = vst [vmem:[#allocation41_spill] sm:$0xff] %v11143_v7  ;;  %v3737_v16 = vmul.f32 %v8740_v61, %v13645_v3  ;;  %v11155_v22 = vmul.f32 %v8741_v17, %v13645_v3  ;;  %v3739_v54 = vmul.f32 %v10669_v5, %v13645_v3  ;;  %v3816_v10 = vrot.slane %v3741_v34, 2  ;;  %v8745_v44 = vld [vmem:[#allocation2 + $0x68] sm:$0xff]  ;;  %v8746_v17 = vld [vmem:[#allocation2 + $0x30] sm:$0xff] }
 0x728   : > { %13616 = vst [vmem:[#allocation34_spill] sm:$0xff] %v11098_v48  ;;  %13640 = vst [vmem:[#allocation64_spill] sm:$0xff] %v11146_v4  ;;  %v3818_v53 = vrot.slane %v3742_v31, 2  ;;  %v11160_v8 = vmul.f32 %v8744_v18, %v13646_v35  ;;  %v11163_v62 = vmul.f32 %v8745_v44, %v13646_v35  ;;  %v11167_v61 = vmul.f32 %v10692_v36, %v13646_v35  ;;  %v13647_v30 = vld [vmem:[#allocation126_spill] sm:$0xff]  ;;  %v13648_v28 = vld [vmem:[#allocation39_spill] sm:$0xff] }
 0x729   : > { %13644 = vst [vmem:[#allocation42_spill] sm:$0xff] %v11151_v23  ;;  %v3743_v47 = vmul.f32 %v8746_v17, %v13647_v30  ;;  %v8747_v37 = vld [vmem:[#allocation2 + $0x38] sm:$0xff]  ;;  %v2384_v34 = vadd.f32 %v13648_v28, %v2067_v39  ;;  %v13649_v31 = vld [vmem:[#allocation40_spill] sm:$0xff]  ;;  %v13650_v3 = vld [vmem:[#allocation163_spill] sm:$0xff]  ;;  %v3811_v36 = vrot.slane %v11155_v22, 2  ;;  %v3745_v35 = vmul.f32 %v10674_v55, %v13647_v30 }
 0x72a   : > { %v11140_v43 = vpop.permute.xlu1 %4654  ;;  %v3744_v5 = vmul.f32 %v8747_v37, %v13647_v30  ;;  %v2385_v63 = vadd.f32 %v13649_v31, %v2068_v40  ;;  %v1730_v9 = vmul.f32 %v8746_v17, %v13650_v3  ;;  %v1731_v60 = vmul.f32 %v8747_v37, %v13650_v3  ;;  %v13651_v23 = vld [vmem:[#allocation118_spill] sm:$0xff]  ;;  %v13655_v30 = vld [vmem:[#allocation20_spill] sm:$0xff]  ;;  %v13656_v3 = vld [vmem:[#allocation19_spill] sm:$0xff] }
 0x72b   : > { %v11138_v1 = vpop.permute.xlu0 %4652  ;;  %13636 = vst [vmem:[#allocation37_spill] sm:$0xff] %v11140_v43  ;;  %v11176_v43 = vadd.f32 %v13651_v23, %v3157_v51  ;;  %v3813_v39 = vrot.slane %v3739_v54, 2  ;;  %v3819_v17 = vsel %vm3809_vm6, %v3816_v10, %v3818_v53  ;;  %v3817_v37 = vsel %vm3809_vm6, %v3815_v27, %v3816_v10  ;;  %v8748_v40 = vld [vmem:[#allocation2 + $0x90] sm:$0xff]  ;;  %v8749_v27 = vld [vmem:[#allocation2 + $0x98] sm:$0xff] }
 0x72c   : > { %13635 = vst [vmem:[#allocation38_spill] sm:$0xff] %v11138_v1  ;;  %v3810_v1 = vrot.slane %v3737_v16, 2  ;;  %v3820_v16 = vrot.slane %v3743_v47, 2  ;;  %v3821_v22 = vrot.slane %v3744_v5, 2  ;;  %v2738_v28 = vadd.f32 %v11038_v57, %v2384_v34  ;;  %v8750_v57 = vld [vmem:[#allocation2 + $0x48] sm:$0xff]  ;;  %v8751_v34 = vld [vmem:[#allocation2 + $0x50] sm:$0xff] }
 0x72d   : > { %13652 = vst [vmem:[#allocation45_spill] sm:$0xff] %v11176_v43  ;;  %v2739_v55 = vadd.f32 %v11045_v15, %v2385_v63  ;;  %v2071_v31 = vadd.f32 %v13655_v30, %v1730_v9  ;;  %v2072_v54 = vadd.f32 %v13656_v3, %v1731_v60  ;;  %v13658_v5 = vld [vmem:[#allocation128_spill] sm:$0xff]  ;;  %v11209_v63 = vadd.f32 %v3819_v17, %v11117_v38  ;;  %v13666_v7 = vld [vmem:[#allocation129_spill] sm:$0xff] }
 0x72e   : > { %v11183_v48 = vpop.permute.xlu1 %4658  ;;  %v3746_v15 = vmul.f32 %v8750_v57, %v13658_v5  ;;  %v3747_v9 = vmul.f32 %v8751_v34, %v13658_v5  ;;  %v3748_v60 = vmul.f32 %v10684_v42, %v13658_v5  ;;  %v13659_v30 = vld [vmem:[#allocation164_spill] sm:$0xff]  ;;  %v13662_v34 = vld [vmem:[#allocation43_spill] sm:$0xff] }
 0x72f   : > { %v11181_v58 = vpop.permute.xlu0 %4656  ;;  %13654 = vst [vmem:[#allocation49_spill] sm:$0xff] %v11183_v48  ;;  %v3823_v48 = vrot.slane %v3745_v35, 2  ;;  %v11212_v35 = vadd.f32 %v3817_v37, %v11120_v29  ;;  %v1734_v3 = vmul.f32 %v8744_v18, %v13659_v30  ;;  %v2388_v51 = vadd.f32 %v13662_v34, %v2071_v31  ;;  %v13663_v43 = vld [vmem:[#allocation44_spill] sm:$0xff]  ;;  %v13664_v5 = vld [vmem:[#allocation75_spill] sm:$0xff] }
 0x730   : > { %13653 = vst [vmem:[#allocation46_spill] sm:$0xff] %v11181_v58  ;;  %v13657_v58 = vld [vmem:[#allocation127_spill] sm:$0xff]  ;;  %v2389_v42 = vadd.f32 %v13663_v43, %v2072_v54  ;;  %v3139_v38 = vadd.f32 %v13664_v5, %v2738_v28  ;;  %v13665_v17 = vld [vmem:[#allocation76_spill] sm:$0xff]  ;;  %v3825_v37 = vrot.slane %v3746_v15, 2 }
 0x731   : > { %v11195_v53 = vmul.f32 %v8748_v40, %v13657_v58  ;;  %v11198_v10 = vmul.f32 %v8749_v27, %v13657_v58  ;;  %v11202_v47 = vmul.f32 %v10710_v2, %v13657_v58  ;;  %v1735_v2 = vmul.f32 %v8745_v44, %v13659_v30  ;;  %v13668_v43 = vld [vmem:[#allocation24_spill] sm:$0xff]  ;;  %v13669_v28 = vld [vmem:[#allocation23_spill] sm:$0xff] }
 0x732   : > { %v3812_v58 = vsel %vm3809_vm6, %v3810_v1, %v3811_v36  ;;  %v11219_v57 = vpop.permute.xlu1 %4662  ;;  %v3140_v4 = vadd.f32 %v13665_v17, %v2739_v55  ;;  %v3814_v1 = vsel %vm3809_vm6, %v3811_v36, %v3813_v39  ;;  %v3826_v30 = vrot.slane %v3747_v9, 2  ;;  %v13670_v39 = vld [vmem:[#allocation100_spill] sm:$0xff]  ;;  %v13671_v9 = vld [vmem:[#allocation99_spill] sm:$0xff] }
 0x733   : > { %v11217_v23 = vpop.permute.xlu0 %4660  ;;  %13661 = vst [vmem:[#allocation53_spill] sm:$0xff] %v11219_v57  ;;  %v8752_v57 = vld [vmem:[#allocation2 + $0xc0] sm:$0xff]  ;;  %v2075_v54 = vadd.f32 %v13668_v43, %v1734_v3  ;;  %v2076_v34 = vadd.f32 %v13669_v28, %v1735_v2  ;;  %v11235_v55 = vsel %vm3809_vm6, %v3820_v16, %v3821_v22  ;;  %v11238_v5 = vsel %vm3809_vm6, %v3821_v22, %v3823_v48  ;;  %v8753_v44 = vld [vmem:[#allocation2 + $0xc8] sm:$0xff]  ;;  %v8754_v3 = vld [vmem:[#allocation2 + $0x78] sm:$0xff] }
 0x734   : > { %13660 = vst [vmem:[#allocation50_spill] sm:$0xff] %v11217_v23  ;;  %v3828_v23 = vrot.slane %v3748_v60, 2  ;;  %v11230_v31 = vmul.f32 %v8752_v57, %v13666_v7  ;;  %v2742_v17 = vadd.f32 %v11055_v24, %v2388_v51  ;;  %v2743_v36 = vadd.f32 %v11062_v59, %v2389_v42  ;;  %v13672_v2 = vld [vmem:[#allocation130_spill] sm:$0xff]  ;;  %v8755_v16 = vld [vmem:[#allocation2 + $0x80] sm:$0xff] }
 0x735   : > { %v3540_v15 = vadd.f32 %v13670_v39, %v3139_v38  ;;  %v3541_v60 = vadd.f32 %v13671_v9, %v3140_v4  ;;  %v11245_v29 = vmul.f32 %v8753_v44, %v13666_v7  ;;  %v3752_v43 = vmul.f32 %v8754_v3, %v13672_v2  ;;  %v13675_v38 = vld [vmem:[#allocation47_spill] sm:$0xff]  ;;  %v13676_v9 = vld [vmem:[#allocation48_spill] sm:$0xff] }
 0x736   : > { %13667 = vst [vmem:[#allocation54_spill] sm:$0xff] %v11230_v31  ;;  %v3753_v28 = vmul.f32 %v8755_v16, %v13672_v2  ;;  %v3754_v48 = vmul.f32 %v10701_v56, %v13672_v2  ;;  %v11253_v59 = vpop.permute.xlu1 %4666  ;;  %v11257_v4 = vmul.f32 %v13594_v49, %v13666_v7  ;;  %v3829_v22 = vsel %vm3809_vm6, %v3826_v30, %v3828_v23  ;;  %v13677_v16 = vld [vmem:[#allocation165_spill] sm:$0xff]  ;;  %v13679_v49 = vld [vmem:[#allocation80_spill] sm:$0xff] }
 0x737   : > { %v11251_v24 = vpop.permute.xlu0 %4664  ;;  %13674 = vst [vmem:[#allocation65_spill] sm:$0xff] %v11253_v59  ;;  %v3827_v42 = vsel %vm3809_vm6, %v3825_v37, %v3826_v30  ;;  %v2392_v39 = vadd.f32 %v13675_v38, %v2075_v54  ;;  %v2393_v3 = vadd.f32 %v13676_v9, %v2076_v34  ;;  %v1738_v56 = vmul.f32 %v8748_v40, %v13677_v16  ;;  %v11269_v37 = vld [vmem:[#allocation2 + $0xf0] sm:$0xff]  ;;  %v13680_v30 = vld [vmem:[#allocation131_spill] sm:$0xff]  ;;  %v11275_v40 = vld [vmem:[#allocation2 + $0xf8] sm:$0xff] }
 0x738   : > { %13673 = vst [vmem:[#allocation63_spill] sm:$0xff] %v11251_v24  ;;  %v1739_v2 = vmul.f32 %v8749_v27, %v13677_v16  ;;  %v3894_v18 = vadd.f32 %v3812_v58, %v3540_v15  ;;  %v3895_v59 = vadd.f32 %v3814_v1, %v3541_v60  ;;  %v13678_v24 = vld [vmem:[#allocation79_spill] sm:$0xff]  ;;  %v3144_v7 = vadd.f32 %v13679_v49, %v2743_v36  ;;  %v8758_v58 = vld [vmem:[#allocation2 + $0xa8] sm:$0xff]  ;;  %v13687_v9 = vld [vmem:[#allocation5_spill] sm:$0xff] }
 0x739   : > { %v3143_v0 = vadd.f32 %v13678_v24, %v2742_v17  ;;  %v3835_v26 = vrot.slane %v3752_v43, 2  ;;  %v3836_v51 = vrot.slane %v3753_v28, 2  ;;  %v3838_v31 = vrot.slane %v3754_v48, 2  ;;  %v13682_v1 = vld [vmem:[#allocation132_spill] sm:$0xff]  ;;  %v13683_v15 = vld [vmem:[#allocation27_spill] sm:$0xff] }
 0x73a   : > { %v3901_v23 = vadd.f32 %v3829_v22, %v11127_v19  ;;  %v11273_v54 = vmul.f32 %v11269_v37, %v13680_v30  ;;  %v11279_v27 = vmul.f32 %v11275_v40, %v13680_v30  ;;  %v11282_v34 = vmul.f32 %v8758_v58, %v13682_v1  ;;  %v13684_v43 = vld [vmem:[#allocation28_spill] sm:$0xff]  ;;  %v11291_v24 = vpop.permute.xlu1 %4670  ;;  %v13686_v22 = vld [vmem:[#allocation6_spill] sm:$0xff] }
 0x73b   : > { %v3900_v17 = vadd.f32 %v3827_v42, %v11130_v13  ;;  %v2746_v19 = vadd.f32 %v11069_v33, %v2392_v39  ;;  %v2747_v36 = vadd.f32 %v11076_v21, %v2393_v3  ;;  %v2079_v60 = vadd.f32 %v13683_v15, %v1738_v56  ;;  %v11289_v48 = vpop.permute.xlu0 %4668  ;;  %13685 = vst [vmem:[#allocation58_spill] sm:$0xff] %v11291_v24  ;;  %v13688_v49 = vld [vmem:[#allocation104_spill] sm:$0xff]  ;;  %v8759_v42 = vld [vmem:[#allocation2 + $0xb0] sm:$0xff]  ;;  %v13690_v39 = vld [vmem:[#allocation7_spill] sm:$0xff] }
 0x73c   : > { %13681 = vst [vmem:[#allocation57_spill] sm:$0xff] %v11279_v27  ;;  %v2080_v28 = vadd.f32 %v13684_v43, %v1739_v2  ;;  %v4295_v38 = vadd.f32 %v13686_v22, %v3894_v18  ;;  %v4296_v16 = vadd.f32 %v13687_v9, %v3895_v59  ;;  %v3544_v58 = vadd.f32 %v13688_v49, %v3143_v0  ;;  %v13689_v27 = vld [vmem:[#allocation103_spill] sm:$0xff]  ;;  %v13691_v56 = vld [vmem:[#allocation9_spill] sm:$0xff]  ;;  %v13692_v18 = vld [vmem:[#allocation8_spill] sm:$0xff] }
 0x73d   : > { %v3545_v13 = vadd.f32 %v13689_v27, %v3144_v7  ;;  %v11298_v33 = vmul.f32 %v8759_v42, %v13682_v1  ;;  %v11302_v21 = vmul.f32 %v10719_v50, %v13682_v1  ;;  %v4298_v3 = vadd.f32 %v13690_v39, %v11209_v63  ;;  %v13693_v27 = vld [vmem:[#allocation12_spill] sm:$0xff]  ;;  %v13694_v43 = vld [vmem:[#allocation51_spill] sm:$0xff] }
 0x73e   : > { %v1742_v2 = vmul.f32 %v8752_v57, %v13691_v56  ;;  %v4297_v59 = vadd.f32 %v13692_v18, %v11212_v35  ;;  %v1743_v0 = vmul.f32 %v8753_v44, %v13691_v56  ;;  %v4696_v7 = vadd.f32 %v10901_v12, %v4295_v38  ;;  %v13695_v9 = vld [vmem:[#allocation52_spill] sm:$0xff]  ;;  %v13696_v50 = vld [vmem:[#allocation83_spill] sm:$0xff] }
 0x73f   : > { %v4697_v15 = vadd.f32 %v13693_v27, %v4296_v16  ;;  %v2396_v22 = vadd.f32 %v13694_v43, %v2079_v60  ;;  %v2397_v49 = vadd.f32 %v13695_v9, %v2080_v28  ;;  %v3147_v1 = vadd.f32 %v13696_v50, %v2746_v19  ;;  %v13697_v42 = vld [vmem:[#allocation84_spill] sm:$0xff]  ;;  %v13698_v16 = vld [vmem:[#allocation31_spill] sm:$0xff]  ;;  %v13707_v50 = vld [vmem:[#allocation138_spill] sm:$0xff] }
 0x740   : > { %v3148_v24 = vadd.f32 %v13697_v42, %v2747_v36  ;;  %v3898_v57 = vadd.f32 %v11235_v55, %v3544_v58  ;;  %v3899_v35 = vadd.f32 %v11238_v5, %v3545_v13  ;;  %v3839_v12 = vsel %vm3809_vm6, %v3836_v51, %v3838_v31  ;;  %v13701_v27 = vld [vmem:[#allocation32_spill] sm:$0xff]  ;;  %v13702_v58 = vld [vmem:[#allocation13_spill] sm:$0xff]  ;;  %v13703_v13 = vld [vmem:[#allocation14_spill] sm:$0xff] }
 0x741   : > { %v3837_v38 = vsel %vm3809_vm6, %v3835_v26, %v3836_v51  ;;  %v2083_v60 = vadd.f32 %v13698_v16, %v1742_v2  ;;  %v13699_v28 = vrot.slane %v11163_v62, 2  ;;  %v13700_v19 = vrot.slane %v11160_v8, 2  ;;  %v13704_v51 = vld [vmem:[#allocation108_spill] sm:$0xff]  ;;  %v13705_v2 = vld [vmem:[#allocation107_spill] sm:$0xff]  ;;  %v13709_v16 = vld [vmem:[#allocation141_spill] sm:$0xff] }
 0x742   : > { %v3851_v56 = vrot.slane %v11245_v29, 2  ;;  %v2084_v55 = vadd.f32 %v13701_v27, %v1743_v0  ;;  %v4698_v5 = vadd.f32 %v13702_v58, %v4297_v59  ;;  %v2750_v26 = vadd.f32 %v11079_v25, %v2396_v22  ;;  %v13706_v43 = vld [vmem:[#allocation139_spill] sm:$0xff]  ;;  %v13756_v29 = vld [vmem:[#allocation134_spill] sm:$0xff] }
 0x743   : > { %v3832_v36 = vsel %vm3809_vm6, %v13700_v19, %v13699_v28  ;;  %v2751_v31 = vadd.f32 %v11082_v6, %v2397_v49  ;;  %v3548_v8 = vadd.f32 %v13704_v51, %v3147_v1  ;;  %v4299_v9 = vadd.f32 %v13706_v43, %v3898_v57  ;;  %v13710_v28 = vld [vmem:[#allocation55_spill] sm:$0xff]  ;;  %v13713_v1 = vld [vmem:[#allocation56_spill] sm:$0xff] }
 0x744   : > { %v4300_v0 = vadd.f32 %v13707_v50, %v3899_v35  ;;  %v13711_v25 = vrot.slane %v11167_v61, 2  ;;  %v13712_v6 = vrot.slane %v11163_v62, 2  ;;  %v2401_v57 = vadd.f32 %v13713_v1, %v2084_v55  ;;  %v13714_v35 = vld [vmem:[#allocation17_spill] sm:$0xff]  ;;  %v13717_v58 = vld [vmem:[#allocation87_spill] sm:$0xff] }
 0x745   : > { %v4700_v19 = vadd.f32 %v13714_v35, %v4299_v9  ;;  %v3905_v43 = vadd.f32 %v3839_v12, %v11133_v45  ;;  %v3904_v9 = vadd.f32 %v3837_v38, %v11136_v14  ;;  %v13722_v45 = vld [vmem:[#allocation36_spill] sm:$0xff]  ;;  %v13723_v14 = vld [vmem:[#allocation143_spill] sm:$0xff] }
 0x746   : > { %v3834_v22 = vsel %vm3809_vm6, %v13712_v6, %v13711_v25  ;;  %v13728_v25 = vld [vmem:[#allocation144_spill] sm:$0xff] }
 0x747   : > { %v4851_v39 = vpop.permute.xlu1 %4850  ;;  %v4306_v6 = vadd.f32 %v13728_v25, %v3905_v43 }
 0x748   : > { %v4847_v63 = vpop.permute.xlu0 %4846  ;;  %v4895_v42 = vadd.f32 %v4851_v39, %v4698_v5  ;;  %v3151_v5 = vadd.f32 %v13717_v58, %v2750_v26  ;;  %v13720_v26 = vld [vmem:[#allocation22_spill] sm:$0xff] }
 0x749   : > { %v4893_v18 = vadd.f32 %v4847_v63, %v4696_v7  ;;  %v4894_v44 = vadd.f32 %v4847_v63, %v4697_v15  ;;  %v4699_v7 = vadd.f32 %v13703_v13, %v4298_v3  ;;  %v3549_v15 = vadd.f32 %v13705_v2, %v3148_v24  ;;  %v13708_v63 = vld [vmem:[#allocation140_spill] sm:$0xff] }
 0x74a   : > { %v4302_v3 = vadd.f32 %v13708_v63, %v3901_v23  ;;  %v3853_v24 = vrot.slane %v11257_v4, 2  ;;  %v13716_v23 = vld [vmem:[#allocation10_spill] sm:$0xff]  ;;  %v13718_v13 = vld [vmem:[#allocation88_spill] sm:$0xff]  ;;  %v3846_v2 = vrot.slane %v11298_v33, 2  ;;  %v13721_v33 = vld [vmem:[#allocation35_spill] sm:$0xff] }
 0x74b   : > { %4941 = vrot.lane.b32.xlu1 %v4893_v18, %s8824_s23  ;;  %4943 = vrot.lane.b32.xlu0 %v4894_v44, %s8824_s23  ;;  %v4896_v59 = vadd.f32 %v4851_v39, %v4699_v7  ;;  %v4301_v18 = vadd.f32 %v13709_v16, %v3900_v17  ;;  %v2400_v44 = vadd.f32 %v13710_v28, %v2083_v60  ;;  %v4855_v49 = vpop.permute.xlu1 %4854  ;;  %v13715_v39 = vld [vmem:[#allocation18_spill] sm:$0xff]  ;;  %v13726_v63 = vld [vmem:[#allocation111_spill] sm:$0xff] }
 0x74c   : > { %v4701_v27 = vadd.f32 %v13715_v39, %v4300_v0  ;;  %v1746_v61 = vmul.f32 %v11269_v37, %v13716_v23  ;;  %v1747_v62 = vmul.f32 %v11275_v40, %v13716_v23  ;;  %v3902_v17 = vadd.f32 %v3832_v36, %v3548_v8  ;;  %v4859_v37 = vpop.permute.xlu0 %4858  ;;  %v13719_v36 = vld [vmem:[#allocation21_spill] sm:$0xff]  ;;  %v8760_v28 = vld [vmem:[#allocation2 + $0xe0] sm:$0xff] }
 0x74d   : > { %v3903_v60 = vadd.f32 %v3834_v22, %v3549_v15  ;;  %v3152_v55 = vadd.f32 %v13718_v13, %v2751_v31  ;;  %v4897_v7 = vadd.f32 %v4855_v49, %v4700_v19  ;;  %v2754_v50 = vadd.f32 %v11085_v52, %v2400_v44  ;;  %v13724_v52 = vld [vmem:[#allocation142_spill] sm:$0xff]  ;;  %v13733_v23 = vld [vmem:[#allocation145_spill] sm:$0xff]  ;;  %v13737_v13 = vld [vmem:[#allocation92_spill] sm:$0xff] }
 0x74e   : > { %v4898_v51 = vadd.f32 %v4855_v49, %v4701_v27  ;;  %v3848_v0 = vrot.slane %v11302_v21, 2  ;;  %v2755_v40 = vadd.f32 %v11090_v20, %v2401_v57  ;;  %v4702_v8 = vadd.f32 %v13719_v36, %v4301_v18  ;;  %v13739_v36 = vld [vmem:[#allocation159_spill] sm:$0xff] }
 0x74f   : > { %4947 = vrot.lane.b32.xlu0 %v4896_v59, %s8824_s23  ;;  %4945 = vrot.lane.b32.xlu1 %v4895_v42, %s8824_s23  ;;  %v4703_v15 = vadd.f32 %v13720_v26, %v4302_v3  ;;  %v2087_v31 = vadd.f32 %v13721_v33, %v1746_v61  ;;  %v2088_v12 = vadd.f32 %v13722_v45, %v1747_v62  ;;  %v13725_v59 = vld [vmem:[#allocation112_spill] sm:$0xff]  ;;  %v13727_v3 = vld [vmem:[#allocation133_spill] sm:$0xff]  ;;  %v13729_v22 = vrot.slane %v11198_v10, 2  ;;  %v4863_v39 = vpop.permute.xlu1 %4862  ;;  %v13736_v10 = vld [vmem:[#allocation91_spill] sm:$0xff] }
 0x750   : > { %v4303_v38 = vadd.f32 %v13723_v14, %v3902_v17  ;;  %v4304_v42 = vadd.f32 %v13724_v52, %v3903_v60  ;;  %v3552_v21 = vadd.f32 %v13725_v59, %v3151_v5  ;;  %v3553_v20 = vadd.f32 %v13726_v63, %v3152_v55  ;;  %v13744_v59 = vld [vmem:[#allocation147_spill] sm:$0xff]  ;;  %v13745_v63 = vld [vmem:[#allocation146_spill] sm:$0xff] }
 0x751   : > { %v4899_v16 = vadd.f32 %v4859_v37, %v4702_v8  ;;  %v4900_v18 = vadd.f32 %v4859_v37, %v4703_v15  ;;  %v11375_v44 = vmul.f32 %v8760_v28, %v13727_v3  ;;  %v13730_v49 = vrot.slane %v11195_v53, 2  ;;  %v13734_v53 = vld [vmem:[#allocation59_spill] sm:$0xff]  ;;  %v4867_v15 = vpop.permute.xlu0 %4866  ;;  %v13747_v28 = vld [vmem:[#allocation64_spill] sm:$0xff] }
 0x752   : > { %v13731_v57 = vrot.slane %v11202_v47, 2  ;;  %v13732_v35 = vmov %v13729_v22  ;;  %v3845_v27 = vrot.slane %v11282_v34, 2  ;;  %v4305_v61 = vadd.f32 %v13733_v23, %v3904_v9  ;;  %v13735_v47 = vld [vmem:[#allocation60_spill] sm:$0xff] }
 0x753   : > { %4951 = vrot.lane.b32.xlu0 %v4898_v51, %s8824_s23  ;;  %4949 = vrot.lane.b32.xlu1 %v4897_v7, %s8824_s23  ;;  %v3842_v1 = vsel %vm3809_vm6, %v13730_v49, %v13729_v22  ;;  %v4704_v62 = vadd.f32 %v11013_v41, %v4303_v38  ;;  %v4705_v17 = vadd.f32 %v11015_v11, %v4304_v42  ;;  %v13738_v41 = vld [vmem:[#allocation160_spill] sm:$0xff]  ;;  %v8761_v11 = vld [vmem:[#allocation2 + $0xd8] sm:$0xff]  ;;  %v4871_v22 = vpop.permute.xlu1 %4870 }
 0x754   : > { %v3844_v19 = vsel %vm3809_vm6, %v13732_v35, %v13731_v57  ;;  %v2404_v60 = vadd.f32 %v13734_v53, %v2087_v31  ;;  %v2405_v58 = vadd.f32 %v13735_v47, %v2088_v12  ;;  %v3155_v5 = vadd.f32 %v13736_v10, %v2754_v50  ;;  %v13741_v12 = vld [vmem:[#allocation29_spill] sm:$0xff]  ;;  %v13742_v38 = vld [vmem:[#allocation116_spill] sm:$0xff] }
 0x755   : > { %v3156_v55 = vadd.f32 %v13737_v13, %v2755_v40  ;;  %v3906_v7 = vadd.f32 %v3842_v1, %v3552_v21  ;;  %v3907_v34 = vadd.f32 %v3844_v19, %v3553_v20  ;;  %v4901_v51 = vadd.f32 %v4863_v39, %v4704_v62  ;;  %v13750_v1 = vld [vmem:[#allocation34_spill] sm:$0xff]  ;;  %v13751_v35 = vld [vmem:[#allocation33_spill] sm:$0xff]  ;;  %v8762_v13 = vld [vmem:[#allocation2 + $0x108] sm:$0xff] }
 0x756   : > { %v4902_v43 = vadd.f32 %v4863_v39, %v4705_v17  ;;  %v11400_v9 = vmul.f32 %v13738_v41, %v13680_v30  ;;  %v3764_v37 = vmul.f32 %v8761_v11, %v13727_v3  ;;  %v3766_v8 = vmul.f32 %v13739_v36, %v13727_v3  ;;  %v13740_v30 = vld [vmem:[#allocation30_spill] sm:$0xff] }
 0x757   : > { %4955 = vrot.lane.b32.xlu0 %v4900_v18, %s8824_s23  ;;  %4953 = vrot.lane.b32.xlu1 %v4899_v16, %s8824_s23  ;;  %v3849_v26 = vsel %vm3809_vm6, %v3846_v2, %v3848_v0  ;;  %v3856_v50 = vrot.slane %v11375_v44, 2  ;;  %v3847_v40 = vsel %vm3809_vm6, %v3845_v27, %v3846_v2  ;;  %v4706_v33 = vadd.f32 %v11025_v32, %v4305_v61  ;;  %v13743_v0 = vld [vmem:[#allocation115_spill] sm:$0xff]  ;;  %v13748_v44 = vld [vmem:[#allocation54_spill] sm:$0xff]  ;;  %v13752_v27 = vld [vmem:[#allocation148_spill] sm:$0xff] }
 0x758   : > { %v4707_v31 = vadd.f32 %v11027_v46, %v4306_v6  ;;  %v2758_v45 = vadd.f32 %v13740_v30, %v2404_v60  ;;  %v2759_v14 = vadd.f32 %v13741_v12, %v2405_v58  ;;  %v3556_v52 = vadd.f32 %v13742_v38, %v3155_v5  ;;  %v13746_v46 = vld [vmem:[#allocation41_spill] sm:$0xff]  ;;  %v13754_v60 = vld [vmem:[#allocation95_spill] sm:$0xff]  ;;  %v13755_v58 = vld [vmem:[#allocation96_spill] sm:$0xff] }
 0x759   : > { %v3557_v42 = vadd.f32 %v13743_v0, %v3156_v55  ;;  %v4307_v21 = vadd.f32 %v13744_v59, %v3906_v7  ;;  %v4308_v2 = vadd.f32 %v13745_v63, %v3907_v34  ;;  %v4903_v20 = vadd.f32 %v4867_v15, %v4706_v33  ;;  %v13753_v61 = vld [vmem:[#allocation149_spill] sm:$0xff]  ;;  %v13764_v38 = vld [vmem:[#allocation119_spill] sm:$0xff] }
 0x75a   : > { %v4904_v32 = vadd.f32 %v4867_v15, %v4707_v31  ;;  %v3858_v16 = vrot.slane %v3766_v8, 2  ;;  %v3909_v18 = vadd.f32 %v3849_v26, %v13746_v46  ;;  %v3908_v3 = vadd.f32 %v3847_v40, %v13747_v28  ;;  %v13757_v7 = vld [vmem:[#allocation161_spill] sm:$0xff]  ;;  %v13761_v31 = vld [vmem:[#allocation151_spill] sm:$0xff]  ;;  %v13769_v28 = vld [vmem:[#allocation46_spill] sm:$0xff] }
 0x75b   : > { %4959 = vrot.lane.b32.xlu0 %v4902_v43, %s8824_s23  ;;  %4957 = vrot.lane.b32.xlu1 %v4901_v51, %s8824_s23  ;;  %v13749_v25 = vrot.slane %v13748_v44, 2  ;;  %v3855_v49 = vrot.slane %v3764_v37, 2  ;;  %v4708_v57 = vadd.f32 %v13750_v1, %v4307_v21  ;;  %v4709_v19 = vadd.f32 %v13751_v35, %v4308_v2  ;;  %v4875_v43 = vpop.permute.xlu0 %4874  ;;  %v13758_v37 = vld [vmem:[#allocation38_spill] sm:$0xff]  ;;  %v13759_v8 = vld [vmem:[#allocation37_spill] sm:$0xff] }
 0x75c   : > { %v3854_v39 = vsel %vm3809_vm6, %v3851_v56, %v3853_v24  ;;  %v4310_v23 = vadd.f32 %v13752_v27, %v3909_v18  ;;  %v4309_v62 = vadd.f32 %v13753_v61, %v3908_v3  ;;  %v3159_v47 = vadd.f32 %v13754_v60, %v2758_v45  ;;  %v13760_v15 = vld [vmem:[#allocation57_spill] sm:$0xff]  ;;  %v13762_v45 = vld [vmem:[#allocation150_spill] sm:$0xff] }
 0x75d   : > { %v3852_v6 = vsel %vm3809_vm6, %v13749_v25, %v3851_v56  ;;  %v3911_v53 = vadd.f32 %v3854_v39, %v3557_v42  ;;  %v3160_v10 = vadd.f32 %v13755_v58, %v2759_v14  ;;  %v4905_v5 = vadd.f32 %v4871_v22, %v4708_v57  ;;  %v8763_v56 = vld [vmem:[#allocation2 + $0x110] sm:$0xff]  ;;  %v13763_v14 = vld [vmem:[#allocation120_spill] sm:$0xff]  ;;  %v13765_v21 = vld [vmem:[#allocation42_spill] sm:$0xff] }
 0x75e   : > { %v3910_v17 = vadd.f32 %v3852_v6, %v3556_v52  ;;  %v4906_v4 = vadd.f32 %v4871_v22, %v4709_v19  ;;  %v3770_v55 = vmul.f32 %v8762_v13, %v13756_v29  ;;  %v3771_v24 = vmul.f32 %v8763_v56, %v13756_v29  ;;  %v13766_v2 = vld [vmem:[#allocation45_spill] sm:$0xff]  ;;  %v5295_v6 = vld [vmem:[%s13242_s5] sm:$0xff]  ;;  %v13771_v22 = vld [vmem:[#allocation152_spill] sm:$0xff] }
 0x75f   : > { %4963 = vrot.lane.b32.xlu0 %v4904_v32, %s8824_s23  ;;  %4961 = vrot.lane.b32.xlu1 %v4903_v20, %s8824_s23  ;;  %v3772_v34 = vmul.f32 %v13757_v7, %v13756_v29  ;;  %v3859_v51 = vsel %vm3809_vm6, %v3856_v50, %v3858_v16  ;;  %v3860_v41 = vrot.slane %v11273_v54, 2  ;;  %v3857_v11 = vsel %vm3809_vm6, %v3855_v49, %v3856_v50  ;;  %v4879_v32 = vpop.permute.xlu1 %4878  ;;  %v13767_v16 = vld [vmem:[#allocation11_spill] sm:$0xff]  ;;  %v13768_v46 = vld [vmem:[#allocation25_spill] sm:$0xff]  ;;  %v13775_v60 = vld [vmem:[#allocation98_spill] sm:$0xff] }
 0x760   : > { %v4710_v36 = vadd.f32 %v13758_v37, %v4309_v62  ;;  %v4711_v26 = vadd.f32 %v13759_v8, %v4310_v23  ;;  %v3861_v40 = vrot.slane %v13760_v15, 2  ;;  %v3863_v33 = vrot.slane %v11400_v9, 2  ;;  %v13770_v44 = vld [vmem:[#allocation49_spill] sm:$0xff]  ;;  %v13773_v62 = vld [vmem:[#allocation26_spill] sm:$0xff] }
 0x761   : > { %v4311_v30 = vadd.f32 %v13761_v31, %v3910_v17  ;;  %v4312_v12 = vadd.f32 %v13762_v45, %v3911_v53  ;;  %v3560_v54 = vadd.f32 %v13763_v14, %v3159_v47  ;;  %v3561_v50 = vadd.f32 %v13764_v38, %v3160_v10  ;;  %v13772_v1 = vld [vmem:[#allocation153_spill] sm:$0xff]  ;;  %v4883_v10 = vpop.permute.xlu0 %4882  ;;  %v13777_v29 = vld [vmem:[#allocation50_spill] sm:$0xff]  ;;  %v13785_v38 = vld [vmem:[#allocation156_spill] sm:$0xff] }
 0x762   : > { %v4907_v52 = vadd.f32 %v4875_v43, %v4710_v36  ;;  %v4908_v0 = vadd.f32 %v4875_v43, %v4711_v26  ;;  %v3866_v42 = vrot.slane %v3771_v24, 2  ;;  %v3868_v59 = vrot.slane %v3772_v34, 2  ;;  %v13774_v17 = vld [vmem:[#allocation97_spill] sm:$0xff]  ;;  %v13782_v37 = vld [vmem:[#allocation154_spill] sm:$0xff] }
 0x763   : > { %4967 = vrot.lane.b32.xlu0 %v4906_v4, %s8824_s23  ;;  %4965 = vrot.lane.b32.xlu1 %v4905_v5, %s8824_s23  ;;  %v3913_v63 = vadd.f32 %v3859_v51, %v13765_v21  ;;  %v3912_v20 = vadd.f32 %v3857_v11, %v13766_v2  ;;  %v2761_v9 = vadd.f32 %v13768_v46, %v13767_v16  ;;  %v3865_v18 = vrot.slane %v3770_v55, 2  ;;  %v13776_v5 = vld [vmem:[#allocation3_spill] sm:$0xff]  ;;  %v13778_v56 = vld [vmem:[#allocation53_spill] sm:$0xff]  ;;  %v13780_v51 = vld [vmem:[#allocation122_spill] sm:$0xff] }
 0x764   : > { %v4712_v3 = vadd.f32 %v13769_v28, %v4311_v30  ;;  %v4713_v25 = vadd.f32 %v13770_v44, %v4312_v12  ;;  %v3862_v35 = vsel %vm3809_vm6, %v3860_v41, %v3861_v40  ;;  %v3864_v19 = vsel %vm3809_vm6, %v3861_v40, %v3863_v33  ;;  %v13779_v7 = vld [vmem:[#allocation121_spill] sm:$0xff]  ;;  %v13781_v41 = vld [vmem:[#allocation155_spill] sm:$0xff]  ;;  %v4887_v33 = vpop.permute.xlu1 %4886  ;;  %v13788_v28 = vld [vmem:[#allocation4_spill] sm:$0xff] }
 0x765   : > { %v4314_v49 = vadd.f32 %v13771_v22, %v3913_v63  ;;  %v4313_v57 = vadd.f32 %v13772_v1, %v3912_v20  ;;  %v3914_v39 = vadd.f32 %v3862_v35, %v3560_v54  ;;  %v3915_v27 = vadd.f32 %v3864_v19, %v3561_v50  ;;  %v13783_v30 = vld [vmem:[#allocation63_spill] sm:$0xff]  ;;  %v13784_v12 = vld [vmem:[#allocation65_spill] sm:$0xff]  ;;  %v4891_v21 = vpop.permute.xlu0 %4890  ;;  %v8610_v1 = vld.sshfl [vmem:[%s13242_s5 + $0x8] sm:$0x33 pattern:$0x75316420] }
 0x766   : > { %v4909_v23 = vadd.f32 %v4879_v32, %v4712_v3  ;;  %v4910_v61 = vadd.f32 %v4879_v32, %v4713_v25  ;;  %v3161_v53 = vadd.f32 %v13774_v17, %v13773_v62  ;;  %v3162_v47 = vadd.f32 %v13775_v60, %v2761_v9  ;;  %v13787_v32 = vld [vmem:[#allocation58_spill] sm:$0xff] }
 0x767   : > { %4971 = vrot.lane.b32.xlu0 %v4908_v0, %s8824_s23  ;;  %4969 = vrot.lane.b32.xlu1 %v4907_v52, %s8824_s23  ;;  %v3869_v58 = vsel %vm3809_vm6, %v3866_v42, %v3868_v59  ;;  %v5306_v4 = vrot.slane %v5295_v6, %v13776_v5  ;;  %v3867_v13 = vsel %vm3809_vm6, %v3865_v18, %v3866_v42  ;;  %v13786_v52 = vld [vmem:[#allocation157_spill] sm:$0xff] }
 0x768   : > { %v4714_v55 = vadd.f32 %v13777_v29, %v4313_v57  ;;  %v4715_v24 = vadd.f32 %v13778_v56, %v4314_v49  ;;  %v3563_v34 = vadd.f32 %v13779_v7, %v3162_v47  ;;  %v3562_v43 = vadd.f32 %v13780_v51, %v3161_v53 }
 0x769   : > { %v4315_v11 = vadd.f32 %v13781_v41, %v3914_v39  ;;  %v4316_v36 = vadd.f32 %v13782_v37, %v3915_v27  ;;  %v5314_v31 = vcombine.high %v5306_v4, %v5306_v4  ;;  %v5299_v54 = vcombine.high %v5295_v6, %v5295_v6 }
 0x76a   : > { %v4911_v8 = vadd.f32 %v4883_v10, %v4714_v55  ;;  %v4912_v26 = vadd.f32 %v4883_v10, %v4715_v24  ;;  %v3917_v15 = vadd.f32 %v3869_v58, %v3563_v34  ;;  %v3916_v40 = vadd.f32 %v3867_v13, %v3562_v43 }
 0x76b   : > { %4975 = vrot.lane.b32.xlu0 %v4910_v61, %s8824_s23  ;;  %4973 = vrot.lane.b32.xlu1 %v4909_v23, %s8824_s23  ;;  %v4716_v45 = vadd.f32 %v13783_v30, %v4315_v11  ;;  %v4717_v14 = vadd.f32 %v13784_v12, %v4316_v36  ;;  %v5336_v63 = vrot.slane %v5314_v31, %v13776_v5  ;;  %v13790_v23 = vmov 2  }
 0x76c   : > { %v4318_v50 = vadd.f32 %v13785_v38, %v3917_v15  ;;  %v4317_v0 = vadd.f32 %v13786_v52, %v3916_v40  ;;  %v5101_v2 = vrot.slane %v5306_v4, %v13776_v5  ;;  %v5313_v46 = vrot.slane %v5299_v54, %v13776_v5 }
 0x76d   : > { %v4913_v42 = vadd.f32 %v4887_v33, %v4716_v45  ;;  %v4914_v59 = vadd.f32 %v4887_v33, %v4717_v14  ;;  %v11503_v44 = vrot.slane %v5336_v63, %v13788_v28  ;;  %v5362_v35 = vrot.slane %v8610_v1, %v13776_v5 }
 0x76e   : > { %v4718_v20 = vadd.f32 %v11289_v48, %v4317_v0  ;;  %v4719_v16 = vadd.f32 %v13787_v32, %v4318_v50  ;;  %v11498_v3 = vrot.slane %v5101_v2, %v13788_v28  ;;  %v5329_v48 = vrot.slane %v5313_v46, %v13776_v5 }
 0x76f   : > { %4979 = vrot.lane.b32.xlu0 %v4912_v26, %s8824_s23  ;;  %4977 = vrot.lane.b32.xlu1 %v4911_v8, %s8824_s23  ;;  %13789 = vst [vmem:[#allocation61_spill] sm:$0xff] %v11503_v44  ;;  %v5123_v25 = vcombine.high %v5101_v2, %v5101_v2  ;;  %v11526_v19 = vrot.slane %v5362_v35, %v13788_v28  ;;  %v13791_v61 = vmov 1  }
 0x770   : > { %v4915_v9 = vadd.f32 %v4891_v21, %v4718_v20  ;;  %v4916_v18 = vadd.f32 %v4891_v21, %v4719_v16  ;;  %v11509_v6 = vrot.slane %v5329_v48, %v13788_v28  ;;  %v5345_v49 = vcombine.high %v5329_v48, %v5329_v48 }
 0x771   : > { %v11512_v22 = vrot.slane %v5123_v25, %v13788_v28  ;;  %v5370_v39 = vcombine.high %v5362_v35, %v5362_v35  ;;  %v5346_v62 = vcombine.high %v5336_v63, %v5336_v63  ;;  %v5315_v17 = vcombine.high %v5313_v46, %v5313_v46 }
 0x772   : > { %v11520_v57 = vrot.slane %v5345_v49, %v13788_v28  ;;  %v5355_v10 = vcombine.high %v8610_v1, %v8610_v1 }
 0x773   : > { %4983 = vrot.lane.b32.xlu0 %v4914_v59, %s8824_s23  ;;  %4981 = vrot.lane.b32.xlu1 %v4913_v42, %s8824_s23  ;;  %v11531_v27 = vrot.slane %v5370_v39, %v13788_v28  ;;  %v11541_v53 = vrot.slane %v5346_v62, %v13788_v28  ;;  %v5343_v60 = vrot.slane %v5315_v17, %v13776_v5 }
 0x774   : > { %v5369_v13 = vrot.slane %v5355_v10, %v13776_v5 }
 0x775   : > { %13792 = vst [vmem:[#allocation62_spill] sm:$0xff] %v11541_v53  ;;  %v11546_v47 = vrot.slane %v5343_v60, %v13788_v28  ;;  %v5347_v58 = vcombine.high %v5343_v60, %v5343_v60 }
 0x776   : > { %v11555_v29 = vrot.slane %v5369_v13, %v13788_v28  ;;  %v5371_v55 = vcombine.high %v5369_v13, %v5369_v13 }
 0x777   : > { %4987 = vrot.lane.b32.xlu0 %v4916_v18, %s8824_s23  ;;  %4985 = vrot.lane.b32.xlu1 %v4915_v9, %s8824_s23  ;;  %13793 = vst [vmem:[#allocation66_spill] sm:$0xff] %v11546_v47  ;;  %v11550_v4 = vrot.slane %v5347_v58, %v13788_v28 }
 0x778   : > { %v11559_v56 = vrot.slane %v5371_v55, %v13788_v28 }
 0x779   : > { %13794 = vst [vmem:[#allocation67_spill] sm:$0xff] %v11550_v4 }
 0x77b   : > { %5425 = vperm.xlu0 %8677, %v11503_v44   ;;  %5200 = vperm.xlu1 %8675, %v11498_v3  }
 0x77f   : > { %5437 = vperm.xlu0 %8677, %v11509_v6   ;;  %5208 = vperm.xlu1 %8675, %v11512_v22  }
 0x783   : > { %5445 = vperm.xlu0 %8677, %v11520_v57   ;;  %5216 = vperm.xlu1 %8675, %v11509_v6  }
 0x787   : > { %5453 = vperm.xlu0 %8677, %v11526_v19   ;;  %5224 = vperm.xlu1 %8675, %v11520_v57  }
 0x78b   : > { %5461 = vperm.xlu0 %8677, %v11531_v27   ;;  %5232 = vperm.xlu1 %8675, %v11526_v19  }
 0x78f   : > { %5240 = vperm.xlu1 %8675, %v11531_v27   ;;  %8678 = vset.pattern.permute.xlu0 %v13790_v23 }
 0x793   : > { %8676 = vset.pattern.permute.xlu1 %v13791_v61 }
 0x794   : > { %5421 = vperm.xlu1 %8676, %v11498_v3  }
 0x798   : > { %5429 = vperm.xlu1 %8676, %v11512_v22  }
 0x79c   : > { %5433 = vperm.xlu1 %8676, %v11541_v53  }
 0x7a0   : > { %5441 = vperm.xlu1 %8676, %v11546_v47  }
 0x7a4   : > { %5449 = vperm.xlu1 %8676, %v11550_v4  }
 0x7a8   : > { %5457 = vperm.xlu1 %8676, %v11555_v29  }
 0x7ac   : > { %5465 = vperm.xlu1 %8676, %v11559_v56  }
 0x7b0   : > { %8679 = vset.pattern.permute.xlu1 %v13790_v23 }
 0x7bd   : > { %v4944_v24 = vpop.permute.xlu0 %4943  ;;  %v4942_v7 = vpop.permute.xlu1 %4941 }
 0x7be   : > { %5015 = vst.msk [vmem:[#allocation2 + $0x9] sm:$0xff] %vm5013_vm7, %v4944_v24  ;;  %5014 = vst.msk [vmem:[#allocation2 + $0x1] sm:$0xff] %vm5013_vm7, %v4942_v7 }
 0x7c1   : > { %v4948_v34 = vpop.permute.xlu0 %4947  ;;  %v4946_v51 = vpop.permute.xlu1 %4945 }
 0x7c2   : > { %5017 = vst.msk [vmem:[#allocation2 + $0x21] sm:$0xff] %vm5013_vm7, %v4948_v34  ;;  %5016 = vst.msk [vmem:[#allocation2 + $0x19] sm:$0xff] %vm5013_vm7, %v4946_v51 }
 0x7c5   : > { %v4952_v43 = vpop.permute.xlu0 %4951  ;;  %v4950_v41 = vpop.permute.xlu1 %4949  ;;  %v11599_v32 = vld [vmem:[#allocation2] sm:$0xff]  ;;  %v11601_v16 = vld [vmem:[#allocation2 + $0x8] sm:$0xff] }
 0x7c6   : > { %5019 = vst.msk [vmem:[#allocation2 + $0x39] sm:$0xff] %vm5013_vm7, %v4952_v43  ;;  %5018 = vst.msk [vmem:[#allocation2 + $0x31] sm:$0xff] %vm5013_vm7, %v4950_v41 }
 0x7c9   : > { %v4956_v11 = vpop.permute.xlu0 %4955  ;;  %v4954_v37 = vpop.permute.xlu1 %4953  ;;  %v11607_v25 = vld [vmem:[#allocation2 + $0x18] sm:$0xff]  ;;  %v11609_v49 = vld [vmem:[#allocation2 + $0x20] sm:$0xff] }
 0x7ca   : > { %5021 = vst.msk [vmem:[#allocation2 + $0x51] sm:$0xff] %vm5013_vm7, %v4956_v11  ;;  %5020 = vst.msk [vmem:[#allocation2 + $0x49] sm:$0xff] %vm5013_vm7, %v4954_v37 }
 0x7cd   : > { %v4960_v36 = vpop.permute.xlu0 %4959  ;;  %v4958_v8 = vpop.permute.xlu1 %4957  ;;  %v11615_v23 = vld [vmem:[#allocation2 + $0x30] sm:$0xff]  ;;  %v11617_v61 = vld [vmem:[#allocation2 + $0x38] sm:$0xff] }
 0x7ce   : > { %5023 = vst.msk [vmem:[#allocation2 + $0x69] sm:$0xff] %vm5013_vm7, %v4960_v36  ;;  %5022 = vst.msk [vmem:[#allocation2 + $0x61] sm:$0xff] %vm5013_vm7, %v4958_v8 }
 0x7d1   : > { %v4964_v26 = vpop.permute.xlu0 %4963  ;;  %v4962_v15 = vpop.permute.xlu1 %4961  ;;  %v11623_v58 = vld [vmem:[#allocation2 + $0x48] sm:$0xff]  ;;  %v11625_v10 = vld [vmem:[#allocation2 + $0x50] sm:$0xff] }
 0x7d2   : > { %5025 = vst.msk [vmem:[#allocation2 + $0x81] sm:$0xff] %vm5013_vm7, %v4964_v26  ;;  %5024 = vst.msk [vmem:[#allocation2 + $0x79] sm:$0xff] %vm5013_vm7, %v4962_v15 }
 0x7d5   : > { %v4968_v40 = vpop.permute.xlu0 %4967  ;;  %v4966_v33 = vpop.permute.xlu1 %4965  ;;  %v11631_v7 = vld [vmem:[#allocation2 + $0x60] sm:$0xff]  ;;  %v11633_v34 = vld [vmem:[#allocation2 + $0x68] sm:$0xff] }
 0x7d6   : > { %5027 = vst.msk [vmem:[#allocation2 + $0x99] sm:$0xff] %vm5013_vm7, %v4968_v40  ;;  %5026 = vst.msk [vmem:[#allocation2 + $0x91] sm:$0xff] %vm5013_vm7, %v4966_v33 }
 0x7d9   : > { %v4972_v31 = vpop.permute.xlu0 %4971  ;;  %v4970_v30 = vpop.permute.xlu1 %4969  ;;  %v11639_v11 = vld [vmem:[#allocation2 + $0x78] sm:$0xff]  ;;  %v11641_v37 = vld [vmem:[#allocation2 + $0x80] sm:$0xff] }
 0x7da   : > { %5029 = vst.msk [vmem:[#allocation2 + $0xb1] sm:$0xff] %vm5013_vm7, %v4972_v31  ;;  %5028 = vst.msk [vmem:[#allocation2 + $0xa9] sm:$0xff] %vm5013_vm7, %v4970_v30 }
 0x7dd   : > { %v4976_v45 = vpop.permute.xlu0 %4975  ;;  %v4974_v12 = vpop.permute.xlu1 %4973  ;;  %v11647_v15 = vld [vmem:[#allocation2 + $0x90] sm:$0xff]  ;;  %v11649_v40 = vld [vmem:[#allocation2 + $0x98] sm:$0xff] }
 0x7de   : > { %5031 = vst.msk [vmem:[#allocation2 + $0xc9] sm:$0xff] %vm5013_vm7, %v4976_v45  ;;  %5030 = vst.msk [vmem:[#allocation2 + $0xc1] sm:$0xff] %vm5013_vm7, %v4974_v12 }
 0x7e1   : > { %v4980_v14 = vpop.permute.xlu0 %4979  ;;  %v4978_v54 = vpop.permute.xlu1 %4977  ;;  %v11655_v45 = vld [vmem:[#allocation2 + $0xa8] sm:$0xff]  ;;  %v11657_v12 = vld [vmem:[#allocation2 + $0xb0] sm:$0xff] }
 0x7e2   : > { %5033 = vst.msk [vmem:[#allocation2 + $0xe1] sm:$0xff] %vm5013_vm7, %v4980_v14  ;;  %5032 = vst.msk [vmem:[#allocation2 + $0xd9] sm:$0xff] %vm5013_vm7, %v4978_v54 }
 0x7e5   : > { %v4984_v38 = vpop.permute.xlu0 %4983  ;;  %v4982_v50 = vpop.permute.xlu1 %4981 }
 0x7e6   : > { %5035 = vst.msk [vmem:[#allocation2 + $0xf9] sm:$0xff] %vm5013_vm7, %v4984_v38  ;;  %5034 = vst.msk [vmem:[#allocation2 + $0xf1] sm:$0xff] %vm5013_vm7, %v4982_v50  ;;  %v11663_v50 = vld [vmem:[#allocation2 + $0xc0] sm:$0xff] }
 0x7e9   : > { %v4988_v52 = vpop.permute.xlu0 %4987  ;;  %v4986_v0 = vpop.permute.xlu1 %4985 }
 0x7ea   : > { %5037 = vst.msk [vmem:[#allocation2 + $0x111] sm:$0xff] %vm5013_vm7, %v4988_v52  ;;  %5036 = vst.msk [vmem:[#allocation2 + $0x109] sm:$0xff] %vm5013_vm7, %v4986_v0  ;;  %v11665_v52 = vld [vmem:[#allocation2 + $0xc8] sm:$0xff] }
 0x7f6   : > { %v11587_v42 = vpop.permute.xlu1 %5200  ;;  %v5426_v48 = vpop.permute.xlu0 %5425 }
 0x7f7   : > { %13795 = vst [vmem:[#allocation68_spill] sm:$0xff] %v11587_v42  ;;  %v5470_v35 = vmul.f32 %v5426_v48, %v11607_v25  ;;  %v5471_v39 = vmul.f32 %v5426_v48, %v11609_v49  ;;  %v11673_v48 = vld [vmem:[#allocation2 + $0xe0] sm:$0xff] }
 0x7fa   : > { %v11589_v59 = vpop.permute.xlu1 %5208  ;;  %v5438_v24 = vpop.permute.xlu0 %5437 }
 0x7fb   : > { %13796 = vst [vmem:[#allocation69_spill] sm:$0xff] %v11589_v59  ;;  %v5476_v51 = vmul.f32 %v5438_v24, %v11631_v7  ;;  %v5477_v43 = vmul.f32 %v5438_v24, %v11633_v34  ;;  %v11687_v24 = vld [vmem:[#allocation2 + $0x108] sm:$0xff] }
 0x7fe   : > { %v11591_v21 = vpop.permute.xlu1 %5216  ;;  %v5446_v26 = vpop.permute.xlu0 %5445 }
 0x7ff   : > { %13797 = vst [vmem:[#allocation70_spill] sm:$0xff] %v11591_v21  ;;  %v5480_v33 = vmul.f32 %v5446_v26, %v11647_v15  ;;  %v5481_v31 = vmul.f32 %v5446_v26, %v11649_v40 }
 0x802   : > { %v11593_v63 = vpop.permute.xlu1 %5224  ;;  %v5454_v38 = vpop.permute.xlu0 %5453 }
 0x803   : > { %13798 = vst [vmem:[#allocation71_spill] sm:$0xff] %v11593_v63  ;;  %v5484_v0 = vmul.f32 %v5454_v38, %v11663_v50 }
 0x806   : > { %v11595_v2 = vpop.permute.xlu1 %5232 }
 0x807   : > { %13799 = vst [vmem:[#allocation73_spill] sm:$0xff] %v11595_v2 }
 0x80a   : > { %v11597_v20 = vpop.permute.xlu1 %5240 }
 0x80b   : > { %13800 = vst [vmem:[#allocation72_spill] sm:$0xff] %v11597_v20 }
 0x80f   : > { %v5422_v46 = vpop.permute.xlu1 %5421 }
 0x810   : > { %v5468_v9 = vmul.f32 %v5422_v46, %v11599_v32  ;;  %v5469_v18 = vmul.f32 %v5422_v46, %v11601_v16  ;;  %v5485_v46 = vmul.f32 %v5454_v38, %v11665_v52 }
 0x812   : > { %5518 = vrot.lane.b32.xlu1 %v5469_v18, %s8834_s16  ;;  %5516 = vrot.lane.b32.xlu0 %v5468_v9, %s8834_s16  ;;  %v11671_v18 = vld [vmem:[#allocation2 + $0xd8] sm:$0xff] }
 0x813   : > { %v5430_v1 = vpop.permute.xlu1 %5429 }
 0x814   : > { %v5472_v62 = vmul.f32 %v5430_v1, %v11615_v23  ;;  %v5473_v17 = vmul.f32 %v5430_v1, %v11617_v61 }
 0x816   : > { %5522 = vrot.lane.b32.xlu1 %v5471_v39, %s8834_s16  ;;  %5520 = vrot.lane.b32.xlu0 %v5470_v35, %s8834_s16  ;;  %v5462_v39 = vpop.permute.xlu0 %5461 }
 0x817   : > { %v5434_v60 = vpop.permute.xlu1 %5433 }
 0x818   : > { %v5474_v13 = vmul.f32 %v5434_v60, %v11623_v58  ;;  %v5475_v55 = vmul.f32 %v5434_v60, %v11625_v10 }
 0x81a   : > { %5526 = vrot.lane.b32.xlu1 %v5473_v17, %s8834_s16  ;;  %5524 = vrot.lane.b32.xlu0 %v5472_v62, %s8834_s16  ;;  %v11679_v62 = vld [vmem:[#allocation2 + $0xf0] sm:$0xff]  ;;  %v11681_v17 = vld [vmem:[#allocation2 + $0xf8] sm:$0xff] }
 0x81b   : > { %v5442_v41 = vpop.permute.xlu1 %5441  ;;  %v5488_v60 = vmul.f32 %v5462_v39, %v11679_v62 }
 0x81c   : > { %v5478_v36 = vmul.f32 %v5442_v41, %v11639_v11  ;;  %v5479_v8 = vmul.f32 %v5442_v41, %v11641_v37 }
 0x81e   : > { %5530 = vrot.lane.b32.xlu1 %v5475_v55, %s8834_s16  ;;  %5528 = vrot.lane.b32.xlu0 %v5474_v13, %s8834_s16  ;;  %v5489_v13 = vmul.f32 %v5462_v39, %v11681_v17 }
 0x81f   : > { %v5450_v30 = vpop.permute.xlu1 %5449 }
 0x820   : > { %v5482_v14 = vmul.f32 %v5450_v30, %v11655_v45  ;;  %v5483_v54 = vmul.f32 %v5450_v30, %v11657_v12 }
 0x822   : > { %5534 = vrot.lane.b32.xlu1 %v5477_v43, %s8834_s16  ;;  %5532 = vrot.lane.b32.xlu0 %v5476_v51, %s8834_s16  ;;  %v11689_v51 = vld [vmem:[#allocation2 + $0x110] sm:$0xff] }
 0x823   : > { %v5458_v9 = vpop.permute.xlu1 %5457 }
 0x824   : > { %v5486_v1 = vmul.f32 %v5458_v9, %v11671_v18  ;;  %v5487_v35 = vmul.f32 %v5458_v9, %v11673_v48 }
 0x826   : > { %5538 = vrot.lane.b32.xlu1 %v5479_v8, %s8834_s16  ;;  %5536 = vrot.lane.b32.xlu0 %v5478_v36, %s8834_s16  ;;  %v13801_v36 = vmov 3  }
 0x827   : > { %v5466_v55 = vpop.permute.xlu1 %5465 }
 0x828   : > { %v5490_v43 = vmul.f32 %v5466_v55, %v11687_v24  ;;  %v5491_v41 = vmul.f32 %v5466_v55, %v11689_v51 }
 0x82a   : > { %5542 = vrot.lane.b32.xlu1 %v5481_v31, %s8834_s16  ;;  %5540 = vrot.lane.b32.xlu0 %v5480_v33, %s8834_s16 }
 0x82e   : > { %5546 = vrot.lane.b32.xlu1 %v5483_v54, %s8834_s16  ;;  %5544 = vrot.lane.b32.xlu0 %v5482_v14, %s8834_s16 }
 0x832   : > { %5550 = vrot.lane.b32.xlu1 %v5485_v46, %s8834_s16  ;;  %5548 = vrot.lane.b32.xlu0 %v5484_v0, %s8834_s16 }
 0x836   : > { %5554 = vrot.lane.b32.xlu1 %v5487_v35, %s8834_s16  ;;  %5552 = vrot.lane.b32.xlu0 %v5486_v1, %s8834_s16 }
 0x83a   : > { %5558 = vrot.lane.b32.xlu1 %v5489_v13, %s8834_s16  ;;  %5556 = vrot.lane.b32.xlu0 %v5488_v60, %s8834_s16 }
 0x83e   : > { %5562 = vrot.lane.b32.xlu1 %v5491_v41, %s8834_s16  ;;  %5560 = vrot.lane.b32.xlu0 %v5490_v43, %s8834_s16 }
 0x842   : > { %5742 = vperm.xlu1 %8679, %v11503_v44   ;;  %5738 = vperm.xlu0 %8678, %v11498_v3  }
 0x846   : > { %5746 = vperm.xlu1 %8679, %v11512_v22   ;;  %5750 = vperm.xlu0 %8678, %v11541_v53  }
 0x84a   : > { %5754 = vperm.xlu1 %8679, %v11509_v6   ;;  %5758 = vperm.xlu0 %8678, %v11546_v47  }
 0x84e   : > { %5762 = vperm.xlu1 %8679, %v11520_v57   ;;  %5766 = vperm.xlu0 %8678, %v11550_v4  }
 0x852   : > { %5770 = vperm.xlu1 %8679, %v11526_v19   ;;  %5774 = vperm.xlu0 %8678, %v11555_v29  }
 0x856   : > { %5778 = vperm.xlu1 %8679, %v11531_v27   ;;  %5782 = vperm.xlu0 %8678, %v11559_v56  }
 0x85a   : > { %8680 = vset.pattern.permute.xlu1 %v13801_v36  ;;  %8681 = vset.pattern.permute.xlu0 %v13801_v36 }
 0x884   : > { %v11709_v8 = vpop.permute.xlu0 %5516  ;;  %v11711_v26 = vpop.permute.xlu1 %5518 }
 0x885   : > { %13802 = vst [vmem:[#allocation135_spill] sm:$0xff] %v11709_v8  ;;  %13803 = vst [vmem:[#allocation158_spill] sm:$0xff] %v11711_v26 }
 0x888   : > { %v11713_v33 = vpop.permute.xlu0 %5520  ;;  %v11715_v31 = vpop.permute.xlu1 %5522 }
 0x889   : > { %13804 = vst [vmem:[#allocation74_spill] sm:$0xff] %v11713_v33  ;;  %13805 = vst [vmem:[#allocation136_spill] sm:$0xff] %v11715_v31 }
 0x88c   : > { %v11717_v30 = vpop.permute.xlu0 %5524  ;;  %v11719_v14 = vpop.permute.xlu1 %5526 }
 0x88d   : > { %13806 = vst [vmem:[#allocation137_spill] sm:$0xff] %v11717_v30  ;;  %13807 = vst [vmem:[#allocation77_spill] sm:$0xff] %v11719_v14 }
 0x890   : > { %v11721_v54 = vpop.permute.xlu0 %5528  ;;  %v11723_v38 = vpop.permute.xlu1 %5530 }
 0x891   : > { %13808 = vst [vmem:[#allocation78_spill] sm:$0xff] %v11721_v54  ;;  %13809 = vst [vmem:[#allocation81_spill] sm:$0xff] %v11723_v38 }
 0x894   : > { %v11725_v0 = vpop.permute.xlu0 %5532  ;;  %v11727_v46 = vpop.permute.xlu1 %5534 }
 0x895   : > { %13810 = vst [vmem:[#allocation82_spill] sm:$0xff] %v11725_v0  ;;  %13811 = vst [vmem:[#allocation85_spill] sm:$0xff] %v11727_v46 }
 0x898   : > { %v11729_v9 = vpop.permute.xlu0 %5536  ;;  %v11731_v1 = vpop.permute.xlu1 %5538 }
 0x899   : > { %13812 = vst [vmem:[#allocation86_spill] sm:$0xff] %v11729_v9  ;;  %13813 = vst [vmem:[#allocation89_spill] sm:$0xff] %v11731_v1 }
 0x89c   : > { %v11733_v35 = vpop.permute.xlu0 %5540  ;;  %v11735_v39 = vpop.permute.xlu1 %5542 }
 0x89d   : > { %13814 = vst [vmem:[#allocation162_spill] sm:$0xff] %v11733_v35  ;;  %13815 = vst [vmem:[#allocation90_spill] sm:$0xff] %v11735_v39 }
 0x8a0   : > { %v11737_v60 = vpop.permute.xlu0 %5544  ;;  %v11739_v13 = vpop.permute.xlu1 %5546 }
 0x8a1   : > { %13816 = vst [vmem:[#allocation93_spill] sm:$0xff] %v11737_v60  ;;  %13817 = vst [vmem:[#allocation94_spill] sm:$0xff] %v11739_v13 }
 0x8a4   : > { %v11741_v55 = vpop.permute.xlu0 %5548  ;;  %v11743_v43 = vpop.permute.xlu1 %5550 }
 0x8a5   : > { %13818 = vst [vmem:[#allocation101_spill] sm:$0xff] %v11741_v55  ;;  %13819 = vst [vmem:[#allocation102_spill] sm:$0xff] %v11743_v43 }
 0x8a8   : > { %v11745_v41 = vpop.permute.xlu0 %5552  ;;  %v11747_v36 = vpop.permute.xlu1 %5554 }
 0x8a9   : > { %13820 = vst [vmem:[#allocation123_spill] sm:$0xff] %v11745_v41  ;;  %13821 = vst [vmem:[#allocation105_spill] sm:$0xff] %v11747_v36 }
 0x8ac   : > { %v11749_v38 = vpop.permute.xlu0 %5556  ;;  %v11751_v9 = vpop.permute.xlu1 %5558 }
 0x8ad   : > { %13822 = vst [vmem:[#allocation106_spill] sm:$0xff] %v11749_v38  ;;  %13823 = vst [vmem:[#allocation109_spill] sm:$0xff] %v11751_v9 }
 0x8b0   : > { %v11753_v1 = vpop.permute.xlu0 %5560  ;;  %v11755_v54 = vpop.permute.xlu1 %5562 }
 0x8b1   : > { %13824 = vst [vmem:[#allocation110_spill] sm:$0xff] %v11753_v1  ;;  %13825 = vst [vmem:[#allocation113_spill] sm:$0xff] %v11755_v54 }
 0x8bd   : > { %v5739_v31 = vpop.permute.xlu0 %5738  ;;  %v5743_v60 = vpop.permute.xlu1 %5742 }
 0x8be   : > { %v5785_v13 = vmul.f32 %v5739_v31, %v11599_v32  ;;  %v5786_v33 = vmul.f32 %v5739_v31, %v11601_v16  ;;  %v5787_v36 = vmul.f32 %v5743_v60, %v11607_v25  ;;  %v5788_v41 = vmul.f32 %v5743_v60, %v11609_v49 }
 0x8c0   : > { %5835 = vrot.lane.b32.xlu0 %v5786_v33, %s8836_s17  ;;  %5833 = vrot.lane.b32.xlu1 %v5785_v13, %s8836_s17 }
 0x8c1   : > { %v5747_v26 = vpop.permute.xlu1 %5746  ;;  %v5751_v54 = vpop.permute.xlu0 %5750 }
 0x8c2   : > { %v5789_v8 = vmul.f32 %v5747_v26, %v11615_v23  ;;  %v5790_v42 = vmul.f32 %v5747_v26, %v11617_v61  ;;  %v5791_v33 = vmul.f32 %v5751_v54, %v11623_v58  ;;  %v5792_v31 = vmul.f32 %v5751_v54, %v11625_v10 }
 0x8c4   : > { %5839 = vrot.lane.b32.xlu0 %v5788_v41, %s8836_s17  ;;  %5837 = vrot.lane.b32.xlu1 %v5787_v36, %s8836_s17 }
 0x8c5   : > { %v5755_v13 = vpop.permute.xlu1 %5754  ;;  %v5759_v36 = vpop.permute.xlu0 %5758 }
 0x8c6   : > { %v5793_v60 = vmul.f32 %v5755_v13, %v11631_v7  ;;  %v5794_v41 = vmul.f32 %v5755_v13, %v11633_v34 }
 0x8c8   : > { %5843 = vrot.lane.b32.xlu0 %v5790_v42, %s8836_s17  ;;  %5841 = vrot.lane.b32.xlu1 %v5789_v8, %s8836_s17  ;;  %v5795_v42 = vmul.f32 %v5759_v36, %v11639_v11  ;;  %v5796_v8 = vmul.f32 %v5759_v36, %v11641_v37 }
 0x8c9   : > { %v5763_v26 = vpop.permute.xlu1 %5762 }
 0x8ca   : > { %v5797_v54 = vmul.f32 %v5763_v26, %v11647_v15 }
 0x8cc   : > { %5847 = vrot.lane.b32.xlu0 %v5792_v31, %s8836_s17  ;;  %5845 = vrot.lane.b32.xlu1 %v5791_v33, %s8836_s17  ;;  %v5798_v33 = vmul.f32 %v5763_v26, %v11649_v40  ;;  %v5767_v31 = vpop.permute.xlu0 %5766 }
 0x8cd   : > { %v5799_v13 = vmul.f32 %v5767_v31, %v11655_v45 }
 0x8d0   : > { %5851 = vrot.lane.b32.xlu0 %v5794_v41, %s8836_s17  ;;  %5849 = vrot.lane.b32.xlu1 %v5793_v60, %s8836_s17  ;;  %v5800_v60 = vmul.f32 %v5767_v31, %v11657_v12  ;;  %v5771_v41 = vpop.permute.xlu1 %5770 }
 0x8d1   : > { %v5801_v36 = vmul.f32 %v5771_v41, %v11663_v50 }
 0x8d4   : > { %5855 = vrot.lane.b32.xlu0 %v5796_v8, %s8836_s17  ;;  %5853 = vrot.lane.b32.xlu1 %v5795_v42, %s8836_s17  ;;  %v5802_v42 = vmul.f32 %v5771_v41, %v11665_v52  ;;  %v5775_v8 = vpop.permute.xlu0 %5774 }
 0x8d5   : > { %v5803_v26 = vmul.f32 %v5775_v8, %v11671_v18 }
 0x8d8   : > { %5859 = vrot.lane.b32.xlu0 %v5798_v33, %s8836_s17  ;;  %5857 = vrot.lane.b32.xlu1 %v5797_v54, %s8836_s17  ;;  %v5804_v54 = vmul.f32 %v5775_v8, %v11673_v48  ;;  %v5779_v33 = vpop.permute.xlu1 %5778 }
 0x8d9   : > { %v5805_v31 = vmul.f32 %v5779_v33, %v11679_v62 }
 0x8dc   : > { %5863 = vrot.lane.b32.xlu0 %v5800_v60, %s8836_s17  ;;  %5861 = vrot.lane.b32.xlu1 %v5799_v13, %s8836_s17  ;;  %v5806_v13 = vmul.f32 %v5779_v33, %v11681_v17  ;;  %v5783_v60 = vpop.permute.xlu0 %5782 }
 0x8dd   : > { %v5807_v41 = vmul.f32 %v5783_v60, %v11687_v24 }
 0x8e0   : > { %5867 = vrot.lane.b32.xlu0 %v5802_v42, %s8836_s17  ;;  %5865 = vrot.lane.b32.xlu1 %v5801_v36, %s8836_s17  ;;  %v5808_v36 = vmul.f32 %v5783_v60, %v11689_v51  ;;  %v13826_v42 = vmov 4  }
 0x8e4   : > { %5871 = vrot.lane.b32.xlu0 %v5804_v54, %s8836_s17  ;;  %5869 = vrot.lane.b32.xlu1 %v5803_v26, %s8836_s17 }
 0x8e8   : > { %5875 = vrot.lane.b32.xlu0 %v5806_v13, %s8836_s17  ;;  %5873 = vrot.lane.b32.xlu1 %v5805_v31, %s8836_s17 }
 0x8ec   : > { %5879 = vrot.lane.b32.xlu0 %v5808_v36, %s8836_s17  ;;  %5877 = vrot.lane.b32.xlu1 %v5807_v41, %s8836_s17 }
 0x8f0   : > { %6059 = vperm.xlu0 %8681, %v11503_v44   ;;  %6055 = vperm.xlu1 %8680, %v11498_v3  }
 0x8f4   : > { %6071 = vperm.xlu0 %8681, %v11509_v6   ;;  %6063 = vperm.xlu1 %8680, %v11512_v22  }
 0x8f8   : > { %6079 = vperm.xlu0 %8681, %v11520_v57   ;;  %6067 = vperm.xlu1 %8680, %v11541_v53  }
 0x8fc   : > { %6087 = vperm.xlu0 %8681, %v11526_v19   ;;  %6075 = vperm.xlu1 %8680, %v11546_v47  }
 0x900   : > { %6095 = vperm.xlu0 %8681, %v11531_v27   ;;  %6083 = vperm.xlu1 %8680, %v11550_v4  }
 0x904   : > { %8682 = vset.pattern.permute.xlu0 %v13826_v42  ;;  %6091 = vperm.xlu1 %8680, %v11555_v29  }
 0x905   : > { %6408 = vperm.xlu0 %8682, %v11498_v3   ;;  %v13827_v3 = vmov 5  }
 0x908   : > { %6099 = vperm.xlu1 %8680, %v11559_v56  }
 0x909   : > { %6420 = vperm.xlu0 %8682, %v11541_v53  }
 0x90c   : > { %8683 = vset.pattern.permute.xlu1 %v13826_v42 }
 0x90d   : > { %6428 = vperm.xlu0 %8682, %v11546_v47   ;;  %6412 = vperm.xlu1 %8683, %v11503_v44  }
 0x911   : > { %6436 = vperm.xlu0 %8682, %v11550_v4   ;;  %6416 = vperm.xlu1 %8683, %v11512_v22  }
 0x915   : > { %6444 = vperm.xlu0 %8682, %v11555_v29   ;;  %6424 = vperm.xlu1 %8683, %v11509_v6  }
 0x919   : > { %6452 = vperm.xlu0 %8682, %v11559_v56   ;;  %6432 = vperm.xlu1 %8683, %v11520_v57  }
 0x91d   : > { %6440 = vperm.xlu1 %8683, %v11526_v19   ;;  %8685 = vset.pattern.permute.xlu0 %v13827_v3 }
 0x921   : > { %6448 = vperm.xlu1 %8683, %v11531_v27  }
 0x925   : > { %8684 = vset.pattern.permute.xlu1 %v13827_v3 }
 0x932   : > { %v11833_v8 = vpop.permute.xlu0 %5835  ;;  %v11835_v26 = vpop.permute.xlu1 %5833 }
 0x933   : > { %13828 = vst [vmem:[#allocation114_spill] sm:$0xff] %v11833_v8  ;;  %13829 = vst [vmem:[#allocation16_spill] sm:$0xff] %v11835_v26 }
 0x936   : > { %v11837_v22 = vpop.permute.xlu0 %5839  ;;  %v11839_v29 = vpop.permute.xlu1 %5837 }
 0x937   : > { %13830 = vst [vmem:[#allocation15_spill] sm:$0xff] %v11837_v22  ;;  %13831 = vst [vmem:[#allocation117_spill] sm:$0xff] %v11839_v29 }
 0x93a   : > { %v11841_v6 = vpop.permute.xlu0 %5843  ;;  %v11843_v56 = vpop.permute.xlu1 %5841 }
 0x93b   : > { %13832 = vst [vmem:[#allocation124_spill] sm:$0xff] %v11841_v6  ;;  %13833 = vst [vmem:[#allocation125_spill] sm:$0xff] %v11843_v56 }
 0x93e   : > { %v11845_v57 = vpop.permute.xlu0 %5847  ;;  %v11847_v19 = vpop.permute.xlu1 %5845 }
 0x93f   : > { %13834 = vst [vmem:[#allocation126_spill] sm:$0xff] %v11845_v57  ;;  %13835 = vst [vmem:[#allocation39_spill] sm:$0xff] %v11847_v19 }
 0x942   : > { %v11849_v54 = vpop.permute.xlu0 %5851  ;;  %v11851_v27 = vpop.permute.xlu1 %5849 }
 0x943   : > { %13836 = vst [vmem:[#allocation40_spill] sm:$0xff] %v11849_v54  ;;  %13837 = vst [vmem:[#allocation163_spill] sm:$0xff] %v11851_v27  ;;  %v11933_v27 = vld [vmem:[#allocation2 + $0x70] sm:$0x3] }
 0x946   : > { %v11853_v33 = vpop.permute.xlu0 %5855  ;;  %v11855_v31 = vpop.permute.xlu1 %5853 }
 0x947   : > { %13838 = vst [vmem:[#allocation118_spill] sm:$0xff] %v11853_v33  ;;  %13839 = vst [vmem:[#allocation20_spill] sm:$0xff] %v11855_v31 }
 0x94a   : > { %v11857_v13 = vpop.permute.xlu0 %5859  ;;  %v11859_v60 = vpop.permute.xlu1 %5857 }
 0x94b   : > { %13840 = vst [vmem:[#allocation19_spill] sm:$0xff] %v11857_v13  ;;  %13841 = vst [vmem:[#allocation127_spill] sm:$0xff] %v11859_v60  ;;  %v11921_v60 = vld [vmem:[#allocation2 + $0x40] sm:$0x3] }
 0x94e   : > { %v11861_v41 = vpop.permute.xlu0 %5863  ;;  %v11863_v36 = vpop.permute.xlu1 %5861 }
 0x94f   : > { %13842 = vst [vmem:[#allocation128_spill] sm:$0xff] %v11861_v41  ;;  %13843 = vst [vmem:[#allocation164_spill] sm:$0xff] %v11863_v36 }
 0x952   : > { %v11865_v42 = vpop.permute.xlu0 %5867  ;;  %v11867_v3 = vpop.permute.xlu1 %5865 }
 0x953   : > { %13844 = vst [vmem:[#allocation43_spill] sm:$0xff] %v11865_v42  ;;  %13845 = vst [vmem:[#allocation44_spill] sm:$0xff] %v11867_v3 }
 0x956   : > { %v11869_v57 = vpop.permute.xlu0 %5871  ;;  %v11871_v19 = vpop.permute.xlu1 %5869 }
 0x957   : > { %13846 = vst [vmem:[#allocation75_spill] sm:$0xff] %v11869_v57  ;;  %13847 = vst [vmem:[#allocation76_spill] sm:$0xff] %v11871_v19 }
 0x95a   : > { %v11873_v22 = vpop.permute.xlu0 %5875  ;;  %v11875_v33 = vpop.permute.xlu1 %5873 }
 0x95b   : > { %13848 = vst [vmem:[#allocation129_spill] sm:$0xff] %v11873_v22  ;;  %13849 = vst [vmem:[#allocation24_spill] sm:$0xff] %v11875_v33 }
 0x95e   : > { %v11877_v31 = vpop.permute.xlu0 %5879  ;;  %v11879_v29 = vpop.permute.xlu1 %5877 }
 0x95f   : > { %13850 = vst [vmem:[#allocation23_spill] sm:$0xff] %v11877_v31  ;;  %13851 = vst [vmem:[#allocation100_spill] sm:$0xff] %v11879_v29 }
 0x96b   : > { %v11881_v26 = vpop.permute.xlu0 %6059  ;;  %v11883_v41 = vpop.permute.xlu1 %6055 }
 0x96c   : > { %13852 = vst [vmem:[#allocation99_spill] sm:$0xff] %v11881_v26  ;;  %13853 = vst [vmem:[#allocation130_spill] sm:$0xff] %v11883_v41  ;;  %v11903_v26 = vld [vmem:[#allocation2 + $0x10] sm:$0x3] }
 0x96f   : > { %v11885_v36 = vpop.permute.xlu0 %6071  ;;  %v11887_v8 = vpop.permute.xlu1 %6063 }
 0x970   : > { %13854 = vst [vmem:[#allocation47_spill] sm:$0xff] %v11885_v36  ;;  %13855 = vst [vmem:[#allocation48_spill] sm:$0xff] %v11887_v8 }
 0x973   : > { %v11889_v1 = vpop.permute.xlu0 %6079  ;;  %v11891_v57 = vpop.permute.xlu1 %6067 }
 0x974   : > { %13856 = vst [vmem:[#allocation165_spill] sm:$0xff] %v11889_v1  ;;  %13857 = vst [vmem:[#allocation79_spill] sm:$0xff] %v11891_v57 }
 0x977   : > { %v11893_v19 = vpop.permute.xlu0 %6087  ;;  %v11895_v22 = vpop.permute.xlu1 %6075 }
 0x978   : > { %13858 = vst [vmem:[#allocation80_spill] sm:$0xff] %v11893_v19  ;;  %13859 = vst [vmem:[#allocation131_spill] sm:$0xff] %v11895_v22 }
 0x97b   : > { %v11897_v33 = vpop.permute.xlu0 %6095  ;;  %v11899_v31 = vpop.permute.xlu1 %6083 }
 0x97c   : > { %13860 = vst [vmem:[#allocation132_spill] sm:$0xff] %v11897_v33  ;;  %13861 = vst [vmem:[#allocation27_spill] sm:$0xff] %v11899_v31  ;;  %v11914_v33 = vld [vmem:[#allocation2 + $0x28] sm:$0x3] }
 0x97f   : > { %v11901_v29 = vpop.permute.xlu1 %6091 }
 0x980   : > { %13862 = vst [vmem:[#allocation28_spill] sm:$0xff] %v11901_v29  ;;  %v6409_v41 = vpop.permute.xlu0 %6408 }
 0x981   : > { %v6455_v9 = vmul.f32 %v6409_v41, %v11599_v32  ;;  %v6456_v38 = vmul.f32 %v6409_v41, %v11601_v16  ;;  %v6457_v20 = vmul.f32 %v6409_v41, %v11903_v26  ;;  %v11919_v41 = vld [vmem:[#allocation2 + $0x58] sm:$0x3] }
 0x983   : > { %v6527_v57 = vrot.slane %v6455_v9, 1  ;;  %v6528_v3 = vrot.slane %v6456_v38, 1  ;;  %v6530_v42 = vrot.slane %v6457_v20, 1  ;;  %v11908_v43 = vpop.permute.xlu1 %6099 }
 0x984   : > { %13863 = vst [vmem:[#allocation6_spill] sm:$0xff] %v11908_v43  ;;  %v6421_v2 = vpop.permute.xlu0 %6420 }
 0x985   : > { %v6531_v22 = vsel %vm2653_vm5, %v6528_v3, %v6530_v42  ;;  %v6529_v29 = vsel %vm2653_vm5, %v6527_v57, %v6528_v3  ;;  %v6465_v57 = vmul.f32 %v6421_v2, %v11625_v10  ;;  %v6466_v3 = vmul.f32 %v6421_v2, %v11919_v41 }
 0x986   : > { %6589 = vrot.lane.b32.xlu0 %v6531_v22, %s8834_s16  ;;  %6587 = vrot.lane.b32.xlu1 %v6529_v29, %s8834_s16  ;;  %v6464_v29 = vmul.f32 %v6421_v2, %v11623_v58 }
 0x987   : > { %v6543_v54 = vrot.slane %v6465_v57, 1  ;;  %v6545_v1 = vrot.slane %v6466_v3, 1 }
 0x988   : > { %v6413_v31 = vpop.permute.xlu1 %6412  ;;  %v6542_v2 = vrot.slane %v6464_v29, 1 }
 0x989   : > { %v6458_v55 = vmul.f32 %v6413_v31, %v11607_v25  ;;  %v6459_v9 = vmul.f32 %v6413_v31, %v11609_v49  ;;  %v6460_v20 = vmul.f32 %v6413_v31, %v11914_v33 }
 0x98b   : > { %v6532_v38 = vrot.slane %v6458_v55, 1  ;;  %v6533_v42 = vrot.slane %v6459_v9, 1  ;;  %v6535_v43 = vrot.slane %v6460_v20, 1 }
 0x98c   : > { %v6417_v22 = vpop.permute.xlu1 %6416 }
 0x98d   : > { %v6461_v13 = vmul.f32 %v6417_v22, %v11615_v23  ;;  %v6462_v19 = vmul.f32 %v6417_v22, %v11617_v61  ;;  %v6463_v31 = vmul.f32 %v6417_v22, %v11921_v60  ;;  %v6536_v55 = vsel %vm2653_vm5, %v6533_v42, %v6535_v43  ;;  %v6429_v22 = vpop.permute.xlu0 %6428 }
 0x98e   : > { %v6534_v9 = vsel %vm2653_vm5, %v6532_v38, %v6533_v42  ;;  %6593 = vrot.lane.b32.xlu0 %v6536_v55, %s8834_s16  ;;  %v6470_v29 = vmul.f32 %v6429_v22, %v11639_v11  ;;  %v6471_v57 = vmul.f32 %v6429_v22, %v11641_v37 }
 0x98f   : > { %v6537_v20 = vrot.slane %v6461_v13, 1  ;;  %6591 = vrot.lane.b32.xlu1 %v6534_v9, %s8834_s16  ;;  %v6538_v39 = vrot.slane %v6462_v19, 1  ;;  %v6540_v35 = vrot.slane %v6463_v31, 1  ;;  %v11942_v19 = vld [vmem:[#allocation2 + $0x88] sm:$0x3]  ;;  %v6546_v31 = vsel %vm2653_vm5, %v6543_v54, %v6545_v1 }
 0x990   : > { %v6425_v63 = vpop.permute.xlu1 %6424  ;;  %v6472_v3 = vmul.f32 %v6429_v22, %v11942_v19 }
 0x991   : > { %v6467_v46 = vmul.f32 %v6425_v63, %v11631_v7  ;;  %v6468_v43 = vmul.f32 %v6425_v63, %v11633_v34  ;;  %v6469_v38 = vmul.f32 %v6425_v63, %v11933_v27  ;;  %v6541_v13 = vsel %vm2653_vm5, %v6538_v39, %v6540_v35  ;;  %v6437_v22 = vpop.permute.xlu0 %6436 }
 0x992   : > { %v6539_v42 = vsel %vm2653_vm5, %v6537_v20, %v6538_v39  ;;  %6597 = vrot.lane.b32.xlu0 %v6541_v13, %s8834_s16  ;;  %v6544_v39 = vsel %vm2653_vm5, %v6542_v2, %v6543_v54  ;;  %v11951_v20 = vld [vmem:[#allocation2 + $0xa0] sm:$0x3]  ;;  %v6552_v13 = vrot.slane %v6470_v29, 1  ;;  %v6555_v0 = vrot.slane %v6472_v3, 1  ;;  %v11960_v2 = vld [vmem:[#allocation2 + $0xb8] sm:$0x3] }
 0x993   : > { %6595 = vrot.lane.b32.xlu1 %v6539_v42, %s8834_s16  ;;  %v6547_v55 = vrot.slane %v6467_v46, 1  ;;  %v6548_v63 = vrot.slane %v6468_v43, 1  ;;  %v6550_v9 = vrot.slane %v6469_v38, 1  ;;  %v6553_v42 = vrot.slane %v6471_v57, 1 }
 0x994   : > { %v6433_v35 = vpop.permute.xlu1 %6432  ;;  %v6476_v38 = vmul.f32 %v6437_v22, %v11655_v45  ;;  %v6477_v29 = vmul.f32 %v6437_v22, %v11657_v12  ;;  %v6478_v57 = vmul.f32 %v6437_v22, %v11960_v2 }
 0x995   : > { %v6473_v21 = vmul.f32 %v6433_v35, %v11647_v15  ;;  %v6474_v1 = vmul.f32 %v6433_v35, %v11649_v40  ;;  %v6475_v46 = vmul.f32 %v6433_v35, %v11951_v20  ;;  %v6551_v43 = vsel %vm2653_vm5, %v6548_v63, %v6550_v9  ;;  %v6445_v22 = vpop.permute.xlu0 %6444 }
 0x996   : > { %6601 = vrot.lane.b32.xlu0 %v6546_v31, %s8834_s16  ;;  %v6549_v54 = vsel %vm2653_vm5, %v6547_v55, %v6548_v63  ;;  %v6556_v3 = vsel %vm2653_vm5, %v6553_v42, %v6555_v0  ;;  %v6554_v55 = vsel %vm2653_vm5, %v6552_v13, %v6553_v42  ;;  %v11969_v63 = vld [vmem:[#allocation2 + $0xd0] sm:$0x3]  ;;  %v6565_v56 = vrot.slane %v6478_v57, 1  ;;  %v11978_v42 = vld [vmem:[#allocation2 + $0xe8] sm:$0x3] }
 0x997   : > { %6599 = vrot.lane.b32.xlu1 %v6544_v39, %s8834_s16  ;;  %v6557_v31 = vrot.slane %v6473_v21, 1  ;;  %v6558_v35 = vrot.slane %v6474_v1, 1  ;;  %v6560_v39 = vrot.slane %v6475_v46, 1  ;;  %v6482_v46 = vmul.f32 %v6445_v22, %v11671_v18 }
 0x998   : > { %v6441_v9 = vpop.permute.xlu1 %6440 }
 0x999   : > { %v6479_v6 = vmul.f32 %v6441_v9, %v11663_v50  ;;  %v6480_v0 = vmul.f32 %v6441_v9, %v11665_v52  ;;  %v6481_v21 = vmul.f32 %v6441_v9, %v11969_v63  ;;  %v6561_v1 = vsel %vm2653_vm5, %v6558_v35, %v6560_v39 }
 0x99a   : > { %6605 = vrot.lane.b32.xlu0 %v6551_v43, %s8834_s16  ;;  %v6562_v43 = vrot.slane %v6476_v38, 1  ;;  %v6559_v13 = vsel %vm2653_vm5, %v6557_v31, %v6558_v35  ;;  %v6483_v38 = vmul.f32 %v6445_v22, %v11673_v48  ;;  %v6683_v35 = vld [vmem:[%s13242_s5] sm:$0xff] }
 0x99b   : > { %6603 = vrot.lane.b32.xlu1 %v6549_v54, %s8834_s16  ;;  %v6563_v54 = vrot.slane %v6477_v29, 1  ;;  %v6484_v29 = vmul.f32 %v6445_v22, %v11978_v42  ;;  %v6568_v9 = vrot.slane %v6480_v0, 1 }
 0x99c   : > { %v6449_v39 = vpop.permute.xlu1 %6448  ;;  %v6573_v22 = vrot.slane %v6483_v38, 1  ;;  %v6687_v38 = vcombine.high %v6683_v35, %v6683_v35 }
 0x99d   : > { %v6566_v57 = vsel %vm2653_vm5, %v6563_v54, %v6565_v56  ;;  %v6564_v31 = vsel %vm2653_vm5, %v6562_v43, %v6563_v54  ;;  %v6575_v36 = vrot.slane %v6484_v29, 1  ;;  %v6453_v56 = vpop.permute.xlu0 %6452  ;;  %v6486_v0 = vmul.f32 %v6449_v39, %v11681_v17 }
 0x99e   : > { %6609 = vrot.lane.b32.xlu0 %v6556_v3, %s8834_s16  ;;  %v6567_v3 = vrot.slane %v6479_v6, 1  ;;  %v6485_v6 = vmul.f32 %v6449_v39, %v11679_v62  ;;  %v6488_v29 = vmul.f32 %v6453_v56, %v11687_v24 }
 0x99f   : > { %6607 = vrot.lane.b32.xlu1 %v6554_v55, %s8834_s16  ;;  %v6570_v55 = vrot.slane %v6481_v21, 1  ;;  %v6578_v30 = vrot.slane %v6486_v0, 1 }
 0x9a0   : > { %v6569_v21 = vsel %vm2653_vm5, %v6567_v3, %v6568_v9 }
 0x9a1   : > { %v6571_v54 = vsel %vm2653_vm5, %v6568_v9, %v6570_v55  ;;  %v6577_v55 = vrot.slane %v6485_v6, 1 }
 0x9a2   : > { %6613 = vrot.lane.b32.xlu0 %v6561_v1, %s8834_s16  ;;  %v11990_v1 = vld [vmem:[#allocation2 + $0x100] sm:$0x3] }
 0x9a3   : > { %6611 = vrot.lane.b32.xlu1 %v6559_v13, %s8834_s16  ;;  %v6572_v13 = vrot.slane %v6482_v46, 1  ;;  %v6487_v43 = vmul.f32 %v6449_v39, %v11990_v1  ;;  %v12000_v46 = vld [vmem:[#allocation2 + $0x118] sm:$0x3]  ;;  %v6576_v39 = vsel %vm2653_vm5, %v6573_v22, %v6575_v36 }
 0x9a4   : > { %v6490_v14 = vmul.f32 %v6453_v56, %v12000_v46 }
 0x9a5   : > { %v6580_v3 = vrot.slane %v6487_v43, 1  ;;  %v6574_v9 = vsel %vm2653_vm5, %v6572_v13, %v6573_v22 }
 0x9a6   : > { %6617 = vrot.lane.b32.xlu0 %v6566_v57, %s8834_s16  ;;  %v6694_v57 = vrot.slane %v6683_v35, %v13776_v5  ;;  %v6701_v35 = vrot.slane %v6687_v38, %v13776_v5  ;;  %v6585_v8 = vrot.slane %v6490_v14, 1  ;;  %v8614_v38 = vld.sshfl [vmem:[%s13242_s5 + $0x8] sm:$0x33 pattern:$0x75316420] }
 0x9a7   : > { %6615 = vrot.lane.b32.xlu1 %v6564_v31, %s8834_s16  ;;  %v6489_v31 = vmul.f32 %v6453_v56, %v11689_v51  ;;  %v6581_v4 = vsel %vm2653_vm5, %v6578_v30, %v6580_v3  ;;  %v6579_v56 = vsel %vm2653_vm5, %v6577_v55, %v6578_v30 }
 0x9a8   : > { %v6710_v13 = vrot.slane %v6694_v57, %v13776_v5  ;;  %v6717_v0 = vrot.slane %v6701_v35, %v13776_v5 }
 0x9a9   : > { %v6583_v59 = vrot.slane %v6489_v31, 1  ;;  %v6750_v31 = vrot.slane %v8614_v38, %v13776_v5 }
 0x9aa   : > { %6621 = vrot.lane.b32.xlu0 %v6571_v54, %s8834_s16  ;;  %v6702_v54 = vcombine.high %v6694_v57, %v6694_v57  ;;  %v6732_v43 = vcombine.high %v6710_v13, %v6710_v13  ;;  %v12028_v14 = vrot.slane %v6717_v0, %v13788_v28 }
 0x9ab   : > { %6619 = vrot.lane.b32.xlu1 %v6569_v21, %s8834_s16  ;;  %v6582_v21 = vrot.slane %v6488_v29, 1  ;;  %v6586_v22 = vsel %vm2653_vm5, %v6583_v59, %v6585_v8  ;;  %v6703_v29 = vcombine.high %v6701_v35, %v6701_v35 }
 0x9ac   : > { %v6724_v36 = vrot.slane %v6702_v54, %v13776_v5  ;;  %v12031_v8 = vrot.slane %v6732_v43, %v13788_v28  ;;  %v6758_v54 = vcombine.high %v6750_v31, %v6750_v31 }
 0x9ad   : > { %v6584_v6 = vsel %vm2653_vm5, %v6582_v21, %v6583_v59  ;;  %v6733_v59 = vcombine.high %v6717_v0, %v6717_v0  ;;  %v6731_v3 = vrot.slane %v6703_v29, %v13776_v5 }
 0x9ae   : > { %6625 = vrot.lane.b32.xlu0 %v6576_v39, %s8834_s16  ;;  %v12022_v30 = vrot.slane %v6724_v36, %v13788_v28  ;;  %v6734_v57 = vcombine.high %v6724_v36, %v6724_v36  ;;  %v12059_v36 = vrot.slane %v6758_v54, %v13788_v28 }
 0x9af   : > { %6623 = vrot.lane.b32.xlu1 %v6574_v9, %s8834_s16  ;;  %v12042_v39 = vrot.slane %v6733_v59, %v13788_v28  ;;  %v12049_v9 = vrot.slane %v6750_v31, %v13788_v28  ;;  %v12054_v21 = vrot.slane %v6731_v3, %v13788_v28  ;;  %v6735_v35 = vcombine.high %v6731_v3, %v6731_v3 }
 0x9b0   : > { %v12045_v55 = vrot.slane %v6734_v57, %v13788_v28  ;;  %v13864_v59 = vmov 6  }
 0x9b2   : > { %6629 = vrot.lane.b32.xlu0 %v6581_v4, %s8834_s16  ;;  %v12025_v4 = vrot.slane %v6710_v13, %v13788_v28  ;;  %v12062_v13 = vrot.slane %v6735_v35, %v13788_v28 }
 0x9b3   : > { %6627 = vrot.lane.b32.xlu1 %v6579_v56, %s8834_s16  ;;  %v6743_v56 = vcombine.high %v8614_v38, %v8614_v38 }
 0x9b6   : > { %6633 = vrot.lane.b32.xlu0 %v6586_v22, %s8834_s16  ;;  %v6757_v22 = vrot.slane %v6743_v56, %v13776_v5 }
 0x9b7   : > { %6631 = vrot.lane.b32.xlu1 %v6584_v6, %s8834_s16 }
 0x9b8   : > { %v12068_v6 = vrot.slane %v6757_v22, %v13788_v28  ;;  %v6759_v0 = vcombine.high %v6757_v22, %v6757_v22 }
 0x9ba   : > { %6813 = vperm.xlu0 %8685, %v12022_v30   ;;  %v12072_v43 = vrot.slane %v6759_v0, %v13788_v28 }
 0x9bb   : > { %6809 = vperm.xlu1 %8684, %v12025_v4  }
 0x9be   : > { %6825 = vperm.xlu0 %8685, %v12028_v14  }
 0x9bf   : > { %6817 = vperm.xlu1 %8684, %v12031_v8  }
 0x9c2   : > { %6833 = vperm.xlu0 %8685, %v12042_v39  }
 0x9c3   : > { %6821 = vperm.xlu1 %8684, %v12045_v55  }
 0x9c6   : > { %6841 = vperm.xlu0 %8685, %v12049_v9  }
 0x9c7   : > { %6829 = vperm.xlu1 %8684, %v12054_v21  }
 0x9ca   : > { %6849 = vperm.xlu0 %8685, %v12059_v36  }
 0x9cb   : > { %6837 = vperm.xlu1 %8684, %v12062_v13  }
 0x9ce   : > { %8686 = vset.pattern.permute.xlu0 %v13864_v59 }
 0x9cf   : > { %6845 = vperm.xlu1 %8684, %v12068_v6  }
 0x9d3   : > { %6853 = vperm.xlu1 %8684, %v12072_v43  }
 0x9d7   : > { %8687 = vset.pattern.permute.xlu1 %v13864_v59 }
 0x9f8   : > { %v12077_v57 = vpop.permute.xlu0 %6589  ;;  %v12079_v38 = vpop.permute.xlu1 %6587 }
 0x9f9   : > { %13865 = vst [vmem:[#allocation5_spill] sm:$0xff] %v12077_v57  ;;  %13866 = vst [vmem:[#allocation104_spill] sm:$0xff] %v12079_v38 }
 0xa00   : > { %v12081_v29 = vpop.permute.xlu0 %6593 }
 0xa01   : > { %13867 = vst [vmem:[#allocation103_spill] sm:$0xff] %v12081_v29  ;;  %v12083_v31 = vpop.permute.xlu1 %6591 }
 0xa02   : > { %13868 = vst [vmem:[#allocation7_spill] sm:$0xff] %v12083_v31 }
 0xa04   : > { %v12085_v3 = vpop.permute.xlu0 %6597 }
 0xa05   : > { %13869 = vst [vmem:[#allocation9_spill] sm:$0xff] %v12085_v3  ;;  %v12087_v54 = vpop.permute.xlu1 %6595 }
 0xa06   : > { %13870 = vst [vmem:[#allocation8_spill] sm:$0xff] %v12087_v54 }
 0xa08   : > { %v12089_v35 = vpop.permute.xlu0 %6601 }
 0xa09   : > { %13871 = vst [vmem:[#allocation12_spill] sm:$0xff] %v12089_v35  ;;  %v12091_v56 = vpop.permute.xlu1 %6599 }
 0xa0a   : > { %13872 = vst [vmem:[#allocation51_spill] sm:$0xff] %v12091_v56 }
 0xa0c   : > { %v12093_v22 = vpop.permute.xlu0 %6605 }
 0xa0d   : > { %13873 = vst [vmem:[#allocation52_spill] sm:$0xff] %v12093_v22  ;;  %v12095_v0 = vpop.permute.xlu1 %6603 }
 0xa0e   : > { %13874 = vst [vmem:[#allocation83_spill] sm:$0xff] %v12095_v0 }
 0xa10   : > { %v12097_v59 = vpop.permute.xlu0 %6609 }
 0xa11   : > { %13875 = vst [vmem:[#allocation84_spill] sm:$0xff] %v12097_v59  ;;  %v12099_v57 = vpop.permute.xlu1 %6607 }
 0xa12   : > { %13876 = vst [vmem:[#allocation31_spill] sm:$0xff] %v12099_v57 }
 0xa14   : > { %v12101_v38 = vpop.permute.xlu0 %6613 }
 0xa15   : > { %13877 = vst [vmem:[#allocation32_spill] sm:$0xff] %v12101_v38  ;;  %v12103_v29 = vpop.permute.xlu1 %6611 }
 0xa16   : > { %13878 = vst [vmem:[#allocation13_spill] sm:$0xff] %v12103_v29 }
 0xa18   : > { %v12105_v31 = vpop.permute.xlu0 %6617 }
 0xa19   : > { %13879 = vst [vmem:[#allocation14_spill] sm:$0xff] %v12105_v31  ;;  %v12107_v3 = vpop.permute.xlu1 %6615 }
 0xa1a   : > { %13880 = vst [vmem:[#allocation108_spill] sm:$0xff] %v12107_v3 }
 0xa1c   : > { %v12109_v54 = vpop.permute.xlu0 %6621 }
 0xa1d   : > { %13881 = vst [vmem:[#allocation107_spill] sm:$0xff] %v12109_v54  ;;  %v12111_v35 = vpop.permute.xlu1 %6619 }
 0xa1e   : > { %13882 = vst [vmem:[#allocation139_spill] sm:$0xff] %v12111_v35 }
 0xa20   : > { %v12113_v56 = vpop.permute.xlu0 %6625 }
 0xa21   : > { %13883 = vst [vmem:[#allocation138_spill] sm:$0xff] %v12113_v56  ;;  %v12115_v22 = vpop.permute.xlu1 %6623 }
 0xa22   : > { %13884 = vst [vmem:[#allocation140_spill] sm:$0xff] %v12115_v22 }
 0xa24   : > { %v12117_v0 = vpop.permute.xlu0 %6629 }
 0xa25   : > { %13885 = vst [vmem:[#allocation141_spill] sm:$0xff] %v12117_v0  ;;  %v12119_v59 = vpop.permute.xlu1 %6627 }
 0xa26   : > { %13886 = vst [vmem:[#allocation55_spill] sm:$0xff] %v12119_v59 }
 0xa28   : > { %v12121_v57 = vpop.permute.xlu0 %6633 }
 0xa29   : > { %13887 = vst [vmem:[#allocation56_spill] sm:$0xff] %v12121_v57  ;;  %v12123_v38 = vpop.permute.xlu1 %6631 }
 0xa2a   : > { %13888 = vst [vmem:[#allocation17_spill] sm:$0xff] %v12123_v38 }
 0xa35   : > { %v6814_v29 = vpop.permute.xlu0 %6813 }
 0xa36   : > { %v6810_v31 = vpop.permute.xlu1 %6809  ;;  %v6859_v3 = vmul.f32 %v6814_v29, %v11607_v25  ;;  %v6860_v54 = vmul.f32 %v6814_v29, %v11609_v49  ;;  %v6861_v35 = vmul.f32 %v6814_v29, %v11914_v33 }
 0xa37   : > { %v6856_v56 = vmul.f32 %v6810_v31, %v11599_v32  ;;  %v6857_v22 = vmul.f32 %v6810_v31, %v11601_v16  ;;  %v6858_v0 = vmul.f32 %v6810_v31, %v11903_v26 }
 0xa38   : > { %v6933_v44 = vrot.slane %v6859_v3, 1  ;;  %v6934_v38 = vrot.slane %v6860_v54, 1  ;;  %v6936_v28 = vrot.slane %v6861_v35, 1 }
 0xa39   : > { %v6928_v47 = vrot.slane %v6856_v56, 1  ;;  %v6929_v59 = vrot.slane %v6857_v22, 1  ;;  %v6931_v53 = vrot.slane %v6858_v0, 1  ;;  %v6826_v35 = vpop.permute.xlu0 %6825 }
 0xa3a   : > { %v6818_v57 = vpop.permute.xlu1 %6817  ;;  %v6937_v54 = vsel %vm2653_vm5, %v6934_v38, %v6936_v28  ;;  %v6870_v22 = vmul.f32 %v6826_v35, %v11933_v27 }
 0xa3b   : > { %v6862_v5 = vmul.f32 %v6818_v57, %v11615_v23  ;;  %v6863_v25 = vmul.f32 %v6818_v57, %v11617_v61  ;;  %v6864_v49 = vmul.f32 %v6818_v57, %v11921_v60  ;;  %v6932_v29 = vsel %vm2653_vm5, %v6929_v59, %v6931_v53 }
 0xa3c   : > { %v6930_v32 = vsel %vm2653_vm5, %v6928_v47, %v6929_v59  ;;  %6990 = vrot.lane.b32.xlu1 %v6932_v29, %s8836_s17  ;;  %v6935_v53 = vsel %vm2653_vm5, %v6933_v44, %v6934_v38  ;;  %v6868_v47 = vmul.f32 %v6826_v35, %v11631_v7 }
 0xa3d   : > { %6988 = vrot.lane.b32.xlu0 %v6930_v32, %s8836_s17  ;;  %v6938_v31 = vrot.slane %v6862_v5, 1  ;;  %v6939_v56 = vrot.slane %v6863_v25, 1  ;;  %v6941_v3 = vrot.slane %v6864_v49, 1  ;;  %v6869_v5 = vmul.f32 %v6826_v35, %v11633_v34  ;;  %v6834_v34 = vpop.permute.xlu0 %6833 }
 0xa3e   : > { %v6822_v16 = vpop.permute.xlu1 %6821  ;;  %v6948_v44 = vrot.slane %v6868_v47, 1  ;;  %v6951_v49 = vrot.slane %v6870_v22, 1 }
 0xa3f   : > { %v6865_v23 = vmul.f32 %v6822_v16, %v11623_v58  ;;  %v6866_v61 = vmul.f32 %v6822_v16, %v11625_v10  ;;  %v6867_v57 = vmul.f32 %v6822_v16, %v11919_v41  ;;  %v6942_v28 = vsel %vm2653_vm5, %v6939_v56, %v6941_v3 }
 0xa40   : > { %6994 = vrot.lane.b32.xlu1 %v6937_v54, %s8836_s17  ;;  %v6940_v25 = vsel %vm2653_vm5, %v6938_v31, %v6939_v56  ;;  %v6949_v38 = vrot.slane %v6869_v5, 1  ;;  %v6874_v31 = vmul.f32 %v6834_v34, %v11647_v15  ;;  %v6875_v56 = vmul.f32 %v6834_v34, %v11649_v40 }
 0xa41   : > { %6992 = vrot.lane.b32.xlu0 %v6935_v53, %s8836_s17  ;;  %v6943_v0 = vrot.slane %v6865_v23, 1  ;;  %v6944_v58 = vrot.slane %v6866_v61, 1  ;;  %v6946_v59 = vrot.slane %v6867_v57, 1  ;;  %v6876_v54 = vmul.f32 %v6834_v34, %v11951_v20  ;;  %v6842_v40 = vpop.permute.xlu0 %6841 }
 0xa42   : > { %v6830_v10 = vpop.permute.xlu1 %6829  ;;  %v6950_v57 = vsel %vm2653_vm5, %v6948_v44, %v6949_v38  ;;  %v6958_v53 = vrot.slane %v6874_v31, 1  ;;  %v6959_v47 = vrot.slane %v6875_v56, 1 }
 0xa43   : > { %v6871_v7 = vmul.f32 %v6830_v10, %v11639_v11  ;;  %v6872_v29 = vmul.f32 %v6830_v10, %v11641_v37  ;;  %v6873_v32 = vmul.f32 %v6830_v10, %v11942_v19  ;;  %v6947_v16 = vsel %vm2653_vm5, %v6944_v58, %v6946_v59 }
 0xa44   : > { %6998 = vrot.lane.b32.xlu1 %v6942_v28, %s8836_s17  ;;  %v6945_v3 = vsel %vm2653_vm5, %v6943_v0, %v6944_v58  ;;  %v6952_v11 = vsel %vm2653_vm5, %v6949_v38, %v6951_v49  ;;  %v6961_v5 = vrot.slane %v6876_v54, 1  ;;  %v6880_v59 = vmul.f32 %v6842_v40, %v11663_v50 }
 0xa45   : > { %6996 = vrot.lane.b32.xlu0 %v6940_v25, %s8836_s17  ;;  %v6953_v35 = vrot.slane %v6871_v7, 1  ;;  %v6954_v37 = vrot.slane %v6872_v29, 1  ;;  %v6956_v23 = vrot.slane %v6873_v32, 1  ;;  %v6881_v10 = vmul.f32 %v6842_v40, %v11665_v52  ;;  %v6850_v52 = vpop.permute.xlu0 %6849 }
 0xa46   : > { %v6838_v61 = vpop.permute.xlu1 %6837  ;;  %v6882_v25 = vmul.f32 %v6842_v40, %v11969_v63  ;;  %v6960_v7 = vsel %vm2653_vm5, %v6958_v53, %v6959_v47  ;;  %v6968_v34 = vrot.slane %v6880_v59, 1  ;;  %v6886_v54 = vmul.f32 %v6850_v52, %v11679_v62 }
 0xa47   : > { %v6877_v15 = vmul.f32 %v6838_v61, %v11655_v45  ;;  %v6878_v22 = vmul.f32 %v6838_v61, %v11657_v12  ;;  %v6879_v28 = vmul.f32 %v6838_v61, %v11960_v2  ;;  %v6957_v0 = vsel %vm2653_vm5, %v6954_v37, %v6956_v23 }
 0xa48   : > { %7002 = vrot.lane.b32.xlu1 %v6947_v16, %s8836_s17  ;;  %v6955_v58 = vsel %vm2653_vm5, %v6953_v35, %v6954_v37  ;;  %v6962_v45 = vsel %vm2653_vm5, %v6959_v47, %v6961_v5  ;;  %v6969_v29 = vrot.slane %v6881_v10, 1  ;;  %v6971_v32 = vrot.slane %v6882_v25, 1 }
 0xa49   : > { %7000 = vrot.lane.b32.xlu0 %v6945_v3, %s8836_s17  ;;  %v6963_v44 = vrot.slane %v6877_v15, 1  ;;  %v6964_v12 = vrot.slane %v6878_v22, 1  ;;  %v6966_v38 = vrot.slane %v6879_v28, 1  ;;  %v6888_v35 = vmul.f32 %v6850_v52, %v11990_v1 }
 0xa4a   : > { %v6846_v49 = vpop.permute.xlu1 %6845  ;;  %v6978_v53 = vrot.slane %v6886_v54, 1  ;;  %v13889_v25 = vmov 7  }
 0xa4b   : > { %v6883_v50 = vmul.f32 %v6846_v49, %v11671_v18  ;;  %v6884_v16 = vmul.f32 %v6846_v49, %v11673_v48  ;;  %v6885_v3 = vmul.f32 %v6846_v49, %v11978_v42  ;;  %v6967_v31 = vsel %vm2653_vm5, %v6964_v12, %v6966_v38 }
 0xa4c   : > { %7006 = vrot.lane.b32.xlu1 %v6952_v11, %s8836_s17  ;;  %v6965_v56 = vsel %vm2653_vm5, %v6963_v44, %v6964_v12  ;;  %v6887_v11 = vmul.f32 %v6850_v52, %v11681_v17  ;;  %v6972_v18 = vsel %vm2653_vm5, %v6969_v29, %v6971_v32  ;;  %v6981_v5 = vrot.slane %v6888_v35, 1 }
 0xa4d   : > { %7004 = vrot.lane.b32.xlu0 %v6950_v57, %s8836_s17  ;;  %v6973_v37 = vrot.slane %v6883_v50, 1  ;;  %v6974_v48 = vrot.slane %v6884_v16, 1  ;;  %v6976_v23 = vrot.slane %v6885_v3, 1  ;;  %v6970_v57 = vsel %vm2653_vm5, %v6968_v34, %v6969_v29 }
 0xa4e   : > { %v6854_v61 = vpop.permute.xlu1 %6853  ;;  %v6979_v47 = vrot.slane %v6887_v11, 1 }
 0xa4f   : > { %v6889_v62 = vmul.f32 %v6854_v61, %v11687_v24  ;;  %v6890_v17 = vmul.f32 %v6854_v61, %v11689_v51  ;;  %v6891_v15 = vmul.f32 %v6854_v61, %v12000_v46  ;;  %v6977_v40 = vsel %vm2653_vm5, %v6974_v48, %v6976_v23 }
 0xa50   : > { %7010 = vrot.lane.b32.xlu1 %v6957_v0, %s8836_s17  ;;  %v6975_v22 = vsel %vm2653_vm5, %v6973_v37, %v6974_v48  ;;  %v6982_v28 = vsel %vm2653_vm5, %v6979_v47, %v6981_v5  ;;  %v6980_v10 = vsel %vm2653_vm5, %v6978_v53, %v6979_v47 }
 0xa51   : > { %7008 = vrot.lane.b32.xlu0 %v6955_v58, %s8836_s17  ;;  %v6983_v0 = vrot.slane %v6889_v62, 1  ;;  %v6984_v58 = vrot.slane %v6890_v17, 1  ;;  %v6986_v59 = vrot.slane %v6891_v15, 1  ;;  %v12309_v62 = vld [vmem:[#allocation2 + $0x18] sm:$0xff]  ;;  %v12312_v15 = vld [vmem:[#allocation2 + $0x20] sm:$0xff] }
 0xa53   : > { %v6987_v24 = vsel %vm2653_vm5, %v6984_v58, %v6986_v59  ;;  %v6985_v51 = vsel %vm2653_vm5, %v6983_v0, %v6984_v58  ;;  %v12319_v58 = vld [vmem:[#allocation2 + $0x8] sm:$0xff] }
 0xa54   : > { %7014 = vrot.lane.b32.xlu1 %v6962_v45, %s8836_s17 }
 0xa55   : > { %7012 = vrot.lane.b32.xlu0 %v6960_v7, %s8836_s17 }
 0xa58   : > { %7018 = vrot.lane.b32.xlu1 %v6967_v31, %s8836_s17 }
 0xa59   : > { %7016 = vrot.lane.b32.xlu0 %v6965_v56, %s8836_s17 }
 0xa5c   : > { %7022 = vrot.lane.b32.xlu1 %v6972_v18, %s8836_s17 }
 0xa5d   : > { %7020 = vrot.lane.b32.xlu0 %v6970_v57, %s8836_s17 }
 0xa60   : > { %7026 = vrot.lane.b32.xlu1 %v6977_v40, %s8836_s17 }
 0xa61   : > { %7024 = vrot.lane.b32.xlu0 %v6975_v22, %s8836_s17 }
 0xa64   : > { %7030 = vrot.lane.b32.xlu1 %v6982_v28, %s8836_s17  ;;  %v12316_v28 = vld [vmem:[#allocation2] sm:$0xff] }
 0xa65   : > { %7028 = vrot.lane.b32.xlu0 %v6980_v10, %s8836_s17 }
 0xa68   : > { %7034 = vrot.lane.b32.xlu1 %v6987_v24, %s8836_s17 }
 0xa69   : > { %7032 = vrot.lane.b32.xlu0 %v6985_v51, %s8836_s17 }
 0xa6c   : > { %7214 = vperm.xlu1 %8687, %v12022_v30  }
 0xa6d   : > { %7210 = vperm.xlu0 %8686, %v12025_v4  }
 0xa70   : > { %7218 = vperm.xlu1 %8687, %v12031_v8  }
 0xa71   : > { %7222 = vperm.xlu0 %8686, %v12045_v55  }
 0xa74   : > { %7226 = vperm.xlu1 %8687, %v12028_v14  }
 0xa75   : > { %7230 = vperm.xlu0 %8686, %v12054_v21  }
 0xa78   : > { %7234 = vperm.xlu1 %8687, %v12042_v39  }
 0xa79   : > { %7238 = vperm.xlu0 %8686, %v12062_v13  }
 0xa7c   : > { %7242 = vperm.xlu1 %8687, %v12049_v9  }
 0xa7d   : > { %7246 = vperm.xlu0 %8686, %v12068_v6  }
 0xa80   : > { %7250 = vperm.xlu1 %8687, %v12059_v36  }
 0xa81   : > { %7254 = vperm.xlu0 %8686, %v12072_v43  }
 0xa84   : > { %8688 = vset.pattern.permute.xlu1 %v13889_v25 }
 0xa85   : > { %8689 = vset.pattern.permute.xlu0 %v13889_v25  ;;  %7563 = vperm.xlu1 %8688, %v12025_v4   ;;  %v13890_v4 = vmov 8  }
 0xa86   : > { %7567 = vperm.xlu0 %8689, %v12022_v30  }
 0xa89   : > { %7571 = vperm.xlu1 %8688, %v12031_v8  }
 0xa8a   : > { %7579 = vperm.xlu0 %8689, %v12028_v14  }
 0xa8d   : > { %7575 = vperm.xlu1 %8688, %v12045_v55  }
 0xa8e   : > { %7587 = vperm.xlu0 %8689, %v12042_v39  }
 0xa91   : > { %7583 = vperm.xlu1 %8688, %v12054_v21  }
 0xa92   : > { %7595 = vperm.xlu0 %8689, %v12049_v9  }
 0xa95   : > { %7591 = vperm.xlu1 %8688, %v12062_v13  }
 0xa96   : > { %7603 = vperm.xlu0 %8689, %v12059_v36  }
 0xa99   : > { %7599 = vperm.xlu1 %8688, %v12068_v6  }
 0xa9a   : > { %8690 = vset.pattern.permute.xlu0 %v13890_v4 }
 0xa9d   : > { %7607 = vperm.xlu1 %8688, %v12072_v43  }
 0xaa1   : > { %8691 = vset.pattern.permute.xlu1 %v13890_v4 }
 0xaae   : > { %v12239_v14 = vpop.permute.xlu1 %6990 }
 0xaaf   : > { %v12237_v30 = vpop.permute.xlu0 %6988  ;;  %13892 = vst [vmem:[#allocation10_spill] sm:$0xff] %v12239_v14 }
 0xab0   : > { %13891 = vst [vmem:[#allocation18_spill] sm:$0xff] %v12237_v30 }
 0xab2   : > { %v12243_v39 = vpop.permute.xlu1 %6994 }
 0xab3   : > { %v12241_v8 = vpop.permute.xlu0 %6992  ;;  %13894 = vst [vmem:[#allocation88_spill] sm:$0xff] %v12243_v39 }
 0xab4   : > { %13893 = vst [vmem:[#allocation87_spill] sm:$0xff] %v12241_v8  ;;  %v12356_v8 = vld [vmem:[#allocation2 + $0x78] sm:$0xff] }
 0xab6   : > { %v12247_v9 = vpop.permute.xlu1 %6998 }
 0xab7   : > { %v12245_v55 = vpop.permute.xlu0 %6996 }
 0xaba   : > { %v12251_v36 = vpop.permute.xlu1 %7002 }
 0xabb   : > { %v12249_v21 = vpop.permute.xlu0 %7000  ;;  %13896 = vst [vmem:[#allocation22_spill] sm:$0xff] %v12251_v36 }
 0xabc   : > { %13895 = vst [vmem:[#allocation21_spill] sm:$0xff] %v12249_v21 }
 0xabe   : > { %v12255_v6 = vpop.permute.xlu1 %7006 }
 0xabf   : > { %v12253_v13 = vpop.permute.xlu0 %7004 }
 0xac2   : > { %v12259_v45 = vpop.permute.xlu1 %7010 }
 0xac3   : > { %v12257_v43 = vpop.permute.xlu0 %7008  ;;  %13898 = vst [vmem:[#allocation36_spill] sm:$0xff] %v12259_v45 }
 0xac4   : > { %13897 = vst [vmem:[#allocation35_spill] sm:$0xff] %v12257_v43 }
 0xac6   : > { %v12263_v12 = vpop.permute.xlu1 %7014 }
 0xac7   : > { %v12261_v44 = vpop.permute.xlu0 %7012 }
 0xaca   : > { %v12267_v49 = vpop.permute.xlu1 %7018 }
 0xacb   : > { %v12265_v38 = vpop.permute.xlu0 %7016  ;;  %13900 = vst [vmem:[#allocation142_spill] sm:$0xff] %v12267_v49 }
 0xacc   : > { %13899 = vst [vmem:[#allocation143_spill] sm:$0xff] %v12265_v38  ;;  %v12323_v38 = vld [vmem:[#allocation2 + $0x30] sm:$0xff] }
 0xace   : > { %v12271_v34 = vpop.permute.xlu1 %7022 }
 0xacf   : > { %v12269_v7 = vpop.permute.xlu0 %7020 }
 0xad2   : > { %v12275_v32 = vpop.permute.xlu1 %7026 }
 0xad3   : > { %v12273_v29 = vpop.permute.xlu0 %7024  ;;  %13902 = vst [vmem:[#allocation111_spill] sm:$0xff] %v12275_v32 }
 0xad4   : > { %13901 = vst [vmem:[#allocation112_spill] sm:$0xff] %v12273_v29 }
 0xad6   : > { %v12279_v52 = vpop.permute.xlu1 %7030 }
 0xad7   : > { %v12277_v50 = vpop.permute.xlu0 %7028 }
 0xada   : > { %v12283_v3 = vpop.permute.xlu1 %7034 }
 0xadb   : > { %v12281_v16 = vpop.permute.xlu0 %7032  ;;  %13904 = vst [vmem:[#allocation144_spill] sm:$0xff] %v12283_v3  ;;  %v12426_v3 = vld [vmem:[#allocation2 + $0x108] sm:$0xff] }
 0xadc   : > { %13903 = vst [vmem:[#allocation133_spill] sm:$0xff] %v12281_v16  ;;  %13918 = vst [vmem:[#allocation146_spill] sm:$0xff] %v12426_v3 }
 0xae7   : > { %v12287_v56 = vpop.permute.xlu1 %7214 }
 0xae8   : > { %v12285_v31 = vpop.permute.xlu0 %7210  ;;  %13906 = vst [vmem:[#allocation59_spill] sm:$0xff] %v12287_v56 }
 0xae9   : > { %13905 = vst [vmem:[#allocation145_spill] sm:$0xff] %v12285_v31 }
 0xaeb   : > { %v12291_v11 = vpop.permute.xlu1 %7218 }
 0xaec   : > { %v12289_v54 = vpop.permute.xlu0 %7222 }
 0xaed   : > { %13907 = vst [vmem:[#allocation60_spill] sm:$0xff] %v12289_v54  ;;  %v12400_v54 = vld [vmem:[#allocation2 + $0xd8] sm:$0xff] }
 0xaee   : > { %13915 = vst [vmem:[#allocation115_spill] sm:$0xff] %v12400_v54 }
 0xaef   : > { %v12295_v18 = vpop.permute.xlu1 %7226 }
 0xaf0   : > { %v12293_v35 = vpop.permute.xlu0 %7230 }
 0xaf1   : > { %13908 = vst [vmem:[#allocation91_spill] sm:$0xff] %v12293_v35 }
 0xaf3   : > { %v12299_v48 = vpop.permute.xlu1 %7234 }
 0xaf4   : > { %v12297_v37 = vpop.permute.xlu0 %7238 }
 0xaf5   : > { %13909 = vst [vmem:[#allocation92_spill] sm:$0xff] %v12297_v37  ;;  %v12378_v37 = vld [vmem:[#allocation2 + $0xa8] sm:$0xff] }
 0xaf6   : > { %13913 = vst [vmem:[#allocation29_spill] sm:$0xff] %v12378_v37 }
 0xaf7   : > { %v12303_v61 = vpop.permute.xlu1 %7242 }
 0xaf8   : > { %v12301_v23 = vpop.permute.xlu0 %7246 }
 0xaf9   : > { %13910 = vst [vmem:[#allocation160_spill] sm:$0xff] %v12301_v23 }
 0xafb   : > { %v12307_v53 = vpop.permute.xlu1 %7250 }
 0xafc   : > { %v12305_v57 = vpop.permute.xlu0 %7254 }
 0xafd   : > { %13911 = vst [vmem:[#allocation159_spill] sm:$0xff] %v12305_v57  ;;  %v13935_v57 = vld [vmem:[#allocation70_spill] sm:$0xff] }
 0xb00   : > { %v7564_v5 = vpop.permute.xlu1 %7563 }
 0xb01   : > { %v7568_v47 = vpop.permute.xlu0 %7567  ;;  %v7610_v0 = vmul.f32 %v12316_v28, %v7564_v5  ;;  %v7611_v59 = vmul.f32 %v12319_v58, %v7564_v5  ;;  %v7612_v10 = vmul.f32 %v7564_v5, %v11903_v26 }
 0xb02   : > { %v7613_v17 = vmul.f32 %v12309_v62, %v7568_v47  ;;  %v7614_v40 = vmul.f32 %v12312_v15, %v7568_v47  ;;  %v7615_v22 = vmul.f32 %v7568_v47, %v11914_v33  ;;  %v12326_v47 = vld [vmem:[#allocation2 + $0x38] sm:$0xff] }
 0xb03   : > { %v7682_v24 = vrot.slane %v7610_v0, 2  ;;  %v7683_v51 = vrot.slane %v7611_v59, 2  ;;  %v7685_v25 = vrot.slane %v7612_v10, 2  ;;  %v12335_v10 = vld [vmem:[#allocation2 + $0x48] sm:$0xff] }
 0xb04   : > { %v7572_v4 = vpop.permute.xlu1 %7571  ;;  %v7687_v32 = vrot.slane %v7613_v17, 2  ;;  %v7688_v29 = vrot.slane %v7614_v40, 2  ;;  %v7690_v23 = vrot.slane %v7615_v22, 2 }
 0xb05   : > { %v7616_v33 = vmul.f32 %v12323_v38, %v7572_v4  ;;  %v7617_v49 = vmul.f32 %v12326_v47, %v7572_v4  ;;  %v7618_v43 = vmul.f32 %v7572_v4, %v11921_v60  ;;  %v7686_v45 = vsel %vm3809_vm6, %v7683_v51, %v7685_v25  ;;  %v7580_v59 = vpop.permute.xlu0 %7579  ;;  %v12338_v60 = vld [vmem:[#allocation2 + $0x50] sm:$0xff] }
 0xb06   : > { %v7684_v26 = vsel %vm3809_vm6, %v7682_v24, %v7683_v51  ;;  %7744 = vrot.lane.b32.xlu1 %v7686_v45, %s8834_s16  ;;  %v7691_v0 = vsel %vm3809_vm6, %v7688_v29, %v7690_v23  ;;  %v7689_v45 = vsel %vm3809_vm6, %v7687_v32, %v7688_v29  ;;  %v12348_v23 = vld [vmem:[#allocation2 + $0x68] sm:$0xff]  ;;  %v7624_v4 = vmul.f32 %v7580_v59, %v11933_v27 }
 0xb07   : > { %7742 = vrot.lane.b32.xlu0 %v7684_v26, %s8834_s16  ;;  %v7692_v17 = vrot.slane %v7616_v33, 2  ;;  %v7693_v40 = vrot.slane %v7617_v49, 2  ;;  %v7695_v22 = vrot.slane %v7618_v43, 2  ;;  %v12345_v43 = vld [vmem:[#allocation2 + $0x60] sm:$0xff]  ;;  %v7623_v51 = vmul.f32 %v12348_v23, %v7580_v59 }
 0xb08   : > { %v7576_v5 = vpop.permute.xlu1 %7575  ;;  %v7622_v49 = vmul.f32 %v12345_v43, %v7580_v59  ;;  %v7705_v36 = vrot.slane %v7624_v4, 2  ;;  %v12359_v59 = vld [vmem:[#allocation2 + $0x80] sm:$0xff] }
 0xb09   : > { %v7619_v21 = vmul.f32 %v12335_v10, %v7576_v5  ;;  %v7620_v25 = vmul.f32 %v12338_v60, %v7576_v5  ;;  %v7621_v24 = vmul.f32 %v7576_v5, %v11919_v41  ;;  %v7696_v33 = vsel %vm3809_vm6, %v7693_v40, %v7695_v22  ;;  %v7588_v27 = vpop.permute.xlu0 %7587  ;;  %13912 = vst [vmem:[#allocation30_spill] sm:$0xff] %v12359_v59 }
 0xb0a   : > { %7748 = vrot.lane.b32.xlu1 %v7691_v0, %s8834_s16  ;;  %v7694_v32 = vsel %vm3809_vm6, %v7692_v17, %v7693_v40  ;;  %v7702_v0 = vrot.slane %v7622_v49, 2  ;;  %v12370_v49 = vld [vmem:[#allocation2 + $0x98] sm:$0xff]  ;;  %v7630_v4 = vmul.f32 %v7588_v27, %v11951_v20 }
 0xb0b   : > { %7746 = vrot.lane.b32.xlu0 %v7689_v45, %s8834_s16  ;;  %v7697_v26 = vrot.slane %v7619_v21, 2  ;;  %v7698_v41 = vrot.slane %v7620_v25, 2  ;;  %v7700_v5 = vrot.slane %v7621_v24, 2  ;;  %v7703_v45 = vrot.slane %v7623_v51, 2  ;;  %v12367_v25 = vld [vmem:[#allocation2 + $0x90] sm:$0xff] }
 0xb0c   : > { %v7584_v29 = vpop.permute.xlu1 %7583  ;;  %v7628_v24 = vmul.f32 %v12367_v25, %v7588_v27  ;;  %v7629_v51 = vmul.f32 %v12370_v49, %v7588_v27  ;;  %v12381_v27 = vld [vmem:[#allocation2 + $0xb0] sm:$0xff] }
 0xb0d   : > { %v7625_v39 = vmul.f32 %v12356_v8, %v7584_v29  ;;  %v7626_v21 = vmul.f32 %v12359_v59, %v7584_v29  ;;  %v7627_v22 = vmul.f32 %v7584_v29, %v11942_v19  ;;  %v7701_v17 = vsel %vm3809_vm6, %v7698_v41, %v7700_v5  ;;  %v7596_v20 = vpop.permute.xlu0 %7595  ;;  %13914 = vst [vmem:[#allocation116_spill] sm:$0xff] %v12381_v27 }
 0xb0e   : > { %7752 = vrot.lane.b32.xlu1 %v7696_v33, %s8834_s16  ;;  %v7699_v40 = vsel %vm3809_vm6, %v7697_v26, %v7698_v41  ;;  %v7706_v19 = vsel %vm3809_vm6, %v7703_v45, %v7705_v36  ;;  %v7704_v41 = vsel %vm3809_vm6, %v7702_v0, %v7703_v45 }
 0xb0f   : > { %7750 = vrot.lane.b32.xlu0 %v7694_v32, %s8834_s16  ;;  %v7707_v33 = vrot.slane %v7625_v39, 2  ;;  %v7708_v5 = vrot.slane %v7626_v21, 2  ;;  %v7710_v29 = vrot.slane %v7627_v22, 2  ;;  %v7712_v32 = vrot.slane %v7628_v24, 2  ;;  %v12389_v21 = vld [vmem:[#allocation2 + $0xc0] sm:$0xff]  ;;  %v12392_v24 = vld [vmem:[#allocation2 + $0xc8] sm:$0xff] }
 0xb10   : > { %v7592_v26 = vpop.permute.xlu1 %7591  ;;  %v7634_v22 = vmul.f32 %v12389_v21, %v7596_v20 }
 0xb11   : > { %v7631_v35 = vmul.f32 %v12378_v37, %v7592_v26  ;;  %v7632_v39 = vmul.f32 %v12381_v27, %v7592_v26  ;;  %v7633_v36 = vmul.f32 %v7592_v26, %v11960_v2  ;;  %v7711_v0 = vsel %vm3809_vm6, %v7708_v5, %v7710_v29 }
 0xb12   : > { %7756 = vrot.lane.b32.xlu1 %v7701_v17, %s8834_s16  ;;  %v7713_v17 = vrot.slane %v7629_v51, 2  ;;  %v7709_v45 = vsel %vm3809_vm6, %v7707_v33, %v7708_v5  ;;  %v7635_v51 = vmul.f32 %v12392_v24, %v7596_v20 }
 0xb13   : > { %7754 = vrot.lane.b32.xlu0 %v7699_v40, %s8834_s16  ;;  %v7715_v40 = vrot.slane %v7630_v4, 2  ;;  %v7636_v4 = vmul.f32 %v7596_v20, %v11969_v63  ;;  %v7718_v29 = vrot.slane %v7632_v39, 2  ;;  %v7720_v26 = vrot.slane %v7633_v36, 2  ;;  %v7604_v63 = vpop.permute.xlu0 %7603  ;;  %v12403_v20 = vld [vmem:[#allocation2 + $0xe0] sm:$0xff]  ;;  %v12414_v36 = vld [vmem:[#allocation2 + $0xf0] sm:$0xff] }
 0xb14   : > { %v7600_v33 = vpop.permute.xlu1 %7599  ;;  %v7714_v5 = vsel %vm3809_vm6, %v7712_v32, %v7713_v17  ;;  %13916 = vst [vmem:[#allocation147_spill] sm:$0xff] %v12403_v20  ;;  %v7838_v39 = vld [vmem:[%s13242_s5] sm:$0xff] }
 0xb15   : > { %v7716_v2 = vsel %vm3809_vm6, %v7713_v17, %v7715_v40  ;;  %v7637_v14 = vmul.f32 %v12400_v54, %v7600_v33  ;;  %v7639_v40 = vmul.f32 %v7600_v33, %v11978_v42  ;;  %v7721_v32 = vsel %vm3809_vm6, %v7718_v29, %v7720_v26 }
 0xb16   : > { %7760 = vrot.lane.b32.xlu1 %v7706_v19, %s8834_s16  ;;  %v7717_v19 = vrot.slane %v7631_v35, 2  ;;  %v7638_v35 = vmul.f32 %v12403_v20, %v7600_v33 }
 0xb17   : > { %7758 = vrot.lane.b32.xlu0 %v7704_v41, %s8834_s16  ;;  %v7722_v41 = vrot.slane %v7634_v22, 2  ;;  %v7640_v22 = vmul.f32 %v12414_v36, %v7604_v63  ;;  %v7730_v26 = vrot.slane %v7639_v40, 2  ;;  %v7842_v40 = vcombine.high %v7838_v39, %v7838_v39 }
 0xb18   : > { %v7719_v17 = vsel %vm3809_vm6, %v7717_v19, %v7718_v29  ;;  %v7727_v19 = vrot.slane %v7637_v14, 2  ;;  %v7728_v29 = vrot.slane %v7638_v35, 2  ;;  %v7608_v33 = vpop.permute.xlu1 %7607 }
 0xb19   : > { %v7732_v30 = vrot.slane %v7640_v22, 2 }
 0xb1a   : > { %7764 = vrot.lane.b32.xlu1 %v7711_v0, %s8834_s16  ;;  %v7723_v0 = vrot.slane %v7635_v51, 2  ;;  %v12417_v51 = vld [vmem:[#allocation2 + $0xf8] sm:$0xff] }
 0xb1b   : > { %7762 = vrot.lane.b32.xlu0 %v7709_v45, %s8834_s16  ;;  %v7725_v45 = vrot.slane %v7636_v4, 2  ;;  %v7641_v42 = vmul.f32 %v12417_v51, %v7604_v63  ;;  %v7642_v4 = vmul.f32 %v7604_v63, %v11990_v1  ;;  %v7643_v1 = vmul.f32 %v12426_v3, %v7608_v33 }
 0xb1c   : > { %v7645_v63 = vmul.f32 %v7608_v33, %v12000_v46 }
 0xb1d   : > { %v7733_v56 = vrot.slane %v7641_v42, 2  ;;  %v7735_v31 = vrot.slane %v7642_v4, 2  ;;  %v7737_v4 = vrot.slane %v7643_v1, 2 }
 0xb1e   : > { %7768 = vrot.lane.b32.xlu1 %v7716_v2, %s8834_s16  ;;  %v7726_v2 = vsel %vm3809_vm6, %v7723_v0, %v7725_v45  ;;  %v12429_v45 = vld [vmem:[#allocation2 + $0x110] sm:$0xff] }
 0xb1f   : > { %7766 = vrot.lane.b32.xlu0 %v7714_v5, %s8834_s16  ;;  %v7724_v5 = vsel %vm3809_vm6, %v7722_v41, %v7723_v0  ;;  %13919 = vst [vmem:[#allocation41_spill] sm:$0xff] %v12429_v45  ;;  %v7644_v14 = vmul.f32 %v12429_v45, %v7608_v33  ;;  %v7731_v41 = vsel %vm3809_vm6, %v7728_v29, %v7730_v26 }
 0xb20   : > { %v7729_v0 = vsel %vm3809_vm6, %v7727_v19, %v7728_v29  ;;  %v7736_v22 = vsel %vm3809_vm6, %v7733_v56, %v7735_v31  ;;  %v7734_v16 = vsel %vm3809_vm6, %v7732_v30, %v7733_v56  ;;  %v13920_v31 = vld [vmem:[#allocation4_spill] sm:$0xff]  ;;  %v5255_v45 = vmul.f32 %v12345_v43, %v13935_v57 }
 0xb22   : > { %7772 = vrot.lane.b32.xlu1 %v7721_v32, %s8834_s16  ;;  %v13917_v32 = vld [vmem:[#allocation3_spill] sm:$0xff] }
 0xb23   : > { %7770 = vrot.lane.b32.xlu0 %v7719_v17, %s8834_s16  ;;  %v7849_v17 = vrot.slane %v7838_v39, %v13917_v32  ;;  %v7856_v19 = vrot.slane %v7842_v40, %v13917_v32 }
 0xb25   : > { %v7857_v35 = vcombine.high %v7849_v17, %v7849_v17  ;;  %v7865_v42 = vrot.slane %v7849_v17, %v13917_v32  ;;  %v7858_v17 = vcombine.high %v7856_v19, %v7856_v19 }
 0xb26   : > { %7776 = vrot.lane.b32.xlu1 %v7726_v2, %s8834_s16  ;;  %v7738_v2 = vrot.slane %v7644_v14, 2 }
 0xb27   : > { %7774 = vrot.lane.b32.xlu0 %v7724_v5, %s8834_s16  ;;  %v7740_v5 = vrot.slane %v7645_v63, 2  ;;  %v7879_v46 = vrot.slane %v7857_v35, %v13917_v32  ;;  %v7918_v26 = vrot.slane %v7865_v42, %v13920_v31  ;;  %v7887_v33 = vcombine.high %v7865_v42, %v7865_v42 }
 0xb28   : > { %v7739_v39 = vsel %vm3809_vm6, %v7737_v4, %v7738_v2  ;;  %v7886_v63 = vrot.slane %v7858_v17, %v13917_v32  ;;  %v13922_v17 = vld [vmem:[#allocation61_spill] sm:$0xff] }
 0xb29   : > { %v7741_v29 = vsel %vm3809_vm6, %v7738_v2, %v7740_v5  ;;  %v7922_v30 = vrot.slane %v7879_v46, %v13920_v31  ;;  %v7889_v56 = vcombine.high %v7879_v46, %v7879_v46  ;;  %v7926_v1 = vrot.slane %v7887_v33, %v13920_v31 }
 0xb2a   : > { %7780 = vrot.lane.b32.xlu1 %v7731_v41, %s8834_s16  ;;  %v8617_v41 = vld.sshfl [vmem:[%s13242_s5 + $0x8] sm:$0x33 pattern:$0x75316420]  ;;  %v7938_v40 = vrot.slane %v7886_v63, %v13920_v31 }
 0xb2b   : > { %7778 = vrot.lane.b32.xlu0 %v7729_v0, %s8834_s16  ;;  %v7930_v14 = vrot.slane %v7889_v56, %v13920_v31  ;;  %v7898_v42 = vcombine.high %v8617_v41, %v8617_v41  ;;  %v7905_v4 = vrot.slane %v8617_v41, %v13917_v32  ;;  %v13921_v56 = vmov 0  }
 0xb2d   : > { %v7912_v46 = vrot.slane %v7898_v42, %v13917_v32  ;;  %v13926_v42 = vld [vmem:[#allocation48_spill] sm:$0xff] }
 0xb2e   : > { %7784 = vrot.lane.b32.xlu1 %v7736_v22, %s8834_s16  ;;  %v7890_v22 = vcombine.high %v7886_v63, %v7886_v63  ;;  %v13924_v63 = vld [vmem:[#allocation66_spill] sm:$0xff] }
 0xb2f   : > { %7782 = vrot.lane.b32.xlu0 %v7734_v16, %s8834_s16  ;;  %v7872_v16 = vrot.slane %v7856_v19, %v13917_v32  ;;  %v7950_v19 = vrot.slane %v7905_v4, %v13920_v31 }
 0xb30   : > { %v7946_v5 = vrot.slane %v7890_v22, %v13920_v31 }
 0xb31   : > { %v7934_v0 = vrot.slane %v7872_v16, %v13920_v31  ;;  %v7888_v35 = vcombine.high %v7872_v16, %v7872_v16  ;;  %v13923_v16 = vld [vmem:[#allocation62_spill] sm:$0xff] }
 0xb32   : > { %7788 = vrot.lane.b32.xlu1 %v7741_v29, %s8834_s16  ;;  %v7954_v29 = vrot.slane %v7912_v46, %v13920_v31 }
 0xb33   : > { %7786 = vrot.lane.b32.xlu0 %v7739_v39, %s8834_s16  ;;  %v7942_v2 = vrot.slane %v7888_v35, %v13920_v31  ;;  %v7913_v39 = vcombine.high %v7905_v4, %v7905_v4  ;;  %v6108_v4 = vmul.f32 %v12323_v38, %v13926_v42 }
 0xb35   : > { %v7958_v33 = vrot.slane %v7913_v39, %v13920_v31 }
 0xb36   : > { %7968 = vperm.xlu1 %8691, %v7922_v30  }
 0xb37   : > { %7964 = vperm.xlu0 %8690, %v7918_v26   ;;  %v7914_v26 = vcombine.high %v7912_v46, %v7912_v46 }
 0xb39   : > { %v7962_v30 = vrot.slane %v7914_v26, %v13920_v31  ;;  %v13927_v26 = vld [vmem:[#allocation69_spill] sm:$0xff] }
 0xb3a   : > { %7972 = vperm.xlu1 %8691, %v7926_v1   ;;  %v8788_v1 = vld.sshfl [vmem:[%s13242_s5 + $0x8] sm:$0x33 pattern:$0x75316420] }
 0xb3b   : > { %7976 = vperm.xlu0 %8690, %v7930_v14   ;;  %v5134_v14 = vcombine.high %v8788_v1, %v8788_v1  ;;  %v13928_v1 = vld [vmem:[#allocation137_spill] sm:$0xff] }
 0xb3d   : > { %v5148_v41 = vrot.slane %v5134_v14, %v13917_v32 }
 0xb3e   : > { %7980 = vperm.xlu1 %8691, %v7934_v0   ;;  %v13925_v0 = vld [vmem:[#allocation67_spill] sm:$0xff] }
 0xb3f   : > { %7984 = vperm.xlu0 %8690, %v7938_v40   ;;  %v5190_v35 = vrot.slane %v5148_v41, %v13920_v31  ;;  %v5150_v40 = vcombine.high %v5148_v41, %v5148_v41 }
 0xb41   : > { %v5198_v22 = vrot.slane %v5150_v40, %v13920_v31 }
 0xb42   : > { %7988 = vperm.xlu1 %8691, %v7942_v2   ;;  %v6109_v2 = vmul.f32 %v12326_v47, %v13926_v42 }
 0xb43   : > { %7992 = vperm.xlu0 %8690, %v7946_v5   ;;  %v12483_v5 = vld [vmem:[#allocation2 + $0x40] sm:$0x3] }
 0xb44   : > { %v6110_v46 = vmul.f32 %v12483_v5, %v13926_v42 }
 0xb46   : > { %7996 = vperm.xlu1 %8691, %v7950_v19   ;;  %v6184_v19 = vrot.slane %v6108_v4, 1  ;;  %v6187_v39 = vrot.slane %v6110_v46, 1 }
 0xb47   : > { %8000 = vperm.xlu0 %8690, %v7954_v29   ;;  %v6185_v29 = vrot.slane %v6109_v2, 1 }
 0xb49   : > { %v6188_v4 = vsel %vm2653_vm5, %v6185_v29, %v6187_v39  ;;  %v6186_v2 = vsel %vm2653_vm5, %v6184_v19, %v6185_v29  ;;  %v5256_v39 = vmul.f32 %v12348_v23, %v13935_v57 }
 0xb4a   : > { %8004 = vperm.xlu1 %8691, %v7958_v33   ;;  %v5251_v33 = vmul.f32 %v12323_v38, %v13927_v26 }
 0xb4b   : > { %8008 = vperm.xlu0 %8690, %v7962_v30   ;;  %v5252_v30 = vmul.f32 %v12326_v47, %v13927_v26  ;;  %v13932_v26 = vld [vmem:[#allocation125_spill] sm:$0xff] }
 0xb4c   : > { %v5592_v14 = vadd.f32 %v13928_v1, %v5251_v33 }
 0xb4e   : > { %8693 = vset.pattern.permute.xlu1 %v13921_v56  ;;  %v5909_v33 = vadd.f32 %v13932_v26, %v5592_v14 }
 0xb4f   : > { %8692 = vset.pattern.permute.xlu0 %v13921_v56  ;;  %v7263_v56 = vmul.f32 %v12323_v38, %v12291_v11 }
 0xb50   : > { %5204 = vperm.xlu0 %8692, %v13922_v17   ;;  %v7264_v17 = vmul.f32 %v12326_v47, %v12291_v11 }
 0xb52   : > { %v7340_v1 = vrot.slane %v7264_v17, 2 }
 0xb54   : > { %5212 = vperm.xlu0 %8692, %v13923_v16   ;;  %v7265_v16 = vmul.f32 %v12483_v5, %v12291_v11  ;;  %v13931_v11 = vld [vmem:[#allocation124_spill] sm:$0xff] }
 0xb58   : > { %5220 = vperm.xlu0 %8692, %v13924_v63   ;;  %v13929_v63 = vld [vmem:[#allocation77_spill] sm:$0xff] }
 0xb59   : > { %v5593_v41 = vadd.f32 %v13929_v63, %v5252_v30  ;;  %v7339_v30 = vrot.slane %v7263_v56, 2  ;;  %v7342_v63 = vrot.slane %v7265_v16, 2  ;;  %v13937_v56 = vld [vmem:[#allocation9_spill] sm:$0xff]  ;;  %v13938_v16 = vld [vmem:[#allocation8_spill] sm:$0xff] }
 0xb5b   : > { %v5910_v46 = vadd.f32 %v13931_v11, %v5593_v41  ;;  %v13936_v11 = vld [vmem:[#allocation82_spill] sm:$0xff] }
 0xb5c   : > { %5228 = vperm.xlu0 %8692, %v13925_v0   ;;  %v13930_v0 = vld [vmem:[#allocation47_spill] sm:$0xff]  ;;  %v5596_v14 = vadd.f32 %v13936_v11, %v5255_v45  ;;  %v7343_v45 = vsel %vm3809_vm6, %v7340_v1, %v7342_v63  ;;  %v13943_v63 = vld [vmem:[#allocation40_spill] sm:$0xff] }
 0xb5d   : > { %v6115_v40 = vmul.f32 %v12348_v23, %v13930_v0  ;;  %v6263_v3 = vadd.f32 %v6188_v4, %v5910_v46  ;;  %v12541_v11 = vld [vmem:[#allocation2 + $0xa0] sm:$0x3] }
 0xb5f   : > { %v6195_v29 = vrot.slane %v6115_v40, 1  ;;  %v6664_v17 = vadd.f32 %v13937_v56, %v6263_v3  ;;  %v13941_v3 = vld [vmem:[#allocation85_spill] sm:$0xff] }
 0xb60   : > { %5236 = vperm.xlu0 %8692, %v5190_v35   ;;  %v6114_v35 = vmul.f32 %v12345_v43, %v13930_v0  ;;  %v5597_v40 = vadd.f32 %v13941_v3, %v5256_v39 }
 0xb62   : > { %v6194_v19 = vrot.slane %v6114_v35, 1  ;;  %v7341_v35 = vsel %vm3809_vm6, %v7339_v30, %v7340_v1  ;;  %v5914_v39 = vadd.f32 %v13943_v63, %v5597_v40 }
 0xb64   : > { %5244 = vperm.xlu0 %8692, %v5198_v22   ;;  %v12503_v22 = vld [vmem:[#allocation2 + $0x70] sm:$0x3]  ;;  %v6196_v1 = vsel %vm2653_vm5, %v6194_v19, %v6195_v29 }
 0xb65   : > { %v6116_v42 = vmul.f32 %v12503_v22, %v13930_v0  ;;  %v6262_v0 = vadd.f32 %v6186_v2, %v5909_v33  ;;  %v7271_v4 = vmul.f32 %v12503_v22, %v12295_v18 }
 0xb67   : > { %v6197_v41 = vrot.slane %v6116_v42, 1  ;;  %v6663_v26 = vadd.f32 %v13938_v16, %v6262_v0  ;;  %v13942_v42 = vld [vmem:[#allocation165_spill] sm:$0xff]  ;;  %v7065_v0 = vadd.f32 %v12247_v9, %v6664_v17  ;;  %v13944_v16 = vld [vmem:[#allocation163_spill] sm:$0xff]  ;;  %v7352_v31 = vrot.slane %v7271_v4, 2 }
 0xb68   : > { %v6120_v46 = vmul.f32 %v12367_v25, %v13942_v42  ;;  %v6122_v56 = vmul.f32 %v12541_v11, %v13942_v42  ;;  %v5913_v3 = vadd.f32 %v13944_v16, %v5596_v14 }
 0xb69   : > { %v7064_v33 = vadd.f32 %v12245_v55, %v6663_v26  ;;  %v6198_v30 = vsel %vm2653_vm5, %v6195_v29, %v6197_v41  ;;  %v7418_v55 = vadd.f32 %v7343_v45, %v7065_v0  ;;  %v13945_v26 = vld [vmem:[#allocation71_spill] sm:$0xff]  ;;  %v13948_v45 = vld [vmem:[#allocation162_spill] sm:$0xff]  ;;  %v7275_v0 = vmul.f32 %v12367_v25, %v12299_v48 }
 0xb6a   : > { %v5259_v9 = vmul.f32 %v12367_v25, %v13945_v26  ;;  %v6267_v32 = vadd.f32 %v6198_v30, %v5914_v39  ;;  %v5260_v19 = vmul.f32 %v12370_v49, %v13945_v26  ;;  %v6204_v29 = vrot.slane %v6120_v46, 1 }
 0xb6c   : > { %v5600_v40 = vadd.f32 %v13948_v45, %v5259_v9  ;;  %v13955_v45 = vld [vmem:[#allocation73_spill] sm:$0xff] }
 0xb78   : > { %v12513_v54 = vpop.permute.xlu1 %7744 }
 0xb79   : > { %v12511_v20 = vpop.permute.xlu0 %7742  ;;  %13934 = vst [vmem:[#allocation54_spill] sm:$0xff] %v12513_v54  ;;  %v7269_v54 = vmul.f32 %v12345_v43, %v12295_v18 }
 0xb7a   : > { %13933 = vst [vmem:[#allocation64_spill] sm:$0xff] %v12511_v20  ;;  %v7270_v20 = vmul.f32 %v12348_v23, %v12295_v18  ;;  %v6121_v18 = vmul.f32 %v12370_v49, %v13942_v42  ;;  %v6266_v42 = vadd.f32 %v6196_v1, %v5913_v3  ;;  %v13952_v1 = vld [vmem:[#allocation80_spill] sm:$0xff]  ;;  %v12579_v3 = vld [vmem:[#allocation2 + $0xd0] sm:$0x3] }
 0xb7b   : > { %v7349_v17 = vrot.slane %v7269_v54, 2  ;;  %v6126_v63 = vmul.f32 %v12389_v21, %v13952_v1 }
 0xb7c   : > { %v12530_v57 = vpop.permute.xlu1 %7748  ;;  %v6205_v14 = vrot.slane %v6121_v18, 1 }
 0xb7d   : > { %v12528_v2 = vpop.permute.xlu0 %7746  ;;  %13940 = vst [vmem:[#allocation33_spill] sm:$0xff] %v12530_v57  ;;  %v7350_v57 = vrot.slane %v7270_v20, 2  ;;  %v13950_v20 = vld [vmem:[#allocation83_spill] sm:$0xff] }
 0xb7e   : > { %13939 = vst [vmem:[#allocation34_spill] sm:$0xff] %v12528_v2  ;;  %v7417_v2 = vadd.f32 %v7341_v35, %v7064_v33  ;;  %v6207_v35 = vrot.slane %v6122_v56, 1  ;;  %v13949_v33 = vld [vmem:[#allocation52_spill] sm:$0xff]  ;;  %v6667_v4 = vadd.f32 %v13950_v20, %v6266_v42 }
 0xb7f   : > { %v6668_v54 = vadd.f32 %v13949_v33, %v6267_v32  ;;  %v7351_v18 = vsel %vm3809_vm6, %v7349_v17, %v7350_v57  ;;  %v7353_v56 = vsel %vm3809_vm6, %v7350_v57, %v7352_v31  ;;  %v13951_v32 = vld [vmem:[#allocation90_spill] sm:$0xff]  ;;  %v6206_v31 = vsel %vm2653_vm5, %v6204_v29, %v6205_v14  ;;  %v13953_v57 = vld [vmem:[#allocation19_spill] sm:$0xff] }
 0xb80   : > { %v7753_v37 = vpop.permute.xlu1 %7752  ;;  %v5601_v30 = vadd.f32 %v13951_v32, %v5260_v19  ;;  %v7068_v39 = vadd.f32 %v12253_v13, %v6667_v4  ;;  %v6208_v26 = vsel %vm2653_vm5, %v6205_v14, %v6207_v35  ;;  %v13954_v17 = vld [vmem:[#allocation127_spill] sm:$0xff]  ;;  %v7359_v33 = vrot.slane %v7275_v0, 2 }
 0xb81   : > { %v7751_v27 = vpop.permute.xlu0 %7750  ;;  %v12553_v41 = vadd.f32 %v7753_v37, %v7418_v55  ;;  %v7277_v37 = vmul.f32 %v12541_v11, %v12299_v48  ;;  %v7069_v16 = vadd.f32 %v12255_v6, %v6668_v54  ;;  %v6128_v55 = vmul.f32 %v12579_v3, %v13952_v1 }
 0xb82   : > { %v12551_v59 = vadd.f32 %v7751_v27, %v7417_v2  ;;  %v7276_v27 = vmul.f32 %v12370_v49, %v12299_v48  ;;  %v6127_v48 = vmul.f32 %v12392_v24, %v13952_v1  ;;  %v5918_v9 = vadd.f32 %v13953_v57, %v5601_v30 }
 0xb83   : > { %13947 = vst [vmem:[#allocation149_spill] sm:$0xff] %v12553_v41  ;;  %v5917_v42 = vadd.f32 %v13954_v17, %v5600_v40  ;;  %v7421_v19 = vadd.f32 %v7351_v18, %v7068_v39  ;;  %v7422_v13 = vadd.f32 %v7353_v56, %v7069_v16  ;;  %v5263_v6 = vmul.f32 %v12389_v21, %v13955_v45  ;;  %v13958_v56 = vld [vmem:[#allocation101_spill] sm:$0xff]  ;;  %v13959_v39 = vld [vmem:[#allocation32_spill] sm:$0xff] }
 0xb84   : > { %13946 = vst [vmem:[#allocation148_spill] sm:$0xff] %v12551_v59  ;;  %v12568_v46 = vpop.permute.xlu1 %7756  ;;  %v7360_v54 = vrot.slane %v7276_v27, 2  ;;  %v7362_v20 = vrot.slane %v7277_v37, 2  ;;  %v6271_v59 = vadd.f32 %v6208_v26, %v5918_v9  ;;  %v5264_v29 = vmul.f32 %v12392_v24, %v13955_v45  ;;  %v13960_v27 = vld [vmem:[#allocation13_spill] sm:$0xff]  ;;  %v13964_v17 = vld [vmem:[#allocation132_spill] sm:$0xff] }
 0xb85   : > { %v12566_v2 = vpop.permute.xlu0 %7754  ;;  %v6270_v1 = vadd.f32 %v6206_v31, %v5917_v42  ;;  %v6214_v14 = vrot.slane %v6126_v63, 1  ;;  %v6215_v40 = vrot.slane %v6127_v48, 1  ;;  %v6217_v18 = vrot.slane %v6128_v55, 1  ;;  %v12617_v45 = vld [vmem:[#allocation2 + $0x100] sm:$0x3] }
 0xb86   : > { %v5604_v30 = vadd.f32 %v13958_v56, %v5263_v6  ;;  %v6672_v0 = vadd.f32 %v13959_v39, %v6271_v59  ;;  %v7281_v16 = vmul.f32 %v12389_v21, %v12303_v61  ;;  %v7282_v26 = vmul.f32 %v12392_v24, %v12303_v61  ;;  %v13963_v59 = vld [vmem:[#allocation102_spill] sm:$0xff] }
 0xb87   : > { %v6671_v37 = vadd.f32 %v13960_v27, %v6270_v1  ;;  %v7283_v31 = vmul.f32 %v12579_v3, %v12303_v61  ;;  %v7361_v48 = vsel %vm3809_vm6, %v7359_v33, %v7360_v54  ;;  %v7363_v55 = vsel %vm3809_vm6, %v7360_v54, %v7362_v20  ;;  %v13965_v20 = vld [vmem:[#allocation43_spill] sm:$0xff] }
 0xb88   : > { %v7761_v32 = vpop.permute.xlu1 %7760  ;;  %v5605_v9 = vadd.f32 %v13963_v59, %v5264_v29  ;;  %v6132_v42 = vmul.f32 %v12414_v36, %v13964_v17  ;;  %v6133_v61 = vmul.f32 %v12417_v51, %v13964_v17  ;;  %v6134_v6 = vmul.f32 %v12617_v45, %v13964_v17 }
 0xb89   : > { %v7759_v4 = vpop.permute.xlu0 %7758  ;;  %v12591_v35 = vadd.f32 %v7761_v32, %v7422_v13  ;;  %v7073_v13 = vadd.f32 %v12263_v12, %v6672_v0  ;;  %v6218_v33 = vsel %vm2653_vm5, %v6215_v40, %v6217_v18  ;;  %v6216_v54 = vsel %vm2653_vm5, %v6214_v14, %v6215_v40  ;;  %v13966_v32 = vld [vmem:[#allocation44_spill] sm:$0xff] }
 0xb8a   : > { %v12589_v41 = vadd.f32 %v7759_v4, %v7421_v19  ;;  %v7072_v19 = vadd.f32 %v12261_v44, %v6671_v37  ;;  %v5922_v4 = vadd.f32 %v13965_v20, %v5605_v9  ;;  %v5921_v1 = vadd.f32 %v13966_v32, %v5604_v30  ;;  %v13969_v18 = vld [vmem:[#allocation72_spill] sm:$0xff]  ;;  %v13975_v32 = vld [vmem:[#allocation109_spill] sm:$0xff] }
 0xb8b   : > { %13957 = vst [vmem:[#allocation96_spill] sm:$0xff] %v12591_v35  ;;  %v7426_v44 = vadd.f32 %v7363_v55, %v7073_v13  ;;  %v7369_v56 = vrot.slane %v7281_v16, 2  ;;  %v7370_v12 = vrot.slane %v7282_v26, 2  ;;  %v7372_v39 = vrot.slane %v7283_v31, 2  ;;  %v13970_v16 = vld [vmem:[#allocation107_spill] sm:$0xff] }
 0xb8c   : > { %13956 = vst [vmem:[#allocation95_spill] sm:$0xff] %v12589_v41  ;;  %v12606_v63 = vpop.permute.xlu1 %7764  ;;  %v7425_v29 = vadd.f32 %v7361_v48, %v7072_v19  ;;  %v6275_v37 = vadd.f32 %v6218_v33, %v5922_v4  ;;  %v6274_v59 = vadd.f32 %v6216_v54, %v5921_v1  ;;  %v5267_v14 = vmul.f32 %v12414_v36, %v13969_v18  ;;  %v13971_v31 = vld [vmem:[#allocation139_spill] sm:$0xff]  ;;  %v13974_v54 = vld [vmem:[#allocation106_spill] sm:$0xff] }
 0xb8d   : > { %v12604_v57 = vpop.permute.xlu0 %7762  ;;  %13962 = vst [vmem:[#allocation161_spill] sm:$0xff] %v12606_v63  ;;  %v6224_v40 = vrot.slane %v6132_v42, 1  ;;  %v6225_v9 = vrot.slane %v6133_v61, 1  ;;  %v6227_v20 = vrot.slane %v6134_v6, 1  ;;  %v5268_v30 = vmul.f32 %v12417_v51, %v13969_v18 }
 0xb8e   : > { %13961 = vst [vmem:[#allocation134_spill] sm:$0xff] %v12604_v57  ;;  %v6676_v26 = vadd.f32 %v13970_v16, %v6275_v37  ;;  %v6675_v48 = vadd.f32 %v13971_v31, %v6274_v59  ;;  %v7287_v55 = vmul.f32 %v12414_v36, %v12307_v53  ;;  %v7288_v19 = vmul.f32 %v12417_v51, %v12307_v53  ;;  %v13977_v59 = vld [vmem:[#allocation24_spill] sm:$0xff] }
 0xb8f   : > { %v7289_v13 = vmul.f32 %v12617_v45, %v12307_v53  ;;  %v7371_v61 = vsel %vm3809_vm6, %v7369_v56, %v7370_v12  ;;  %v7373_v6 = vsel %vm3809_vm6, %v7370_v12, %v7372_v39  ;;  %v5608_v4 = vadd.f32 %v13974_v54, %v5267_v14 }
 0xb90   : > { %v7769_v27 = vpop.permute.xlu1 %7768  ;;  %v5609_v1 = vadd.f32 %v13975_v32, %v5268_v30  ;;  %v6226_v53 = vsel %vm2653_vm5, %v6224_v40, %v6225_v9  ;;  %v7379_v31 = vrot.slane %v7287_v55, 2  ;;  %v7380_v12 = vrot.slane %v7288_v19, 2  ;;  %v13981_v40 = vld [vmem:[#allocation55_spill] sm:$0xff] }
 0xb91   : > { %v7767_v0 = vpop.permute.xlu0 %7766  ;;  %v12627_v17 = vadd.f32 %v7769_v27, %v7426_v44  ;;  %v7077_v44 = vadd.f32 %v12271_v34, %v6676_v26  ;;  %v13976_v27 = vld [vmem:[#allocation129_spill] sm:$0xff]  ;;  %v5925_v18 = vadd.f32 %v13977_v59, %v5608_v4  ;;  %v7382_v39 = vrot.slane %v7289_v13, 2 }
 0xb92   : > { %v12625_v57 = vadd.f32 %v7767_v0, %v7425_v29  ;;  %v7076_v29 = vadd.f32 %v12269_v7, %v6675_v48  ;;  %v6228_v0 = vsel %vm2653_vm5, %v6225_v9, %v6227_v20  ;;  %v5926_v37 = vadd.f32 %v13976_v27, %v5609_v1  ;;  %v13980_v20 = vld [vmem:[#allocation141_spill] sm:$0xff] }
 0xb93   : > { %13968 = vst [vmem:[#allocation37_spill] sm:$0xff] %v12627_v17  ;;  %v7430_v56 = vadd.f32 %v7373_v6, %v7077_v44  ;;  %v6278_v32 = vadd.f32 %v6226_v53, %v5925_v18  ;;  %v7381_v55 = vsel %vm3809_vm6, %v7379_v31, %v7380_v12  ;;  %v7383_v19 = vsel %vm3809_vm6, %v7380_v12, %v7382_v39  ;;  %v12684_v39 = vld [vmem:[#allocation2 + $0x28] sm:$0x3] }
 0xb94   : > { %13967 = vst [vmem:[#allocation38_spill] sm:$0xff] %v12625_v57  ;;  %v12643_v42 = vpop.permute.xlu1 %7772  ;;  %v7429_v16 = vadd.f32 %v7371_v61, %v7076_v29  ;;  %v6279_v30 = vadd.f32 %v6228_v0, %v5926_v37 }
 0xb95   : > { %v12641_v33 = vpop.permute.xlu0 %7770  ;;  %13973 = vst [vmem:[#allocation151_spill] sm:$0xff] %v12643_v42  ;;  %v6679_v9 = vadd.f32 %v13981_v40, %v6278_v32 }
 0xb96   : > { %13972 = vst [vmem:[#allocation57_spill] sm:$0xff] %v12641_v33  ;;  %v6680_v26 = vadd.f32 %v13980_v20, %v6279_v30 }
 0xb97   : > { %v7080_v13 = vadd.f32 %v12277_v50, %v6679_v9 }
 0xb98   : > { %v7777_v54 = vpop.permute.xlu1 %7776  ;;  %v7081_v61 = vadd.f32 %v12279_v52, %v6680_v26 }
 0xb99   : > { %v7775_v14 = vpop.permute.xlu0 %7774  ;;  %v12657_v34 = vadd.f32 %v7777_v54, %v7430_v56  ;;  %v7433_v6 = vadd.f32 %v7381_v55, %v7080_v13  ;;  %v12679_v56 = vld [vmem:[#allocation2 + $0x10] sm:$0x3] }
 0xb9a   : > { %v12655_v7 = vadd.f32 %v7775_v14, %v7429_v16  ;;  %v7434_v1 = vadd.f32 %v7383_v19, %v7081_v61 }
 0xb9b   : > { %13979 = vst [vmem:[#allocation120_spill] sm:$0xff] %v12657_v34 }
 0xb9c   : > { %13978 = vst [vmem:[#allocation150_spill] sm:$0xff] %v12655_v7  ;;  %v12663_v4 = vpop.permute.xlu1 %7780 }
 0xb9d   : > { %v12661_v48 = vpop.permute.xlu0 %7778  ;;  %13983 = vst [vmem:[#allocation42_spill] sm:$0xff] %v12663_v4  ;;  %v13998_v4 = vld [vmem:[#allocation23_spill] sm:$0xff] }
 0xb9e   : > { %13982 = vst [vmem:[#allocation119_spill] sm:$0xff] %v12661_v48 }
 0xba0   : > { %v7785_v44 = vpop.permute.xlu1 %7784 }
 0xba1   : > { %v7783_v29 = vpop.permute.xlu0 %7782  ;;  %v12671_v53 = vadd.f32 %v7785_v44, %v7434_v1  ;;  %v12696_v1 = vld [vmem:[#allocation2 + $0x58] sm:$0x3] }
 0xba2   : > { %v12669_v0 = vadd.f32 %v7783_v29, %v7433_v6 }
 0xba3   : > { %13985 = vst [vmem:[#allocation11_spill] sm:$0xff] %v12671_v53 }
 0xba4   : > { %13984 = vst [vmem:[#allocation45_spill] sm:$0xff] %v12669_v0  ;;  %v12675_v37 = vpop.permute.xlu1 %7788 }
 0xba5   : > { %v12673_v27 = vpop.permute.xlu0 %7786 }
 0xbb1   : > { %v7969_v18 = vpop.permute.xlu1 %7968 }
 0xbb2   : > { %v7965_v59 = vpop.permute.xlu0 %7964  ;;  %v8014_v31 = vmul.f32 %v12309_v62, %v7969_v18  ;;  %v8015_v12 = vmul.f32 %v12312_v15, %v7969_v18  ;;  %v8016_v14 = vmul.f32 %v12684_v39, %v7969_v18 }
 0xbb3   : > { %v8011_v16 = vmul.f32 %v12316_v28, %v7965_v59  ;;  %v8012_v50 = vmul.f32 %v12319_v58, %v7965_v59  ;;  %v8013_v52 = vmul.f32 %v12679_v56, %v7965_v59 }
 0xbb4   : > { %v8088_v28 = vrot.slane %v8014_v31, 2  ;;  %v8089_v40 = vrot.slane %v8015_v12, 2  ;;  %v8091_v58 = vrot.slane %v8016_v14, 2 }
 0xbb5   : > { %v8083_v54 = vrot.slane %v8011_v16, 2  ;;  %v8084_v30 = vrot.slane %v8012_v50, 2  ;;  %v8086_v32 = vrot.slane %v8013_v52, 2  ;;  %v7973_v26 = vpop.permute.xlu1 %7972 }
 0xbb6   : > { %v7977_v20 = vpop.permute.xlu0 %7976  ;;  %v8017_v9 = vmul.f32 %v12323_v38, %v7973_v26  ;;  %v8018_v55 = vmul.f32 %v12326_v47, %v7973_v26  ;;  %v8019_v62 = vmul.f32 %v12483_v5, %v7973_v26  ;;  %v8092_v59 = vsel %vm3809_vm6, %v8089_v40, %v8091_v58 }
 0xbb7   : > { %v8087_v15 = vsel %vm3809_vm6, %v8084_v30, %v8086_v32  ;;  %v8085_v19 = vsel %vm3809_vm6, %v8083_v54, %v8084_v30  ;;  %v8020_v61 = vmul.f32 %v12335_v10, %v7977_v20  ;;  %v8021_v6 = vmul.f32 %v12338_v60, %v7977_v20 }
 0xbb8   : > { %8145 = vrot.lane.b32.xlu0 %v8087_v15, %s8836_s17  ;;  %8143 = vrot.lane.b32.xlu1 %v8085_v19, %s8836_s17  ;;  %v8022_v38 = vmul.f32 %v12696_v1, %v7977_v20  ;;  %v8093_v47 = vrot.slane %v8017_v9, 2  ;;  %v8094_v29 = vrot.slane %v8018_v55, 2  ;;  %v8096_v5 = vrot.slane %v8019_v62, 2  ;;  %v13986_v20 = vld [vmem:[#allocation30_spill] sm:$0xff] }
 0xbb9   : > { %v7981_v44 = vpop.permute.xlu1 %7980  ;;  %v8090_v18 = vsel %vm3809_vm6, %v8088_v28, %v8089_v40  ;;  %v8098_v10 = vrot.slane %v8020_v61, 2  ;;  %v8099_v50 = vrot.slane %v8021_v6, 2  ;;  %v12714_v28 = vld [vmem:[#allocation2 + $0x88] sm:$0x3] }
 0xbba   : > { %v7985_v13 = vpop.permute.xlu0 %7984  ;;  %v8101_v60 = vrot.slane %v8022_v38, 2  ;;  %v8023_v52 = vmul.f32 %v12345_v43, %v7981_v44  ;;  %v8024_v31 = vmul.f32 %v12348_v23, %v7981_v44  ;;  %v8025_v12 = vmul.f32 %v12503_v22, %v7981_v44 }
 0xbbb   : > { %v8097_v14 = vsel %vm3809_vm6, %v8094_v29, %v8096_v5  ;;  %v8095_v54 = vsel %vm3809_vm6, %v8093_v47, %v8094_v29  ;;  %v8026_v32 = vmul.f32 %v12356_v8, %v7985_v13  ;;  %v8027_v26 = vmul.f32 %v13986_v20, %v7985_v13  ;;  %v8239_v8 = vld [vmem:[%s13243_s6] sm:$0xff] }
 0xbbc   : > { %8149 = vrot.lane.b32.xlu0 %v8092_v59, %s8836_s17  ;;  %8147 = vrot.lane.b32.xlu1 %v8090_v18, %s8836_s17  ;;  %v8028_v43 = vmul.f32 %v12714_v28, %v7985_v13  ;;  %v8103_v23 = vrot.slane %v8023_v52, 2  ;;  %v8104_v22 = vrot.slane %v8024_v31, 2  ;;  %v8106_v40 = vrot.slane %v8025_v12, 2  ;;  %v13987_v5 = vld [vmem:[#allocation3_spill] sm:$0xff]  ;;  %v13988_v59 = vld [vmem:[#allocation29_spill] sm:$0xff] }
 0xbbd   : > { %v7989_v58 = vpop.permute.xlu1 %7988  ;;  %v8102_v9 = vsel %vm3809_vm6, %v8099_v50, %v8101_v60  ;;  %v8100_v55 = vsel %vm3809_vm6, %v8098_v10, %v8099_v50  ;;  %v8108_v15 = vrot.slane %v8026_v32, 2  ;;  %v8109_v19 = vrot.slane %v8027_v26, 2  ;;  %v13989_v10 = vld [vmem:[#allocation116_spill] sm:$0xff]  ;;  %v12736_v60 = vld [vmem:[#allocation2 + $0xb8] sm:$0x3] }
 0xbbe   : > { %v7993_v16 = vpop.permute.xlu0 %7992  ;;  %v8111_v13 = vrot.slane %v8028_v43, 2  ;;  %v8029_v61 = vmul.f32 %v12367_v25, %v7989_v58  ;;  %v8030_v6 = vmul.f32 %v12370_v49, %v7989_v58  ;;  %v8031_v38 = vmul.f32 %v12541_v11, %v7989_v58 }
 0xbbf   : > { %v8107_v47 = vsel %vm3809_vm6, %v8104_v22, %v8106_v40  ;;  %v8105_v29 = vsel %vm3809_vm6, %v8103_v23, %v8104_v22  ;;  %v8250_v44 = vrot.slane %v8239_v8, %v13987_v5  ;;  %v8032_v18 = vmul.f32 %v13988_v59, %v7993_v16 }
 0xbc0   : > { %8153 = vrot.lane.b32.xlu0 %v8097_v14, %s8836_s17  ;;  %8151 = vrot.lane.b32.xlu1 %v8095_v54, %s8836_s17  ;;  %v8033_v50 = vmul.f32 %v13989_v10, %v7993_v16  ;;  %v8034_v25 = vmul.f32 %v12736_v60, %v7993_v16  ;;  %v8113_v49 = vrot.slane %v8029_v61, 2  ;;  %v8114_v52 = vrot.slane %v8030_v6, 2  ;;  %v8618_v10 = vld.sshfl [vmem:[%s13243_s6 + $0x8] sm:$0x33 pattern:$0x75316420] }
 0xbc1   : > { %v8116_v31 = vrot.slane %v8031_v38, 2  ;;  %v8112_v12 = vsel %vm3809_vm6, %v8109_v19, %v8111_v13  ;;  %v8110_v14 = vsel %vm3809_vm6, %v8108_v15, %v8109_v19  ;;  %v8258_v54 = vcombine.high %v8250_v44, %v8250_v44  ;;  %v13990_v13 = vld [vmem:[#allocation4_spill] sm:$0xff] }
 0xbc2   : > { %v12710_v30 = vpop.permute.xlu0 %8000  ;;  %v8243_v32 = vcombine.high %v8239_v8, %v8239_v8  ;;  %v8118_v20 = vrot.slane %v8032_v18, 2  ;;  %v8119_v43 = vrot.slane %v8033_v50, 2  ;;  %v8121_v16 = vrot.slane %v8034_v25, 2  ;;  %v13991_v25 = vld [vmem:[#allocation6_spill] sm:$0xff] }
 0xbc3   : > { %v8117_v23 = vsel %vm3809_vm6, %v8114_v52, %v8116_v31  ;;  %v8115_v22 = vsel %vm3809_vm6, %v8113_v49, %v8114_v52  ;;  %v8280_v40 = vrot.slane %v8258_v54, %v13987_v5  ;;  %v8266_v58 = vrot.slane %v8250_v44, %v13987_v5  ;;  %v13992_v49 = vld [vmem:[#allocation146_spill] sm:$0xff]  ;;  %v13993_v31 = vld [vmem:[#allocation41_spill] sm:$0xff] }
 0xbc4   : > { %8157 = vrot.lane.b32.xlu0 %v8102_v9, %s8836_s17  ;;  %8155 = vrot.lane.b32.xlu1 %v8100_v55, %s8836_s17  ;;  %v8257_v9 = vrot.slane %v8243_v32, %v13987_v5  ;;  %v8122_v8 = vsel %vm3809_vm6, %v8119_v43, %v8121_v16  ;;  %v8120_v15 = vsel %vm3809_vm6, %v8118_v20, %v8119_v43 }
 0xbc5   : > { %v8288_v19 = vcombine.high %v8266_v58, %v8266_v58  ;;  %v8323_v61 = vrot.slane %v8280_v40, %v13990_v13  ;;  %v8319_v6 = vrot.slane %v8266_v58, %v13990_v13  ;;  %v8290_v44 = vcombine.high %v8280_v40, %v8280_v40 }
 0xbc6   : > { %v12721_v62 = vpop.permute.xlu0 %8008  ;;  %v8273_v38 = vrot.slane %v8257_v9, %v13987_v5  ;;  %v8259_v50 = vcombine.high %v8257_v9, %v8257_v9  ;;  %v6135_v52 = vmul.f32 %v13992_v49, %v13991_v25  ;;  %v8306_v20 = vrot.slane %v8618_v10, %v13987_v5  ;;  %v13994_v9 = vld [vmem:[#allocation159_spill] sm:$0xff] }
 0xbc7   : > { %v8331_v16 = vrot.slane %v8290_v44, %v13990_v13 }
 0xbc8   : > { %8161 = vrot.lane.b32.xlu0 %v8107_v47, %s8836_s17  ;;  %8159 = vrot.lane.b32.xlu1 %v8105_v29, %s8836_s17  ;;  %v8327_v29 = vrot.slane %v8288_v19, %v13990_v13  ;;  %v8335_v59 = vrot.slane %v8273_v38, %v13990_v13  ;;  %v8289_v18 = vcombine.high %v8273_v38, %v8273_v38 }
 0xbc9   : > { %v8314_v38 = vcombine.high %v8306_v20, %v8306_v20 }
 0xbca   : > { %v8343_v43 = vrot.slane %v8289_v18, %v13990_v13  ;;  %v8299_v18 = vcombine.high %v8618_v10, %v8618_v10 }
 0xbcb   : > { %v12739_v11 = vpop.permute.xlu0 %5204 }
 0xbcc   : > { %8165 = vrot.lane.b32.xlu0 %v8112_v12, %s8836_s17  ;;  %8163 = vrot.lane.b32.xlu1 %v8110_v14, %s8836_s17  ;;  %v6136_v12 = vmul.f32 %v13993_v31, %v13991_v25  ;;  %v12774_v14 = vld [vmem:[#allocation2 + $0x118] sm:$0x3] }
 0xbcd   : > { %v6137_v54 = vmul.f32 %v12774_v14, %v13991_v25  ;;  %v7292_v25 = vmul.f32 %v12774_v14, %v13994_v9 }
 0xbce   : > { %v6230_v40 = vrot.slane %v6136_v12, 1 }
 0xbcf   : > { %v12745_v26 = vpop.permute.xlu0 %5212  ;;  %v6232_v58 = vrot.slane %v6137_v54, 1  ;;  %v13996_v54 = vld [vmem:[#allocation113_spill] sm:$0xff] }
 0xbd0   : > { %8169 = vrot.lane.b32.xlu0 %v8117_v23, %s8836_s17  ;;  %8167 = vrot.lane.b32.xlu1 %v8115_v22, %s8836_s17  ;;  %v8287_v23 = vrot.slane %v8259_v50, %v13987_v5  ;;  %v6229_v22 = vrot.slane %v6135_v52, 1  ;;  %v7291_v50 = vmul.f32 %v13993_v31, %v13994_v9  ;;  %v13995_v52 = vld [vmem:[#allocation110_spill] sm:$0xff] }
 0xbd2   : > { %v8339_v44 = vrot.slane %v8287_v23, %v13990_v13  ;;  %v6231_v53 = vsel %vm2653_vm5, %v6229_v22, %v6230_v40  ;;  %v7385_v22 = vrot.slane %v7291_v50, 2  ;;  %v14004_v50 = vld [vmem:[#allocation144_spill] sm:$0xff] }
 0xbd3   : > { %v12754_v55 = vpop.permute.xlu0 %5220 }
 0xbd4   : > { %8173 = vrot.lane.b32.xlu0 %v8122_v8, %s8836_s17  ;;  %8171 = vrot.lane.b32.xlu1 %v8120_v15, %s8836_s17  ;;  %v7290_v8 = vmul.f32 %v13992_v49, %v13994_v9  ;;  %v8359_v9 = vrot.slane %v8314_v38, %v13990_v13  ;;  %v14002_v38 = vld [vmem:[#allocation56_spill] sm:$0xff] }
 0xbd6   : > { %v7384_v0 = vrot.slane %v7290_v8, 2 }
 0xbd7   : > { %v12763_v47 = vpop.permute.xlu0 %5228 }
 0xbd8   : > { %8369 = vperm.xlu0 %8692, %v8323_v61   ;;  %8365 = vperm.xlu1 %8693, %v8319_v6   ;;  %v8351_v6 = vrot.slane %v8306_v20, %v13990_v13  ;;  %v6233_v20 = vsel %vm2653_vm5, %v6230_v40, %v6232_v58 }
 0xbdb   : > { %v12778_v32 = vpop.permute.xlu0 %5236 }
 0xbdc   : > { %8381 = vperm.xlu0 %8692, %v8335_v59   ;;  %8373 = vperm.xlu1 %8693, %v8327_v29   ;;  %v7997_v29 = vpop.permute.xlu1 %7996  ;;  %v8291_v59 = vcombine.high %v8287_v23, %v8287_v23  ;;  %v13997_v23 = vld [vmem:[#allocation100_spill] sm:$0xff] }
 0xbdf   : > { %v5245_v15 = vpop.permute.xlu0 %5244 }
 0xbe0   : > { %v5269_v19 = vmul.f32 %v13992_v49, %v5245_v15  ;;  %v5270_v61 = vmul.f32 %v13993_v31, %v5245_v15  ;;  %8389 = vperm.xlu0 %8692, %v8343_v43   ;;  %8377 = vperm.xlu1 %8693, %v8331_v16   ;;  %v8035_v43 = vmul.f32 %v12389_v21, %v7997_v29  ;;  %v13999_v21 = vld [vmem:[#allocation115_spill] sm:$0xff] }
 0xbe1   : > { %v8036_v16 = vmul.f32 %v12392_v24, %v7997_v29  ;;  %v8038_v24 = vmul.f32 %v13999_v21, %v12710_v30 }
 0xbe2   : > { %v5610_v12 = vadd.f32 %v13995_v52, %v5269_v19  ;;  %v5611_v15 = vadd.f32 %v13996_v54, %v5270_v61  ;;  %v8347_v19 = vrot.slane %v8291_v59, %v13990_v13  ;;  %v8313_v61 = vrot.slane %v8299_v18, %v13987_v5 }
 0xbe3   : > { %v7387_v52 = vrot.slane %v7292_v25, 2  ;;  %v8124_v8 = vrot.slane %v8036_v16, 2  ;;  %v7386_v18 = vsel %vm3809_vm6, %v7384_v0, %v7385_v22 }
 0xbe4   : > { %v5927_v10 = vadd.f32 %v13997_v23, %v5610_v12  ;;  %v5928_v34 = vadd.f32 %v13998_v4, %v5611_v15  ;;  %8397 = vperm.xlu0 %8692, %v8351_v6   ;;  %8385 = vperm.xlu1 %8693, %v8339_v44   ;;  %v14000_v12 = vld [vmem:[#allocation147_spill] sm:$0xff]  ;;  %v8123_v4 = vrot.slane %v8035_v43, 2  ;;  %v8005_v6 = vpop.permute.xlu1 %8004  ;;  %v14001_v44 = vld [vmem:[#allocation17_spill] sm:$0xff]  ;;  %v8355_v5 = vrot.slane %v8313_v61, %v13990_v13 }
 0xbe5   : > { %v8039_v54 = vmul.f32 %v14000_v12, %v12710_v30  ;;  %v8315_v59 = vcombine.high %v8313_v61, %v8313_v61  ;;  %v8128_v43 = vrot.slane %v8038_v24, 2  ;;  %v8043_v12 = vmul.f32 %v12617_v45, %v8005_v6 }
 0xbe6   : > { %v6280_v40 = vadd.f32 %v6231_v53, %v5927_v10  ;;  %v6281_v58 = vadd.f32 %v6233_v20, %v5928_v34  ;;  %v14003_v53 = vld [vmem:[#allocation133_spill] sm:$0xff]  ;;  %v7388_v20 = vsel %vm3809_vm6, %v7385_v22, %v7387_v52  ;;  %v8037_v10 = vmul.f32 %v12579_v3, %v7997_v29  ;;  %v12828_v3 = vld [vmem:[#allocation2 + $0xe8] sm:$0x3] }
 0xbe7   : > { %v8129_v16 = vrot.slane %v8039_v54, 2  ;;  %v8363_v0 = vrot.slane %v8315_v59, %v13990_v13  ;;  %14007 = vst [vmem:[#allocation49_spill] sm:$0xff] %v12828_v3  ;;  %v8044_v29 = vmul.f32 %v13992_v49, %v12721_v62  ;;  %v8045_v52 = vmul.f32 %v13993_v31, %v12721_v62 }
 0xbe8   : > { %v6681_v15 = vadd.f32 %v14001_v44, %v6280_v40  ;;  %v6682_v23 = vadd.f32 %v14002_v38, %v6281_v58  ;;  %8405 = vperm.xlu0 %8692, %v8359_v9   ;;  %8393 = vperm.xlu1 %8693, %v8347_v19   ;;  %v8041_v40 = vmul.f32 %v12414_v36, %v8005_v6  ;;  %v8136_v31 = vrot.slane %v8043_v12, 2 }
 0xbe9   : > { %v8042_v9 = vmul.f32 %v12417_v51, %v8005_v6  ;;  %v8125_v19 = vsel %vm3809_vm6, %v8123_v4, %v8124_v8  ;;  %v8040_v36 = vmul.f32 %v12828_v3, %v12710_v30  ;;  %v8126_v51 = vrot.slane %v8037_v10, 2 }
 0xbea   : > { %v7082_v34 = vadd.f32 %v14003_v53, %v6681_v15  ;;  %v7083_v25 = vadd.f32 %v14004_v50, %v6682_v23  ;;  %v8133_v24 = vrot.slane %v8041_v40, 2  ;;  %v8138_v54 = vrot.slane %v8044_v29, 2  ;;  %v12853_v23 = vld [vmem:[#allocation2] sm:$0xff]  ;;  %v14009_v50 = vld [vmem:[#allocation68_spill] sm:$0xff] }
 0xbeb   : > { %v8134_v13 = vrot.slane %v8042_v9, 2  ;;  %v8139_v4 = vrot.slane %v8045_v52, 2  ;;  %v8127_v30 = vsel %vm3809_vm6, %v8124_v8, %v8126_v51  ;;  %v8046_v49 = vmul.f32 %v12774_v14, %v12721_v62  ;;  %v14008_v62 = vld [vmem:[#allocation130_spill] sm:$0xff]  ;;  %v12875_v40 = vld [vmem:[#allocation2 + $0x20] sm:$0xff] }
 0xbec   : > { %v7435_v58 = vadd.f32 %v7386_v18, %v7082_v34  ;;  %v7436_v61 = vadd.f32 %v7388_v20, %v7083_v25  ;;  %8401 = vperm.xlu1 %8693, %v8355_v5   ;;  %8175 = vrot.lane.b32.xlu0 %v8125_v19, %s8836_s17  ;;  %v6102_v14 = vmul.f32 %v12853_v23, %v14008_v62  ;;  %v12857_v5 = vld [vmem:[#allocation2 + $0x8] sm:$0xff]  ;;  %v14012_v51 = vld [vmem:[#allocation158_spill] sm:$0xff] }
 0xbed   : > { %v8135_v44 = vsel %vm3809_vm6, %v8133_v24, %v8134_v13  ;;  %v8140_v38 = vsel %vm3809_vm6, %v8138_v54, %v8139_v4  ;;  %v8141_v45 = vrot.slane %v8046_v49, 2  ;;  %v8137_v8 = vsel %vm3809_vm6, %v8134_v13, %v8136_v31  ;;  %v14013_v13 = vld [vmem:[#allocation114_spill] sm:$0xff]  ;;  %v12891_v31 = vld [vmem:[#allocation2 + $0x48] sm:$0xff] }
 0xbee   : > { %v12823_v21 = vadd.f32 %v12673_v27, %v7435_v58  ;;  %v12826_v22 = vadd.f32 %v12675_v37, %v7436_v61  ;;  %v8130_v27 = vsel %vm3809_vm6, %v8128_v43, %v8129_v16  ;;  %v8131_v37 = vrot.slane %v8040_v36, 2  ;;  %v12871_v43 = vld [vmem:[#allocation2 + $0x18] sm:$0xff] }
 0xbef   : > { %v8142_v6 = vsel %vm3809_vm6, %v8139_v4, %v8141_v45  ;;  %v6103_v59 = vmul.f32 %v12857_v5, %v14008_v62  ;;  %v6104_v53 = vmul.f32 %v12679_v56, %v14008_v62  ;;  %v5247_v25 = vmul.f32 %v12853_v23, %v14009_v50  ;;  %v12895_v45 = vld [vmem:[#allocation2 + $0x50] sm:$0xff]  ;;  %v12901_v62 = vld [vmem:[#allocation2 + $0x78] sm:$0xff] }
 0xbf0   : > { %14005 = vst [vmem:[#allocation25_spill] sm:$0xff] %v12823_v21  ;;  %14006 = vst [vmem:[#allocation46_spill] sm:$0xff] %v12826_v22  ;;  %8409 = vperm.xlu1 %8693, %v8363_v0   ;;  %8179 = vrot.lane.b32.xlu0 %v8130_v27, %s8836_s17  ;;  %v8132_v15 = vsel %vm3809_vm6, %v8129_v16, %v8131_v37  ;;  %v5248_v20 = vmul.f32 %v12857_v5, %v14009_v50  ;;  %v14010_v16 = vld [vmem:[#allocation99_spill] sm:$0xff]  ;;  %v6174_v19 = vrot.slane %v6102_v14, 1  ;;  %v14014_v37 = vld [vmem:[#allocation16_spill] sm:$0xff] }
 0xbf1   : > { %v6105_v10 = vmul.f32 %v12871_v43, %v14010_v16  ;;  %v6106_v9 = vmul.f32 %v12875_v40, %v14010_v16  ;;  %v6175_v58 = vrot.slane %v6103_v59, 1  ;;  %v6177_v61 = vrot.slane %v6104_v53, 1  ;;  %v14011_v0 = vld [vmem:[#allocation135_spill] sm:$0xff] }
 0xbf2   : > { %v5588_v36 = vadd.f32 %v14011_v0, %v5247_v25  ;;  %v5589_v29 = vadd.f32 %v14012_v51, %v5248_v20  ;;  %v6107_v54 = vmul.f32 %v12684_v39, %v14010_v16  ;;  %v14016_v14 = vld [vmem:[#allocation131_spill] sm:$0xff]  ;;  %v12911_v20 = vld [vmem:[#allocation2 + $0xa8] sm:$0xff]  ;;  %v12925_v51 = vld [vmem:[#allocation2 + $0xd8] sm:$0xff]  ;;  %v5249_v21 = vmul.f32 %v12871_v43, %v12739_v11 }
 0xbf3   : > { %v6179_v4 = vrot.slane %v6105_v10, 1  ;;  %v6176_v49 = vsel %vm2653_vm5, %v6174_v19, %v6175_v58  ;;  %v6117_v59 = vmul.f32 %v12901_v62, %v14016_v14  ;;  %v12905_v53 = vld [vmem:[#allocation2 + $0x80] sm:$0xff]  ;;  %v6119_v25 = vmul.f32 %v12714_v28, %v14016_v14 }
 0xbf4   : > { %8177 = vrot.lane.b32.xlu1 %v8127_v30, %s8836_s17  ;;  %8183 = vrot.lane.b32.xlu0 %v8135_v44, %s8836_s17  ;;  %v5906_v27 = vadd.f32 %v14013_v13, %v5589_v29  ;;  %v5905_v12 = vadd.f32 %v14014_v37, %v5588_v36  ;;  %v6180_v30 = vrot.slane %v6106_v9, 1  ;;  %v6178_v44 = vsel %vm2653_vm5, %v6175_v58, %v6177_v61  ;;  %v14017_v16 = vld [vmem:[#allocation27_spill] sm:$0xff]  ;;  %v12915_v9 = vld [vmem:[#allocation2 + $0xb0] sm:$0xff]  ;;  %v14018_v29 = vld [vmem:[#allocation28_spill] sm:$0xff] }
 0xbf5   : > { %v6118_v50 = vmul.f32 %v12905_v53, %v14016_v14  ;;  %v6123_v10 = vmul.f32 %v12911_v20, %v14017_v16  ;;  %v6124_v19 = vmul.f32 %v12915_v9, %v14017_v16  ;;  %v6182_v0 = vrot.slane %v6107_v54, 1  ;;  %v12929_v37 = vld [vmem:[#allocation2 + $0xe0] sm:$0xff] }
 0xbf6   : > { %v6125_v36 = vmul.f32 %v12736_v60, %v14017_v16  ;;  %v6129_v13 = vmul.f32 %v12925_v51, %v14018_v29  ;;  %v6259_v14 = vadd.f32 %v6178_v44, %v5906_v27  ;;  %v6258_v22 = vadd.f32 %v6176_v49, %v5905_v12 }
 0xbf7   : > { %v5250_v54 = vmul.f32 %v12875_v40, %v12739_v11  ;;  %v6199_v33 = vrot.slane %v6117_v59, 1  ;;  %v6200_v42 = vrot.slane %v6118_v50, 1  ;;  %v6202_v63 = vrot.slane %v6119_v25, 1  ;;  %v14022_v59 = vld [vmem:[#allocation136_spill] sm:$0xff] }
 0xbf8   : > { %8181 = vrot.lane.b32.xlu1 %v8132_v15, %s8836_s17  ;;  %8187 = vrot.lane.b32.xlu0 %v8140_v38, %s8836_s17  ;;  %v14015_v15 = vld [vmem:[#allocation79_spill] sm:$0xff]  ;;  %v6209_v57 = vrot.slane %v6123_v10, 1  ;;  %v6210_v17 = vrot.slane %v6124_v19, 1  ;;  %v6212_v41 = vrot.slane %v6125_v36, 1  ;;  %v12941_v35 = vmul.f32 %v12828_v3, %v14018_v29 }
 0xbf9   : > { %v6111_v38 = vmul.f32 %v12891_v31, %v14015_v15  ;;  %v6219_v27 = vrot.slane %v6129_v13, 1  ;;  %v6181_v11 = vsel %vm2653_vm5, %v6179_v4, %v6180_v30  ;;  %v5591_v50 = vadd.f32 %v14022_v59, %v5250_v54 }
 0xbfa   : > { %14020 = vst [vmem:[#allocation153_spill] sm:$0xff] %v12941_v35  ;;  %v5253_v19 = vmul.f32 %v12891_v31, %v12745_v26  ;;  %v5254_v36 = vmul.f32 %v12895_v45, %v12745_v26  ;;  %v12974_v26 = vsel %vm2653_vm5, %v6210_v17, %v6212_v41 }
 0xbfb   : > { %v6189_v16 = vrot.slane %v6111_v38, 1  ;;  %v6183_v38 = vsel %vm2653_vm5, %v6180_v30, %v6182_v0  ;;  %v12965_v30 = vsel %vm2653_vm5, %v6199_v33, %v6200_v42  ;;  %v14026_v33 = vld [vmem:[#allocation117_spill] sm:$0xff] }
 0xbfc   : > { %8185 = vrot.lane.b32.xlu1 %v8137_v8, %s8836_s17  ;;  %v6112_v8 = vmul.f32 %v12895_v45, %v14015_v15 }
 0xbfe   : > { %v6190_v48 = vrot.slane %v6112_v8, 1  ;;  %v14021_v8 = vld [vmem:[#allocation74_spill] sm:$0xff] }
 0xc00   : > { %8189 = vrot.lane.b32.xlu1 %v8142_v6, %s8836_s17  ;;  %v6113_v6 = vmul.f32 %v12696_v1, %v14015_v15  ;;  %v12933_v15 = vmul.f32 %v12929_v37, %v14018_v29  ;;  %v6191_v25 = vsel %vm2653_vm5, %v6189_v16, %v6190_v48  ;;  %v14023_v29 = vld [vmem:[#allocation145_spill] sm:$0xff]  ;;  %s13087_s17 = sshll.u32 %s14100_s10, 6 }
 0xc01   : > { %v7257_v13 = vmul.f32 %v12853_v23, %v14023_v29  ;;  %v7258_v4 = vmul.f32 %v12857_v5, %v14023_v29  ;;  %v14024_v5 = vld [vmem:[#allocation5_spill] sm:$0xff]  ;;  %s13102_s15 = scalar_lea.vmem %s13244_s7, %s13087_s17  ;;  %s13133_s23 = scalar_lea.vmem %s13245_s8, %s13087_s17 }
 0xc02   : > { %14019 = vst [vmem:[#allocation152_spill] sm:$0xff] %v12933_v15  ;;  %v6192_v7 = vrot.slane %v6113_v6, 1  ;;  %v13364_v12 = vrot.slane %v12933_v15, 1  ;;  %v5590_v6 = vadd.f32 %v14021_v8, %v5249_v21  ;;  %v7259_v21 = vmul.f32 %v12679_v56, %v14023_v29  ;;  %v14025_v56 = vld [vmem:[#allocation104_spill] sm:$0xff]  ;;  %v14027_v8 = vld [vmem:[#allocation15_spill] sm:$0xff]  ;;  %v14030_v29 = vld [vmem:[#allocation81_spill] sm:$0xff]  ;;  %s13207_s22 = scalar_lea.vmem %s13246_s9, %s13087_s17 }
 0xc03   : > { %v6660_v0 = vadd.f32 %v14024_v5, %v6259_v14  ;;  %v6659_v54 = vadd.f32 %v14025_v56, %v6258_v22  ;;  %v7329_v22 = vrot.slane %v7257_v13, 2  ;;  %v7330_v5 = vrot.slane %v7258_v4, 2  ;;  %v14031_v56 = vld [vmem:[#allocation18_spill] sm:$0xff] }
 0xc04   : > { %v6193_v10 = vsel %vm2653_vm5, %v6190_v48, %v6192_v7  ;;  %v12968_v7 = vsel %vm2653_vm5, %v6200_v42, %v6202_v63  ;;  %v12971_v48 = vsel %vm2653_vm5, %v6209_v57, %v6210_v17  ;;  %v12979_v23 = vsel %vm2653_vm5, %v6219_v27, %v13364_v12  ;;  %v14028_v42 = vld [vmem:[#allocation59_spill] sm:$0xff]  ;;  %v14029_v17 = vld [vmem:[#allocation78_spill] sm:$0xff] }
 0xc05   : > { %v5907_v16 = vadd.f32 %v14026_v33, %v5590_v6  ;;  %v5908_v63 = vadd.f32 %v14027_v8, %v5591_v50  ;;  %v12987_v57 = vmul.f32 %v12871_v43, %v14028_v42  ;;  %v7261_v41 = vmul.f32 %v12875_v40, %v14028_v42  ;;  %v14032_v33 = vld [vmem:[#allocation10_spill] sm:$0xff] }
 0xc06   : > { %v5594_v59 = vadd.f32 %v14029_v17, %v5253_v19  ;;  %v5595_v27 = vadd.f32 %v14030_v29, %v5254_v36  ;;  %v7332_v6 = vrot.slane %v7259_v21, 2  ;;  %v7262_v50 = vmul.f32 %v12684_v39, %v14028_v42  ;;  %v14033_v36 = vld [vmem:[#allocation60_spill] sm:$0xff]  ;;  %v14035_v29 = vld [vmem:[#allocation126_spill] sm:$0xff] }
 0xc07   : > { %v7060_v43 = vadd.f32 %v14031_v56, %v6659_v54  ;;  %v7061_v8 = vadd.f32 %v14032_v33, %v6660_v0  ;;  %v5257_v40 = vmul.f32 %v12901_v62, %v12754_v55  ;;  %v5258_v19 = vmul.f32 %v12905_v53, %v12754_v55  ;;  %v14034_v54 = vld [vmem:[#allocation39_spill] sm:$0xff]  ;;  %v14036_v15 = vld [vmem:[#allocation86_spill] sm:$0xff] }
 0xc08   : > { %v13007_v17 = vmul.f32 %v12891_v31, %v14033_v36  ;;  %v7267_v13 = vmul.f32 %v12895_v45, %v14033_v36  ;;  %v6260_v4 = vadd.f32 %v6181_v11, %v5907_v16  ;;  %v6261_v21 = vadd.f32 %v6183_v38, %v5908_v63  ;;  %v14037_v45 = vld [vmem:[#allocation89_spill] sm:$0xff] }
 0xc09   : > { %v7334_v39 = vrot.slane %v12987_v57, 2  ;;  %v7268_v0 = vmul.f32 %v12696_v1, %v14033_v36  ;;  %v5911_v42 = vadd.f32 %v14034_v54, %v5594_v59  ;;  %v5912_v56 = vadd.f32 %v14035_v29, %v5595_v27  ;;  %v14039_v59 = vld [vmem:[#allocation103_spill] sm:$0xff] }
 0xc0a   : > { %v7335_v33 = vrot.slane %v7261_v41, 2  ;;  %v7337_v55 = vrot.slane %v7262_v50, 2  ;;  %v7331_v3 = vsel %vm3809_vm6, %v7329_v22, %v7330_v5  ;;  %v7333_v31 = vsel %vm3809_vm6, %v7330_v5, %v7332_v6  ;;  %v14040_v22 = vld [vmem:[#allocation7_spill] sm:$0xff] }
 0xc0b   : > { %v5598_v35 = vadd.f32 %v14036_v15, %v5257_v40  ;;  %v5599_v11 = vadd.f32 %v14037_v45, %v5258_v19  ;;  %v5261_v38 = vmul.f32 %v12911_v20, %v12763_v47  ;;  %v5262_v1 = vmul.f32 %v12915_v9, %v12763_v47  ;;  %v14041_v6 = vld [vmem:[#allocation91_spill] sm:$0xff]  ;;  %v14043_v45 = vld [vmem:[#allocation118_spill] sm:$0xff] }
 0xc0c   : > { %v7344_v57 = vrot.slane %v13007_v17, 2  ;;  %v7345_v41 = vrot.slane %v7267_v13, 2  ;;  %v6662_v27 = vadd.f32 %v14039_v59, %v6261_v21  ;;  %v6661_v5 = vadd.f32 %v14040_v22, %v6260_v4  ;;  %v14042_v17 = vld [vmem:[#allocation20_spill] sm:$0xff]  ;;  %v14044_v59 = vld [vmem:[#allocation93_spill] sm:$0xff] }
 0xc0d   : > { %v7347_v15 = vrot.slane %v7268_v0, 2  ;;  %v7272_v50 = vmul.f32 %v12901_v62, %v14041_v6  ;;  %v6264_v40 = vadd.f32 %v6191_v25, %v5911_v42  ;;  %v6265_v19 = vadd.f32 %v6193_v10, %v5912_v56  ;;  %v14045_v0 = vld [vmem:[#allocation94_spill] sm:$0xff]  ;;  %v14047_v25 = vld [vmem:[#allocation88_spill] sm:$0xff]  ;;  %v14050_v56 = vld [vmem:[#allocation51_spill] sm:$0xff] }
 0xc0e   : > { %v7273_v47 = vmul.f32 %v12905_v53, %v14041_v6  ;;  %v7274_v36 = vmul.f32 %v12714_v28, %v14041_v6  ;;  %v7413_v54 = vadd.f32 %v7331_v3, %v7060_v43  ;;  %v7414_v29 = vadd.f32 %v7333_v31, %v7061_v8  ;;  %v14048_v3 = vld [vmem:[#allocation87_spill] sm:$0xff]  ;;  %v14049_v8 = vld [vmem:[#allocation12_spill] sm:$0xff] }
 0xc0f   : > { %v5915_v13 = vadd.f32 %v14042_v17, %v5598_v35  ;;  %v5916_v21 = vadd.f32 %v14043_v45, %v5599_v11  ;;  %v5602_v4 = vadd.f32 %v14044_v59, %v5261_v38  ;;  %v5603_v22 = vadd.f32 %v14045_v0, %v5262_v1 }
 0xc10   : > { %v7063_v28 = vadd.f32 %v14047_v25, %v6662_v27  ;;  %v7062_v10 = vadd.f32 %v14048_v3, %v6661_v5  ;;  %v7354_v43 = vrot.slane %v7272_v50, 2  ;;  %v6666_v42 = vadd.f32 %v14049_v8, %v6265_v19  ;;  %v14052_v50 = vld [vmem:[#allocation128_spill] sm:$0xff]  ;;  %v14056_v3 = vld [vmem:[#allocation31_spill] sm:$0xff] }
 0xc11   : > { %v6665_v31 = vadd.f32 %v14050_v56, %v6264_v40  ;;  %v7355_v38 = vrot.slane %v7273_v47, 2  ;;  %v7338_v1 = vsel %vm3809_vm6, %v7335_v33, %v7337_v55  ;;  %v7336_v27 = vsel %vm3809_vm6, %v7334_v39, %v7335_v33  ;;  %v14053_v33 = vld [vmem:[#allocation22_spill] sm:$0xff]  ;;  %v14054_v55 = vld [vmem:[#allocation21_spill] sm:$0xff]  ;;  %v14055_v25 = vld [vmem:[#allocation84_spill] sm:$0xff] }
 0xc12   : > { %v6268_v5 = vadd.f32 %v12965_v30, %v5915_v13  ;;  %v6269_v6 = vadd.f32 %v12968_v7, %v5916_v21  ;;  %v5920_v19 = vadd.f32 %v14052_v50, %v5603_v22  ;;  %v7416_v45 = vadd.f32 %v7338_v1, %v7063_v28  ;;  %v14063_v50 = vld [vmem:[#allocation35_spill] sm:$0xff] }
 0xc13   : > { %v7415_v47 = vadd.f32 %v7336_v27, %v7062_v10  ;;  %v5265_v39 = vmul.f32 %v12925_v51, %v12778_v32  ;;  %v7067_v30 = vadd.f32 %v14053_v33, %v6666_v42  ;;  %v7066_v7 = vadd.f32 %v14054_v55, %v6665_v31 }
 0xc14   : > { %v7348_v13 = vsel %vm3809_vm6, %v7345_v41, %v7347_v15  ;;  %v7346_v21 = vsel %vm3809_vm6, %v7344_v57, %v7345_v41  ;;  %v6273_v22 = vadd.f32 %v12974_v26, %v5920_v19  ;;  %v6670_v28 = vadd.f32 %v14055_v25, %v6269_v6  ;;  %v14057_v15 = vld [vmem:[#allocation64_spill] sm:$0xff]  ;;  %v14058_v41 = vld [vmem:[#allocation54_spill] sm:$0xff]  ;;  %v14061_v26 = vld [vmem:[#allocation123_spill] sm:$0xff] }
 0xc15   : > { %v6669_v10 = vadd.f32 %v14056_v3, %v6268_v5  ;;  %v7814_v57 = vadd.f32 %v14057_v15, %v7413_v54  ;;  %v7815_v56 = vadd.f32 %v14058_v41, %v7414_v29  ;;  %v7420_v1 = vadd.f32 %v7348_v13, %v7067_v30  ;;  %v14062_v54 = vld [vmem:[#allocation36_spill] sm:$0xff]  ;;  %v14070_v41 = vld [vmem:[#allocation95_spill] sm:$0xff] }
 0xc16   : > { %v7419_v27 = vadd.f32 %v7346_v21, %v7066_v7  ;;  %v7071_v29 = vadd.f32 %v14062_v54, %v6670_v28  ;;  %v5266_v7 = vmul.f32 %v12929_v37, %v12778_v32  ;;  %v14066_v13 = vld [vmem:[#allocation76_spill] sm:$0xff]  ;;  %v14071_v32 = vld [vmem:[#allocation142_spill] sm:$0xff] }
 0xc17   : > { %v7070_v19 = vadd.f32 %v14063_v50, %v6669_v10  ;;  %v14068_v3 = vld [vmem:[#allocation148_spill] sm:$0xff] }
 0xc18   : > { %v7820_v25 = vadd.f32 %v12566_v2, %v7419_v27  ;;  %v14069_v15 = vld [vmem:[#allocation96_spill] sm:$0xff] }
 0xc2a   : > { %v12863_v34 = vpop.permute.xlu0 %8145  ;;  %v12865_v18 = vpop.permute.xlu1 %8143 }
 0xc2b   : > { %v8216_v5 = vadd.f32 %v12863_v34, %v7815_v56  ;;  %v8215_v6 = vadd.f32 %v12865_v18, %v7814_v57 }
 0xc2e   : > { %v12881_v52 = vpop.permute.xlu0 %8149  ;;  %v12883_v24 = vpop.permute.xlu1 %8147 }
 0xc32   : > { %v12919_v58 = vpop.permute.xlu0 %8153  ;;  %v12921_v61 = vpop.permute.xlu1 %8151 }
 0xc33   : > { %v8219_v10 = vadd.f32 %v12921_v61, %v14068_v3  ;;  %v14072_v61 = vld [vmem:[#allocation143_spill] sm:$0xff] }
 0xc36   : > { %v12944_v44 = vpop.permute.xlu0 %8157  ;;  %v12946_v49 = vpop.permute.xlu1 %8155 }
 0xc3a   : > { %v12993_v12 = vpop.permute.xlu0 %8161  ;;  %v12995_v14 = vpop.permute.xlu1 %8159 }
 0xc3b   : > { %v8224_v57 = vadd.f32 %v12993_v12, %v14069_v15  ;;  %v8223_v56 = vadd.f32 %v12995_v14, %v14070_v41 }
 0xc3e   : > { %v13024_v16 = vpop.permute.xlu0 %8165  ;;  %v13026_v63 = vpop.permute.xlu1 %8163 }
 0xc3f   : > { %14038 = vst [vmem:[#allocation26_spill] sm:$0xff] %v13026_v63  ;;  %v14046_v63 = vld [vmem:[#allocation92_spill] sm:$0xff] }
 0xc40   : > { %v13043_v62 = vmul.f32 %v12911_v20, %v14046_v63  ;;  %v13047_v53 = vmul.f32 %v12915_v9, %v14046_v63  ;;  %v13053_v35 = vmul.f32 %v12736_v60, %v14046_v63  ;;  %v7357_v9 = vrot.slane %v7274_v36, 2  ;;  %v14051_v60 = vld [vmem:[#allocation164_spill] sm:$0xff] }
 0xc41   : > { %v5919_v63 = vadd.f32 %v14051_v60, %v5602_v4  ;;  %v7356_v4 = vsel %vm3809_vm6, %v7354_v43, %v7355_v38  ;;  %v14059_v43 = vld [vmem:[#allocation33_spill] sm:$0xff] }
 0xc42   : > { %v13057_v11 = vpop.permute.xlu0 %8169  ;;  %v13059_v20 = vpop.permute.xlu1 %8167  ;;  %v7364_v40 = vrot.slane %v13043_v62, 2  ;;  %v7365_v17 = vrot.slane %v13047_v53, 2  ;;  %v7367_v36 = vrot.slane %v13053_v35, 2  ;;  %v7358_v59 = vsel %vm3809_vm6, %v7355_v38, %v7357_v9  ;;  %v14076_v62 = vld [vmem:[#allocation161_spill] sm:$0xff] }
 0xc43   : > { %v6272_v0 = vadd.f32 %v12971_v48, %v5919_v63  ;;  %v7817_v31 = vadd.f32 %v14059_v43, %v7416_v45  ;;  %v14060_v48 = vld [vmem:[#allocation34_spill] sm:$0xff]  ;;  %v5606_v9 = vadd.f32 %v14061_v26, %v5265_v39  ;;  %v14065_v39 = vld [vmem:[#allocation108_spill] sm:$0xff]  ;;  %v7424_v2 = vadd.f32 %v7358_v59, %v7071_v29 }
 0xc44   : > { %v7816_v38 = vadd.f32 %v14060_v48, %v7415_v47  ;;  %v14064_v45 = vld [vmem:[#allocation14_spill] sm:$0xff]  ;;  %v7368_v59 = vsel %vm3809_vm6, %v7365_v17, %v7367_v36 }
 0xc45   : > { %v8218_v60 = vadd.f32 %v12881_v52, %v7817_v31  ;;  %v6674_v47 = vadd.f32 %v14064_v45, %v6273_v22  ;;  %v6673_v34 = vadd.f32 %v14065_v39, %v6272_v0  ;;  %v5923_v21 = vadd.f32 %v14066_v13, %v5606_v9  ;;  %v14067_v0 = vld [vmem:[#allocation149_spill] sm:$0xff]  ;;  %v14083_v13 = vld [vmem:[#allocation151_spill] sm:$0xff] }
 0xc46   : > { %v13082_v8 = vpop.permute.xlu0 %8173  ;;  %v13084_v42 = vpop.permute.xlu1 %8171  ;;  %v8217_v63 = vadd.f32 %v12883_v24, %v7816_v38  ;;  %v7821_v22 = vadd.f32 %v12568_v46, %v7420_v1  ;;  %v8220_v28 = vadd.f32 %v12919_v58, %v14067_v0  ;;  %v7423_v46 = vadd.f32 %v7356_v4, %v7070_v19  ;;  %v14073_v9 = vld [vmem:[#allocation105_spill] sm:$0xff] }
 0xc47   : > { %v7075_v58 = vadd.f32 %v14071_v32, %v6674_v47  ;;  %v7074_v12 = vadd.f32 %v14072_v61, %v6673_v34  ;;  %v5607_v1 = vadd.f32 %v14073_v9, %v5266_v7  ;;  %v6276_v27 = vadd.f32 %v12979_v23, %v5923_v21  ;;  %v14075_v23 = vld [vmem:[#allocation38_spill] sm:$0xff]  ;;  %v14078_v19 = vld [vmem:[#allocation153_spill] sm:$0xff]  ;;  %v14079_v47 = vld [vmem:[#allocation160_spill] sm:$0xff] }
 0xc48   : > { %v7366_v4 = vsel %vm3809_vm6, %v7364_v40, %v7365_v17  ;;  %v8227_v35 = vadd.f32 %v13059_v20, %v14075_v23  ;;  %v7825_v53 = vadd.f32 %v14076_v62, %v7424_v2  ;;  %v14077_v40 = vld [vmem:[#allocation134_spill] sm:$0xff]  ;;  %v6222_v45 = vrot.slane %v14078_v19, 1 }
 0xc49   : > { %v7284_v39 = vmul.f32 %v12925_v51, %v14079_v47  ;;  %v7285_v34 = vmul.f32 %v12929_v37, %v14079_v47  ;;  %v14082_v51 = vld [vmem:[#allocation140_spill] sm:$0xff]  ;;  %v14095_v19 = vld [vmem:[#allocation42_spill] sm:$0xff] }
 0xc4b   : > { %v7375_v3 = vrot.slane %v7285_v34, 2  ;;  %v14096_v34 = vld [vmem:[#allocation25_spill] sm:$0xff] }
 0xc53   : > { %v8370_v18 = vpop.permute.xlu0 %8369  ;;  %v8366_v52 = vpop.permute.xlu1 %8365 }
 0xc54   : > { %v8414_v24 = vadd.f32 %v8370_v18, %v8217_v63  ;;  %v8415_v33 = vadd.f32 %v8370_v18, %v8218_v60  ;;  %v8412_v30 = vadd.f32 %v8366_v52, %v8215_v6  ;;  %v8413_v55 = vadd.f32 %v8366_v52, %v8216_v5  ;;  %v14074_v60 = vld [vmem:[#allocation37_spill] sm:$0xff]  ;;  %v14080_v18 = vld [vmem:[#allocation75_spill] sm:$0xff] }
 0xc55   : > { %v8222_v5 = vadd.f32 %v12944_v44, %v7821_v22  ;;  %v8221_v6 = vadd.f32 %v12946_v49, %v7820_v25  ;;  %v8228_v63 = vadd.f32 %v13057_v11, %v14074_v60  ;;  %v7824_v44 = vadd.f32 %v14077_v40, %v7423_v46  ;;  %v14084_v22 = vld [vmem:[#allocation57_spill] sm:$0xff]  ;;  %v14087_v46 = vld [vmem:[#allocation112_spill] sm:$0xff]  ;;  %v14092_v60 = vld [vmem:[#allocation111_spill] sm:$0xff] }
 0xc56   : > { %8439 = vst.msk [vmem:[%s13102_s15 + $0x10] sm:$0xff] %vm8436_vm8, %v8414_v24  ;;  %8440 = vst.msk [vmem:[%s13102_s15 + $0x18] sm:$0xff] %vm8436_vm8, %v8415_v33  ;;  %v7428_v49 = vadd.f32 %v7368_v59, %v7075_v58  ;;  %v7427_v11 = vadd.f32 %v7366_v4, %v7074_v12  ;;  %v5924_v52 = vadd.f32 %v14080_v18, %v5607_v1  ;;  %v14081_v33 = vld [vmem:[#allocation26_spill] sm:$0xff] }
 0xc57   : > { %8437 = vst.msk [vmem:[%s13102_s15] sm:$0xff] %vm8436_vm8, %v8412_v30  ;;  %8438 = vst.msk [vmem:[%s13102_s15 + $0x8] sm:$0xff] %vm8436_vm8, %v8413_v55  ;;  %v8382_v14 = vpop.permute.xlu0 %8381  ;;  %v8374_v43 = vpop.permute.xlu1 %8373  ;;  %v8226_v24 = vadd.f32 %v13024_v16, %v7825_v53  ;;  %v8225_v30 = vadd.f32 %v14081_v33, %v7824_v44  ;;  %v6677_v55 = vadd.f32 %v14082_v51, %v6276_v27  ;;  %v14090_v1 = vld [vmem:[#allocation150_spill] sm:$0xff]  ;;  %v14097_v51 = vld [vmem:[#allocation11_spill] sm:$0xff] }
 0xc58   : > { %v8420_v31 = vadd.f32 %v8382_v14, %v8223_v56  ;;  %v8421_v48 = vadd.f32 %v8382_v14, %v8224_v57  ;;  %v8416_v38 = vadd.f32 %v8374_v43, %v8219_v10  ;;  %v8417_v26 = vadd.f32 %v8374_v43, %v8220_v28  ;;  %v14085_v10 = vld [vmem:[#allocation152_spill] sm:$0xff]  ;;  %v14088_v43 = vld [vmem:[#allocation49_spill] sm:$0xff] }
 0xc59   : > { %v7829_v21 = vadd.f32 %v14083_v13, %v7428_v49  ;;  %v7828_v16 = vadd.f32 %v14084_v22, %v7427_v11  ;;  %v7374_v28 = vrot.slane %v7284_v39, 2  ;;  %v14086_v15 = vrot.slane %v14085_v10, 1  ;;  %v14098_v13 = vld [vmem:[#allocation46_spill] sm:$0xff] }
 0xc5a   : > { %8445 = vst.msk [vmem:[%s13133_s23] sm:$0xff] %vm8436_vm8, %v8420_v31  ;;  %8446 = vst.msk [vmem:[%s13133_s23 + $0x8] sm:$0xff] %vm8436_vm8, %v8421_v48  ;;  %v7078_v32 = vadd.f32 %v14087_v46, %v6677_v55  ;;  %v7286_v31 = vmul.f32 %v14088_v43, %v14079_v47 }
 0xc5b   : > { %8441 = vst.msk [vmem:[%s13102_s15 + $0x20] sm:$0xff] %vm8436_vm8, %v8416_v38  ;;  %8442 = vst.msk [vmem:[%s13102_s15 + $0x28] sm:$0xff] %vm8436_vm8, %v8417_v26  ;;  %v8390_v17 = vpop.permute.xlu0 %8389  ;;  %v8378_v20 = vpop.permute.xlu1 %8377  ;;  %v6223_v57 = vsel %vm2653_vm5, %v14086_v15, %v6222_v45  ;;  %v8230_v56 = vadd.f32 %v13082_v8, %v7829_v21  ;;  %v8229_v2 = vadd.f32 %v13084_v42, %v7828_v16  ;;  %v14089_v42 = vld [vmem:[#allocation138_spill] sm:$0xff] }
 0xc5c   : > { %v8424_v36 = vadd.f32 %v8390_v17, %v8227_v35  ;;  %v8425_v54 = vadd.f32 %v8390_v17, %v8228_v63  ;;  %v8418_v29 = vadd.f32 %v8378_v20, %v8221_v6  ;;  %v8419_v50 = vadd.f32 %v8378_v20, %v8222_v5  ;;  %v14091_v5 = vld [vmem:[#allocation119_spill] sm:$0xff]  ;;  %v14093_v17 = vld [vmem:[#allocation45_spill] sm:$0xff] }
 0xc5d   : > { %v6277_v41 = vadd.f32 %v6223_v57, %v5924_v52  ;;  %v7376_v48 = vsel %vm3809_vm6, %v7374_v28, %v7375_v3  ;;  %v7377_v59 = vrot.slane %v7286_v31, 2 }
 0xc5e   : > { %8449 = vst.msk [vmem:[%s13133_s23 + $0x20] sm:$0xff] %vm8436_vm8, %v8424_v36  ;;  %8450 = vst.msk [vmem:[%s13133_s23 + $0x28] sm:$0xff] %vm8436_vm8, %v8425_v54  ;;  %v7431_v8 = vadd.f32 %v7376_v48, %v7078_v32  ;;  %v14094_v36 = vld [vmem:[#allocation120_spill] sm:$0xff] }
 0xc5f   : > { %8443 = vst.msk [vmem:[%s13102_s15 + $0x30] sm:$0xff] %vm8436_vm8, %v8418_v29  ;;  %8444 = vst.msk [vmem:[%s13102_s15 + $0x38] sm:$0xff] %vm8436_vm8, %v8419_v50  ;;  %v8398_v7 = vpop.permute.xlu0 %8397  ;;  %v8386_v37 = vpop.permute.xlu1 %8385  ;;  %v6678_v38 = vadd.f32 %v14089_v42, %v6277_v41  ;;  %v7378_v53 = vsel %vm3809_vm6, %v7375_v3, %v7377_v59 }
 0xc60   : > { %v8422_v25 = vadd.f32 %v8386_v37, %v8225_v30  ;;  %v8423_v0 = vadd.f32 %v8386_v37, %v8226_v24  ;;  %v7832_v6 = vadd.f32 %v14091_v5, %v7431_v8 }
 0xc61   : > { %v7079_v63 = vadd.f32 %v14092_v60, %v6678_v38 }
 0xc62   : > { %8447 = vst.msk [vmem:[%s13133_s23 + $0x10] sm:$0xff] %vm8436_vm8, %v8422_v25  ;;  %8448 = vst.msk [vmem:[%s13133_s23 + $0x18] sm:$0xff] %vm8436_vm8, %v8423_v0 }
 0xc63   : > { %v8406_v58 = vpop.permute.xlu0 %8405  ;;  %v8394_v61 = vpop.permute.xlu1 %8393  ;;  %v7432_v44 = vadd.f32 %v7378_v53, %v7079_v63 }
 0xc64   : > { %v8426_v12 = vadd.f32 %v8394_v61, %v8229_v2  ;;  %v8427_v14 = vadd.f32 %v8394_v61, %v8230_v56 }
 0xc65   : > { %v7833_v45 = vadd.f32 %v14095_v19, %v7432_v44 }
 0xc66   : > { %8451 = vst.msk [vmem:[%s13133_s23 + $0x30] sm:$0xff] %vm8436_vm8, %v8426_v12  ;;  %8452 = vst.msk [vmem:[%s13133_s23 + $0x38] sm:$0xff] %vm8436_vm8, %v8427_v14 }
 0xc67   : > { %v8176_v26 = vpop.permute.xlu0 %8175  ;;  %v8402_v9 = vpop.permute.xlu1 %8401 }
 0xc68   : > { %v8231_v27 = vadd.f32 %v8176_v26, %v14090_v1 }
 0xc6a   : > { %v8428_v4 = vadd.f32 %v8398_v7, %v8231_v27 }
 0xc6b   : > { %v8180_v23 = vpop.permute.xlu0 %8179  ;;  %v8410_v35 = vpop.permute.xlu1 %8409 }
 0xc6c   : > { %8453 = vst.msk [vmem:[%s13207_s22] sm:$0xff] %vm8436_vm8, %v8428_v4  ;;  %v8233_v62 = vadd.f32 %v8180_v23, %v7832_v6 }
 0xc6e   : > { %v8430_v40 = vadd.f32 %v8402_v9, %v8233_v62 }
 0xc6f   : > { %v8184_v49 = vpop.permute.xlu0 %8183  ;;  %v8178_v11 = vpop.permute.xlu1 %8177 }
 0xc70   : > { %8455 = vst.msk [vmem:[%s13207_s22 + $0x10] sm:$0xff] %vm8436_vm8, %v8430_v40  ;;  %v8235_v20 = vadd.f32 %v8184_v49, %v14093_v17  ;;  %v8232_v54 = vadd.f32 %v8178_v11, %v14094_v36 }
 0xc72   : > { %v8432_v29 = vadd.f32 %v8406_v58, %v8235_v20  ;;  %v8429_v50 = vadd.f32 %v8398_v7, %v8232_v54 }
 0xc73   : > { %v8188_v47 = vpop.permute.xlu0 %8187  ;;  %v8182_v39 = vpop.permute.xlu1 %8181 }
 0xc74   : > { %8457 = vst.msk [vmem:[%s13207_s22 + $0x20] sm:$0xff] %vm8436_vm8, %v8432_v29  ;;  %8454 = vst.msk [vmem:[%s13207_s22 + $0x8] sm:$0xff] %vm8436_vm8, %v8429_v50  ;;  %v8237_v18 = vadd.f32 %v8188_v47, %v14096_v34  ;;  %v8234_v52 = vadd.f32 %v8182_v39, %v7833_v45 }
 0xc76   : > { %v8434_v24 = vadd.f32 %v8410_v35, %v8237_v18  ;;  %v8431_v33 = vadd.f32 %v8402_v9, %v8234_v52 }
 0xc77   : > { %v8186_v30 = vpop.permute.xlu1 %8185 }
 0xc78   : > { %8459 = vst.msk [vmem:[%s13207_s22 + $0x30] sm:$0xff] %vm8436_vm8, %v8434_v24  ;;  %8456 = vst.msk [vmem:[%s13207_s22 + $0x18] sm:$0xff] %vm8436_vm8, %v8431_v33  ;;  %v8236_v55 = vadd.f32 %v8186_v30, %v14097_v51 }
 0xc7a   : > { %v8433_v7 = vadd.f32 %v8406_v58, %v8236_v55 }
 0xc7b   : > { %v8190_v37 = vpop.permute.xlu1 %8189 }
 0xc7c   : > { %8458 = vst.msk [vmem:[%s13207_s22 + $0x28] sm:$0xff] %vm8436_vm8, %v8433_v7  ;;  %v8238_v21 = vadd.f32 %v8190_v37, %v14098_v13 }
 0xc7e   : > { %v8435_v22 = vadd.f32 %v8410_v35, %v8238_v21 }
 0xc80   : > { %8460 = vst.msk [vmem:[%s13207_s22 + $0x38] sm:$0xff] %vm8436_vm8, %v8435_v22 }
 0xc81 PF: > { %s20_s30 = sadd.s32 1, %s8819_s30  }
 0xc82   : > { %p17_p4 = scmp.ge.s32.totalorder %s20_s30, 4  }
 0xc84   :  { %19 = sbr.rel (!%p17_p4) target bundleno = 1 (0x1), region = 102 }

</bundles_post_ra>
